<compile_context>
chip_gen: v7x
topology: tpu7x:2x2x1
jax: 0.10.0
libtpu: 0.0.40
codegen_flags: <defaults>
</compile_context>

<pallas_src>
import functools

import numpy as np
import jax
import jax.numpy as jnp
from jax.experimental import pallas as pl
from jax.experimental.pallas import tpu as pltpu

_BS = 16  # rows of the all-ones bias slot in the tap stack (= bf16 sublane tile)


def _round_up(x, m):
    return ((x + m - 1) // m) * m


# ----------------------------------------------------------------------------
# Fused Pallas kernel:
#   conv4(cat) -> (+R1+R2) -> conv_fus -> x+conv_spat(x) -> x+conv_spec(x)
# ----------------------------------------------------------------------------
def _ssinr_fused_kernel(acts_ref, w_ref, o_ref, pad_ref, tap_ref,
                        *, H, W, pad, nb, cs):
    HW = H * W

    # Column-wrap masks: in the row-major flattened layout a +/-1 column shift
    # wraps into the neighbouring image row; those lanes must read zero.
    col = jax.lax.broadcasted_iota(jnp.int32, (1, HW), 1) % W
    lmask = col >= 1            # valid lanes when kx == -1
    rmask = col <= (W - 2)      # valid lanes when kx == +1

    # One-time init: zero ONLY the two pad strips (interior is fully rewritten
    # every layer -> zeroing it would be wasted store bandwidth) and write the
    # all-ones bias slot of the tap stack (bias folded into the matmul).
    pad_ref[:, 0:pad] = jnp.zeros((cs, pad), jnp.bfloat16)
    pad_ref[:, pad + HW:pad + HW + pad] = jnp.zeros((cs, pad), jnp.bfloat16)
    tap_ref[0:_BS, :] = jnp.ones((_BS, HW), jnp.bfloat16)

    def conv3x3_relu(act, w):
        # act: (cs, HW) f32  ->  relu(conv3x3(act) + b): (nb, HW) f32
        act_bf = act.astype(jnp.bfloat16)
        pad_ref[:, pad:pad + HW] = act_bf                    # 16-row aligned bf16 store
        tap_ref[_BS + cs * 4:_BS + cs * 5, :] = act_bf       # center tap (0,0) for free
        t = 0
        for ky in (-1, 0, 1):
            for kx in (-1, 0, 1):
                if (ky, kx) != (0, 0):
                    start = pad + ky * W + kx                # static lane offset
                    tap = pad_ref[:, start:start + HW]       # bf16 slice of padded act
                    if kx != 0:
                        # column-wrap mask on f32 before the bf16 cast (v5e-safe)
                        m = lmask if kx == -1 else rmask
                        tap = jnp.where(m, tap.astype(jnp.float32),
                                        0.0).astype(jnp.bfloat16)
                    tap_ref[_BS + cs * t:_BS + cs * (t + 1), :] = tap
                t += 1
        # One folded-K MXU matmul per layer: (nb, K) @ (K, HW), K = _BS + 9*cs.
        # Column 0 of the ones-slot carries the bias, so no epilogue add.
        y = jnp.dot(w, tap_ref[...], preferred_element_type=jnp.float32)
        return jnp.maximum(y, 0.0)                           # f32 ReLU epilogue

    zpad = jnp.zeros((cs - nb, HW), jnp.float32)

    def widen(x):                 # (nb, HW) -> (cs, HW), keeps stores 16-row aligned
        return x if cs == nb else jnp.concatenate([x, zpad], axis=0)

    x1 = acts_ref[0:cs, :]                    # cat(h0, x_hr) (channel-padded)
    r1 = acts_ref[cs:cs + nb, :]              # R1
    r2 = acts_ref[cs + nb:cs + 2 * nb, :]     # R2

    h = conv3x3_relu(x1, w_ref[0])                          # conv4(cat(h0, x_hr))
    x = conv3x3_relu(widen(h + r1 + r2), w_ref[1])          # conv_fus(h + R1 + R2)
    x = x + conv3x3_relu(widen(x), w_ref[2])                # x + conv_spat(x)
    x = x + conv3x3_relu(widen(x), w_ref[3])                # x + conv_spec(x)
    o_ref[...] = x


# ----------------------------------------------------------------------------
# One-time parameter preparation (outside the per-call hot path)
# ----------------------------------------------------------------------------
def prepare_ssinr_weights(params, n_bands, n_select_bands):
    """Fold each 3x3 conv + bias into one (nb, _BS + 9*cs) bf16 matrix and pack
    the 4 layers into a single (4, nb, K) array. Column layout matches the
    in-kernel tap stack: col 0 = bias (x ones row), tap t channels at
    [_BS + cs*t + c]."""
    cs = _round_up(n_bands + n_select_bands, _BS)

    def fold(w, b):
        cout, cin = w.shape[0], w.shape[1]
        wt = jnp.transpose(w, (0, 2, 3, 1)).reshape(cout, 9, cin)
        wt = jnp.pad(wt, ((0, 0), (0, 0), (0, cs - cin))).reshape(cout, 9 * cs)
        bias = jnp.pad(b[:, None], ((0, 0), (0, _BS - 1)))    # bias in col 0
        return jnp.concatenate([bias, wt], axis=1)

    layers = [params["conv4"], params["conv_fus"],
              params["conv_spat"], params["conv_spec"]]
    for (w, _) in layers[1:]:
        assert w.shape[0] == w.shape[1] == n_bands, "residual layers need Cin == Cout"
    return jnp.stack([fold(w, b) for (w, b) in layers]).astype(jnp.bfloat16)


# ----------------------------------------------------------------------------
# Wrapper (NCHW in / NCHW out, batch = 1)
# ----------------------------------------------------------------------------
def ssinr_head(w_packed, x_hr, h0, R1, R2):
    _, nb, H, W = h0.shape
    n_sel = x_hr.shape[1]
    HW = H * W
    cs = _round_up(nb + n_sel, _BS)      # channel-slot stride (13 -> 16)
    pad = _round_up(W + 1, 128)          # lane-aligned interior offset, >= W+1

    # Single packed activation operand: [cat(h0, x_hr) padded to cs ; R1 ; R2].
    pieces = [h0[0].reshape(nb, HW), x_hr[0].reshape(n_sel, HW)]
    if cs > nb + n_sel:
        pieces.append(jnp.zeros((cs - nb - n_sel, HW), jnp.float32))
    pieces += [R1[0].reshape(nb, HW), R2[0].reshape(nb, HW)]
    acts = jnp.concatenate(pieces, axis=0)                    # (cs + 2*nb, HW) f32

    kern = functools.partial(_ssinr_fused_kernel, H=H, W=W, pad=pad, nb=nb, cs=cs)
    vspec = pl.BlockSpec(memory_space=pltpu.MemorySpace.VMEM)
    vmem_bytes = (4 * (acts.size + nb * HW) + 2 * w_packed.size
                  + 2 * (cs * (HW + 2 * pad) + (_BS + 9 * cs) * HW))
    y = pl.pallas_call(
        kern,
        out_shape=jax.ShapeDtypeStruct((nb, HW), jnp.float32),
        in_specs=[vspec, vspec],
        out_specs=vspec,
        scratch_shapes=[
            pltpu.VMEM((cs, HW + 2 * pad), jnp.bfloat16),     # padded-row scratch
            pltpu.VMEM((_BS + 9 * cs, HW), jnp.bfloat16),     # ones-slot + 9 tap slots
        ],
        compiler_params=pltpu.CompilerParams(
            vmem_limit_bytes=int(min(max(4 * vmem_bytes, 16 << 20), 64 << 20))),
    )(acts, w_packed)
    return y.reshape(1, nb, H, W)


def ssinr_forward(w_packed, x_hr, h0, R1, R2):
    # TODO(synk): LIIF / LIIF1, build_datasets1/2 and liif.make_coord are external
    # modules not defined in the provided source; their outputs (h0, R1, R2) are
    # taken as inputs instead of being recomputed here.
    x = ssinr_head(w_packed, x_hr, h0, R1, R2)
    return (x, 0, 0, 0, 0, 0)


# ----------------------------------------------------------------------------
# SSINR parameters (deterministic synthetic init, shapes from __init__)
# ----------------------------------------------------------------------------
def init_ssinr_params(key, n_bands, n_select_bands):
    def conv_p(k, cin, cout):
        kw, kb = jax.random.split(k)
        w = jax.random.normal(kw, (cout, cin, 3, 3), jnp.float32) * 0.1
        b = jax.random.normal(kb, (cout,), jnp.float32) * 0.01
        return w, b

    ks = jax.random.split(key, 4)
    return {
        "conv4":     conv_p(ks[0], n_bands + n_select_bands, n_bands),
        "conv_fus":  conv_p(ks[1], n_bands, n_bands),
        "conv_spat": conv_p(ks[2], n_bands, n_bands),
        "conv_spec": conv_p(ks[3], n_bands, n_bands),
    }


# ----------------------------------------------------------------------------
# Pure-JAX reference (lax.conv, full f32) for correctness checking
# ----------------------------------------------------------------------------
def _ref_conv_relu(x, w, b):
    y = jax.lax.conv_general_dilated(
        x, w, window_strides=(1, 1), padding=((1, 1), (1, 1)),
        dimension_numbers=("NCHW", "OIHW", "NCHW"),
        precision=jax.lax.Precision.HIGHEST)
    return jax.nn.relu(y + b[None, :, None, None])


def ssinr_forward_ref(params, x_hr, h0, R1, R2):
    h = _ref_conv_relu(jnp.concatenate([h0, x_hr], axis=1), *params["conv4"])
    x = _ref_conv_relu(h + R1 + R2, *params["conv_fus"])
    x = x + _ref_conv_relu(x, *params["conv_spat"])
    x = x + _ref_conv_relu(x, *params["conv_spec"])
    return x


if __name__ == "__main__":
    key = jax.random.PRNGKey(0)
    n_bands, n_select_bands = 8, 5
    H = W = 32  # HR spatial size (x_lr would be H/scale_ratio = 8 in the LIIF path)

    k1, k2, k3, k4, kp = jax.random.split(key, 5)
    x_hr = jax.random.normal(k1, (1, n_select_bands, H, W), jnp.float32)
    h0   = jax.random.normal(k2, (1, n_bands, H, W), jnp.float32)  # LIIF(x_lr) stand-in
    R1   = jax.random.normal(k3, (1, n_bands, H, W), jnp.float32)  # LIIF residual stand-in
    R2   = jax.random.normal(k4, (1, n_bands, H, W), jnp.float32)  # LIIF1 residual stand-in
    params = init_ssinr_params(kp, n_bands, n_select_bands)

    # Weight folding / bf16 cast happens once, outside the per-call jit path.
    w_packed = jax.block_until_ready(
        prepare_ssinr_weights(params, n_bands, n_select_bands))

    out = jax.jit(ssinr_forward)(w_packed, x_hr, h0, R1, R2)
    x = jax.block_until_ready(out[0])
    assert x.shape == (1, n_bands, H, W)

    x_ref = jax.block_until_ready(ssinr_forward_ref(params, x_hr, h0, R1, R2))
    # Tolerance accounts for bf16 MXU operands / bf16 activation scratch (f32
    # accumulate) over a 4-conv chain vs the full-f32 HIGHEST reference.
    np.testing.assert_allclose(np.asarray(x), np.asarray(x_ref),
                               atol=5e-2, rtol=5e-2)
    print("KERNEL_OK")
</pallas_src>

<mosaic_0001>
module attributes {stable_mosaic.version = 11 : i64} {
  func.func @_ssinr_fused_kernel(%arg0: memref<32x1024xf32, #tpu.memory_space<vmem>>, %arg1: memref<4x8x160xbf16, #tpu.memory_space<vmem>>, %arg2: memref<8x1024xf32, #tpu.memory_space<vmem>>, %arg3: memref<16x1280xbf16, #tpu.memory_space<vmem>>, %arg4: memref<160x1024xbf16, #tpu.memory_space<vmem>>) attributes {dimension_semantics = [], scalar_prefetch = 0 : i64, scratch_operands = 2 : i64, tpu.core_type = #tpu.core_type<tc>} {
    %0 = tpu.iota {dimensions = array<i32: 1>} : vector<1x1024xi32>
    %c32_i32 = arith.constant 32 : i32
    %c0_i32 = arith.constant 0 : i32
    %1 = arith.cmpi eq, %c32_i32, %c0_i32 : i32
    %c1_i32 = arith.constant 1 : i32
    %2 = arith.select %1, %c1_i32, %c32_i32 : i32
    %3 = vector.broadcast %2 : i32 to vector<1x1024xi32>
    %4 = arith.remsi %0, %3 : vector<1x1024xi32>
    %c0_i32_0 = arith.constant 0 : i32
    %5 = vector.broadcast %c0_i32_0 : i32 to vector<1x1024xi32>
    %6 = arith.cmpi ne, %4, %5 : vector<1x1024xi32>
    %c0_i32_1 = arith.constant 0 : i32
    %7 = vector.broadcast %c0_i32_1 : i32 to vector<1x1024xi32>
    %8 = arith.cmpi slt, %4, %7 : vector<1x1024xi32>
    %c0_i32_2 = arith.constant 0 : i32
    %9 = arith.cmpi slt, %2, %c0_i32_2 : i32
    %10 = vector.broadcast %9 : i1 to vector<1x1024xi1>
    %11 = vector.broadcast %10 : vector<1x1024xi1> to vector<1x1024xi1>
    %12 = arith.xori %8, %11 : vector<1x1024xi1>
    %13 = arith.andi %12, %6 : vector<1x1024xi1>
    %14 = vector.broadcast %2 : i32 to vector<1x1024xi32>
    %15 = arith.addi %4, %14 : vector<1x1024xi32>
    %16 = arith.select %13, %15, %4 : vector<1x1024xi1>, vector<1x1024xi32>
    %c1_i32_3 = arith.constant 1 : i32
    %17 = vector.broadcast %c1_i32_3 : i32 to vector<1x1024xi32>
    %18 = arith.cmpi sge, %16, %17 : vector<1x1024xi32>
    %c30_i32 = arith.constant 30 : i32
    %19 = vector.broadcast %c30_i32 : i32 to vector<1x1024xi32>
    %20 = arith.cmpi sle, %16, %19 : vector<1x1024xi32>
    %cst = arith.constant 0.000000e+00 : bf16
    %21 = vector.broadcast %cst : bf16 to vector<16x128xbf16>
    %c0 = arith.constant 0 : index
    %c0_4 = arith.constant 0 : index
    %22 = vector.load %arg3[%c0, %c0_4] : memref<16x1280xbf16, #tpu.memory_space<vmem>>, vector<16x128xbf16>
    tpu.vector_store %arg3[%c0, %c0_4], %21 {strides = array<i32>} : memref<16x1280xbf16, #tpu.memory_space<vmem>>, vector<16x128xbf16>,
    %cst_5 = arith.constant 0.000000e+00 : bf16
    %23 = vector.broadcast %cst_5 : bf16 to vector<16x128xbf16>
    %c0_6 = arith.constant 0 : index
    %c1152 = arith.constant 1152 : index
    %24 = vector.load %arg3[%c0_6, %c1152] : memref<16x1280xbf16, #tpu.memory_space<vmem>>, vector<16x128xbf16>
    tpu.vector_store %arg3[%c0_6, %c1152], %23 {strides = array<i32>} : memref<16x1280xbf16, #tpu.memory_space<vmem>>, vector<16x128xbf16>,
    %cst_7 = arith.constant 1.000000e+00 : bf16
    %25 = vector.broadcast %cst_7 : bf16 to vector<16x1024xbf16>
    %c0_8 = arith.constant 0 : index
    %c0_9 = arith.constant 0 : index
    %26 = vector.load %arg4[%c0_8, %c0_9] : memref<160x1024xbf16, #tpu.memory_space<vmem>>, vector<16x1024xbf16>
    tpu.vector_store %arg4[%c0_8, %c0_9], %25 {strides = array<i32>} : memref<160x1024xbf16, #tpu.memory_space<vmem>>, vector<16x1024xbf16>,
    %cst_10 = arith.constant 0.000000e+00 : f32
    %27 = vector.broadcast %cst_10 : f32 to vector<8x1024xf32>
    %c0_11 = arith.constant 0 : index
    %c0_12 = arith.constant 0 : index
    %28 = vector.load %arg0[%c0_11, %c0_12] : memref<32x1024xf32, #tpu.memory_space<vmem>>, vector<16x1024xf32>
    %c16 = arith.constant 16 : index
    %c0_13 = arith.constant 0 : index
    %29 = vector.load %arg0[%c16, %c0_13] : memref<32x1024xf32, #tpu.memory_space<vmem>>, vector<8x1024xf32>
    %c24 = arith.constant 24 : index
    %c0_14 = arith.constant 0 : index
    %30 = vector.load %arg0[%c24, %c0_14] : memref<32x1024xf32, #tpu.memory_space<vmem>>, vector<8x1024xf32>
    %c0_15 = arith.constant 0 : index
    %c0_16 = arith.constant 0 : index
    %c0_17 = arith.constant 0 : index
    %31 = vector.load %arg1[%c0_15, %c0_16, %c0_17] : memref<4x8x160xbf16, #tpu.memory_space<vmem>>, vector<1x8x160xbf16>
    %32 = vector.shape_cast %31 : vector<1x8x160xbf16> to vector<8x160xbf16>
    %33 = arith.truncf %28 : vector<16x1024xf32> to vector<16x1024xbf16>
    %c0_18 = arith.constant 0 : index
    %c128 = arith.constant 128 : index
    %34 = vector.load %arg3[%c0_18, %c128] : memref<16x1280xbf16, #tpu.memory_space<vmem>>, vector<16x1024xbf16>
    tpu.vector_store %arg3[%c0_18, %c128], %33 {strides = array<i32>} : memref<16x1280xbf16, #tpu.memory_space<vmem>>, vector<16x1024xbf16>,
    %c80 = arith.constant 80 : index
    %c0_19 = arith.constant 0 : index
    %35 = vector.load %arg4[%c80, %c0_19] : memref<160x1024xbf16, #tpu.memory_space<vmem>>, vector<16x1024xbf16>
    tpu.vector_store %arg4[%c80, %c0_19], %33 {strides = array<i32>} : memref<160x1024xbf16, #tpu.memory_space<vmem>>, vector<16x1024xbf16>,
    %c0_20 = arith.constant 0 : index
    %c95 = arith.constant 95 : index
    %36 = vector.load %arg3[%c0_20, %c95] : memref<16x1280xbf16, #tpu.memory_space<vmem>>, vector<16x1024xbf16>
    %37 = arith.extf %36 : vector<16x1024xbf16> to vector<16x1024xf32>
    %cst_21 = arith.constant 0.000000e+00 : f32
    %38 = vector.shape_cast %18 : vector<1x1024xi1> to vector<1x1024xi1>
    %39 = vector.broadcast %38 : vector<1x1024xi1> to vector<16x1024xi1>
    %40 = vector.broadcast %cst_21 : f32 to vector<16x1024xf32>
    %41 = arith.select %39, %37, %40 : vector<16x1024xi1>, vector<16x1024xf32>
    %42 = arith.truncf %41 : vector<16x1024xf32> to vector<16x1024xbf16>
    %c16_22 = arith.constant 16 : index
    %c0_23 = arith.constant 0 : index
    %43 = vector.load %arg4[%c16_22, %c0_23] : memref<160x1024xbf16, #tpu.memory_space<vmem>>, vector<16x1024xbf16>
    tpu.vector_store %arg4[%c16_22, %c0_23], %42 {strides = array<i32>} : memref<160x1024xbf16, #tpu.memory_space<vmem>>, vector<16x1024xbf16>,
    %c0_24 = arith.constant 0 : index
    %c96 = arith.constant 96 : index
    %44 = vector.load %arg3[%c0_24, %c96] : memref<16x1280xbf16, #tpu.memory_space<vmem>>, vector<16x1024xbf16>
    %c32 = arith.constant 32 : index
    %c0_25 = arith.constant 0 : index
    %45 = vector.load %arg4[%c32, %c0_25] : memref<160x1024xbf16, #tpu.memory_space<vmem>>, vector<16x1024xbf16>
    tpu.vector_store %arg4[%c32, %c0_25], %44 {strides = array<i32>} : memref<160x1024xbf16, #tpu.memory_space<vmem>>, vector<16x1024xbf16>,
    %c0_26 = arith.constant 0 : index
    %c97 = arith.constant 97 : index
    %46 = vector.load %arg3[%c0_26, %c97] : memref<16x1280xbf16, #tpu.memory_space<vmem>>, vector<16x1024xbf16>
    %47 = arith.extf %46 : vector<16x1024xbf16> to vector<16x1024xf32>
    %cst_27 = arith.constant 0.000000e+00 : f32
    %48 = vector.shape_cast %20 : vector<1x1024xi1> to vector<1x1024xi1>
    %49 = vector.broadcast %48 : vector<1x1024xi1> to vector<16x1024xi1>
    %50 = vector.broadcast %cst_27 : f32 to vector<16x1024xf32>
    %51 = arith.select %49, %47, %50 : vector<16x1024xi1>, vector<16x1024xf32>
    %52 = arith.truncf %51 : vector<16x1024xf32> to vector<16x1024xbf16>
    %c48 = arith.constant 48 : index
    %c0_28 = arith.constant 0 : index
    %53 = vector.load %arg4[%c48, %c0_28] : memref<160x1024xbf16, #tpu.memory_space<vmem>>, vector<16x1024xbf16>
    tpu.vector_store %arg4[%c48, %c0_28], %52 {strides = array<i32>} : memref<160x1024xbf16, #tpu.memory_space<vmem>>, vector<16x1024xbf16>,
    %c0_29 = arith.constant 0 : index
    %c127 = arith.constant 127 : index
    %54 = vector.load %arg3[%c0_29, %c127] : memref<16x1280xbf16, #tpu.memory_space<vmem>>, vector<16x1024xbf16>
    %55 = arith.extf %54 : vector<16x1024xbf16> to vector<16x1024xf32>
    %cst_30 = arith.constant 0.000000e+00 : f32
    %56 = vector.shape_cast %18 : vector<1x1024xi1> to vector<1x1024xi1>
    %57 = vector.broadcast %56 : vector<1x1024xi1> to vector<16x1024xi1>
    %58 = vector.broadcast %cst_30 : f32 to vector<16x1024xf32>
    %59 = arith.select %57, %55, %58 : vector<16x1024xi1>, vector<16x1024xf32>
    %60 = arith.truncf %59 : vector<16x1024xf32> to vector<16x1024xbf16>
    %c64 = arith.constant 64 : index
    %c0_31 = arith.constant 0 : index
    %61 = vector.load %arg4[%c64, %c0_31] : memref<160x1024xbf16, #tpu.memory_space<vmem>>, vector<16x1024xbf16>
    tpu.vector_store %arg4[%c64, %c0_31], %60 {strides = array<i32>} : memref<160x1024xbf16, #tpu.memory_space<vmem>>, vector<16x1024xbf16>,
    %c0_32 = arith.constant 0 : index
    %c129 = arith.constant 129 : index
    %62 = vector.load %arg3[%c0_32, %c129] : memref<16x1280xbf16, #tpu.memory_space<vmem>>, vector<16x1024xbf16>
    %63 = arith.extf %62 : vector<16x1024xbf16> to vector<16x1024xf32>
    %cst_33 = arith.constant 0.000000e+00 : f32
    %64 = vector.shape_cast %20 : vector<1x1024xi1> to vector<1x1024xi1>
    %65 = vector.broadcast %64 : vector<1x1024xi1> to vector<16x1024xi1>
    %66 = vector.broadcast %cst_33 : f32 to vector<16x1024xf32>
    %67 = arith.select %65, %63, %66 : vector<16x1024xi1>, vector<16x1024xf32>
    %68 = arith.truncf %67 : vector<16x1024xf32> to vector<16x1024xbf16>
    %c96_34 = arith.constant 96 : index
    %c0_35 = arith.constant 0 : index
    %69 = vector.load %arg4[%c96_34, %c0_35] : memref<160x1024xbf16, #tpu.memory_space<vmem>>, vector<16x1024xbf16>
    tpu.vector_store %arg4[%c96_34, %c0_35], %68 {strides = array<i32>} : memref<160x1024xbf16, #tpu.memory_space<vmem>>, vector<16x1024xbf16>,
    %c0_36 = arith.constant 0 : index
    %c159 = arith.constant 159 : index
    %70 = vector.load %arg3[%c0_36, %c159] : memref<16x1280xbf16, #tpu.memory_space<vmem>>, vector<16x1024xbf16>
    %71 = arith.extf %70 : vector<16x1024xbf16> to vector<16x1024xf32>
    %cst_37 = arith.constant 0.000000e+00 : f32
    %72 = vector.shape_cast %18 : vector<1x1024xi1> to vector<1x1024xi1>
    %73 = vector.broadcast %72 : vector<1x1024xi1> to vector<16x1024xi1>
    %74 = vector.broadcast %cst_37 : f32 to vector<16x1024xf32>
    %75 = arith.select %73, %71, %74 : vector<16x1024xi1>, vector<16x1024xf32>
    %76 = arith.truncf %75 : vector<16x1024xf32> to vector<16x1024xbf16>
    %c112 = arith.constant 112 : index
    %c0_38 = arith.constant 0 : index
    %77 = vector.load %arg4[%c112, %c0_38] : memref<160x1024xbf16, #tpu.memory_space<vmem>>, vector<16x1024xbf16>
    tpu.vector_store %arg4[%c112, %c0_38], %76 {strides = array<i32>} : memref<160x1024xbf16, #tpu.memory_space<vmem>>, vector<16x1024xbf16>,
    %c0_39 = arith.constant 0 : index
    %c160 = arith.constant 160 : index
    %78 = vector.load %arg3[%c0_39, %c160] : memref<16x1280xbf16, #tpu.memory_space<vmem>>, vector<16x1024xbf16>
    %c128_40 = arith.constant 128 : index
    %c0_41 = arith.constant 0 : index
    %79 = vector.load %arg4[%c128_40, %c0_41] : memref<160x1024xbf16, #tpu.memory_space<vmem>>, vector<16x1024xbf16>
    tpu.vector_store %arg4[%c128_40, %c0_41], %78 {strides = array<i32>} : memref<160x1024xbf16, #tpu.memory_space<vmem>>, vector<16x1024xbf16>,
    %c0_42 = arith.constant 0 : index
    %c161 = arith.constant 161 : index
    %80 = vector.load %arg3[%c0_42, %c161] : memref<16x1280xbf16, #tpu.memory_space<vmem>>, vector<16x1024xbf16>
    %81 = arith.extf %80 : vector<16x1024xbf16> to vector<16x1024xf32>
    %cst_43 = arith.constant 0.000000e+00 : f32
    %82 = vector.shape_cast %20 : vector<1x1024xi1> to vector<1x1024xi1>
    %83 = vector.broadcast %82 : vector<1x1024xi1> to vector<16x1024xi1>
    %84 = vector.broadcast %cst_43 : f32 to vector<16x1024xf32>
    %85 = arith.select %83, %81, %84 : vector<16x1024xi1>, vector<16x1024xf32>
    %86 = arith.truncf %85 : vector<16x1024xf32> to vector<16x1024xbf16>
    %c144 = arith.constant 144 : index
    %c0_44 = arith.constant 0 : index
    %87 = vector.load %arg4[%c144, %c0_44] : memref<160x1024xbf16, #tpu.memory_space<vmem>>, vector<16x1024xbf16>
    tpu.vector_store %arg4[%c144, %c0_44], %86 {strides = array<i32>} : memref<160x1024xbf16, #tpu.memory_space<vmem>>, vector<16x1024xbf16>,
    %c0_45 = arith.constant 0 : index
    %c0_46 = arith.constant 0 : index
    %88 = vector.load %arg4[%c0_45, %c0_46] : memref<160x1024xbf16, #tpu.memory_space<vmem>>, vector<160x1024xbf16>
    %cst_47 = arith.constant dense<0.000000e+00> : vector<8x1024xf32>
    %89 = tpu.matmul %32, %88, %cst_47 {dimension_numbers = #tpu.dot_dimension_numbers<[1], [0], [0], [1], [0, 0, 1, 1], [], []>} : vector<8x160xbf16>, vector<160x1024xbf16>, vector<8x1024xf32> -> vector<8x1024xf32>
    %cst_48 = arith.constant 0.000000e+00 : f32
    %90 = vector.broadcast %cst_48 : f32 to vector<8x1024xf32>
    %91 = arith.maximumf %89, %90 : vector<8x1024xf32>
    %92 = arith.addf %91, %29 : vector<8x1024xf32>
    %93 = arith.addf %92, %30 : vector<8x1024xf32>
    %94 = tpu.concatenate %93, %27 in 0 : vector<8x1024xf32>, vector<8x1024xf32> -> vector<16x1024xf32>
    %c1 = arith.constant 1 : index
    %c0_49 = arith.constant 0 : index
    %c0_50 = arith.constant 0 : index
    %95 = vector.load %arg1[%c1, %c0_49, %c0_50] : memref<4x8x160xbf16, #tpu.memory_space<vmem>>, vector<1x8x160xbf16>
    %96 = vector.shape_cast %95 : vector<1x8x160xbf16> to vector<8x160xbf16>
    %97 = arith.truncf %94 : vector<16x1024xf32> to vector<16x1024xbf16>
    %c0_51 = arith.constant 0 : index
    %c128_52 = arith.constant 128 : index
    %98 = vector.load %arg3[%c0_51, %c128_52] : memref<16x1280xbf16, #tpu.memory_space<vmem>>, vector<16x1024xbf16>
    tpu.vector_store %arg3[%c0_51, %c128_52], %97 {strides = array<i32>} : memref<16x1280xbf16, #tpu.memory_space<vmem>>, vector<16x1024xbf16>,
    %c80_53 = arith.constant 80 : index
    %c0_54 = arith.constant 0 : index
    %99 = vector.load %arg4[%c80_53, %c0_54] : memref<160x1024xbf16, #tpu.memory_space<vmem>>, vector<16x1024xbf16>
    tpu.vector_store %arg4[%c80_53, %c0_54], %97 {strides = array<i32>} : memref<160x1024xbf16, #tpu.memory_space<vmem>>, vector<16x1024xbf16>,
    %c0_55 = arith.constant 0 : index
    %c95_56 = arith.constant 95 : index
    %100 = vector.load %arg3[%c0_55, %c95_56] : memref<16x1280xbf16, #tpu.memory_space<vmem>>, vector<16x1024xbf16>
    %101 = arith.extf %100 : vector<16x1024xbf16> to vector<16x1024xf32>
    %cst_57 = arith.constant 0.000000e+00 : f32
    %102 = vector.shape_cast %18 : vector<1x1024xi1> to vector<1x1024xi1>
    %103 = vector.broadcast %102 : vector<1x1024xi1> to vector<16x1024xi1>
    %104 = vector.broadcast %cst_57 : f32 to vector<16x1024xf32>
    %105 = arith.select %103, %101, %104 : vector<16x1024xi1>, vector<16x1024xf32>
    %106 = arith.truncf %105 : vector<16x1024xf32> to vector<16x1024xbf16>
    %c16_58 = arith.constant 16 : index
    %c0_59 = arith.constant 0 : index
    %107 = vector.load %arg4[%c16_58, %c0_59] : memref<160x1024xbf16, #tpu.memory_space<vmem>>, vector<16x1024xbf16>
    tpu.vector_store %arg4[%c16_58, %c0_59], %106 {strides = array<i32>} : memref<160x1024xbf16, #tpu.memory_space<vmem>>, vector<16x1024xbf16>,
    %c0_60 = arith.constant 0 : index
    %c96_61 = arith.constant 96 : index
    %108 = vector.load %arg3[%c0_60, %c96_61] : memref<16x1280xbf16, #tpu.memory_space<vmem>>, vector<16x1024xbf16>
    %c32_62 = arith.constant 32 : index
    %c0_63 = arith.constant 0 : index
    %109 = vector.load %arg4[%c32_62, %c0_63] : memref<160x1024xbf16, #tpu.memory_space<vmem>>, vector<16x1024xbf16>
    tpu.vector_store %arg4[%c32_62, %c0_63], %108 {strides = array<i32>} : memref<160x1024xbf16, #tpu.memory_space<vmem>>, vector<16x1024xbf16>,
    %c0_64 = arith.constant 0 : index
    %c97_65 = arith.constant 97 : index
    %110 = vector.load %arg3[%c0_64, %c97_65] : memref<16x1280xbf16, #tpu.memory_space<vmem>>, vector<16x1024xbf16>
    %111 = arith.extf %110 : vector<16x1024xbf16> to vector<16x1024xf32>
    %cst_66 = arith.constant 0.000000e+00 : f32
    %112 = vector.shape_cast %20 : vector<1x1024xi1> to vector<1x1024xi1>
    %113 = vector.broadcast %112 : vector<1x1024xi1> to vector<16x1024xi1>
    %114 = vector.broadcast %cst_66 : f32 to vector<16x1024xf32>
    %115 = arith.select %113, %111, %114 : vector<16x1024xi1>, vector<16x1024xf32>
    %116 = arith.truncf %115 : vector<16x1024xf32> to vector<16x1024xbf16>
    %c48_67 = arith.constant 48 : index
    %c0_68 = arith.constant 0 : index
    %117 = vector.load %arg4[%c48_67, %c0_68] : memref<160x1024xbf16, #tpu.memory_space<vmem>>, vector<16x1024xbf16>
    tpu.vector_store %arg4[%c48_67, %c0_68], %116 {strides = array<i32>} : memref<160x1024xbf16, #tpu.memory_space<vmem>>, vector<16x1024xbf16>,
    %c0_69 = arith.constant 0 : index
    %c127_70 = arith.constant 127 : index
    %118 = vector.load %arg3[%c0_69, %c127_70] : memref<16x1280xbf16, #tpu.memory_space<vmem>>, vector<16x1024xbf16>
    %119 = arith.extf %118 : vector<16x1024xbf16> to vector<16x1024xf32>
    %cst_71 = arith.constant 0.000000e+00 : f32
    %120 = vector.shape_cast %18 : vector<1x1024xi1> to vector<1x1024xi1>
    %121 = vector.broadcast %120 : vector<1x1024xi1> to vector<16x1024xi1>
    %122 = vector.broadcast %cst_71 : f32 to vector<16x1024xf32>
    %123 = arith.select %121, %119, %122 : vector<16x1024xi1>, vector<16x1024xf32>
    %124 = arith.truncf %123 : vector<16x1024xf32> to vector<16x1024xbf16>
    %c64_72 = arith.constant 64 : index
    %c0_73 = arith.constant 0 : index
    %125 = vector.load %arg4[%c64_72, %c0_73] : memref<160x1024xbf16, #tpu.memory_space<vmem>>, vector<16x1024xbf16>
    tpu.vector_store %arg4[%c64_72, %c0_73], %124 {strides = array<i32>} : memref<160x1024xbf16, #tpu.memory_space<vmem>>, vector<16x1024xbf16>,
    %c0_74 = arith.constant 0 : index
    %c129_75 = arith.constant 129 : index
    %126 = vector.load %arg3[%c0_74, %c129_75] : memref<16x1280xbf16, #tpu.memory_space<vmem>>, vector<16x1024xbf16>
    %127 = arith.extf %126 : vector<16x1024xbf16> to vector<16x1024xf32>
    %cst_76 = arith.constant 0.000000e+00 : f32
    %128 = vector.shape_cast %20 : vector<1x1024xi1> to vector<1x1024xi1>
    %129 = vector.broadcast %128 : vector<1x1024xi1> to vector<16x1024xi1>
    %130 = vector.broadcast %cst_76 : f32 to vector<16x1024xf32>
    %131 = arith.select %129, %127, %130 : vector<16x1024xi1>, vector<16x1024xf32>
    %132 = arith.truncf %131 : vector<16x1024xf32> to vector<16x1024xbf16>
    %c96_77 = arith.constant 96 : index
    %c0_78 = arith.constant 0 : index
    %133 = vector.load %arg4[%c96_77, %c0_78] : memref<160x1024xbf16, #tpu.memory_space<vmem>>, vector<16x1024xbf16>
    tpu.vector_store %arg4[%c96_77, %c0_78], %132 {strides = array<i32>} : memref<160x1024xbf16, #tpu.memory_space<vmem>>, vector<16x1024xbf16>,
    %c0_79 = arith.constant 0 : index
    %c159_80 = arith.constant 159 : index
    %134 = vector.load %arg3[%c0_79, %c159_80] : memref<16x1280xbf16, #tpu.memory_space<vmem>>, vector<16x1024xbf16>
    %135 = arith.extf %134 : vector<16x1024xbf16> to vector<16x1024xf32>
    %cst_81 = arith.constant 0.000000e+00 : f32
    %136 = vector.shape_cast %18 : vector<1x1024xi1> to vector<1x1024xi1>
    %137 = vector.broadcast %136 : vector<1x1024xi1> to vector<16x1024xi1>
    %138 = vector.broadcast %cst_81 : f32 to vector<16x1024xf32>
    %139 = arith.select %137, %135, %138 : vector<16x1024xi1>, vector<16x1024xf32>
    %140 = arith.truncf %139 : vector<16x1024xf32> to vector<16x1024xbf16>
    %c112_82 = arith.constant 112 : index
    %c0_83 = arith.constant 0 : index
    %141 = vector.load %arg4[%c112_82, %c0_83] : memref<160x1024xbf16, #tpu.memory_space<vmem>>, vector<16x1024xbf16>
    tpu.vector_store %arg4[%c112_82, %c0_83], %140 {strides = array<i32>} : memref<160x1024xbf16, #tpu.memory_space<vmem>>, vector<16x1024xbf16>,
    %c0_84 = arith.constant 0 : index
    %c160_85 = arith.constant 160 : index
    %142 = vector.load %arg3[%c0_84, %c160_85] : memref<16x1280xbf16, #tpu.memory_space<vmem>>, vector<16x1024xbf16>
    %c128_86 = arith.constant 128 : index
    %c0_87 = arith.constant 0 : index
    %143 = vector.load %arg4[%c128_86, %c0_87] : memref<160x1024xbf16, #tpu.memory_space<vmem>>, vector<16x1024xbf16>
    tpu.vector_store %arg4[%c128_86, %c0_87], %142 {strides = array<i32>} : memref<160x1024xbf16, #tpu.memory_space<vmem>>, vector<16x1024xbf16>,
    %c0_88 = arith.constant 0 : index
    %c161_89 = arith.constant 161 : index
    %144 = vector.load %arg3[%c0_88, %c161_89] : memref<16x1280xbf16, #tpu.memory_space<vmem>>, vector<16x1024xbf16>
    %145 = arith.extf %144 : vector<16x1024xbf16> to vector<16x1024xf32>
    %cst_90 = arith.constant 0.000000e+00 : f32
    %146 = vector.shape_cast %20 : vector<1x1024xi1> to vector<1x1024xi1>
    %147 = vector.broadcast %146 : vector<1x1024xi1> to vector<16x1024xi1>
    %148 = vector.broadcast %cst_90 : f32 to vector<16x1024xf32>
    %149 = arith.select %147, %145, %148 : vector<16x1024xi1>, vector<16x1024xf32>
    %150 = arith.truncf %149 : vector<16x1024xf32> to vector<16x1024xbf16>
    %c144_91 = arith.constant 144 : index
    %c0_92 = arith.constant 0 : index
    %151 = vector.load %arg4[%c144_91, %c0_92] : memref<160x1024xbf16, #tpu.memory_space<vmem>>, vector<16x1024xbf16>
    tpu.vector_store %arg4[%c144_91, %c0_92], %150 {strides = array<i32>} : memref<160x1024xbf16, #tpu.memory_space<vmem>>, vector<16x1024xbf16>,
    %c0_93 = arith.constant 0 : index
    %c0_94 = arith.constant 0 : index
    %152 = vector.load %arg4[%c0_93, %c0_94] : memref<160x1024xbf16, #tpu.memory_space<vmem>>, vector<160x1024xbf16>
    %cst_95 = arith.constant dense<0.000000e+00> : vector<8x1024xf32>
    %153 = tpu.matmul %96, %152, %cst_95 {dimension_numbers = #tpu.dot_dimension_numbers<[1], [0], [0], [1], [0, 0, 1, 1], [], []>} : vector<8x160xbf16>, vector<160x1024xbf16>, vector<8x1024xf32> -> vector<8x1024xf32>
    %cst_96 = arith.constant 0.000000e+00 : f32
    %154 = vector.broadcast %cst_96 : f32 to vector<8x1024xf32>
    %155 = arith.maximumf %153, %154 : vector<8x1024xf32>
    %156 = tpu.concatenate %155, %27 in 0 : vector<8x1024xf32>, vector<8x1024xf32> -> vector<16x1024xf32>
    %c2 = arith.constant 2 : index
    %c0_97 = arith.constant 0 : index
    %c0_98 = arith.constant 0 : index
    %157 = vector.load %arg1[%c2, %c0_97, %c0_98] : memref<4x8x160xbf16, #tpu.memory_space<vmem>>, vector<1x8x160xbf16>
    %158 = vector.shape_cast %157 : vector<1x8x160xbf16> to vector<8x160xbf16>
    %159 = arith.truncf %156 : vector<16x1024xf32> to vector<16x1024xbf16>
    %c0_99 = arith.constant 0 : index
    %c128_100 = arith.constant 128 : index
    %160 = vector.load %arg3[%c0_99, %c128_100] : memref<16x1280xbf16, #tpu.memory_space<vmem>>, vector<16x1024xbf16>
    tpu.vector_store %arg3[%c0_99, %c128_100], %159 {strides = array<i32>} : memref<16x1280xbf16, #tpu.memory_space<vmem>>, vector<16x1024xbf16>,
    %c80_101 = arith.constant 80 : index
    %c0_102 = arith.constant 0 : index
    %161 = vector.load %arg4[%c80_101, %c0_102] : memref<160x1024xbf16, #tpu.memory_space<vmem>>, vector<16x1024xbf16>
    tpu.vector_store %arg4[%c80_101, %c0_102], %159 {strides = array<i32>} : memref<160x1024xbf16, #tpu.memory_space<vmem>>, vector<16x1024xbf16>,
    %c0_103 = arith.constant 0 : index
    %c95_104 = arith.constant 95 : index
    %162 = vector.load %arg3[%c0_103, %c95_104] : memref<16x1280xbf16, #tpu.memory_space<vmem>>, vector<16x1024xbf16>
    %163 = arith.extf %162 : vector<16x1024xbf16> to vector<16x1024xf32>
    %cst_105 = arith.constant 0.000000e+00 : f32
    %164 = vector.shape_cast %18 : vector<1x1024xi1> to vector<1x1024xi1>
    %165 = vector.broadcast %164 : vector<1x1024xi1> to vector<16x1024xi1>
    %166 = vector.broadcast %cst_105 : f32 to vector<16x1024xf32>
    %167 = arith.select %165, %163, %166 : vector<16x1024xi1>, vector<16x1024xf32>
    %168 = arith.truncf %167 : vector<16x1024xf32> to vector<16x1024xbf16>
    %c16_106 = arith.constant 16 : index
    %c0_107 = arith.constant 0 : index
    %169 = vector.load %arg4[%c16_106, %c0_107] : memref<160x1024xbf16, #tpu.memory_space<vmem>>, vector<16x1024xbf16>
    tpu.vector_store %arg4[%c16_106, %c0_107], %168 {strides = array<i32>} : memref<160x1024xbf16, #tpu.memory_space<vmem>>, vector<16x1024xbf16>,
    %c0_108 = arith.constant 0 : index
    %c96_109 = arith.constant 96 : index
    %170 = vector.load %arg3[%c0_108, %c96_109] : memref<16x1280xbf16, #tpu.memory_space<vmem>>, vector<16x1024xbf16>
    %c32_110 = arith.constant 32 : index
    %c0_111 = arith.constant 0 : index
    %171 = vector.load %arg4[%c32_110, %c0_111] : memref<160x1024xbf16, #tpu.memory_space<vmem>>, vector<16x1024xbf16>
    tpu.vector_store %arg4[%c32_110, %c0_111], %170 {strides = array<i32>} : memref<160x1024xbf16, #tpu.memory_space<vmem>>, vector<16x1024xbf16>,
    %c0_112 = arith.constant 0 : index
    %c97_113 = arith.constant 97 : index
    %172 = vector.load %arg3[%c0_112, %c97_113] : memref<16x1280xbf16, #tpu.memory_space<vmem>>, vector<16x1024xbf16>
    %173 = arith.extf %172 : vector<16x1024xbf16> to vector<16x1024xf32>
    %cst_114 = arith.constant 0.000000e+00 : f32
    %174 = vector.shape_cast %20 : vector<1x1024xi1> to vector<1x1024xi1>
    %175 = vector.broadcast %174 : vector<1x1024xi1> to vector<16x1024xi1>
    %176 = vector.broadcast %cst_114 : f32 to vector<16x1024xf32>
    %177 = arith.select %175, %173, %176 : vector<16x1024xi1>, vector<16x1024xf32>
    %178 = arith.truncf %177 : vector<16x1024xf32> to vector<16x1024xbf16>
    %c48_115 = arith.constant 48 : index
    %c0_116 = arith.constant 0 : index
    %179 = vector.load %arg4[%c48_115, %c0_116] : memref<160x1024xbf16, #tpu.memory_space<vmem>>, vector<16x1024xbf16>
    tpu.vector_store %arg4[%c48_115, %c0_116], %178 {strides = array<i32>} : memref<160x1024xbf16, #tpu.memory_space<vmem>>, vector<16x1024xbf16>,
    %c0_117 = arith.constant 0 : index
    %c127_118 = arith.constant 127 : index
    %180 = vector.load %arg3[%c0_117, %c127_118] : memref<16x1280xbf16, #tpu.memory_space<vmem>>, vector<16x1024xbf16>
    %181 = arith.extf %180 : vector<16x1024xbf16> to vector<16x1024xf32>
    %cst_119 = arith.constant 0.000000e+00 : f32
    %182 = vector.shape_cast %18 : vector<1x1024xi1> to vector<1x1024xi1>
    %183 = vector.broadcast %182 : vector<1x1024xi1> to vector<16x1024xi1>
    %184 = vector.broadcast %cst_119 : f32 to vector<16x1024xf32>
    %185 = arith.select %183, %181, %184 : vector<16x1024xi1>, vector<16x1024xf32>
    %186 = arith.truncf %185 : vector<16x1024xf32> to vector<16x1024xbf16>
    %c64_120 = arith.constant 64 : index
    %c0_121 = arith.constant 0 : index
    %187 = vector.load %arg4[%c64_120, %c0_121] : memref<160x1024xbf16, #tpu.memory_space<vmem>>, vector<16x1024xbf16>
    tpu.vector_store %arg4[%c64_120, %c0_121], %186 {strides = array<i32>} : memref<160x1024xbf16, #tpu.memory_space<vmem>>, vector<16x1024xbf16>,
    %c0_122 = arith.constant 0 : index
    %c129_123 = arith.constant 129 : index
    %188 = vector.load %arg3[%c0_122, %c129_123] : memref<16x1280xbf16, #tpu.memory_space<vmem>>, vector<16x1024xbf16>
    %189 = arith.extf %188 : vector<16x1024xbf16> to vector<16x1024xf32>
    %cst_124 = arith.constant 0.000000e+00 : f32
    %190 = vector.shape_cast %20 : vector<1x1024xi1> to vector<1x1024xi1>
    %191 = vector.broadcast %190 : vector<1x1024xi1> to vector<16x1024xi1>
    %192 = vector.broadcast %cst_124 : f32 to vector<16x1024xf32>
    %193 = arith.select %191, %189, %192 : vector<16x1024xi1>, vector<16x1024xf32>
    %194 = arith.truncf %193 : vector<16x1024xf32> to vector<16x1024xbf16>
    %c96_125 = arith.constant 96 : index
    %c0_126 = arith.constant 0 : index
    %195 = vector.load %arg4[%c96_125, %c0_126] : memref<160x1024xbf16, #tpu.memory_space<vmem>>, vector<16x1024xbf16>
    tpu.vector_store %arg4[%c96_125, %c0_126], %194 {strides = array<i32>} : memref<160x1024xbf16, #tpu.memory_space<vmem>>, vector<16x1024xbf16>,
    %c0_127 = arith.constant 0 : index
    %c159_128 = arith.constant 159 : index
    %196 = vector.load %arg3[%c0_127, %c159_128] : memref<16x1280xbf16, #tpu.memory_space<vmem>>, vector<16x1024xbf16>
    %197 = arith.extf %196 : vector<16x1024xbf16> to vector<16x1024xf32>
    %cst_129 = arith.constant 0.000000e+00 : f32
    %198 = vector.shape_cast %18 : vector<1x1024xi1> to vector<1x1024xi1>
    %199 = vector.broadcast %198 : vector<1x1024xi1> to vector<16x1024xi1>
    %200 = vector.broadcast %cst_129 : f32 to vector<16x1024xf32>
    %201 = arith.select %199, %197, %200 : vector<16x1024xi1>, vector<16x1024xf32>
    %202 = arith.truncf %201 : vector<16x1024xf32> to vector<16x1024xbf16>
    %c112_130 = arith.constant 112 : index
    %c0_131 = arith.constant 0 : index
    %203 = vector.load %arg4[%c112_130, %c0_131] : memref<160x1024xbf16, #tpu.memory_space<vmem>>, vector<16x1024xbf16>
    tpu.vector_store %arg4[%c112_130, %c0_131], %202 {strides = array<i32>} : memref<160x1024xbf16, #tpu.memory_space<vmem>>, vector<16x1024xbf16>,
    %c0_132 = arith.constant 0 : index
    %c160_133 = arith.constant 160 : index
    %204 = vector.load %arg3[%c0_132, %c160_133] : memref<16x1280xbf16, #tpu.memory_space<vmem>>, vector<16x1024xbf16>
    %c128_134 = arith.constant 128 : index
    %c0_135 = arith.constant 0 : index
    %205 = vector.load %arg4[%c128_134, %c0_135] : memref<160x1024xbf16, #tpu.memory_space<vmem>>, vector<16x1024xbf16>
    tpu.vector_store %arg4[%c128_134, %c0_135], %204 {strides = array<i32>} : memref<160x1024xbf16, #tpu.memory_space<vmem>>, vector<16x1024xbf16>,
    %c0_136 = arith.constant 0 : index
    %c161_137 = arith.constant 161 : index
    %206 = vector.load %arg3[%c0_136, %c161_137] : memref<16x1280xbf16, #tpu.memory_space<vmem>>, vector<16x1024xbf16>
    %207 = arith.extf %206 : vector<16x1024xbf16> to vector<16x1024xf32>
    %cst_138 = arith.constant 0.000000e+00 : f32
    %208 = vector.shape_cast %20 : vector<1x1024xi1> to vector<1x1024xi1>
    %209 = vector.broadcast %208 : vector<1x1024xi1> to vector<16x1024xi1>
    %210 = vector.broadcast %cst_138 : f32 to vector<16x1024xf32>
    %211 = arith.select %209, %207, %210 : vector<16x1024xi1>, vector<16x1024xf32>
    %212 = arith.truncf %211 : vector<16x1024xf32> to vector<16x1024xbf16>
    %c144_139 = arith.constant 144 : index
    %c0_140 = arith.constant 0 : index
    %213 = vector.load %arg4[%c144_139, %c0_140] : memref<160x1024xbf16, #tpu.memory_space<vmem>>, vector<16x1024xbf16>
    tpu.vector_store %arg4[%c144_139, %c0_140], %212 {strides = array<i32>} : memref<160x1024xbf16, #tpu.memory_space<vmem>>, vector<16x1024xbf16>,
    %c0_141 = arith.constant 0 : index
    %c0_142 = arith.constant 0 : index
    %214 = vector.load %arg4[%c0_141, %c0_142] : memref<160x1024xbf16, #tpu.memory_space<vmem>>, vector<160x1024xbf16>
    %cst_143 = arith.constant dense<0.000000e+00> : vector<8x1024xf32>
    %215 = tpu.matmul %158, %214, %cst_143 {dimension_numbers = #tpu.dot_dimension_numbers<[1], [0], [0], [1], [0, 0, 1, 1], [], []>} : vector<8x160xbf16>, vector<160x1024xbf16>, vector<8x1024xf32> -> vector<8x1024xf32>
    %cst_144 = arith.constant 0.000000e+00 : f32
    %216 = vector.broadcast %cst_144 : f32 to vector<8x1024xf32>
    %217 = arith.maximumf %215, %216 : vector<8x1024xf32>
    %218 = arith.addf %155, %217 : vector<8x1024xf32>
    %219 = tpu.concatenate %218, %27 in 0 : vector<8x1024xf32>, vector<8x1024xf32> -> vector<16x1024xf32>
    %c3 = arith.constant 3 : index
    %c0_145 = arith.constant 0 : index
    %c0_146 = arith.constant 0 : index
    %220 = vector.load %arg1[%c3, %c0_145, %c0_146] : memref<4x8x160xbf16, #tpu.memory_space<vmem>>, vector<1x8x160xbf16>
    %221 = vector.shape_cast %220 : vector<1x8x160xbf16> to vector<8x160xbf16>
    %222 = arith.truncf %219 : vector<16x1024xf32> to vector<16x1024xbf16>
    %c0_147 = arith.constant 0 : index
    %c128_148 = arith.constant 128 : index
    %223 = vector.load %arg3[%c0_147, %c128_148] : memref<16x1280xbf16, #tpu.memory_space<vmem>>, vector<16x1024xbf16>
    tpu.vector_store %arg3[%c0_147, %c128_148], %222 {strides = array<i32>} : memref<16x1280xbf16, #tpu.memory_space<vmem>>, vector<16x1024xbf16>,
    %c80_149 = arith.constant 80 : index
    %c0_150 = arith.constant 0 : index
    %224 = vector.load %arg4[%c80_149, %c0_150] : memref<160x1024xbf16, #tpu.memory_space<vmem>>, vector<16x1024xbf16>
    tpu.vector_store %arg4[%c80_149, %c0_150], %222 {strides = array<i32>} : memref<160x1024xbf16, #tpu.memory_space<vmem>>, vector<16x1024xbf16>,
    %c0_151 = arith.constant 0 : index
    %c95_152 = arith.constant 95 : index
    %225 = vector.load %arg3[%c0_151, %c95_152] : memref<16x1280xbf16, #tpu.memory_space<vmem>>, vector<16x1024xbf16>
    %226 = arith.extf %225 : vector<16x1024xbf16> to vector<16x1024xf32>
    %cst_153 = arith.constant 0.000000e+00 : f32
    %227 = vector.shape_cast %18 : vector<1x1024xi1> to vector<1x1024xi1>
    %228 = vector.broadcast %227 : vector<1x1024xi1> to vector<16x1024xi1>
    %229 = vector.broadcast %cst_153 : f32 to vector<16x1024xf32>
    %230 = arith.select %228, %226, %229 : vector<16x1024xi1>, vector<16x1024xf32>
    %231 = arith.truncf %230 : vector<16x1024xf32> to vector<16x1024xbf16>
    %c16_154 = arith.constant 16 : index
    %c0_155 = arith.constant 0 : index
    %232 = vector.load %arg4[%c16_154, %c0_155] : memref<160x1024xbf16, #tpu.memory_space<vmem>>, vector<16x1024xbf16>
    tpu.vector_store %arg4[%c16_154, %c0_155], %231 {strides = array<i32>} : memref<160x1024xbf16, #tpu.memory_space<vmem>>, vector<16x1024xbf16>,
    %c0_156 = arith.constant 0 : index
    %c96_157 = arith.constant 96 : index
    %233 = vector.load %arg3[%c0_156, %c96_157] : memref<16x1280xbf16, #tpu.memory_space<vmem>>, vector<16x1024xbf16>
    %c32_158 = arith.constant 32 : index
    %c0_159 = arith.constant 0 : index
    %234 = vector.load %arg4[%c32_158, %c0_159] : memref<160x1024xbf16, #tpu.memory_space<vmem>>, vector<16x1024xbf16>
    tpu.vector_store %arg4[%c32_158, %c0_159], %233 {strides = array<i32>} : memref<160x1024xbf16, #tpu.memory_space<vmem>>, vector<16x1024xbf16>,
    %c0_160 = arith.constant 0 : index
    %c97_161 = arith.constant 97 : index
    %235 = vector.load %arg3[%c0_160, %c97_161] : memref<16x1280xbf16, #tpu.memory_space<vmem>>, vector<16x1024xbf16>
    %236 = arith.extf %235 : vector<16x1024xbf16> to vector<16x1024xf32>
    %cst_162 = arith.constant 0.000000e+00 : f32
    %237 = vector.shape_cast %20 : vector<1x1024xi1> to vector<1x1024xi1>
    %238 = vector.broadcast %237 : vector<1x1024xi1> to vector<16x1024xi1>
    %239 = vector.broadcast %cst_162 : f32 to vector<16x1024xf32>
    %240 = arith.select %238, %236, %239 : vector<16x1024xi1>, vector<16x1024xf32>
    %241 = arith.truncf %240 : vector<16x1024xf32> to vector<16x1024xbf16>
    %c48_163 = arith.constant 48 : index
    %c0_164 = arith.constant 0 : index
    %242 = vector.load %arg4[%c48_163, %c0_164] : memref<160x1024xbf16, #tpu.memory_space<vmem>>, vector<16x1024xbf16>
    tpu.vector_store %arg4[%c48_163, %c0_164], %241 {strides = array<i32>} : memref<160x1024xbf16, #tpu.memory_space<vmem>>, vector<16x1024xbf16>,
    %c0_165 = arith.constant 0 : index
    %c127_166 = arith.constant 127 : index
    %243 = vector.load %arg3[%c0_165, %c127_166] : memref<16x1280xbf16, #tpu.memory_space<vmem>>, vector<16x1024xbf16>
    %244 = arith.extf %243 : vector<16x1024xbf16> to vector<16x1024xf32>
    %cst_167 = arith.constant 0.000000e+00 : f32
    %245 = vector.shape_cast %18 : vector<1x1024xi1> to vector<1x1024xi1>
    %246 = vector.broadcast %245 : vector<1x1024xi1> to vector<16x1024xi1>
    %247 = vector.broadcast %cst_167 : f32 to vector<16x1024xf32>
    %248 = arith.select %246, %244, %247 : vector<16x1024xi1>, vector<16x1024xf32>
    %249 = arith.truncf %248 : vector<16x1024xf32> to vector<16x1024xbf16>
    %c64_168 = arith.constant 64 : index
    %c0_169 = arith.constant 0 : index
    %250 = vector.load %arg4[%c64_168, %c0_169] : memref<160x1024xbf16, #tpu.memory_space<vmem>>, vector<16x1024xbf16>
    tpu.vector_store %arg4[%c64_168, %c0_169], %249 {strides = array<i32>} : memref<160x1024xbf16, #tpu.memory_space<vmem>>, vector<16x1024xbf16>,
    %c0_170 = arith.constant 0 : index
    %c129_171 = arith.constant 129 : index
    %251 = vector.load %arg3[%c0_170, %c129_171] : memref<16x1280xbf16, #tpu.memory_space<vmem>>, vector<16x1024xbf16>
    %252 = arith.extf %251 : vector<16x1024xbf16> to vector<16x1024xf32>
    %cst_172 = arith.constant 0.000000e+00 : f32
    %253 = vector.shape_cast %20 : vector<1x1024xi1> to vector<1x1024xi1>
    %254 = vector.broadcast %253 : vector<1x1024xi1> to vector<16x1024xi1>
    %255 = vector.broadcast %cst_172 : f32 to vector<16x1024xf32>
    %256 = arith.select %254, %252, %255 : vector<16x1024xi1>, vector<16x1024xf32>
    %257 = arith.truncf %256 : vector<16x1024xf32> to vector<16x1024xbf16>
    %c96_173 = arith.constant 96 : index
    %c0_174 = arith.constant 0 : index
    %258 = vector.load %arg4[%c96_173, %c0_174] : memref<160x1024xbf16, #tpu.memory_space<vmem>>, vector<16x1024xbf16>
    tpu.vector_store %arg4[%c96_173, %c0_174], %257 {strides = array<i32>} : memref<160x1024xbf16, #tpu.memory_space<vmem>>, vector<16x1024xbf16>,
    %c0_175 = arith.constant 0 : index
    %c159_176 = arith.constant 159 : index
    %259 = vector.load %arg3[%c0_175, %c159_176] : memref<16x1280xbf16, #tpu.memory_space<vmem>>, vector<16x1024xbf16>
    %260 = arith.extf %259 : vector<16x1024xbf16> to vector<16x1024xf32>
    %cst_177 = arith.constant 0.000000e+00 : f32
    %261 = vector.shape_cast %18 : vector<1x1024xi1> to vector<1x1024xi1>
    %262 = vector.broadcast %261 : vector<1x1024xi1> to vector<16x1024xi1>
    %263 = vector.broadcast %cst_177 : f32 to vector<16x1024xf32>
    %264 = arith.select %262, %260, %263 : vector<16x1024xi1>, vector<16x1024xf32>
    %265 = arith.truncf %264 : vector<16x1024xf32> to vector<16x1024xbf16>
    %c112_178 = arith.constant 112 : index
    %c0_179 = arith.constant 0 : index
    %266 = vector.load %arg4[%c112_178, %c0_179] : memref<160x1024xbf16, #tpu.memory_space<vmem>>, vector<16x1024xbf16>
    tpu.vector_store %arg4[%c112_178, %c0_179], %265 {strides = array<i32>} : memref<160x1024xbf16, #tpu.memory_space<vmem>>, vector<16x1024xbf16>,
    %c0_180 = arith.constant 0 : index
    %c160_181 = arith.constant 160 : index
    %267 = vector.load %arg3[%c0_180, %c160_181] : memref<16x1280xbf16, #tpu.memory_space<vmem>>, vector<16x1024xbf16>
    %c128_182 = arith.constant 128 : index
    %c0_183 = arith.constant 0 : index
    %268 = vector.load %arg4[%c128_182, %c0_183] : memref<160x1024xbf16, #tpu.memory_space<vmem>>, vector<16x1024xbf16>
    tpu.vector_store %arg4[%c128_182, %c0_183], %267 {strides = array<i32>} : memref<160x1024xbf16, #tpu.memory_space<vmem>>, vector<16x1024xbf16>,
    %c0_184 = arith.constant 0 : index
    %c161_185 = arith.constant 161 : index
    %269 = vector.load %arg3[%c0_184, %c161_185] : memref<16x1280xbf16, #tpu.memory_space<vmem>>, vector<16x1024xbf16>
    %270 = arith.extf %269 : vector<16x1024xbf16> to vector<16x1024xf32>
    %cst_186 = arith.constant 0.000000e+00 : f32
    %271 = vector.shape_cast %20 : vector<1x1024xi1> to vector<1x1024xi1>
    %272 = vector.broadcast %271 : vector<1x1024xi1> to vector<16x1024xi1>
    %273 = vector.broadcast %cst_186 : f32 to vector<16x1024xf32>
    %274 = arith.select %272, %270, %273 : vector<16x1024xi1>, vector<16x1024xf32>
    %275 = arith.truncf %274 : vector<16x1024xf32> to vector<16x1024xbf16>
    %c144_187 = arith.constant 144 : index
    %c0_188 = arith.constant 0 : index
    %276 = vector.load %arg4[%c144_187, %c0_188] : memref<160x1024xbf16, #tpu.memory_space<vmem>>, vector<16x1024xbf16>
    tpu.vector_store %arg4[%c144_187, %c0_188], %275 {strides = array<i32>} : memref<160x1024xbf16, #tpu.memory_space<vmem>>, vector<16x1024xbf16>,
    %c0_189 = arith.constant 0 : index
    %c0_190 = arith.constant 0 : index
    %277 = vector.load %arg4[%c0_189, %c0_190] : memref<160x1024xbf16, #tpu.memory_space<vmem>>, vector<160x1024xbf16>
    %cst_191 = arith.constant dense<0.000000e+00> : vector<8x1024xf32>
    %278 = tpu.matmul %221, %277, %cst_191 {dimension_numbers = #tpu.dot_dimension_numbers<[1], [0], [0], [1], [0, 0, 1, 1], [], []>} : vector<8x160xbf16>, vector<160x1024xbf16>, vector<8x1024xf32> -> vector<8x1024xf32>
    %cst_192 = arith.constant 0.000000e+00 : f32
    %279 = vector.broadcast %cst_192 : f32 to vector<8x1024xf32>
    %280 = arith.maximumf %278, %279 : vector<8x1024xf32>
    %281 = arith.addf %218, %280 : vector<8x1024xf32>
    %c0_193 = arith.constant 0 : index
    %c0_194 = arith.constant 0 : index
    %282 = vector.load %arg2[%c0_193, %c0_194] : memref<8x1024xf32, #tpu.memory_space<vmem>>, vector<8x1024xf32>
    tpu.vector_store %arg2[%c0_193, %c0_194], %281 {strides = array<i32>} : memref<8x1024xf32, #tpu.memory_space<vmem>>, vector<8x1024xf32>,
    return
  }
}

</mosaic_0001>

<bundles_post_ra>
// kernel: squeeze.5
= control target key start
LH: loop header
LB: loop body
LE: loop exit
PB: predicated region body
PF: predicated region fallthrough
CT: control target
= control target key end

     0   :  { %vm38_vm0 = vcmask 1041409   ;;  %vm42_vm1 = vcmask 1042434   ;;  %vm46_vm2 = vcmask 1043459   ;;  %s49_s6 = smov 48  ;;  %vm51_vm3 = vcmask 1045508   ;;  %s104_s23 = smov 6  ;;  %s1293_s0 = inlined_call_operand.vmem [shape: f32[1,5,32,32], index: 0, kind: input, shape index: {}]   ;;  %s1294_s1 = inlined_call_operand.vmem [shape: f32[5,1024], index: 1, kind: output, shape index: {}]  }
   0x1   :  { %v547_v0 = vld [vmem:[%s1293_s0 + $0x3] sm:$0x1]   ;;  %v552_v6 = vld [vmem:[%s1293_s0 + $0x21] sm:$0x40]   ;;  %vm55_vm4 = vcmask 1046534   ;;  %vm59_vm5 = vcmask 1047559  }
   0x2   :  { %v548_v1 = vld [vmem:[%s1293_s0 + $0x22] sm:$0x2]   ;;  %v553_v8 = vld [vmem:[%s1293_s0 + $0x40] sm:$0x80]   ;;  %vm106_vm6 = vcmask 1042433   ;;  %vm114_vm7 = vcmask 1044484  }
   0x3   :  { %v549_v2 = vld [vmem:[%s1293_s0 + $0x41] sm:$0x4]   ;;  %v39_v3 = vsel %vm38_vm0, %v548_v1, %v547_v0  ;;  %v564_v9 = vld [vmem:[%s1293_s0 + $0x67] sm:$0x1]   ;;  %v566_v11 = vld [vmem:[%s1293_s0 + $0x28] sm:$0x8]  }
   0x4   :  { %v550_v4 = vld [vmem:[%s1293_s0 + $0x60] sm:$0x8]   ;;  %v43_v7 = vsel %vm42_vm1, %v549_v2, %v39_v3  ;;  %v567_v12 = vld [vmem:[%s1293_s0 + $0x47] sm:$0x10]   ;;  %vm118_vm8 = vcmask 1045509   ;;  %s121_s3 = smov 192 }
   0x5   :  { %v551_v5 = vld [vmem:[%s1293_s0 + $0x273] ss:$-124 sm:%s49_s6]   ;;  %v47_v10 = vsel %vm46_vm2, %v550_v4, %v43_v7  ;;  %vm123_vm9 = vcmask 1047558   ;;  %s682_s14 = smov 96   ;;  %s82_s15 = smov 48  ;;  %vm180_vm10 = vcmask 1044483  }
   0x6   :  { %v52_v13 = vsel %vm51_vm3, %v551_v5, %v47_v10  ;;  %v565_v14 = vld [vmem:[%s1293_s0 + $0x103] ss:$-124 sm:%s104_s23]   ;;  %s137_s20 = smov 6  ;;  %s154_s4 = smov 192  ;;  %v591_v57 = vld [vmem:[%s1293_s0 + $0x2] sm:$0x1]  }
   0x7   :  { %v568_v15 = vld [vmem:[%s1293_s0 + $0x66] sm:$0x20]   ;;  %v56_v16 = vsel %vm55_vm4, %v552_v6, %v52_v13  ;;  %v107_v17 = vsel %vm106_vm6, %v565_v14, %v564_v9  ;;  %v555_v18 = vld [vmem:[%s1293_s0 + $0x13] sm:$0x1]   ;;  %v560_v28 = vld [vmem:[%s1293_s0 + $0x31] sm:$0x40]  }
   0x8   :  { %v556_v19 = vld [vmem:[%s1293_s0 + $0x32] sm:$0x2]   ;;  %v60_v20 = vsel %vm59_vm5, %v553_v8, %v56_v16  ;;  %v111_v21 = vsel %vm46_vm2, %v566_v11, %v107_v17  ;;  %v561_v29 = vld [vmem:[%s1293_s0 + $0x50] sm:$0x80]   ;;  %v575_v34 = vld [vmem:[%s1293_s0 + $0x38] sm:$0x8]  }
   0x9   :  { %v569_v22 = vld [vmem:[%s1293_s0 + $0x373] ss:$-124 sm:%s121_s3]   ;;  %v72_v23 = vsel %vm38_vm0, %v556_v19, %v555_v18  ;;  %61 = vrot.lane.b32.xlu0 %v60_v20, %s682_s14  ;;  %v115_v26 = vsel %vm114_vm7, %v567_v12, %v111_v21  ;;  %s178_s9 = smov 24  ;;  %v592_v60 = vld [vmem:[%s1293_s0 + $0x21] sm:$0x2]   ;;  %s271_s8 = smov 6 }
   0xa   :  { %v557_v24 = vld [vmem:[%s1293_s0 + $0x51] sm:$0x4]   ;;  %v119_v30 = vsel %vm118_vm8, %v568_v15, %v115_v26  ;;  %v573_v33 = vld [vmem:[%s1293_s0 + $0x77] sm:$0x1]   ;;  %v576_v38 = vld [vmem:[%s1293_s0 + $0x57] sm:$0x10]   ;;  %v206_v0 = vsel %vm38_vm0, %v592_v60, %v591_v57 }
   0xb   :  { %v558_v25 = vld [vmem:[%s1293_s0 + $0x70] sm:$0x8]   ;;  %v76_v27 = vsel %vm42_vm1, %v557_v24, %v72_v23  ;;  %v124_v35 = vsel %vm123_vm9, %v569_v22, %v119_v30  ;;  %v577_v39 = vld [vmem:[%s1293_s0 + $0x76] sm:$0x20]   ;;  %v582_v42 = vld [vmem:[%s1293_s0 + $0x2f] sm:$0x1]  }
   0xc   :  { %v80_v31 = vsel %vm46_vm2, %v558_v25, %v76_v27  ;;  %v559_v32 = vld [vmem:[%s1293_s0 + $0x283] ss:$-124 sm:%s82_s15]   ;;  %125 = vrot.lane.b32.xlu1 %v124_v35, %s682_s14  ;;  %s216_s15 = smov 48  ;;  %v593_v61 = vld [vmem:[%s1293_s0 + $0x40] sm:$0x4]   ;;  %s683_s11 = smov 64  }
   0xd   :  { %v85_v36 = vsel %vm51_vm3, %v559_v32, %v80_v31  ;;  %v574_v37 = vld [vmem:[%s1293_s0 + $0x113] ss:$-124 sm:%s137_s20]   ;;  %s813_s20 = smov 48  ;;  %v594_v62 = vld [vmem:[%s1293_s0 + $0x5f] sm:$0x8]   ;;  %v210_v4 = vsel %vm42_vm1, %v593_v61, %v206_v0  ;;  %s304_s12 = smov 6 }
   0xe   :  { %v89_v40 = vsel %vm55_vm4, %v560_v28, %v85_v36  ;;  %v140_v41 = vsel %vm106_vm6, %v574_v37, %v573_v33  ;;  %v583_v43 = vld [vmem:[%s1293_s0 + $0x4e] sm:$0x2]   ;;  %v586_v52 = vld [vmem:[%s1293_s0 + $0x5a] sm:$0x20]   ;;  %v595_v1 = vld [vmem:[%s1293_s0 + $0x272] ss:$-124 sm:%s216_s15]   ;;  %v214_v8 = vsel %vm46_vm2, %v594_v62, %v210_v4 }
   0xf   :  { %v93_v44 = vsel %vm59_vm5, %v561_v29, %v89_v40  ;;  %v144_v45 = vsel %vm46_vm2, %v575_v34, %v140_v41  ;;  %v578_v46 = vld [vmem:[%s1293_s0 + $0x383] ss:$-124 sm:%s154_s4]   ;;  %v172_v47 = vsel %vm38_vm0, %v583_v43, %v582_v42  ;;  %v596_v2 = vld [vmem:[%s1293_s0 + $0x20] sm:$0x40]   ;;  %v599_v6 = vld [vmem:[%s1293_s0 + $0x12] sm:$0x1]   ;;  %v219_v13 = vsel %vm51_vm3, %v595_v1, %v214_v8 }
  0x10   :  { %v584_v48 = vld [vmem:[%s1293_s0 + $0x6d] sm:$0x4]   ;;  %94 = vrot.lane.b32.xlu0 %v93_v44, %s682_s14  ;;  %v148_v49 = vsel %vm114_vm7, %v576_v38, %v144_v45  ;;  %v587_v55 = vld [vmem:[%s1293_s0 + $0x79] sm:$0x40]   ;;  %v597_v5 = vld [vmem:[%s1293_s0 + $0x3f] sm:$0x80]   ;;  %v223_v18 = vsel %vm55_vm4, %v596_v2, %v219_v13 }
  0x11   :  { %v176_v50 = vsel %vm42_vm1, %v584_v48, %v172_v47  ;;  %v585_v51 = vld [vmem:[%s1293_s0 + $0x17f] ss:$-80 sm:%s178_s9]   ;;  %v152_v53 = vsel %vm118_vm8, %v577_v39, %v148_v49  ;;  %s288_s9 = smov 192  ;;  %v600_v7 = vld [vmem:[%s1293_s0 + $0x31] sm:$0x2]   ;;  %v227_v23 = vsel %vm59_vm5, %v597_v5, %v223_v18  ;;  %s321_s17 = smov 192 }
  0x12   :  { %v181_v54 = vsel %vm180_vm10, %v585_v51, %v176_v50  ;;  %v588_v56 = vld [vmem:[%s1293_s0 + $0x98] sm:$0x80]   ;;  %v157_v58 = vsel %vm123_vm9, %v578_v46, %v152_v53  ;;  %v239_v9 = vsel %vm38_vm0, %v600_v7, %v599_v6  ;;  %v601_v10 = vld [vmem:[%s1293_s0 + $0x50] sm:$0x4]   ;;  %v604_v12 = vld [vmem:[%s1293_s0 + $0x30] sm:$0x40]  }
  0x13   :  { %v185_v59 = vsel %vm118_vm8, %v586_v52, %v181_v54  ;;  %158 = vrot.lane.b32.xlu1 %v157_v58, %s682_s14  ;;  %v602_v11 = vld [vmem:[%s1293_s0 + $0x6f] sm:$0x8]   ;;  %v243_v14 = vsel %vm42_vm1, %v601_v10, %v239_v9  ;;  %v605_v16 = vld [vmem:[%s1293_s0 + $0x4f] sm:$0x80]   ;;  %v608_v17 = vld [vmem:[%s1293_s0 + $0x66] sm:$0x1]  }
  0x14   :  { %v189_v63 = vsel %vm55_vm4, %v587_v55, %v185_v59  ;;  %v603_v15 = vld [vmem:[%s1293_s0 + $0x282] ss:$-124 sm:%s813_s20]   ;;  %v247_v19 = vsel %vm46_vm2, %v602_v11, %v243_v14  ;;  %s345_s28 = smov 24  ;;  %s383_s29 = smov 48  ;;  %v635_v52 = vld [vmem:[%s1293_s0 + $0x1] sm:$0x1]  }
  0x15   :  { %v193_v3 = vsel %vm59_vm5, %v588_v56, %v189_v63  ;;  %v609_v20 = vld [vmem:[%s1293_s0 + $0x102] ss:$-124 sm:%s271_s8]   ;;  %v252_v24 = vsel %vm51_vm3, %v603_v15, %v247_v19  ;;  %v636_v55 = vld [vmem:[%s1293_s0 + $0x20] sm:$0x2]   ;;  %v640_v62 = vld [vmem:[%s1293_s0 + $0x1f] sm:$0x40]  }
  0x16   :  { %194 = vrot.lane.b32.xlu0 %v193_v3, %s682_s14  ;;  %v610_v21 = vld [vmem:[%s1293_s0 + $0x27] sm:$0x8]   ;;  %v274_v25 = vsel %vm106_vm6, %v609_v20, %v608_v17  ;;  %v617_v28 = vld [vmem:[%s1293_s0 + $0x76] sm:$0x1]   ;;  %v256_v29 = vsel %vm55_vm4, %v604_v12, %v252_v24  ;;  %v619_v31 = vld [vmem:[%s1293_s0 + $0x37] sm:$0x8]   ;;  %v373_v60 = vsel %vm38_vm0, %v636_v55, %v635_v52 }
  0x17   :  { %v611_v22 = vld [vmem:[%s1293_s0 + $0x46] sm:$0x10]   ;;  %228 = vrot.lane.b32.xlu1 %v227_v23, %s683_s11  ;;  %v278_v30 = vsel %vm46_vm2, %v610_v21, %v274_v25  ;;  %v620_v32 = vld [vmem:[%s1293_s0 + $0x56] sm:$0x10]   ;;  %v260_v33 = vsel %vm59_vm5, %v605_v16, %v256_v29  ;;  %v626_v37 = vld [vmem:[%s1293_s0 + $0x2e] sm:$0x1]  }
  0x18   :  { %v612_v26 = vld [vmem:[%s1293_s0 + $0x65] sm:$0x20]   ;;  %v282_v34 = vsel %vm114_vm7, %v611_v22, %v278_v30  ;;  %v621_v36 = vld [vmem:[%s1293_s0 + $0x75] sm:$0x20]   ;;  %v627_v41 = vld [vmem:[%s1293_s0 + $0x4d] sm:$0x2]  }
  0x19   :  { %v613_v27 = vld [vmem:[%s1293_s0 + $0x372] ss:$-124 sm:%s288_s9]   ;;  %v286_v38 = vsel %vm118_vm8, %v612_v26, %v282_v34  ;;  %v339_v44 = vsel %vm38_vm0, %v627_v41, %v626_v37  ;;  %v637_v56 = vld [vmem:[%s1293_s0 + $0x3f] sm:$0x4]   ;;  %v641_v63 = vld [vmem:[%s1293_s0 + $0x3e] sm:$0x80]  }
  0x1a   :  { %v618_v35 = vld [vmem:[%s1293_s0 + $0x112] ss:$-124 sm:%s304_s12]   ;;  %261 = vrot.lane.b32.xlu0 %v260_v33, %s683_s11  ;;  %v291_v42 = vsel %vm123_vm9, %v613_v27, %v286_v38  ;;  %v638_v57 = vld [vmem:[%s1293_s0 + $0x5e] sm:$0x8]   ;;  %v377_v1 = vsel %vm42_vm1, %v637_v56, %v373_v60  ;;  %s416_s30 = smov 48  ;;  %s438_s15 = smov 6 }
  0x1b   :  { %v307_v39 = vsel %vm106_vm6, %v618_v35, %v617_v28  ;;  %v622_v40 = vld [vmem:[%s1293_s0 + $0x382] ss:$-124 sm:%s321_s17]   ;;  %292 = vrot.lane.b32.xlu1 %v291_v42, %s683_s11  ;;  %v643_v2 = vld [vmem:[%s1293_s0 + $0x11] sm:$0x1]   ;;  %v381_v5 = vsel %vm46_vm2, %v638_v57, %v377_v1  ;;  %s455_s19 = smov 192  ;;  %s684_s26 = smov 32  }
  0x1c   :  { %v311_v43 = vsel %vm46_vm2, %v619_v31, %v307_v39  ;;  %v628_v45 = vld [vmem:[%s1293_s0 + $0x6c] sm:$0x4]   ;;  %v630_v47 = vld [vmem:[%s1293_s0 + $0x59] sm:$0x20]   ;;  %v639_v61 = vld [vmem:[%s1293_s0 + $0x271] ss:$-124 sm:%s383_s29]  }
  0x1d   :  { %v629_v46 = vld [vmem:[%s1293_s0 + $0x17e] ss:$-80 sm:%s345_s28]   ;;  %v315_v48 = vsel %vm114_vm7, %v620_v32, %v311_v43  ;;  %v343_v49 = vsel %vm42_vm1, %v628_v45, %v339_v44  ;;  %v644_v3 = vld [vmem:[%s1293_s0 + $0x30] sm:$0x2]   ;;  %v386_v10 = vsel %vm51_vm3, %v639_v61, %v381_v5  ;;  %v648_v12 = vld [vmem:[%s1293_s0 + $0x2f] sm:$0x40]  }
  0x1e   :  { %v631_v50 = vld [vmem:[%s1293_s0 + $0x78] sm:$0x40]   ;;  %v319_v53 = vsel %vm118_vm8, %v621_v36, %v315_v48  ;;  %v348_v54 = vsel %vm180_vm10, %v629_v46, %v343_v49  ;;  %v406_v6 = vsel %vm38_vm0, %v644_v3, %v643_v2  ;;  %v645_v7 = vld [vmem:[%s1293_s0 + $0x4f] sm:$0x4]   ;;  %v649_v13 = vld [vmem:[%s1293_s0 + $0x4e] sm:$0x80]   ;;  %v390_v15 = vsel %vm55_vm4, %v640_v62, %v386_v10 }
  0x1f   :  { %v632_v51 = vld [vmem:[%s1293_s0 + $0x97] sm:$0x80]   ;;  %v324_v58 = vsel %vm123_vm9, %v622_v40, %v319_v53  ;;  %v352_v59 = vsel %vm118_vm8, %v630_v47, %v348_v54  ;;  %v646_v8 = vld [vmem:[%s1293_s0 + $0x6e] sm:$0x8]   ;;  %v410_v11 = vsel %vm42_vm1, %v645_v7, %v406_v6  ;;  %v652_v14 = vld [vmem:[%s1293_s0 + $0x65] sm:$0x1]   ;;  %v394_v19 = vsel %vm59_vm5, %v641_v63, %v390_v15 }
  0x20   :  { %325 = vrot.lane.b32.xlu0 %v324_v58, %s683_s11  ;;  %v356_v0 = vsel %vm55_vm4, %v631_v50, %v352_v59  ;;  %v647_v9 = vld [vmem:[%s1293_s0 + $0x281] ss:$-124 sm:%s416_s30]   ;;  %v414_v16 = vsel %vm46_vm2, %v646_v8, %v410_v11  ;;  %s471_s29 = smov 6  ;;  %s488_s3 = smov 192  ;;  %vm3_vm11 = vcmask 261120   ;;  %vm63_vm12 = vcmask 1048320  }
  0x21   :  { %v360_v4 = vsel %vm59_vm5, %v632_v51, %v356_v0  ;;  %v654_v17 = vld [vmem:[%s1293_s0 + $0x26] sm:$0x8]   ;;  %v419_v20 = vsel %vm51_vm3, %v647_v9, %v414_v16  ;;  %v661_v23 = vld [vmem:[%s1293_s0 + $0x75] sm:$0x1]   ;;  %v663_v27 = vld [vmem:[%s1293_s0 + $0x36] sm:$0x8]  }
  0x22   :  { %361 = vrot.lane.b32.xlu1 %v360_v4, %s683_s11  ;;  %v655_v18 = vld [vmem:[%s1293_s0 + $0x45] sm:$0x10]   ;;  %v423_v24 = vsel %vm55_vm4, %v648_v12, %v419_v20  ;;  %v664_v31 = vld [vmem:[%s1293_s0 + $0x55] sm:$0x10]   ;;  %v670_v36 = vld [vmem:[%s1293_s0 + $0x2d] sm:$0x1]  }
  0x23   :  { %v653_v21 = vld [vmem:[%s1293_s0 + $0x101] ss:$-124 sm:%s438_s15]   ;;  %v427_v28 = vsel %vm59_vm5, %v649_v13, %v423_v24  ;;  %s512_s15 = smov 24  ;;  %v2_v50 = vld [vmem:[%s1293_s0] ss:$4 sm:$0xff]   ;;  %vm230_vm13 = vcmask 785920  }
  0x24   :  { %v656_v22 = vld [vmem:[%s1293_s0 + $0x64] sm:$0x20]   ;;  %395 = vrot.lane.b32.xlu0 %v394_v19, %s684_s26  ;;  %v441_v25 = vsel %vm106_vm6, %v653_v21, %v652_v14  ;;  %v665_v32 = vld [vmem:[%s1293_s0 + $0x74] sm:$0x20]   ;;  %v671_v39 = vld [vmem:[%s1293_s0 + $0x4c] sm:$0x2]  }
  0x25   :  { %v657_v26 = vld [vmem:[%s1293_s0 + $0x371] ss:$-124 sm:%s455_s19]   ;;  %v445_v29 = vsel %vm46_vm2, %v654_v17, %v441_v25  ;;  %v506_v44 = vsel %vm38_vm0, %v671_v39, %v670_v36  ;;  %v541_v51 = vld [vmem:[%s1293_s0 + $0x60] ss:$4 sm:$0xff]   ;;  %vm397_vm14 = vcmask 523520  }
  0x26   :  { %v662_v30 = vld [vmem:[%s1293_s0 + $0x111] ss:$-124 sm:%s471_s29]   ;;  %428 = vrot.lane.b32.xlu1 %v427_v28, %s684_s26  ;;  %v449_v33 = vsel %vm114_vm7, %v655_v18, %v445_v29  ;;  %4 = vst.msk [vmem:[%s1294_s1] ss:$8 sm:$0xf] %vm3_vm11, %v2_v50  }
  0x27   :  { %v474_v34 = vsel %vm106_vm6, %v662_v30, %v661_v23  ;;  %v666_v35 = vld [vmem:[%s1293_s0 + $0x381] ss:$-124 sm:%s488_s3]   ;;  %v453_v37 = vsel %vm118_vm8, %v656_v22, %v449_v33  ;;  %542 = vst.msk [vmem:[%s1294_s1 + $0x3] ss:$8 sm:$0xf] %vm3_vm11, %v541_v51  }
  0x28   :  { %v478_v38 = vsel %vm46_vm2, %v663_v27, %v474_v34  ;;  %v672_v40 = vld [vmem:[%s1293_s0 + $0x6b] sm:$0x4]   ;;  %v458_v42 = vsel %vm123_vm9, %v657_v26, %v453_v37  ;;  %v674_v45 = vld [vmem:[%s1293_s0 + $0x58] sm:$0x20]   ;;  %v544_v54 = vld [vmem:[%s1293_s0 + $0x80] ss:$4 sm:$0xff]  }
  0x29   :  { %v673_v41 = vld [vmem:[%s1293_s0 + $0x17d] ss:$-80 sm:%s512_s15]   ;;  %v482_v43 = vsel %vm114_vm7, %v664_v31, %v478_v38  ;;  %459 = vrot.lane.b32.xlu0 %v458_v42, %s684_s26  ;;  %v510_v48 = vsel %vm42_vm1, %v672_v40, %v506_v44  ;;  %5 = vst.msk [vmem:[%s1294_s1] ss:$8 sm:$0xf0] %vm3_vm11, %v2_v50  }
  0x2a   :  { %v675_v46 = vld [vmem:[%s1293_s0 + $0x77] sm:$0x40]   ;;  %v486_v47 = vsel %vm118_vm8, %v665_v32, %v482_v43  ;;  %v515_v53 = vsel %vm180_vm10, %v673_v41, %v510_v48  ;;  %543 = vst.msk [vmem:[%s1294_s1 + $0x3] ss:$8 sm:$0xf0] %vm3_vm11, %v541_v51  }
  0x2b   :  { %v676_v49 = vld [vmem:[%s1293_s0 + $0x96] sm:$0x80]   ;;  %v491_v52 = vsel %vm123_vm9, %v666_v35, %v486_v47  ;;  %v535_v55 = vld [vmem:[%s1293_s0 + $0x20] ss:$4 sm:$0xff]   ;;  %v519_v57 = vsel %vm118_vm8, %v674_v45, %v515_v53 }
  0x2c   :  { %v538_v56 = vld [vmem:[%s1293_s0 + $0x40] ss:$4 sm:$0xff]   ;;  %492 = vrot.lane.b32.xlu1 %v491_v52, %s684_s26  ;;  %545 = vst.msk [vmem:[%s1294_s1 + $0x4] ss:$8 sm:$0xf] %vm3_vm11, %v544_v54   ;;  %v523_v58 = vsel %vm55_vm4, %v675_v46, %v519_v57 }
  0x2d   :  { %546 = vst.msk [vmem:[%s1294_s1 + $0x4] ss:$8 sm:$0xf0] %vm3_vm11, %v544_v54   ;;  %536 = vst.msk [vmem:[%s1294_s1 + $0x1] ss:$8 sm:$0xf] %vm3_vm11, %v535_v55   ;;  %v527_v59 = vsel %vm59_vm5, %v676_v49, %v523_v58 }
  0x2e   :  { %539 = vst.msk [vmem:[%s1294_s1 + $0x2] ss:$8 sm:$0xf] %vm3_vm11, %v538_v56   ;;  %537 = vst.msk [vmem:[%s1294_s1 + $0x1] ss:$8 sm:$0xf0] %vm3_vm11, %v535_v55   ;;  %528 = vrot.lane.b32.xlu0 %v527_v59, %s684_s26 }
  0x2f   :  { %540 = vst.msk [vmem:[%s1294_s1 + $0x2] ss:$8 sm:$0xf0] %vm3_vm11, %v538_v56  }
  0x7b   :  { %v62_v60 = vpop.permute.xlu0 %61  }
  0x7c   :  { %64 = vst.msk [vmem:[%s1294_s1] sm:$0x1f] %vm63_vm12, %v62_v60   ;;  %554 = vst.msk [vmem:[%s1294_s1 + $0x3] sm:$0xe0] %vm63_vm12, %v62_v60  }
  0x7e   :  { %v126_v61 = vpop.permute.xlu1 %125  }
  0x7f   :  { %570 = vst.msk [vmem:[%s1294_s1 + $0xb] sm:$0x3] %vm63_vm12, %v126_v61   ;;  %572 = vst.msk [vmem:[%s1294_s1 + $0x11] sm:$0x80] %vm63_vm12, %v126_v61  }
  0x80   :  { %571 = vst.msk [vmem:[%s1294_s1 + $0xe] sm:$0x7c] %vm63_vm12, %v126_v61  }
  0x82   :  { %v95_v62 = vpop.permute.xlu0 %94  }
  0x83   :  { %562 = vst.msk [vmem:[%s1294_s1 + $0x20] sm:$0x1f] %vm63_vm12, %v95_v62   ;;  %563 = vst.msk [vmem:[%s1294_s1 + $0x23] sm:$0xe0] %vm63_vm12, %v95_v62  }
  0x85   :  { %v159_v63 = vpop.permute.xlu1 %158  }
  0x86   :  { %579 = vst.msk [vmem:[%s1294_s1 + $0x2b] sm:$0x3] %vm63_vm12, %v159_v63   ;;  %581 = vst.msk [vmem:[%s1294_s1 + $0x31] sm:$0x80] %vm63_vm12, %v159_v63  }
  0x87   :  { %580 = vst.msk [vmem:[%s1294_s1 + $0x2e] sm:$0x7c] %vm63_vm12, %v159_v63  }
  0x88   :  { %v195_v0 = vpop.permute.xlu0 %194  }
  0x89   :  { %589 = vst.msk [vmem:[%s1294_s1 + $0x19] sm:$0xf] %vm63_vm12, %v195_v0   ;;  %590 = vst.msk [vmem:[%s1294_s1 + $0x35] sm:$0xf0] %vm63_vm12, %v195_v0   ;;  %v229_v1 = vpop.permute.xlu1 %228  }
  0x8a   :  { %231 = vst.msk [vmem:[%s1294_s1] sm:$0x1f] %vm230_vm13, %v229_v1   ;;  %598 = vst.msk [vmem:[%s1294_s1 + $0x3] sm:$0xe0] %vm230_vm13, %v229_v1  }
  0x8c   :  { %v262_v2 = vpop.permute.xlu0 %261  }
  0x8d   :  { %606 = vst.msk [vmem:[%s1294_s1 + $0x20] sm:$0x1f] %vm230_vm13, %v262_v2   ;;  %607 = vst.msk [vmem:[%s1294_s1 + $0x23] sm:$0xe0] %vm230_vm13, %v262_v2   ;;  %v293_v3 = vpop.permute.xlu1 %292  }
  0x8e   :  { %614 = vst.msk [vmem:[%s1294_s1 + $0xb] sm:$0x3] %vm230_vm13, %v293_v3   ;;  %615 = vst.msk [vmem:[%s1294_s1 + $0xe] sm:$0x7c] %vm230_vm13, %v293_v3  }
  0x8f   :  { %616 = vst.msk [vmem:[%s1294_s1 + $0x11] sm:$0x80] %vm230_vm13, %v293_v3  }
  0x92   :  { %v326_v4 = vpop.permute.xlu0 %325  }
  0x93   :  { %623 = vst.msk [vmem:[%s1294_s1 + $0x2b] sm:$0x3] %vm230_vm13, %v326_v4   ;;  %624 = vst.msk [vmem:[%s1294_s1 + $0x2e] sm:$0x7c] %vm230_vm13, %v326_v4  }
  0x94   :  { %625 = vst.msk [vmem:[%s1294_s1 + $0x31] sm:$0x80] %vm230_vm13, %v326_v4   ;;  %v362_v5 = vpop.permute.xlu1 %361  }
  0x95   :  { %633 = vst.msk [vmem:[%s1294_s1 + $0x19] sm:$0xf] %vm230_vm13, %v362_v5   ;;  %634 = vst.msk [vmem:[%s1294_s1 + $0x35] sm:$0xf0] %vm230_vm13, %v362_v5  }
  0x96   :  { %v396_v6 = vpop.permute.xlu0 %395  }
  0x97   :  { %398 = vst.msk [vmem:[%s1294_s1] sm:$0x1f] %vm397_vm14, %v396_v6   ;;  %642 = vst.msk [vmem:[%s1294_s1 + $0x3] sm:$0xe0] %vm397_vm14, %v396_v6  }
  0x98   :  { %v429_v7 = vpop.permute.xlu1 %428  }
  0x99   :  { %650 = vst.msk [vmem:[%s1294_s1 + $0x20] sm:$0x1f] %vm397_vm14, %v429_v7   ;;  %651 = vst.msk [vmem:[%s1294_s1 + $0x23] sm:$0xe0] %vm397_vm14, %v429_v7  }
  0x9b   :  { %v460_v8 = vpop.permute.xlu0 %459  }
  0x9c   :  { %658 = vst.msk [vmem:[%s1294_s1 + $0xb] sm:$0x3] %vm397_vm14, %v460_v8   ;;  %659 = vst.msk [vmem:[%s1294_s1 + $0xe] sm:$0x7c] %vm397_vm14, %v460_v8  }
  0x9d   :  { %660 = vst.msk [vmem:[%s1294_s1 + $0x11] sm:$0x80] %vm397_vm14, %v460_v8  }
  0x9e   :  { %v493_v9 = vpop.permute.xlu1 %492  }
  0x9f   :  { %667 = vst.msk [vmem:[%s1294_s1 + $0x2b] sm:$0x3] %vm397_vm14, %v493_v9   ;;  %668 = vst.msk [vmem:[%s1294_s1 + $0x2e] sm:$0x7c] %vm397_vm14, %v493_v9  }
  0xa0   :  { %669 = vst.msk [vmem:[%s1294_s1 + $0x31] sm:$0x80] %vm397_vm14, %v493_v9   ;;  %v529_v10 = vpop.permute.xlu0 %528  }
  0xa1   :  { %677 = vst.msk [vmem:[%s1294_s1 + $0x19] sm:$0xf] %vm397_vm14, %v529_v10   ;;  %678 = vst.msk [vmem:[%s1294_s1 + $0x35] sm:$0xf0] %vm397_vm14, %v529_v10  }

// kernel: squeeze.6
= control target key start
LH: loop header
LB: loop body
LE: loop exit
PB: predicated region body
PF: predicated region fallthrough
CT: control target
= control target key end

     0   :  { %vm59_vm0 = vcmask 1041409   ;;  %vm63_vm1 = vcmask 1042434   ;;  %vm67_vm2 = vcmask 1043459   ;;  %vm71_vm3 = vcmask 1044484   ;;  %s1129_s25 = smov 96   ;;  %s1130_s10 = smov 64   ;;  %s2094_s0 = inlined_call_operand.vmem [shape: f32[1,8,32,32], index: 0, kind: input, shape index: {}]   ;;  %s2095_s1 = inlined_call_operand.vmem [shape: f32[8,1024], index: 1, kind: output, shape index: {}]  }
   0x1   :  { %vm75_vm4 = vcmask 1045509   ;;  %vm79_vm5 = vcmask 1046534   ;;  %v930_v0 = vld [vmem:[%s2094_s0 + $0x7] sm:$0x1]   ;;  %vm83_vm6 = vcmask 1047559   ;;  %s1131_s23 = smov 32  }
   0x2   :  { %v931_v1 = vld [vmem:[%s2094_s0 + $0x26] sm:$0x2]   ;;  %v913_v9 = vld [vmem:[%s2094_s0 + $0x3] sm:$0x1]   ;;  %v939_v23 = vld [vmem:[%s2094_s0 + $0x17] sm:$0x1]  }
   0x3   :  { %v932_v2 = vld [vmem:[%s2094_s0 + $0x45] sm:$0x4]   ;;  %v129_v4 = vsel %vm59_vm0, %v931_v1, %v930_v0  ;;  %v914_v10 = vld [vmem:[%s2094_s0 + $0x22] sm:$0x2]   ;;  %v940_v24 = vld [vmem:[%s2094_s0 + $0x36] sm:$0x2]  }
   0x4   :  { %v933_v3 = vld [vmem:[%s2094_s0 + $0x64] sm:$0x8]   ;;  %v133_v7 = vsel %vm63_vm1, %v932_v2, %v129_v4  ;;  %v60_v12 = vsel %vm59_vm0, %v914_v10, %v913_v9  ;;  %v915_v13 = vld [vmem:[%s2094_s0 + $0x41] sm:$0x4]   ;;  %v941_v25 = vld [vmem:[%s2094_s0 + $0x55] sm:$0x4]   ;;  %v164_v29 = vsel %vm59_vm0, %v940_v24, %v939_v23 }
   0x5   :  { %v934_v5 = vld [vmem:[%s2094_s0 + $0x83] sm:$0x10]   ;;  %v137_v11 = vsel %vm67_vm2, %v933_v3, %v133_v7  ;;  %v916_v14 = vld [vmem:[%s2094_s0 + $0x60] sm:$0x8]   ;;  %v64_v18 = vsel %vm63_vm1, %v915_v13, %v60_v12  ;;  %v942_v30 = vld [vmem:[%s2094_s0 + $0x74] sm:$0x8]   ;;  %v168_v34 = vsel %vm63_vm1, %v941_v25, %v164_v29 }
   0x6   :  { %v935_v6 = vld [vmem:[%s2094_s0 + $0xa2] sm:$0x20]   ;;  %v917_v15 = vld [vmem:[%s2094_s0 + $0x7f] sm:$0x10]   ;;  %v141_v16 = vsel %vm71_vm3, %v934_v5, %v137_v11  ;;  %v68_v22 = vsel %vm67_vm2, %v916_v14, %v64_v18  ;;  %v943_v31 = vld [vmem:[%s2094_s0 + $0x93] sm:$0x10]   ;;  %v172_v39 = vsel %vm67_vm2, %v942_v30, %v168_v34 }
   0x7   :  { %v936_v8 = vld [vmem:[%s2094_s0 + $0xc1] sm:$0x40]   ;;  %v918_v19 = vld [vmem:[%s2094_s0 + $0x9e] sm:$0x20]   ;;  %v145_v21 = vsel %vm75_vm4, %v935_v6, %v141_v16  ;;  %v72_v27 = vsel %vm71_vm3, %v917_v15, %v68_v22  ;;  %v944_v35 = vld [vmem:[%s2094_s0 + $0xb2] sm:$0x20]   ;;  %v176_v44 = vsel %vm71_vm3, %v943_v31, %v172_v39 }
   0x8   :  { %v937_v17 = vld [vmem:[%s2094_s0 + $0xe0] sm:$0x80]   ;;  %v919_v20 = vld [vmem:[%s2094_s0 + $0xbd] sm:$0x40]   ;;  %v149_v26 = vsel %vm79_vm5, %v936_v8, %v145_v21  ;;  %v76_v33 = vsel %vm75_vm4, %v918_v19, %v72_v27  ;;  %v945_v36 = vld [vmem:[%s2094_s0 + $0xd1] sm:$0x40]   ;;  %v180_v49 = vsel %vm75_vm4, %v944_v35, %v176_v44 }
   0x9   :  { %v920_v28 = vld [vmem:[%s2094_s0 + $0xdc] sm:$0x80]   ;;  %v153_v32 = vsel %vm83_vm6, %v937_v17, %v149_v26  ;;  %v921_v37 = vld [vmem:[%s2094_s0 + $0x13] sm:$0x1]   ;;  %v80_v38 = vsel %vm79_vm5, %v919_v20, %v76_v33  ;;  %v946_v45 = vld [vmem:[%s2094_s0 + $0xf0] sm:$0x80]   ;;  %v184_v54 = vsel %vm79_vm5, %v945_v36, %v180_v49 }
   0xa   :  { %154 = vrot.lane.b32.xlu1 %v153_v32, %s1129_s25  ;;  %v922_v40 = vld [vmem:[%s2094_s0 + $0x32] sm:$0x2]   ;;  %v84_v43 = vsel %vm83_vm6, %v920_v28, %v80_v38  ;;  %v957_v52 = vld [vmem:[%s2094_s0 + $0x1b] sm:$0x1]   ;;  %v188_v60 = vsel %vm83_vm6, %v946_v45, %v184_v54  ;;  %v948_v4 = vld [vmem:[%s2094_s0 + $0xb] sm:$0x1]  }
   0xb   :  { %v923_v41 = vld [vmem:[%s2094_s0 + $0x51] sm:$0x4]   ;;  %v94_v46 = vsel %vm59_vm0, %v922_v40, %v921_v37  ;;  %85 = vrot.lane.b32.xlu0 %v84_v43, %s1129_s25  ;;  %v958_v53 = vld [vmem:[%s2094_s0 + $0x3a] sm:$0x2]   ;;  %v949_v5 = vld [vmem:[%s2094_s0 + $0x2a] sm:$0x2]  }
   0xc   :  { %v924_v42 = vld [vmem:[%s2094_s0 + $0x70] sm:$0x8]   ;;  %v98_v50 = vsel %vm63_vm1, %v923_v41, %v94_v46  ;;  %v234_v56 = vsel %vm59_vm0, %v958_v53, %v957_v52  ;;  %v959_v57 = vld [vmem:[%s2094_s0 + $0x59] sm:$0x4]   ;;  %v950_v6 = vld [vmem:[%s2094_s0 + $0x49] sm:$0x4]   ;;  %v199_v10 = vsel %vm59_vm0, %v949_v5, %v948_v4 }
   0xd   :  { %v925_v47 = vld [vmem:[%s2094_s0 + $0x8f] sm:$0x10]   ;;  %v102_v55 = vsel %vm67_vm2, %v924_v42, %v98_v50  ;;  %v960_v58 = vld [vmem:[%s2094_s0 + $0x78] sm:$0x8]   ;;  %v238_v63 = vsel %vm63_vm1, %v959_v57, %v234_v56  ;;  %v951_v11 = vld [vmem:[%s2094_s0 + $0x68] sm:$0x8]   ;;  %v203_v15 = vsel %vm63_vm1, %v950_v6, %v199_v10 }
   0xe   :  { %v926_v48 = vld [vmem:[%s2094_s0 + $0xae] sm:$0x20]   ;;  %v961_v59 = vld [vmem:[%s2094_s0 + $0x97] sm:$0x10]   ;;  %v106_v61 = vsel %vm71_vm3, %v925_v47, %v102_v55  ;;  %189 = vrot.lane.b32.xlu1 %v188_v60, %s1129_s25  ;;  %v242_v3 = vsel %vm67_vm2, %v960_v58, %v238_v63  ;;  %v952_v12 = vld [vmem:[%s2094_s0 + $0x87] sm:$0x10]   ;;  %v207_v20 = vsel %vm67_vm2, %v951_v11, %v203_v15 }
   0xf   :  { %v927_v51 = vld [vmem:[%s2094_s0 + $0xcd] sm:$0x40]   ;;  %v962_v0 = vld [vmem:[%s2094_s0 + $0xb6] sm:$0x20]   ;;  %v110_v2 = vsel %vm75_vm4, %v926_v48, %v106_v61  ;;  %v246_v8 = vsel %vm71_vm3, %v961_v59, %v242_v3  ;;  %v953_v16 = vld [vmem:[%s2094_s0 + $0xa6] sm:$0x20]   ;;  %v211_v25 = vsel %vm71_vm3, %v952_v12, %v207_v20 }
  0x10   :  { %v928_v62 = vld [vmem:[%s2094_s0 + $0xec] sm:$0x80]   ;;  %v963_v1 = vld [vmem:[%s2094_s0 + $0xd5] sm:$0x40]   ;;  %v114_v7 = vsel %vm79_vm5, %v927_v51, %v110_v2  ;;  %v250_v14 = vsel %vm75_vm4, %v962_v0, %v246_v8  ;;  %v954_v17 = vld [vmem:[%s2094_s0 + $0xc5] sm:$0x40]   ;;  %v215_v30 = vsel %vm75_vm4, %v953_v16, %v211_v25 }
  0x11   :  { %v964_v9 = vld [vmem:[%s2094_s0 + $0xf4] sm:$0x80]   ;;  %v118_v13 = vsel %vm83_vm6, %v928_v62, %v114_v7  ;;  %v975_v18 = vld [vmem:[%s2094_s0 + $0x1f] sm:$0x1]   ;;  %v254_v19 = vsel %vm79_vm5, %v963_v1, %v250_v14  ;;  %v955_v26 = vld [vmem:[%s2094_s0 + $0xe4] sm:$0x80]   ;;  %v219_v35 = vsel %vm79_vm5, %v954_v17, %v215_v30 }
  0x12   :  { %119 = vrot.lane.b32.xlu0 %v118_v13, %s1129_s25  ;;  %v976_v21 = vld [vmem:[%s2094_s0 + $0x3e] sm:$0x2]   ;;  %v258_v24 = vsel %vm83_vm6, %v964_v9, %v254_v19  ;;  %v966_v33 = vld [vmem:[%s2094_s0 + $0xf] sm:$0x1]   ;;  %v223_v41 = vsel %vm83_vm6, %v955_v26, %v219_v35  ;;  %v992_v49 = vld [vmem:[%s2094_s0 + $0x12] sm:$0x1]  }
  0x13   :  { %v977_v22 = vld [vmem:[%s2094_s0 + $0x5d] sm:$0x4]   ;;  %v304_v27 = vsel %vm59_vm0, %v976_v21, %v975_v18  ;;  %259 = vrot.lane.b32.xlu1 %v258_v24, %s1129_s25  ;;  %v967_v34 = vld [vmem:[%s2094_s0 + $0x2e] sm:$0x2]   ;;  %v993_v50 = vld [vmem:[%s2094_s0 + $0x31] sm:$0x2]  }
  0x14   :  { %v978_v23 = vld [vmem:[%s2094_s0 + $0x7c] sm:$0x8]   ;;  %v308_v31 = vsel %vm63_vm1, %v977_v22, %v304_v27  ;;  %v269_v37 = vsel %vm59_vm0, %v967_v34, %v966_v33  ;;  %v968_v38 = vld [vmem:[%s2094_s0 + $0x4d] sm:$0x4]   ;;  %v994_v51 = vld [vmem:[%s2094_s0 + $0x50] sm:$0x4]   ;;  %v373_v55 = vsel %vm59_vm0, %v993_v50, %v992_v49 }
  0x15   :  { %v979_v28 = vld [vmem:[%s2094_s0 + $0x9b] sm:$0x10]   ;;  %v312_v36 = vsel %vm67_vm2, %v978_v23, %v308_v31  ;;  %v969_v39 = vld [vmem:[%s2094_s0 + $0x6c] sm:$0x8]   ;;  %v273_v44 = vsel %vm63_vm1, %v968_v38, %v269_v37  ;;  %v995_v56 = vld [vmem:[%s2094_s0 + $0x6f] sm:$0x8]   ;;  %v377_v60 = vsel %vm63_vm1, %v994_v51, %v373_v55 }
  0x16   :  { %v980_v29 = vld [vmem:[%s2094_s0 + $0xba] sm:$0x20]   ;;  %v970_v40 = vld [vmem:[%s2094_s0 + $0x8b] sm:$0x10]   ;;  %v316_v42 = vsel %vm71_vm3, %v979_v28, %v312_v36  ;;  %224 = vrot.lane.b32.xlu0 %v223_v41, %s1129_s25  ;;  %v277_v48 = vsel %vm67_vm2, %v969_v39, %v273_v44  ;;  %v996_v57 = vld [vmem:[%s2094_s0 + $0x8e] sm:$0x10]   ;;  %v381_v1 = vsel %vm67_vm2, %v995_v56, %v377_v60 }
  0x17   :  { %v981_v32 = vld [vmem:[%s2094_s0 + $0xd9] sm:$0x40]   ;;  %v971_v45 = vld [vmem:[%s2094_s0 + $0xaa] sm:$0x20]   ;;  %v320_v47 = vsel %vm75_vm4, %v980_v29, %v316_v42  ;;  %v281_v53 = vsel %vm71_vm3, %v970_v40, %v277_v48  ;;  %v997_v61 = vld [vmem:[%s2094_s0 + $0xad] sm:$0x20]   ;;  %v385_v6 = vsel %vm71_vm3, %v996_v57, %v381_v1 }
  0x18   :  { %v982_v43 = vld [vmem:[%s2094_s0 + $0xf8] sm:$0x80]   ;;  %v972_v46 = vld [vmem:[%s2094_s0 + $0xc9] sm:$0x40]   ;;  %v324_v52 = vsel %vm79_vm5, %v981_v32, %v320_v47  ;;  %v285_v59 = vsel %vm75_vm4, %v971_v45, %v281_v53  ;;  %v998_v62 = vld [vmem:[%s2094_s0 + $0xcc] sm:$0x40]   ;;  %v389_v11 = vsel %vm75_vm4, %v997_v61, %v385_v6 }
  0x19   :  { %v973_v54 = vld [vmem:[%s2094_s0 + $0xe8] sm:$0x80]   ;;  %v328_v58 = vsel %vm83_vm6, %v982_v43, %v324_v52  ;;  %v984_v63 = vld [vmem:[%s2094_s0 + $0x2] sm:$0x1]   ;;  %v289_v0 = vsel %vm79_vm5, %v972_v46, %v285_v59  ;;  %v999_v7 = vld [vmem:[%s2094_s0 + $0xeb] sm:$0x80]   ;;  %v393_v16 = vsel %vm79_vm5, %v998_v62, %v389_v11 }
  0x1a   :  { %329 = vrot.lane.b32.xlu1 %v328_v58, %s1129_s25  ;;  %v985_v2 = vld [vmem:[%s2094_s0 + $0x21] sm:$0x2]   ;;  %v293_v5 = vsel %vm83_vm6, %v973_v54, %v289_v0  ;;  %v1010_v14 = vld [vmem:[%s2094_s0 + $0x16] sm:$0x1]   ;;  %v397_v22 = vsel %vm83_vm6, %v999_v7, %v393_v16  ;;  %v1001_v30 = vld [vmem:[%s2094_s0 + $0x6] sm:$0x1]  }
  0x1b   :  { %v986_v3 = vld [vmem:[%s2094_s0 + $0x40] sm:$0x4]   ;;  %v339_v8 = vsel %vm59_vm0, %v985_v2, %v984_v63  ;;  %294 = vrot.lane.b32.xlu0 %v293_v5, %s1129_s25  ;;  %v1011_v15 = vld [vmem:[%s2094_s0 + $0x35] sm:$0x2]   ;;  %v1002_v31 = vld [vmem:[%s2094_s0 + $0x25] sm:$0x2]  }
  0x1c   :  { %v987_v4 = vld [vmem:[%s2094_s0 + $0x5f] sm:$0x8]   ;;  %v343_v12 = vsel %vm63_vm1, %v986_v3, %v339_v8  ;;  %v443_v18 = vsel %vm59_vm0, %v1011_v15, %v1010_v14  ;;  %v1012_v19 = vld [vmem:[%s2094_s0 + $0x54] sm:$0x4]   ;;  %v1003_v32 = vld [vmem:[%s2094_s0 + $0x44] sm:$0x4]   ;;  %v408_v36 = vsel %vm59_vm0, %v1002_v31, %v1001_v30 }
  0x1d   :  { %v988_v9 = vld [vmem:[%s2094_s0 + $0x7e] sm:$0x10]   ;;  %v347_v17 = vsel %vm67_vm2, %v987_v4, %v343_v12  ;;  %v1013_v20 = vld [vmem:[%s2094_s0 + $0x73] sm:$0x8]   ;;  %v447_v25 = vsel %vm63_vm1, %v1012_v19, %v443_v18  ;;  %v1004_v37 = vld [vmem:[%s2094_s0 + $0x63] sm:$0x8]   ;;  %v412_v41 = vsel %vm63_vm1, %v1003_v32, %v408_v36 }
  0x1e   :  { %v989_v10 = vld [vmem:[%s2094_s0 + $0x9d] sm:$0x20]   ;;  %v1014_v21 = vld [vmem:[%s2094_s0 + $0x92] sm:$0x10]   ;;  %v351_v23 = vsel %vm71_vm3, %v988_v9, %v347_v17  ;;  %398 = vrot.lane.b32.xlu1 %v397_v22, %s1130_s10  ;;  %v451_v29 = vsel %vm67_vm2, %v1013_v20, %v447_v25  ;;  %v1005_v38 = vld [vmem:[%s2094_s0 + $0x82] sm:$0x10]   ;;  %v416_v46 = vsel %vm67_vm2, %v1004_v37, %v412_v41 }
  0x1f   :  { %v990_v13 = vld [vmem:[%s2094_s0 + $0xbc] sm:$0x40]   ;;  %v1015_v26 = vld [vmem:[%s2094_s0 + $0xb1] sm:$0x20]   ;;  %v355_v28 = vsel %vm75_vm4, %v989_v10, %v351_v23  ;;  %v455_v34 = vsel %vm71_vm3, %v1014_v21, %v451_v29  ;;  %v1006_v42 = vld [vmem:[%s2094_s0 + $0xa1] sm:$0x20]   ;;  %v420_v51 = vsel %vm71_vm3, %v1005_v38, %v416_v46 }
  0x20   :  { %v991_v24 = vld [vmem:[%s2094_s0 + $0xdb] sm:$0x80]   ;;  %v1016_v27 = vld [vmem:[%s2094_s0 + $0xd0] sm:$0x40]   ;;  %v359_v33 = vsel %vm79_vm5, %v990_v13, %v355_v28  ;;  %v459_v40 = vsel %vm75_vm4, %v1015_v26, %v455_v34  ;;  %v1007_v43 = vld [vmem:[%s2094_s0 + $0xc0] sm:$0x40]   ;;  %v424_v56 = vsel %vm75_vm4, %v1006_v42, %v420_v51 }
  0x21   :  { %v1017_v35 = vld [vmem:[%s2094_s0 + $0xef] sm:$0x80]   ;;  %v363_v39 = vsel %vm83_vm6, %v991_v24, %v359_v33  ;;  %v1028_v44 = vld [vmem:[%s2094_s0 + $0x1a] sm:$0x1]   ;;  %v463_v45 = vsel %vm79_vm5, %v1016_v27, %v459_v40  ;;  %v1008_v52 = vld [vmem:[%s2094_s0 + $0xdf] sm:$0x80]   ;;  %v428_v61 = vsel %vm79_vm5, %v1007_v43, %v424_v56 }
  0x22   :  { %364 = vrot.lane.b32.xlu0 %v363_v39, %s1130_s10  ;;  %v1029_v47 = vld [vmem:[%s2094_s0 + $0x39] sm:$0x2]   ;;  %v467_v50 = vsel %vm83_vm6, %v1017_v35, %v463_v45  ;;  %v1019_v59 = vld [vmem:[%s2094_s0 + $0xa] sm:$0x1]   ;;  %v432_v3 = vsel %vm83_vm6, %v1008_v52, %v428_v61  ;;  %v1046_v11 = vld [vmem:[%s2094_s0 + $0x1e] sm:$0x1]  }
  0x23   :  { %v1030_v48 = vld [vmem:[%s2094_s0 + $0x58] sm:$0x4]   ;;  %v513_v53 = vsel %vm59_vm0, %v1029_v47, %v1028_v44  ;;  %468 = vrot.lane.b32.xlu1 %v467_v50, %s1130_s10  ;;  %v1020_v60 = vld [vmem:[%s2094_s0 + $0x29] sm:$0x2]   ;;  %v1047_v12 = vld [vmem:[%s2094_s0 + $0x3d] sm:$0x2]  }
  0x24   :  { %v1031_v49 = vld [vmem:[%s2094_s0 + $0x77] sm:$0x8]   ;;  %v517_v57 = vsel %vm63_vm1, %v1030_v48, %v513_v53  ;;  %v478_v63 = vsel %vm59_vm0, %v1020_v60, %v1019_v59  ;;  %v1021_v0 = vld [vmem:[%s2094_s0 + $0x48] sm:$0x4]   ;;  %v1048_v13 = vld [vmem:[%s2094_s0 + $0x5c] sm:$0x4]   ;;  %v583_v17 = vsel %vm59_vm0, %v1047_v12, %v1046_v11 }
  0x25   :  { %v1032_v54 = vld [vmem:[%s2094_s0 + $0x96] sm:$0x10]   ;;  %v521_v62 = vsel %vm67_vm2, %v1031_v49, %v517_v57  ;;  %v1022_v1 = vld [vmem:[%s2094_s0 + $0x67] sm:$0x8]   ;;  %v482_v6 = vsel %vm63_vm1, %v1021_v0, %v478_v63  ;;  %v1049_v18 = vld [vmem:[%s2094_s0 + $0x7b] sm:$0x8]   ;;  %v587_v22 = vsel %vm63_vm1, %v1048_v13, %v583_v17 }
  0x26   :  { %v1033_v55 = vld [vmem:[%s2094_s0 + $0xb5] sm:$0x20]   ;;  %v1023_v2 = vld [vmem:[%s2094_s0 + $0x86] sm:$0x10]   ;;  %v525_v4 = vsel %vm71_vm3, %v1032_v54, %v521_v62  ;;  %433 = vrot.lane.b32.xlu0 %v432_v3, %s1130_s10  ;;  %v486_v10 = vsel %vm67_vm2, %v1022_v1, %v482_v6  ;;  %v1050_v19 = vld [vmem:[%s2094_s0 + $0x9a] sm:$0x10]   ;;  %v591_v27 = vsel %vm67_vm2, %v1049_v18, %v587_v22 }
  0x27   :  { %v1034_v58 = vld [vmem:[%s2094_s0 + $0xd4] sm:$0x40]   ;;  %v1024_v7 = vld [vmem:[%s2094_s0 + $0xa5] sm:$0x20]   ;;  %v529_v9 = vsel %vm75_vm4, %v1033_v55, %v525_v4  ;;  %v490_v15 = vsel %vm71_vm3, %v1023_v2, %v486_v10  ;;  %v1051_v23 = vld [vmem:[%s2094_s0 + $0xb9] sm:$0x20]   ;;  %v595_v32 = vsel %vm71_vm3, %v1050_v19, %v591_v27 }
  0x28   :  { %v1035_v5 = vld [vmem:[%s2094_s0 + $0xf3] sm:$0x80]   ;;  %v1025_v8 = vld [vmem:[%s2094_s0 + $0xc4] sm:$0x40]   ;;  %v533_v14 = vsel %vm79_vm5, %v1034_v58, %v529_v9  ;;  %v494_v21 = vsel %vm75_vm4, %v1024_v7, %v490_v15  ;;  %v1052_v24 = vld [vmem:[%s2094_s0 + $0xd8] sm:$0x40]   ;;  %v599_v37 = vsel %vm75_vm4, %v1051_v23, %v595_v32 }
  0x29   :  { %v1026_v16 = vld [vmem:[%s2094_s0 + $0xe3] sm:$0x80]   ;;  %v537_v20 = vsel %vm83_vm6, %v1035_v5, %v533_v14  ;;  %v1037_v25 = vld [vmem:[%s2094_s0 + $0xe] sm:$0x1]   ;;  %v498_v26 = vsel %vm79_vm5, %v1025_v8, %v494_v21  ;;  %v1053_v33 = vld [vmem:[%s2094_s0 + $0xf7] sm:$0x80]   ;;  %v603_v42 = vsel %vm79_vm5, %v1052_v24, %v599_v37 }
  0x2a   :  { %538 = vrot.lane.b32.xlu1 %v537_v20, %s1130_s10  ;;  %v1038_v28 = vld [vmem:[%s2094_s0 + $0x2d] sm:$0x2]   ;;  %v502_v31 = vsel %vm83_vm6, %v1026_v16, %v498_v26  ;;  %v1063_v40 = vld [vmem:[%s2094_s0 + $0x11] sm:$0x1]   ;;  %v607_v48 = vsel %vm83_vm6, %v1053_v33, %v603_v42  ;;  %v1055_v56 = vld [vmem:[%s2094_s0 + $0x1] sm:$0x1]  }
  0x2b   :  { %v1039_v29 = vld [vmem:[%s2094_s0 + $0x4c] sm:$0x4]   ;;  %v548_v34 = vsel %vm59_vm0, %v1038_v28, %v1037_v25  ;;  %503 = vrot.lane.b32.xlu0 %v502_v31, %s1130_s10  ;;  %v1064_v41 = vld [vmem:[%s2094_s0 + $0x30] sm:$0x2]   ;;  %v1056_v57 = vld [vmem:[%s2094_s0 + $0x20] sm:$0x2]  }
  0x2c   :  { %v1040_v30 = vld [vmem:[%s2094_s0 + $0x6b] sm:$0x8]   ;;  %v552_v38 = vsel %vm63_vm1, %v1039_v29, %v548_v34  ;;  %v652_v44 = vsel %vm59_vm0, %v1064_v41, %v1063_v40  ;;  %v1065_v45 = vld [vmem:[%s2094_s0 + $0x4f] sm:$0x4]   ;;  %v1057_v58 = vld [vmem:[%s2094_s0 + $0x3f] sm:$0x4]   ;;  %v618_v62 = vsel %vm59_vm0, %v1056_v57, %v1055_v56 }
  0x2d   :  { %v1041_v35 = vld [vmem:[%s2094_s0 + $0x8a] sm:$0x10]   ;;  %v556_v43 = vsel %vm67_vm2, %v1040_v30, %v552_v38  ;;  %v1066_v46 = vld [vmem:[%s2094_s0 + $0x6e] sm:$0x8]   ;;  %v656_v51 = vsel %vm63_vm1, %v1065_v45, %v652_v44  ;;  %v1058_v63 = vld [vmem:[%s2094_s0 + $0x5e] sm:$0x8]   ;;  %v622_v3 = vsel %vm63_vm1, %v1057_v58, %v618_v62 }
  0x2e   :  { %v1042_v36 = vld [vmem:[%s2094_s0 + $0xa9] sm:$0x20]   ;;  %v1067_v47 = vld [vmem:[%s2094_s0 + $0x8d] sm:$0x10]   ;;  %v560_v49 = vsel %vm71_vm3, %v1041_v35, %v556_v43  ;;  %608 = vrot.lane.b32.xlu1 %v607_v48, %s1130_s10  ;;  %v660_v55 = vsel %vm67_vm2, %v1066_v46, %v656_v51  ;;  %v1059_v0 = vld [vmem:[%s2094_s0 + $0x7d] sm:$0x10]   ;;  %v626_v8 = vsel %vm67_vm2, %v1058_v63, %v622_v3 }
  0x2f   :  { %v1043_v39 = vld [vmem:[%s2094_s0 + $0xc8] sm:$0x40]   ;;  %v1068_v52 = vld [vmem:[%s2094_s0 + $0xac] sm:$0x20]   ;;  %v564_v54 = vsel %vm75_vm4, %v1042_v36, %v560_v49  ;;  %v664_v60 = vsel %vm71_vm3, %v1067_v47, %v660_v55  ;;  %v1060_v4 = vld [vmem:[%s2094_s0 + $0x9c] sm:$0x20]   ;;  %v630_v13 = vsel %vm71_vm3, %v1059_v0, %v626_v8 }
  0x30   :  { %v1044_v50 = vld [vmem:[%s2094_s0 + $0xe7] sm:$0x80]   ;;  %v1069_v53 = vld [vmem:[%s2094_s0 + $0xcb] sm:$0x40]   ;;  %v568_v59 = vsel %vm79_vm5, %v1043_v39, %v564_v54  ;;  %v668_v2 = vsel %vm75_vm4, %v1068_v52, %v664_v60  ;;  %v1061_v5 = vld [vmem:[%s2094_s0 + $0xbb] sm:$0x40]   ;;  %v634_v18 = vsel %vm75_vm4, %v1060_v4, %v630_v13 }
  0x31   :  { %v1070_v61 = vld [vmem:[%s2094_s0 + $0xea] sm:$0x80]   ;;  %v572_v1 = vsel %vm83_vm6, %v1044_v50, %v568_v59  ;;  %v1081_v6 = vld [vmem:[%s2094_s0 + $0x15] sm:$0x1]   ;;  %v672_v7 = vsel %vm79_vm5, %v1069_v53, %v668_v2  ;;  %v1062_v14 = vld [vmem:[%s2094_s0 + $0xda] sm:$0x80]   ;;  %v638_v23 = vsel %vm79_vm5, %v1061_v5, %v634_v18 }
  0x32   :  { %573 = vrot.lane.b32.xlu0 %v572_v1, %s1130_s10  ;;  %v1082_v9 = vld [vmem:[%s2094_s0 + $0x34] sm:$0x2]   ;;  %v676_v12 = vsel %vm83_vm6, %v1070_v61, %v672_v7  ;;  %v1072_v21 = vld [vmem:[%s2094_s0 + $0x5] sm:$0x1]   ;;  %v642_v29 = vsel %vm83_vm6, %v1062_v14, %v638_v23  ;;  %v1099_v37 = vld [vmem:[%s2094_s0 + $0x19] sm:$0x1]  }
  0x33   :  { %v1083_v10 = vld [vmem:[%s2094_s0 + $0x53] sm:$0x4]   ;;  %v722_v15 = vsel %vm59_vm0, %v1082_v9, %v1081_v6  ;;  %677 = vrot.lane.b32.xlu1 %v676_v12, %s1131_s23  ;;  %v1073_v22 = vld [vmem:[%s2094_s0 + $0x24] sm:$0x2]   ;;  %v1100_v38 = vld [vmem:[%s2094_s0 + $0x38] sm:$0x2]  }
  0x34   :  { %v1084_v11 = vld [vmem:[%s2094_s0 + $0x72] sm:$0x8]   ;;  %v726_v19 = vsel %vm63_vm1, %v1083_v10, %v722_v15  ;;  %v687_v25 = vsel %vm59_vm0, %v1073_v22, %v1072_v21  ;;  %v1074_v26 = vld [vmem:[%s2094_s0 + $0x43] sm:$0x4]   ;;  %v1101_v39 = vld [vmem:[%s2094_s0 + $0x57] sm:$0x4]   ;;  %v792_v43 = vsel %vm59_vm0, %v1100_v38, %v1099_v37 }
  0x35   :  { %v1085_v16 = vld [vmem:[%s2094_s0 + $0x91] sm:$0x10]   ;;  %v730_v24 = vsel %vm67_vm2, %v1084_v11, %v726_v19  ;;  %v1075_v27 = vld [vmem:[%s2094_s0 + $0x62] sm:$0x8]   ;;  %v691_v32 = vsel %vm63_vm1, %v1074_v26, %v687_v25  ;;  %v1102_v44 = vld [vmem:[%s2094_s0 + $0x76] sm:$0x8]   ;;  %v796_v48 = vsel %vm63_vm1, %v1101_v39, %v792_v43 }
  0x36   :  { %v1086_v17 = vld [vmem:[%s2094_s0 + $0xb0] sm:$0x20]   ;;  %v1076_v28 = vld [vmem:[%s2094_s0 + $0x81] sm:$0x10]   ;;  %v734_v30 = vsel %vm71_vm3, %v1085_v16, %v730_v24  ;;  %643 = vrot.lane.b32.xlu0 %v642_v29, %s1131_s23  ;;  %v695_v36 = vsel %vm67_vm2, %v1075_v27, %v691_v32  ;;  %v1103_v45 = vld [vmem:[%s2094_s0 + $0x95] sm:$0x10]   ;;  %v800_v53 = vsel %vm67_vm2, %v1102_v44, %v796_v48 }
  0x37   :  { %v1087_v20 = vld [vmem:[%s2094_s0 + $0xcf] sm:$0x40]   ;;  %v1077_v33 = vld [vmem:[%s2094_s0 + $0xa0] sm:$0x20]   ;;  %v738_v35 = vsel %vm75_vm4, %v1086_v17, %v734_v30  ;;  %v699_v41 = vsel %vm71_vm3, %v1076_v28, %v695_v36  ;;  %v1104_v49 = vld [vmem:[%s2094_s0 + $0xb4] sm:$0x20]   ;;  %v804_v58 = vsel %vm71_vm3, %v1103_v45, %v800_v53 }
  0x38   :  { %v1088_v31 = vld [vmem:[%s2094_s0 + $0xee] sm:$0x80]   ;;  %v1078_v34 = vld [vmem:[%s2094_s0 + $0xbf] sm:$0x40]   ;;  %v742_v40 = vsel %vm79_vm5, %v1087_v20, %v738_v35  ;;  %v703_v47 = vsel %vm75_vm4, %v1077_v33, %v699_v41  ;;  %v1105_v50 = vld [vmem:[%s2094_s0 + $0xd3] sm:$0x40]   ;;  %v808_v63 = vsel %vm75_vm4, %v1104_v49, %v804_v58 }
  0x39   :  { %v1079_v42 = vld [vmem:[%s2094_s0 + $0xde] sm:$0x80]   ;;  %v746_v46 = vsel %vm83_vm6, %v1088_v31, %v742_v40  ;;  %v1090_v51 = vld [vmem:[%s2094_s0 + $0x9] sm:$0x1]   ;;  %v707_v52 = vsel %vm79_vm5, %v1078_v34, %v703_v47  ;;  %v1106_v59 = vld [vmem:[%s2094_s0 + $0xf2] sm:$0x80]   ;;  %v812_v4 = vsel %vm79_vm5, %v1105_v50, %v808_v63 }
  0x3a   :  { %747 = vrot.lane.b32.xlu1 %v746_v46, %s1131_s23  ;;  %v1091_v54 = vld [vmem:[%s2094_s0 + $0x28] sm:$0x2]   ;;  %v711_v57 = vsel %vm83_vm6, %v1079_v42, %v707_v52  ;;  %v1117_v2 = vld [vmem:[%s2094_s0 + $0x1d] sm:$0x1]   ;;  %v816_v10 = vsel %vm83_vm6, %v1106_v59, %v812_v4  ;;  %v1108_v18 = vld [vmem:[%s2094_s0 + $0xd] sm:$0x1]  }
  0x3b   :  { %v1092_v55 = vld [vmem:[%s2094_s0 + $0x47] sm:$0x4]   ;;  %v757_v60 = vsel %vm59_vm0, %v1091_v54, %v1090_v51  ;;  %712 = vrot.lane.b32.xlu0 %v711_v57, %s1131_s23  ;;  %v1118_v3 = vld [vmem:[%s2094_s0 + $0x3c] sm:$0x2]   ;;  %v1109_v19 = vld [vmem:[%s2094_s0 + $0x2c] sm:$0x2]  }
  0x3c   :  { %v1093_v56 = vld [vmem:[%s2094_s0 + $0x66] sm:$0x8]   ;;  %v761_v0 = vsel %vm63_vm1, %v1092_v55, %v757_v60  ;;  %v862_v6 = vsel %vm59_vm0, %v1118_v3, %v1117_v2  ;;  %v1119_v7 = vld [vmem:[%s2094_s0 + $0x5b] sm:$0x4]   ;;  %v1110_v20 = vld [vmem:[%s2094_s0 + $0x4b] sm:$0x4]   ;;  %v827_v24 = vsel %vm59_vm0, %v1109_v19, %v1108_v18 }
  0x3d   :  { %v1094_v61 = vld [vmem:[%s2094_s0 + $0x85] sm:$0x10]   ;;  %v765_v5 = vsel %vm67_vm2, %v1093_v56, %v761_v0  ;;  %v1120_v8 = vld [vmem:[%s2094_s0 + $0x7a] sm:$0x8]   ;;  %v866_v13 = vsel %vm63_vm1, %v1119_v7, %v862_v6  ;;  %v1111_v25 = vld [vmem:[%s2094_s0 + $0x6a] sm:$0x8]   ;;  %v831_v29 = vsel %vm63_vm1, %v1110_v20, %v827_v24 }
  0x3e   :  { %v1095_v62 = vld [vmem:[%s2094_s0 + $0xa4] sm:$0x20]   ;;  %v1121_v9 = vld [vmem:[%s2094_s0 + $0x99] sm:$0x10]   ;;  %v769_v11 = vsel %vm71_vm3, %v1094_v61, %v765_v5  ;;  %817 = vrot.lane.b32.xlu1 %v816_v10, %s1131_s23  ;;  %v870_v17 = vsel %vm67_vm2, %v1120_v8, %v866_v13  ;;  %v1112_v26 = vld [vmem:[%s2094_s0 + $0x89] sm:$0x10]   ;;  %v835_v33 = vsel %vm67_vm2, %v1111_v25, %v831_v29 }
  0x3f   :  { %v1096_v1 = vld [vmem:[%s2094_s0 + $0xc3] sm:$0x40]   ;;  %v1122_v14 = vld [vmem:[%s2094_s0 + $0xb8] sm:$0x20]   ;;  %v773_v16 = vsel %vm75_vm4, %v1095_v62, %v769_v11  ;;  %v874_v22 = vsel %vm71_vm3, %v1121_v9, %v870_v17  ;;  %v1113_v30 = vld [vmem:[%s2094_s0 + $0xa8] sm:$0x20]   ;;  %v839_v38 = vsel %vm71_vm3, %v1112_v26, %v835_v33 }
  0x40   :  { %v1097_v12 = vld [vmem:[%s2094_s0 + $0xe2] sm:$0x80]   ;;  %v1123_v15 = vld [vmem:[%s2094_s0 + $0xd7] sm:$0x40]   ;;  %v777_v21 = vsel %vm79_vm5, %v1096_v1, %v773_v16  ;;  %v878_v28 = vsel %vm75_vm4, %v1122_v14, %v874_v22  ;;  %v1114_v31 = vld [vmem:[%s2094_s0 + $0xc7] sm:$0x40]   ;;  %v843_v42 = vsel %vm75_vm4, %v1113_v30, %v839_v38 }
  0x41   :  { %v1124_v23 = vld [vmem:[%s2094_s0 + $0xf6] sm:$0x80]   ;;  %v781_v27 = vsel %vm83_vm6, %v1097_v12, %v777_v21  ;;  %vm3_vm7 = vcmask 261120   ;;  %v882_v32 = vsel %vm79_vm5, %v1123_v15, %v878_v28  ;;  %v1115_v34 = vld [vmem:[%s2094_s0 + $0xe6] sm:$0x80]   ;;  %v847_v46 = vsel %vm79_vm5, %v1114_v31, %v843_v42 }
  0x42   :  { %782 = vrot.lane.b32.xlu0 %v781_v27, %s1131_s23  ;;  %v2_v35 = vld [vmem:[%s2094_s0] ss:$4 sm:$0xff]   ;;  %v886_v37 = vsel %vm83_vm6, %v1124_v23, %v882_v32  ;;  %v851_v47 = vsel %vm83_vm6, %v1115_v34, %v847_v46  ;;  %vm87_vm8 = vcmask 1048320   ;;  %vm366_vm9 = vcmask 785920  }
  0x43   :  { %v892_v36 = vld [vmem:[%s2094_s0 + $0x20] ss:$4 sm:$0xff]   ;;  %5 = vst.msk [vmem:[%s2095_s1] ss:$8 sm:$0xf0] %vm3_vm7, %v2_v35   ;;  %887 = vrot.lane.b32.xlu1 %v886_v37, %s1131_s23  ;;  %vm645_vm10 = vcmask 523520  }
  0x44   :  { %894 = vst.msk [vmem:[%s2095_s1 + $0x1] ss:$8 sm:$0xf0] %vm3_vm7, %v892_v36   ;;  %v895_v39 = vld [vmem:[%s2094_s0 + $0x40] ss:$4 sm:$0xff]  }
  0x45   :  { %v898_v40 = vld [vmem:[%s2094_s0 + $0x60] ss:$4 sm:$0xff]   ;;  %4 = vst.msk [vmem:[%s2095_s1] ss:$8 sm:$0xf] %vm3_vm7, %v2_v35  }
  0x46   :  { %v901_v41 = vld [vmem:[%s2094_s0 + $0x80] ss:$4 sm:$0xff]   ;;  %893 = vst.msk [vmem:[%s2095_s1 + $0x1] ss:$8 sm:$0xf] %vm3_vm7, %v892_v36   ;;  %852 = vrot.lane.b32.xlu0 %v851_v47, %s1131_s23 }
  0x47   :  { %897 = vst.msk [vmem:[%s2095_s1 + $0x2] ss:$8 sm:$0xf0] %vm3_vm7, %v895_v39   ;;  %900 = vst.msk [vmem:[%s2095_s1 + $0x3] ss:$8 sm:$0xf0] %vm3_vm7, %v898_v40  }
  0x48   :  { %903 = vst.msk [vmem:[%s2095_s1 + $0x4] ss:$8 sm:$0xf0] %vm3_vm7, %v901_v41   ;;  %v904_v43 = vld [vmem:[%s2094_s0 + $0xa0] ss:$4 sm:$0xff]  }
  0x49   :  { %v907_v44 = vld [vmem:[%s2094_s0 + $0xc0] ss:$4 sm:$0xff]   ;;  %896 = vst.msk [vmem:[%s2095_s1 + $0x2] ss:$8 sm:$0xf] %vm3_vm7, %v895_v39  }
  0x4a   :  { %v910_v45 = vld [vmem:[%s2094_s0 + $0xe0] ss:$4 sm:$0xff]   ;;  %899 = vst.msk [vmem:[%s2095_s1 + $0x3] ss:$8 sm:$0xf] %vm3_vm7, %v898_v40  }
  0x4b   :  { %902 = vst.msk [vmem:[%s2095_s1 + $0x4] ss:$8 sm:$0xf] %vm3_vm7, %v901_v41   ;;  %906 = vst.msk [vmem:[%s2095_s1 + $0x5] ss:$8 sm:$0xf0] %vm3_vm7, %v904_v43  }
  0x4c   :  { %909 = vst.msk [vmem:[%s2095_s1 + $0x6] ss:$8 sm:$0xf0] %vm3_vm7, %v907_v44   ;;  %912 = vst.msk [vmem:[%s2095_s1 + $0x7] ss:$8 sm:$0xf0] %vm3_vm7, %v910_v45  }
  0x4d   :  { %905 = vst.msk [vmem:[%s2095_s1 + $0x5] ss:$8 sm:$0xf] %vm3_vm7, %v904_v43   ;;  %908 = vst.msk [vmem:[%s2095_s1 + $0x6] ss:$8 sm:$0xf] %vm3_vm7, %v907_v44  }
  0x4e   :  { %911 = vst.msk [vmem:[%s2095_s1 + $0x7] ss:$8 sm:$0xf] %vm3_vm7, %v910_v45  }
  0x7c   :  { %v155_v48 = vpop.permute.xlu1 %154  }
  0x7d   :  { %938 = vst.msk [vmem:[%s2095_s1 + $0x8] sm:$0xff] %vm87_vm8, %v155_v48   ;;  %v86_v49 = vpop.permute.xlu0 %85  }
  0x7e   :  { %88 = vst.msk [vmem:[%s2095_s1] sm:$0xff] %vm87_vm8, %v86_v49  }
  0x80   :  { %v190_v50 = vpop.permute.xlu1 %189  }
  0x81   :  { %947 = vst.msk [vmem:[%s2095_s1 + $0x28] sm:$0xff] %vm87_vm8, %v190_v50  }
  0x84   :  { %v120_v51 = vpop.permute.xlu0 %119  }
  0x85   :  { %929 = vst.msk [vmem:[%s2095_s1 + $0x20] sm:$0xff] %vm87_vm8, %v120_v51   ;;  %v260_v52 = vpop.permute.xlu1 %259  }
  0x86   :  { %965 = vst.msk [vmem:[%s2095_s1 + $0x30] sm:$0xff] %vm87_vm8, %v260_v52  }
  0x88   :  { %v225_v53 = vpop.permute.xlu0 %224  }
  0x89   :  { %956 = vst.msk [vmem:[%s2095_s1 + $0x10] sm:$0xff] %vm87_vm8, %v225_v53  }
  0x8c   :  { %v330_v54 = vpop.permute.xlu1 %329  }
  0x8d   :  { %983 = vst.msk [vmem:[%s2095_s1 + $0x38] sm:$0xff] %vm87_vm8, %v330_v54   ;;  %v295_v55 = vpop.permute.xlu0 %294  }
  0x8e   :  { %974 = vst.msk [vmem:[%s2095_s1 + $0x18] sm:$0xff] %vm87_vm8, %v295_v55  }
  0x90   :  { %v399_v56 = vpop.permute.xlu1 %398  }
  0x91   :  { %1000 = vst.msk [vmem:[%s2095_s1 + $0x20] sm:$0xff] %vm366_vm9, %v399_v56  }
  0x94   :  { %v365_v57 = vpop.permute.xlu0 %364  }
  0x95   :  { %367 = vst.msk [vmem:[%s2095_s1] sm:$0xff] %vm366_vm9, %v365_v57   ;;  %v469_v58 = vpop.permute.xlu1 %468  }
  0x96   :  { %1018 = vst.msk [vmem:[%s2095_s1 + $0x28] sm:$0xff] %vm366_vm9, %v469_v58  }
  0x98   :  { %v434_v59 = vpop.permute.xlu0 %433  }
  0x99   :  { %1009 = vst.msk [vmem:[%s2095_s1 + $0x8] sm:$0xff] %vm366_vm9, %v434_v59  }
  0x9c   :  { %v539_v60 = vpop.permute.xlu1 %538  }
  0x9d   :  { %1036 = vst.msk [vmem:[%s2095_s1 + $0x30] sm:$0xff] %vm366_vm9, %v539_v60   ;;  %v504_v61 = vpop.permute.xlu0 %503  }
  0x9e   :  { %1027 = vst.msk [vmem:[%s2095_s1 + $0x10] sm:$0xff] %vm366_vm9, %v504_v61  }
  0xa0   :  { %v609_v62 = vpop.permute.xlu1 %608  }
  0xa1   :  { %1054 = vst.msk [vmem:[%s2095_s1 + $0x38] sm:$0xff] %vm366_vm9, %v609_v62  }
  0xa4   :  { %v574_v63 = vpop.permute.xlu0 %573  }
  0xa5   :  { %1045 = vst.msk [vmem:[%s2095_s1 + $0x18] sm:$0xff] %vm366_vm9, %v574_v63   ;;  %v678_v0 = vpop.permute.xlu1 %677  }
  0xa6   :  { %1071 = vst.msk [vmem:[%s2095_s1 + $0x20] sm:$0xff] %vm645_vm10, %v678_v0  }
  0xa8   :  { %v644_v1 = vpop.permute.xlu0 %643  }
  0xa9   :  { %646 = vst.msk [vmem:[%s2095_s1] sm:$0xff] %vm645_vm10, %v644_v1  }
  0xac   :  { %v748_v2 = vpop.permute.xlu1 %747  }
  0xad   :  { %1089 = vst.msk [vmem:[%s2095_s1 + $0x28] sm:$0xff] %vm645_vm10, %v748_v2   ;;  %v713_v3 = vpop.permute.xlu0 %712  }
  0xae   :  { %1080 = vst.msk [vmem:[%s2095_s1 + $0x8] sm:$0xff] %vm645_vm10, %v713_v3  }
  0xb0   :  { %v818_v4 = vpop.permute.xlu1 %817  }
  0xb1   :  { %1107 = vst.msk [vmem:[%s2095_s1 + $0x30] sm:$0xff] %vm645_vm10, %v818_v4  }
  0xb4   :  { %v783_v5 = vpop.permute.xlu0 %782  }
  0xb5   :  { %1098 = vst.msk [vmem:[%s2095_s1 + $0x10] sm:$0xff] %vm645_vm10, %v783_v5   ;;  %v888_v6 = vpop.permute.xlu1 %887  }
  0xb6   :  { %1125 = vst.msk [vmem:[%s2095_s1 + $0x38] sm:$0xff] %vm645_vm10, %v888_v6  }
  0xb8   :  { %v853_v7 = vpop.permute.xlu0 %852  }
  0xb9   :  { %1116 = vst.msk [vmem:[%s2095_s1 + $0x18] sm:$0xff] %vm645_vm10, %v853_v7  }

// kernel: squeeze.4
= control target key start
LH: loop header
LB: loop body
LE: loop exit
PB: predicated region body
PF: predicated region fallthrough
CT: control target
= control target key end

     0   :  { %2 = vsyncpa [#allocation1], 0  ;;  %s966_s6 = smov [#allocation0]   ;;  %s1344_s0 = inlined_call_operand.hbm [shape: f32[1,8,32,32], index: 0, kind: input, shape index: {}]   ;;  %s1345_s1 = inlined_call_operand.vmem [shape: f32[8,1024], index: 1, kind: output, shape index: {}]  }
   0x1   :  { %s7_s7 = sshll.u32 %s966_s6, 4  ;;  %s942_s10 = scalar_lea.hbm %s1344_s0, 4096  ;;  %s8_s7 = int_to_ptr.vmem [resolvable:$true] %s7_s7 }
   0x2   :  { %p943_p0 = scmp.ne.s32.totalorder %s1344_s0, %s942_s10  ;;  %p946_p1 = scmp.lt.u32.totalorder %s942_s10, %s1344_s0 }
   0x4   :  { %p948_p2 = pnand %p946_p1, %p943_p0 }
   0x6   :  { %951 = shalt.err (!%p948_p2)
}
   0x7   :  { %s952_s15 = scalar_lea.vmem %s8_s7, 4096  ;;  %p957_p4 = scmp.lt.s32.totalorder %s8_s7, %s8_s7 }
   0x8   :  { %p953_p3 = scmp.ne.s32.totalorder %s8_s7, %s952_s15  ;;  %p958_p5 = scmp.lt.s32.totalorder %s952_s15, %s952_s15 }
   0xa   :  { %p959_p6 = por %p958_p5, %p957_p4 }
   0xc   :  { %p960_p7 = pnand %p959_p6, %p953_p3 }
   0xe   :  { %963 = shalt.err (!%p960_p7)
}
   0xf   :  { %10 = dma.hbm_to_vmem [thread:$0]  %s1344_s0, 4096, %s8_s7, [#allocation1]  }
  0x10   :  { %964 = dma.done.wait [#allocation1], 4096  }
  0x11   :  { %965 = vsyncadd [#allocation1], 4294963200  ;;  %vm69_vm0 = vcmask 1041409   ;;  %vm73_vm1 = vcmask 1042434   ;;  %vm77_vm2 = vcmask 1043459   ;;  %vm81_vm3 = vcmask 1044484  }
  0x12   :  { %vm85_vm4 = vcmask 1045509   ;;  %vm89_vm5 = vcmask 1046534   ;;  %vm93_vm6 = vcmask 1047559   ;;  %v135_v0 = vld [vmem:[#allocation0 + $0x7] sm:$0x1]   ;;  %s967_s0 = smov 96  }
  0x13   :  { %v137_v1 = vld [vmem:[#allocation0 + $0x26] sm:$0x2]   ;;  %v66_v9 = vld [vmem:[#allocation0 + $0x3] sm:$0x1]   ;;  %v170_v22 = vld [vmem:[#allocation0 + $0x17] sm:$0x1]  }
  0x14   :  { %v141_v2 = vld [vmem:[#allocation0 + $0x45] sm:$0x4]   ;;  %v139_v3 = vsel %vm69_vm0, %v137_v1, %v135_v0  ;;  %v68_v11 = vld [vmem:[#allocation0 + $0x22] sm:$0x2]   ;;  %v172_v23 = vld [vmem:[#allocation0 + $0x36] sm:$0x2]  }
  0x15   :  { %v145_v4 = vld [vmem:[#allocation0 + $0x64] sm:$0x8]   ;;  %v143_v6 = vsel %vm73_vm1, %v141_v2, %v139_v3  ;;  %v72_v12 = vld [vmem:[#allocation0 + $0x41] sm:$0x4]   ;;  %v70_v16 = vsel %vm69_vm0, %v68_v11, %v66_v9  ;;  %v174_v26 = vsel %vm69_vm0, %v172_v23, %v170_v22  ;;  %v176_v27 = vld [vmem:[#allocation0 + $0x55] sm:$0x4]  }
  0x16   :  { %v149_v5 = vld [vmem:[#allocation0 + $0x83] sm:$0x10]   ;;  %v147_v10 = vsel %vm77_vm2, %v145_v4, %v143_v6  ;;  %v76_v13 = vld [vmem:[#allocation0 + $0x60] sm:$0x8]   ;;  %v74_v20 = vsel %vm73_vm1, %v72_v12, %v70_v16  ;;  %v180_v28 = vld [vmem:[#allocation0 + $0x74] sm:$0x8]   ;;  %v178_v33 = vsel %vm73_vm1, %v176_v27, %v174_v26 }
  0x17   :  { %v153_v7 = vld [vmem:[#allocation0 + $0xa2] sm:$0x20]   ;;  %v151_v14 = vsel %vm81_vm3, %v149_v5, %v147_v10  ;;  %v80_v17 = vld [vmem:[#allocation0 + $0x7f] sm:$0x10]   ;;  %v78_v25 = vsel %vm77_vm2, %v76_v13, %v74_v20  ;;  %v184_v29 = vld [vmem:[#allocation0 + $0x93] sm:$0x10]   ;;  %v182_v37 = vsel %vm77_vm2, %v180_v28, %v178_v33 }
  0x18   :  { %v157_v8 = vld [vmem:[#allocation0 + $0xc1] sm:$0x40]   ;;  %v84_v18 = vld [vmem:[#allocation0 + $0x9e] sm:$0x20]   ;;  %v155_v19 = vsel %vm85_vm4, %v153_v7, %v151_v14  ;;  %v82_v31 = vsel %vm81_vm3, %v80_v17, %v78_v25  ;;  %v188_v34 = vld [vmem:[#allocation0 + $0xb2] sm:$0x20]   ;;  %v186_v42 = vsel %vm81_vm3, %v184_v29, %v182_v37 }
  0x19   :  { %v161_v15 = vld [vmem:[#allocation0 + $0xe0] sm:$0x80]   ;;  %v88_v21 = vld [vmem:[#allocation0 + $0xbd] sm:$0x40]   ;;  %v159_v24 = vsel %vm89_vm5, %v157_v8, %v155_v19  ;;  %v192_v35 = vld [vmem:[#allocation0 + $0xd1] sm:$0x40]   ;;  %v86_v36 = vsel %vm85_vm4, %v84_v18, %v82_v31  ;;  %v190_v48 = vsel %vm85_vm4, %v188_v34, %v186_v42 }
  0x1a   :  { %v163_v30 = vsel %vm93_vm6, %v161_v15, %v159_v24  ;;  %v92_v32 = vld [vmem:[#allocation0 + $0xdc] sm:$0x80]   ;;  %v100_v38 = vld [vmem:[#allocation0 + $0x13] sm:$0x1]   ;;  %v90_v41 = vsel %vm89_vm5, %v88_v21, %v86_v36  ;;  %v196_v43 = vld [vmem:[#allocation0 + $0xf0] sm:$0x80]   ;;  %v194_v53 = vsel %vm89_vm5, %v192_v35, %v190_v48 }
  0x1b   :  { %164 = vrot.lane.b32.xlu1 %v163_v30, %s967_s0  ;;  %v102_v39 = vld [vmem:[#allocation0 + $0x32] sm:$0x2]   ;;  %v94_v47 = vsel %vm93_vm6, %v92_v32, %v90_v41  ;;  %v240_v52 = vld [vmem:[#allocation0 + $0x1b] sm:$0x1]   ;;  %v198_v58 = vsel %vm93_vm6, %v196_v43, %v194_v53  ;;  %v205_v3 = vld [vmem:[#allocation0 + $0xb] sm:$0x1]  }
  0x1c   :  { %v106_v40 = vld [vmem:[#allocation0 + $0x51] sm:$0x4]   ;;  %v104_v44 = vsel %vm69_vm0, %v102_v39, %v100_v38  ;;  %95 = vrot.lane.b32.xlu0 %v94_v47, %s967_s0  ;;  %v242_v55 = vld [vmem:[#allocation0 + $0x3a] sm:$0x2]   ;;  %v207_v4 = vld [vmem:[#allocation0 + $0x2a] sm:$0x2]  }
  0x1d   :  { %v110_v45 = vld [vmem:[#allocation0 + $0x70] sm:$0x8]   ;;  %v108_v49 = vsel %vm73_vm1, %v106_v40, %v104_v44  ;;  %v246_v56 = vld [vmem:[#allocation0 + $0x59] sm:$0x4]   ;;  %v244_v61 = vsel %vm69_vm0, %v242_v55, %v240_v52  ;;  %v209_v7 = vsel %vm69_vm0, %v207_v4, %v205_v3  ;;  %v211_v8 = vld [vmem:[#allocation0 + $0x49] sm:$0x4]  }
  0x1e   :  { %v114_v46 = vld [vmem:[#allocation0 + $0x8f] sm:$0x10]   ;;  %v112_v54 = vsel %vm77_vm2, %v110_v45, %v108_v49  ;;  %v250_v57 = vld [vmem:[#allocation0 + $0x78] sm:$0x8]   ;;  %v248_v1 = vsel %vm73_vm1, %v246_v56, %v244_v61  ;;  %v215_v9 = vld [vmem:[#allocation0 + $0x68] sm:$0x8]   ;;  %v213_v14 = vsel %vm73_vm1, %v211_v8, %v209_v7 }
  0x1f   :  { %v118_v50 = vld [vmem:[#allocation0 + $0xae] sm:$0x20]   ;;  %v116_v59 = vsel %vm81_vm3, %v114_v46, %v112_v54  ;;  %v254_v62 = vld [vmem:[#allocation0 + $0x97] sm:$0x10]   ;;  %199 = vrot.lane.b32.xlu1 %v198_v58, %s967_s0  ;;  %v252_v6 = vsel %vm77_vm2, %v250_v57, %v248_v1  ;;  %v219_v10 = vld [vmem:[#allocation0 + $0x87] sm:$0x10]   ;;  %v217_v18 = vsel %vm77_vm2, %v215_v9, %v213_v14 }
  0x20   :  { %v122_v51 = vld [vmem:[#allocation0 + $0xcd] sm:$0x40]   ;;  %v258_v63 = vld [vmem:[#allocation0 + $0xb6] sm:$0x20]   ;;  %v120_v0 = vsel %vm85_vm4, %v118_v50, %v116_v59  ;;  %v256_v12 = vsel %vm81_vm3, %v254_v62, %v252_v6  ;;  %v223_v15 = vld [vmem:[#allocation0 + $0xa6] sm:$0x20]   ;;  %v221_v23 = vsel %vm81_vm3, %v219_v10, %v217_v18 }
  0x21   :  { %v126_v60 = vld [vmem:[#allocation0 + $0xec] sm:$0x80]   ;;  %v262_v2 = vld [vmem:[#allocation0 + $0xd5] sm:$0x40]   ;;  %v124_v5 = vsel %vm89_vm5, %v122_v51, %v120_v0  ;;  %v227_v16 = vld [vmem:[#allocation0 + $0xc5] sm:$0x40]   ;;  %v260_v17 = vsel %vm85_vm4, %v258_v63, %v256_v12  ;;  %v225_v29 = vsel %vm85_vm4, %v223_v15, %v221_v23 }
  0x22   :  { %v128_v11 = vsel %vm93_vm6, %v126_v60, %v124_v5  ;;  %v266_v13 = vld [vmem:[#allocation0 + $0xf4] sm:$0x80]   ;;  %v310_v19 = vld [vmem:[#allocation0 + $0x1f] sm:$0x1]   ;;  %v264_v22 = vsel %vm89_vm5, %v262_v2, %v260_v17  ;;  %v231_v24 = vld [vmem:[#allocation0 + $0xe4] sm:$0x80]   ;;  %v229_v34 = vsel %vm89_vm5, %v227_v16, %v225_v29 }
  0x23   :  { %129 = vrot.lane.b32.xlu0 %v128_v11, %s967_s0  ;;  %v312_v20 = vld [vmem:[#allocation0 + $0x3e] sm:$0x2]   ;;  %v268_v28 = vsel %vm93_vm6, %v266_v13, %v264_v22  ;;  %v275_v33 = vld [vmem:[#allocation0 + $0xf] sm:$0x1]   ;;  %v233_v39 = vsel %vm93_vm6, %v231_v24, %v229_v34  ;;  %v379_v48 = vld [vmem:[#allocation0 + $0x12] sm:$0x1]  }
  0x24   :  { %v316_v21 = vld [vmem:[#allocation0 + $0x5d] sm:$0x4]   ;;  %v314_v25 = vsel %vm69_vm0, %v312_v20, %v310_v19  ;;  %269 = vrot.lane.b32.xlu1 %v268_v28, %s967_s0  ;;  %v277_v36 = vld [vmem:[#allocation0 + $0x2e] sm:$0x2]   ;;  %v381_v49 = vld [vmem:[#allocation0 + $0x31] sm:$0x2]  }
  0x25   :  { %v320_v26 = vld [vmem:[#allocation0 + $0x7c] sm:$0x8]   ;;  %v318_v30 = vsel %vm73_vm1, %v316_v21, %v314_v25  ;;  %v281_v37 = vld [vmem:[#allocation0 + $0x4d] sm:$0x4]   ;;  %v279_v42 = vsel %vm69_vm0, %v277_v36, %v275_v33  ;;  %v383_v52 = vsel %vm69_vm0, %v381_v49, %v379_v48  ;;  %v385_v53 = vld [vmem:[#allocation0 + $0x50] sm:$0x4]  }
  0x26   :  { %v324_v27 = vld [vmem:[#allocation0 + $0x9b] sm:$0x10]   ;;  %v322_v35 = vsel %vm77_vm2, %v320_v26, %v318_v30  ;;  %v285_v38 = vld [vmem:[#allocation0 + $0x6c] sm:$0x8]   ;;  %v283_v46 = vsel %vm73_vm1, %v281_v37, %v279_v42  ;;  %v389_v54 = vld [vmem:[#allocation0 + $0x6f] sm:$0x8]   ;;  %v387_v59 = vsel %vm73_vm1, %v385_v53, %v383_v52 }
  0x27   :  { %v328_v31 = vld [vmem:[#allocation0 + $0xba] sm:$0x20]   ;;  %v326_v40 = vsel %vm81_vm3, %v324_v27, %v322_v35  ;;  %v289_v43 = vld [vmem:[#allocation0 + $0x8b] sm:$0x10]   ;;  %234 = vrot.lane.b32.xlu0 %v233_v39, %s967_s0  ;;  %v287_v51 = vsel %vm77_vm2, %v285_v38, %v283_v46  ;;  %v393_v55 = vld [vmem:[#allocation0 + $0x8e] sm:$0x10]   ;;  %v391_v63 = vsel %vm77_vm2, %v389_v54, %v387_v59 }
  0x28   :  { %v332_v32 = vld [vmem:[#allocation0 + $0xd9] sm:$0x40]   ;;  %v293_v44 = vld [vmem:[#allocation0 + $0xaa] sm:$0x20]   ;;  %v330_v45 = vsel %vm85_vm4, %v328_v31, %v326_v40  ;;  %v291_v57 = vsel %vm81_vm3, %v289_v43, %v287_v51  ;;  %v397_v60 = vld [vmem:[#allocation0 + $0xad] sm:$0x20]   ;;  %v395_v4 = vsel %vm81_vm3, %v393_v55, %v391_v63 }
  0x29   :  { %v336_v41 = vld [vmem:[#allocation0 + $0xf8] sm:$0x80]   ;;  %v297_v47 = vld [vmem:[#allocation0 + $0xc9] sm:$0x40]   ;;  %v334_v50 = vsel %vm89_vm5, %v332_v32, %v330_v45  ;;  %v401_v61 = vld [vmem:[#allocation0 + $0xcc] sm:$0x40]   ;;  %v295_v62 = vsel %vm85_vm4, %v293_v44, %v291_v57  ;;  %v399_v10 = vsel %vm85_vm4, %v397_v60, %v395_v4 }
  0x2a   :  { %v338_v56 = vsel %vm93_vm6, %v336_v41, %v334_v50  ;;  %v301_v58 = vld [vmem:[#allocation0 + $0xe8] sm:$0x80]   ;;  %v345_v0 = vld [vmem:[#allocation0 + $0x2] sm:$0x1]   ;;  %v299_v3 = vsel %vm89_vm5, %v297_v47, %v295_v62  ;;  %v405_v5 = vld [vmem:[#allocation0 + $0xeb] sm:$0x80]   ;;  %v403_v15 = vsel %vm89_vm5, %v401_v61, %v399_v10 }
  0x2b   :  { %339 = vrot.lane.b32.xlu1 %v338_v56, %s967_s0  ;;  %v347_v1 = vld [vmem:[#allocation0 + $0x21] sm:$0x2]   ;;  %v303_v9 = vsel %vm93_vm6, %v301_v58, %v299_v3  ;;  %v449_v14 = vld [vmem:[#allocation0 + $0x16] sm:$0x1]   ;;  %v407_v20 = vsel %vm93_vm6, %v405_v5, %v403_v15  ;;  %s968_s18 = smov 64   ;;  %s969_s19 = smov 32  }
  0x2c   :  { %v351_v2 = vld [vmem:[#allocation0 + $0x40] sm:$0x4]   ;;  %v349_v6 = vsel %vm69_vm0, %v347_v1, %v345_v0  ;;  %304 = vrot.lane.b32.xlu0 %v303_v9, %s967_s0  ;;  %v451_v17 = vld [vmem:[#allocation0 + $0x35] sm:$0x2]   ;;  %v414_v29 = vld [vmem:[#allocation0 + $0x6] sm:$0x1]  }
  0x2d   :  { %v355_v7 = vld [vmem:[#allocation0 + $0x5f] sm:$0x8]   ;;  %v353_v11 = vsel %vm73_vm1, %v351_v2, %v349_v6  ;;  %v455_v18 = vld [vmem:[#allocation0 + $0x54] sm:$0x4]   ;;  %v453_v23 = vsel %vm69_vm0, %v451_v17, %v449_v14  ;;  %v416_v30 = vld [vmem:[#allocation0 + $0x25] sm:$0x2]  }
  0x2e   :  { %v359_v8 = vld [vmem:[#allocation0 + $0x7e] sm:$0x10]   ;;  %v357_v16 = vsel %vm77_vm2, %v355_v7, %v353_v11  ;;  %v459_v19 = vld [vmem:[#allocation0 + $0x73] sm:$0x8]   ;;  %v457_v27 = vsel %vm73_vm1, %v455_v18, %v453_v23  ;;  %v418_v33 = vsel %vm69_vm0, %v416_v30, %v414_v29  ;;  %v420_v34 = vld [vmem:[#allocation0 + $0x44] sm:$0x4]  }
  0x2f   :  { %v363_v12 = vld [vmem:[#allocation0 + $0x9d] sm:$0x20]   ;;  %v361_v21 = vsel %vm81_vm3, %v359_v8, %v357_v16  ;;  %v463_v24 = vld [vmem:[#allocation0 + $0x92] sm:$0x10]   ;;  %408 = vrot.lane.b32.xlu1 %v407_v20, %s968_s18  ;;  %v461_v32 = vsel %vm77_vm2, %v459_v19, %v457_v27  ;;  %v424_v35 = vld [vmem:[#allocation0 + $0x63] sm:$0x8]   ;;  %v422_v40 = vsel %vm73_vm1, %v420_v34, %v418_v33 }
  0x30   :  { %v367_v13 = vld [vmem:[#allocation0 + $0xbc] sm:$0x40]   ;;  %v467_v25 = vld [vmem:[#allocation0 + $0xb1] sm:$0x20]   ;;  %v365_v26 = vsel %vm85_vm4, %v363_v12, %v361_v21  ;;  %v428_v36 = vld [vmem:[#allocation0 + $0x82] sm:$0x10]   ;;  %v465_v38 = vsel %vm81_vm3, %v463_v24, %v461_v32  ;;  %v426_v44 = vsel %vm77_vm2, %v424_v35, %v422_v40 }
  0x31   :  { %v371_v22 = vld [vmem:[#allocation0 + $0xdb] sm:$0x80]   ;;  %v471_v28 = vld [vmem:[#allocation0 + $0xd0] sm:$0x40]   ;;  %v369_v31 = vsel %vm89_vm5, %v367_v13, %v365_v26  ;;  %v432_v41 = vld [vmem:[#allocation0 + $0xa1] sm:$0x20]   ;;  %v469_v43 = vsel %vm85_vm4, %v467_v25, %v465_v38  ;;  %v430_v49 = vsel %vm81_vm3, %v428_v36, %v426_v44 }
  0x32   :  { %v373_v37 = vsel %vm93_vm6, %v371_v22, %v369_v31  ;;  %v475_v39 = vld [vmem:[#allocation0 + $0xef] sm:$0x80]   ;;  %v436_v42 = vld [vmem:[#allocation0 + $0xc0] sm:$0x40]   ;;  %v519_v45 = vld [vmem:[#allocation0 + $0x1a] sm:$0x1]   ;;  %v473_v48 = vsel %vm89_vm5, %v471_v28, %v469_v43  ;;  %v434_v55 = vsel %vm85_vm4, %v432_v41, %v430_v49 }
  0x33   :  { %374 = vrot.lane.b32.xlu0 %v373_v37, %s968_s18  ;;  %v521_v46 = vld [vmem:[#allocation0 + $0x39] sm:$0x2]   ;;  %v440_v50 = vld [vmem:[#allocation0 + $0xdf] sm:$0x80]   ;;  %v477_v54 = vsel %vm93_vm6, %v475_v39, %v473_v48  ;;  %v484_v59 = vld [vmem:[#allocation0 + $0xa] sm:$0x1]   ;;  %v438_v60 = vsel %vm89_vm5, %v436_v42, %v434_v55 }
  0x34   :  { %v525_v47 = vld [vmem:[#allocation0 + $0x58] sm:$0x4]   ;;  %v523_v51 = vsel %vm69_vm0, %v521_v46, %v519_v45  ;;  %478 = vrot.lane.b32.xlu1 %v477_v54, %s968_s18  ;;  %v486_v62 = vld [vmem:[#allocation0 + $0x29] sm:$0x2]   ;;  %v442_v1 = vsel %vm93_vm6, %v440_v50, %v438_v60  ;;  %v589_v10 = vld [vmem:[#allocation0 + $0x1e] sm:$0x1]  }
  0x35   :  { %v529_v52 = vld [vmem:[#allocation0 + $0x77] sm:$0x8]   ;;  %v527_v56 = vsel %vm73_vm1, %v525_v47, %v523_v51  ;;  %v490_v63 = vld [vmem:[#allocation0 + $0x48] sm:$0x4]   ;;  %v488_v4 = vsel %vm69_vm0, %v486_v62, %v484_v59  ;;  %v591_v11 = vld [vmem:[#allocation0 + $0x3d] sm:$0x2]  }
  0x36   :  { %v533_v53 = vld [vmem:[#allocation0 + $0x96] sm:$0x10]   ;;  %v531_v61 = vsel %vm77_vm2, %v529_v52, %v527_v56  ;;  %v494_v0 = vld [vmem:[#allocation0 + $0x67] sm:$0x8]   ;;  %v492_v8 = vsel %vm73_vm1, %v490_v63, %v488_v4  ;;  %v593_v14 = vsel %vm69_vm0, %v591_v11, %v589_v10  ;;  %v595_v15 = vld [vmem:[#allocation0 + $0x5c] sm:$0x4]  }
  0x37   :  { %v537_v57 = vld [vmem:[#allocation0 + $0xb5] sm:$0x20]   ;;  %v535_v2 = vsel %vm81_vm3, %v533_v53, %v531_v61  ;;  %v498_v5 = vld [vmem:[#allocation0 + $0x86] sm:$0x10]   ;;  %443 = vrot.lane.b32.xlu0 %v442_v1, %s968_s18  ;;  %v496_v13 = vsel %vm77_vm2, %v494_v0, %v492_v8  ;;  %v599_v16 = vld [vmem:[#allocation0 + $0x7b] sm:$0x8]   ;;  %v597_v21 = vsel %vm73_vm1, %v595_v15, %v593_v14 }
  0x38   :  { %v541_v58 = vld [vmem:[#allocation0 + $0xd4] sm:$0x40]   ;;  %v502_v6 = vld [vmem:[#allocation0 + $0xa5] sm:$0x20]   ;;  %v539_v7 = vsel %vm85_vm4, %v537_v57, %v535_v2  ;;  %v603_v17 = vld [vmem:[#allocation0 + $0x9a] sm:$0x10]   ;;  %v500_v19 = vsel %vm81_vm3, %v498_v5, %v496_v13  ;;  %v601_v25 = vsel %vm77_vm2, %v599_v16, %v597_v21 }
  0x39   :  { %v545_v3 = vld [vmem:[#allocation0 + $0xf3] sm:$0x80]   ;;  %v506_v9 = vld [vmem:[#allocation0 + $0xc4] sm:$0x40]   ;;  %v543_v12 = vsel %vm89_vm5, %v541_v58, %v539_v7  ;;  %v607_v22 = vld [vmem:[#allocation0 + $0xb9] sm:$0x20]   ;;  %v504_v24 = vsel %vm85_vm4, %v502_v6, %v500_v19  ;;  %v605_v30 = vsel %vm81_vm3, %v603_v17, %v601_v25 }
  0x3a   :  { %v547_v18 = vsel %vm93_vm6, %v545_v3, %v543_v12  ;;  %v510_v20 = vld [vmem:[#allocation0 + $0xe3] sm:$0x80]   ;;  %v611_v23 = vld [vmem:[#allocation0 + $0xd8] sm:$0x40]   ;;  %v554_v26 = vld [vmem:[#allocation0 + $0xe] sm:$0x1]   ;;  %v508_v29 = vsel %vm89_vm5, %v506_v9, %v504_v24  ;;  %v609_v36 = vsel %vm85_vm4, %v607_v22, %v605_v30 }
  0x3b   :  { %548 = vrot.lane.b32.xlu1 %v547_v18, %s968_s18  ;;  %v556_v27 = vld [vmem:[#allocation0 + $0x2d] sm:$0x2]   ;;  %v615_v31 = vld [vmem:[#allocation0 + $0xf7] sm:$0x80]   ;;  %v512_v35 = vsel %vm93_vm6, %v510_v20, %v508_v29  ;;  %v658_v40 = vld [vmem:[#allocation0 + $0x11] sm:$0x1]   ;;  %v613_v41 = vsel %vm89_vm5, %v611_v23, %v609_v36 }
  0x3c   :  { %v560_v28 = vld [vmem:[#allocation0 + $0x4c] sm:$0x4]   ;;  %v558_v32 = vsel %vm69_vm0, %v556_v27, %v554_v26  ;;  %513 = vrot.lane.b32.xlu0 %v512_v35, %s968_s18  ;;  %v660_v43 = vld [vmem:[#allocation0 + $0x30] sm:$0x2]   ;;  %v617_v46 = vsel %vm93_vm6, %v615_v31, %v613_v41  ;;  %v624_v55 = vld [vmem:[#allocation0 + $0x1] sm:$0x1]  }
  0x3d   :  { %v564_v33 = vld [vmem:[#allocation0 + $0x6b] sm:$0x8]   ;;  %v562_v37 = vsel %vm73_vm1, %v560_v28, %v558_v32  ;;  %v664_v44 = vld [vmem:[#allocation0 + $0x4f] sm:$0x4]   ;;  %v662_v49 = vsel %vm69_vm0, %v660_v43, %v658_v40  ;;  %v626_v56 = vld [vmem:[#allocation0 + $0x20] sm:$0x2]  }
  0x3e   :  { %v568_v34 = vld [vmem:[#allocation0 + $0x8a] sm:$0x10]   ;;  %v566_v42 = vsel %vm77_vm2, %v564_v33, %v562_v37  ;;  %v668_v45 = vld [vmem:[#allocation0 + $0x6e] sm:$0x8]   ;;  %v666_v53 = vsel %vm73_vm1, %v664_v44, %v662_v49  ;;  %v628_v59 = vsel %vm69_vm0, %v626_v56, %v624_v55  ;;  %v630_v60 = vld [vmem:[#allocation0 + $0x3f] sm:$0x4]  }
  0x3f   :  { %v572_v38 = vld [vmem:[#allocation0 + $0xa9] sm:$0x20]   ;;  %v570_v47 = vsel %vm81_vm3, %v568_v34, %v566_v42  ;;  %v672_v50 = vld [vmem:[#allocation0 + $0x8d] sm:$0x10]   ;;  %618 = vrot.lane.b32.xlu1 %v617_v46, %s968_s18  ;;  %v670_v58 = vsel %vm77_vm2, %v668_v45, %v666_v53  ;;  %v634_v61 = vld [vmem:[#allocation0 + $0x5e] sm:$0x8]   ;;  %v632_v2 = vsel %vm73_vm1, %v630_v60, %v628_v59 }
  0x40   :  { %v576_v39 = vld [vmem:[#allocation0 + $0xc8] sm:$0x40]   ;;  %v676_v51 = vld [vmem:[#allocation0 + $0xac] sm:$0x20]   ;;  %v574_v52 = vsel %vm85_vm4, %v572_v38, %v570_v47  ;;  %v638_v62 = vld [vmem:[#allocation0 + $0x7d] sm:$0x10]   ;;  %v674_v0 = vsel %vm81_vm3, %v672_v50, %v670_v58  ;;  %v636_v6 = vsel %vm77_vm2, %v634_v61, %v632_v2 }
  0x41   :  { %v580_v48 = vld [vmem:[#allocation0 + $0xe7] sm:$0x80]   ;;  %v680_v54 = vld [vmem:[#allocation0 + $0xcb] sm:$0x40]   ;;  %v578_v57 = vsel %vm89_vm5, %v576_v39, %v574_v52  ;;  %v642_v3 = vld [vmem:[#allocation0 + $0x9c] sm:$0x20]   ;;  %v678_v5 = vsel %vm85_vm4, %v676_v51, %v674_v0  ;;  %v640_v11 = vsel %vm81_vm3, %v638_v62, %v636_v6 }
  0x42   :  { %v582_v63 = vsel %vm93_vm6, %v580_v48, %v578_v57  ;;  %v684_v1 = vld [vmem:[#allocation0 + $0xea] sm:$0x80]   ;;  %v646_v4 = vld [vmem:[#allocation0 + $0xbb] sm:$0x40]   ;;  %v728_v7 = vld [vmem:[#allocation0 + $0x15] sm:$0x1]   ;;  %v682_v10 = vsel %vm89_vm5, %v680_v54, %v678_v5  ;;  %v644_v17 = vsel %vm85_vm4, %v642_v3, %v640_v11 }
  0x43   :  { %583 = vrot.lane.b32.xlu0 %v582_v63, %s968_s18  ;;  %v730_v8 = vld [vmem:[#allocation0 + $0x34] sm:$0x2]   ;;  %v650_v12 = vld [vmem:[#allocation0 + $0xda] sm:$0x80]   ;;  %v686_v16 = vsel %vm93_vm6, %v684_v1, %v682_v10  ;;  %v693_v21 = vld [vmem:[#allocation0 + $0x5] sm:$0x1]   ;;  %v648_v22 = vsel %vm89_vm5, %v646_v4, %v644_v17 }
  0x44   :  { %v734_v9 = vld [vmem:[#allocation0 + $0x53] sm:$0x4]   ;;  %v732_v13 = vsel %vm69_vm0, %v730_v8, %v728_v7  ;;  %687 = vrot.lane.b32.xlu1 %v686_v16, %s969_s19  ;;  %v695_v24 = vld [vmem:[#allocation0 + $0x24] sm:$0x2]   ;;  %v652_v27 = vsel %vm93_vm6, %v650_v12, %v648_v22  ;;  %v798_v36 = vld [vmem:[#allocation0 + $0x19] sm:$0x1]  }
  0x45   :  { %v738_v14 = vld [vmem:[#allocation0 + $0x72] sm:$0x8]   ;;  %v736_v18 = vsel %vm73_vm1, %v734_v9, %v732_v13  ;;  %v699_v25 = vld [vmem:[#allocation0 + $0x43] sm:$0x4]   ;;  %v697_v30 = vsel %vm69_vm0, %v695_v24, %v693_v21  ;;  %v800_v37 = vld [vmem:[#allocation0 + $0x38] sm:$0x2]  }
  0x46   :  { %v742_v15 = vld [vmem:[#allocation0 + $0x91] sm:$0x10]   ;;  %v740_v23 = vsel %vm77_vm2, %v738_v14, %v736_v18  ;;  %v703_v26 = vld [vmem:[#allocation0 + $0x62] sm:$0x8]   ;;  %v701_v34 = vsel %vm73_vm1, %v699_v25, %v697_v30  ;;  %v802_v40 = vsel %vm69_vm0, %v800_v37, %v798_v36  ;;  %v804_v41 = vld [vmem:[#allocation0 + $0x57] sm:$0x4]  }
  0x47   :  { %v746_v19 = vld [vmem:[#allocation0 + $0xb0] sm:$0x20]   ;;  %v744_v28 = vsel %vm81_vm3, %v742_v15, %v740_v23  ;;  %v707_v31 = vld [vmem:[#allocation0 + $0x81] sm:$0x10]   ;;  %653 = vrot.lane.b32.xlu0 %v652_v27, %s969_s19  ;;  %v705_v39 = vsel %vm77_vm2, %v703_v26, %v701_v34  ;;  %v808_v42 = vld [vmem:[#allocation0 + $0x76] sm:$0x8]   ;;  %v806_v47 = vsel %vm73_vm1, %v804_v41, %v802_v40 }
  0x48   :  { %v750_v20 = vld [vmem:[#allocation0 + $0xcf] sm:$0x40]   ;;  %v711_v32 = vld [vmem:[#allocation0 + $0xa0] sm:$0x20]   ;;  %v748_v33 = vsel %vm85_vm4, %v746_v19, %v744_v28  ;;  %v812_v43 = vld [vmem:[#allocation0 + $0x95] sm:$0x10]   ;;  %v709_v45 = vsel %vm81_vm3, %v707_v31, %v705_v39  ;;  %v810_v51 = vsel %vm77_vm2, %v808_v42, %v806_v47 }
  0x49   :  { %v754_v29 = vld [vmem:[#allocation0 + $0xee] sm:$0x80]   ;;  %v715_v35 = vld [vmem:[#allocation0 + $0xbf] sm:$0x40]   ;;  %v752_v38 = vsel %vm89_vm5, %v750_v20, %v748_v33  ;;  %v816_v48 = vld [vmem:[#allocation0 + $0xb4] sm:$0x20]   ;;  %v713_v50 = vsel %vm85_vm4, %v711_v32, %v709_v45  ;;  %v814_v56 = vsel %vm81_vm3, %v812_v43, %v810_v51 }
  0x4a   :  { %v756_v44 = vsel %vm93_vm6, %v754_v29, %v752_v38  ;;  %v719_v46 = vld [vmem:[#allocation0 + $0xde] sm:$0x80]   ;;  %v820_v49 = vld [vmem:[#allocation0 + $0xd3] sm:$0x40]   ;;  %v763_v52 = vld [vmem:[#allocation0 + $0x9] sm:$0x1]   ;;  %v717_v55 = vsel %vm89_vm5, %v715_v35, %v713_v50  ;;  %v818_v62 = vsel %vm85_vm4, %v816_v48, %v814_v56 }
  0x4b   :  { %757 = vrot.lane.b32.xlu1 %v756_v44, %s969_s19  ;;  %v765_v53 = vld [vmem:[#allocation0 + $0x28] sm:$0x2]   ;;  %v824_v57 = vld [vmem:[#allocation0 + $0xf2] sm:$0x80]   ;;  %v721_v61 = vsel %vm93_vm6, %v719_v46, %v717_v55  ;;  %v868_v2 = vld [vmem:[#allocation0 + $0x1d] sm:$0x1]   ;;  %v822_v3 = vsel %vm89_vm5, %v820_v49, %v818_v62 }
  0x4c   :  { %v769_v54 = vld [vmem:[#allocation0 + $0x47] sm:$0x4]   ;;  %v767_v58 = vsel %vm69_vm0, %v765_v53, %v763_v52  ;;  %722 = vrot.lane.b32.xlu0 %v721_v61, %s969_s19  ;;  %v870_v5 = vld [vmem:[#allocation0 + $0x3c] sm:$0x2]   ;;  %v826_v8 = vsel %vm93_vm6, %v824_v57, %v822_v3  ;;  %v833_v17 = vld [vmem:[#allocation0 + $0xd] sm:$0x1]  }
  0x4d   :  { %v773_v59 = vld [vmem:[#allocation0 + $0x66] sm:$0x8]   ;;  %v771_v63 = vsel %vm73_vm1, %v769_v54, %v767_v58  ;;  %v874_v6 = vld [vmem:[#allocation0 + $0x5b] sm:$0x4]   ;;  %v872_v11 = vsel %vm69_vm0, %v870_v5, %v868_v2  ;;  %v835_v18 = vld [vmem:[#allocation0 + $0x2c] sm:$0x2]  }
  0x4e   :  { %v777_v60 = vld [vmem:[#allocation0 + $0x85] sm:$0x10]   ;;  %v775_v4 = vsel %vm77_vm2, %v773_v59, %v771_v63  ;;  %v878_v7 = vld [vmem:[#allocation0 + $0x7a] sm:$0x8]   ;;  %v876_v15 = vsel %vm73_vm1, %v874_v6, %v872_v11  ;;  %v837_v21 = vsel %vm69_vm0, %v835_v18, %v833_v17  ;;  %v839_v22 = vld [vmem:[#allocation0 + $0x4b] sm:$0x4]  }
  0x4f   :  { %v781_v0 = vld [vmem:[#allocation0 + $0xa4] sm:$0x20]   ;;  %v779_v9 = vsel %vm81_vm3, %v777_v60, %v775_v4  ;;  %v882_v12 = vld [vmem:[#allocation0 + $0x99] sm:$0x10]   ;;  %827 = vrot.lane.b32.xlu1 %v826_v8, %s969_s19  ;;  %v880_v20 = vsel %vm77_vm2, %v878_v7, %v876_v15  ;;  %v843_v23 = vld [vmem:[#allocation0 + $0x6a] sm:$0x8]   ;;  %v841_v28 = vsel %vm73_vm1, %v839_v22, %v837_v21 }
  0x50   :  { %v785_v1 = vld [vmem:[#allocation0 + $0xc3] sm:$0x40]   ;;  %v886_v13 = vld [vmem:[#allocation0 + $0xb8] sm:$0x20]   ;;  %v783_v14 = vsel %vm85_vm4, %v781_v0, %v779_v9  ;;  %v847_v24 = vld [vmem:[#allocation0 + $0x89] sm:$0x10]   ;;  %v884_v26 = vsel %vm81_vm3, %v882_v12, %v880_v20  ;;  %v845_v32 = vsel %vm77_vm2, %v843_v23, %v841_v28 }
  0x51   :  { %v789_v10 = vld [vmem:[#allocation0 + $0xe2] sm:$0x80]   ;;  %v890_v16 = vld [vmem:[#allocation0 + $0xd7] sm:$0x40]   ;;  %v787_v19 = vsel %vm89_vm5, %v785_v1, %v783_v14  ;;  %v851_v29 = vld [vmem:[#allocation0 + $0xa8] sm:$0x20]   ;;  %v888_v31 = vsel %vm85_vm4, %v886_v13, %v884_v26  ;;  %v849_v36 = vsel %vm81_vm3, %v847_v24, %v845_v32 }
  0x52   :  { %v791_v25 = vsel %vm93_vm6, %v789_v10, %v787_v19  ;;  %v894_v27 = vld [vmem:[#allocation0 + $0xf6] sm:$0x80]   ;;  %v855_v30 = vld [vmem:[#allocation0 + $0xc7] sm:$0x40]   ;;  %vm13_vm7 = vcmask 261120   ;;  %v892_v35 = vsel %vm89_vm5, %v890_v16, %v888_v31  ;;  %v853_v41 = vsel %vm85_vm4, %v851_v29, %v849_v36 }
  0x53   :  { %792 = vrot.lane.b32.xlu0 %v791_v25, %s969_s19  ;;  %v12_v33 = vld [vmem:[#allocation0] ss:$4 sm:$0xff]   ;;  %v859_v37 = vld [vmem:[#allocation0 + $0xe6] sm:$0x80]   ;;  %v896_v40 = vsel %vm93_vm6, %v894_v27, %v892_v35  ;;  %v857_v45 = vsel %vm89_vm5, %v855_v30, %v853_v41  ;;  %vm97_vm8 = vcmask 1048320   ;;  %vm376_vm9 = vcmask 785920  }
  0x54   :  { %v17_v34 = vld [vmem:[#allocation0 + $0x20] ss:$4 sm:$0xff]   ;;  %15 = vst.msk [vmem:[%s1345_s1] ss:$8 sm:$0xf0] %vm13_vm7, %v12_v33   ;;  %897 = vrot.lane.b32.xlu1 %v896_v40, %s969_s19  ;;  %v861_v47 = vsel %vm93_vm6, %v859_v37, %v857_v45  ;;  %vm655_vm10 = vcmask 523520  }
  0x55   :  { %904 = vst.msk [vmem:[%s1345_s1 + $0x1] ss:$8 sm:$0xf0] %vm13_vm7, %v17_v34   ;;  %v24_v38 = vld [vmem:[#allocation0 + $0x40] ss:$4 sm:$0xff]  }
  0x56   :  { %v31_v39 = vld [vmem:[#allocation0 + $0x60] ss:$4 sm:$0xff]   ;;  %14 = vst.msk [vmem:[%s1345_s1] ss:$8 sm:$0xf] %vm13_vm7, %v12_v33  }
  0x57   :  { %903 = vst.msk [vmem:[%s1345_s1 + $0x1] ss:$8 sm:$0xf] %vm13_vm7, %v17_v34   ;;  %906 = vst.msk [vmem:[%s1345_s1 + $0x2] ss:$8 sm:$0xf0] %vm13_vm7, %v24_v38   ;;  %862 = vrot.lane.b32.xlu0 %v861_v47, %s969_s19 }
  0x58   :  { %908 = vst.msk [vmem:[%s1345_s1 + $0x3] ss:$8 sm:$0xf0] %vm13_vm7, %v31_v39   ;;  %v38_v42 = vld [vmem:[#allocation0 + $0x80] ss:$4 sm:$0xff]  }
  0x59   :  { %v45_v43 = vld [vmem:[#allocation0 + $0xa0] ss:$4 sm:$0xff]   ;;  %905 = vst.msk [vmem:[%s1345_s1 + $0x2] ss:$8 sm:$0xf] %vm13_vm7, %v24_v38  }
  0x5a   :  { %v52_v44 = vld [vmem:[#allocation0 + $0xc0] ss:$4 sm:$0xff]   ;;  %907 = vst.msk [vmem:[%s1345_s1 + $0x3] ss:$8 sm:$0xf] %vm13_vm7, %v31_v39  }
  0x5b   :  { %910 = vst.msk [vmem:[%s1345_s1 + $0x4] ss:$8 sm:$0xf0] %vm13_vm7, %v38_v42   ;;  %912 = vst.msk [vmem:[%s1345_s1 + $0x5] ss:$8 sm:$0xf0] %vm13_vm7, %v45_v43  }
  0x5c   :  { %914 = vst.msk [vmem:[%s1345_s1 + $0x6] ss:$8 sm:$0xf0] %vm13_vm7, %v52_v44   ;;  %v59_v46 = vld [vmem:[#allocation0 + $0xe0] ss:$4 sm:$0xff]  }
  0x5d   :  { %909 = vst.msk [vmem:[%s1345_s1 + $0x4] ss:$8 sm:$0xf] %vm13_vm7, %v38_v42   ;;  %911 = vst.msk [vmem:[%s1345_s1 + $0x5] ss:$8 sm:$0xf] %vm13_vm7, %v45_v43  }
  0x5e   :  { %913 = vst.msk [vmem:[%s1345_s1 + $0x6] ss:$8 sm:$0xf] %vm13_vm7, %v52_v44   ;;  %916 = vst.msk [vmem:[%s1345_s1 + $0x7] ss:$8 sm:$0xf0] %vm13_vm7, %v59_v46  }
  0x5f   :  { %915 = vst.msk [vmem:[%s1345_s1 + $0x7] ss:$8 sm:$0xf] %vm13_vm7, %v59_v46  }
  0x8d   :  { %v165_v48 = vpop.permute.xlu1 %164  }
  0x8e   :  { %918 = vst.msk [vmem:[%s1345_s1 + $0x8] sm:$0xff] %vm97_vm8, %v165_v48   ;;  %v96_v49 = vpop.permute.xlu0 %95  }
  0x8f   :  { %98 = vst.msk [vmem:[%s1345_s1] sm:$0xff] %vm97_vm8, %v96_v49  }
  0x91   :  { %v200_v50 = vpop.permute.xlu1 %199  }
  0x92   :  { %919 = vst.msk [vmem:[%s1345_s1 + $0x28] sm:$0xff] %vm97_vm8, %v200_v50  }
  0x95   :  { %v130_v51 = vpop.permute.xlu0 %129  }
  0x96   :  { %917 = vst.msk [vmem:[%s1345_s1 + $0x20] sm:$0xff] %vm97_vm8, %v130_v51   ;;  %v270_v52 = vpop.permute.xlu1 %269  }
  0x97   :  { %921 = vst.msk [vmem:[%s1345_s1 + $0x30] sm:$0xff] %vm97_vm8, %v270_v52  }
  0x99   :  { %v235_v53 = vpop.permute.xlu0 %234  }
  0x9a   :  { %920 = vst.msk [vmem:[%s1345_s1 + $0x10] sm:$0xff] %vm97_vm8, %v235_v53  }
  0x9d   :  { %v340_v54 = vpop.permute.xlu1 %339  }
  0x9e   :  { %923 = vst.msk [vmem:[%s1345_s1 + $0x38] sm:$0xff] %vm97_vm8, %v340_v54   ;;  %v305_v55 = vpop.permute.xlu0 %304  }
  0x9f   :  { %922 = vst.msk [vmem:[%s1345_s1 + $0x18] sm:$0xff] %vm97_vm8, %v305_v55  }
  0xa1   :  { %v409_v56 = vpop.permute.xlu1 %408  }
  0xa2   :  { %924 = vst.msk [vmem:[%s1345_s1 + $0x20] sm:$0xff] %vm376_vm9, %v409_v56  }
  0xa5   :  { %v375_v57 = vpop.permute.xlu0 %374  }
  0xa6   :  { %377 = vst.msk [vmem:[%s1345_s1] sm:$0xff] %vm376_vm9, %v375_v57   ;;  %v479_v58 = vpop.permute.xlu1 %478  }
  0xa7   :  { %926 = vst.msk [vmem:[%s1345_s1 + $0x28] sm:$0xff] %vm376_vm9, %v479_v58  }
  0xa9   :  { %v444_v59 = vpop.permute.xlu0 %443  }
  0xaa   :  { %925 = vst.msk [vmem:[%s1345_s1 + $0x8] sm:$0xff] %vm376_vm9, %v444_v59  }
  0xad   :  { %v549_v60 = vpop.permute.xlu1 %548  }
  0xae   :  { %928 = vst.msk [vmem:[%s1345_s1 + $0x30] sm:$0xff] %vm376_vm9, %v549_v60   ;;  %v514_v61 = vpop.permute.xlu0 %513  }
  0xaf   :  { %927 = vst.msk [vmem:[%s1345_s1 + $0x10] sm:$0xff] %vm376_vm9, %v514_v61  }
  0xb1   :  { %v619_v62 = vpop.permute.xlu1 %618  }
  0xb2   :  { %930 = vst.msk [vmem:[%s1345_s1 + $0x38] sm:$0xff] %vm376_vm9, %v619_v62  }
  0xb5   :  { %v584_v63 = vpop.permute.xlu0 %583  }
  0xb6   :  { %929 = vst.msk [vmem:[%s1345_s1 + $0x18] sm:$0xff] %vm376_vm9, %v584_v63   ;;  %v688_v0 = vpop.permute.xlu1 %687  }
  0xb7   :  { %931 = vst.msk [vmem:[%s1345_s1 + $0x20] sm:$0xff] %vm655_vm10, %v688_v0  }
  0xb9   :  { %v654_v1 = vpop.permute.xlu0 %653  }
  0xba   :  { %656 = vst.msk [vmem:[%s1345_s1] sm:$0xff] %vm655_vm10, %v654_v1  }
  0xbd   :  { %v758_v2 = vpop.permute.xlu1 %757  }
  0xbe   :  { %933 = vst.msk [vmem:[%s1345_s1 + $0x28] sm:$0xff] %vm655_vm10, %v758_v2   ;;  %v723_v3 = vpop.permute.xlu0 %722  }
  0xbf   :  { %932 = vst.msk [vmem:[%s1345_s1 + $0x8] sm:$0xff] %vm655_vm10, %v723_v3  }
  0xc1   :  { %v828_v4 = vpop.permute.xlu1 %827  }
  0xc2   :  { %935 = vst.msk [vmem:[%s1345_s1 + $0x30] sm:$0xff] %vm655_vm10, %v828_v4  }
  0xc5   :  { %v793_v5 = vpop.permute.xlu0 %792  }
  0xc6   :  { %934 = vst.msk [vmem:[%s1345_s1 + $0x10] sm:$0xff] %vm655_vm10, %v793_v5   ;;  %v898_v6 = vpop.permute.xlu1 %897  }
  0xc7   :  { %937 = vst.msk [vmem:[%s1345_s1 + $0x38] sm:$0xff] %vm655_vm10, %v898_v6  }
  0xc9   :  { %v863_v7 = vpop.permute.xlu0 %862  }
  0xca   :  { %936 = vst.msk [vmem:[%s1345_s1 + $0x18] sm:$0xff] %vm655_vm10, %v863_v7  }
  0xcb   :  { %902 = vsyncpa [#allocation1], 1 }

// kernel: ssinr_forward.1
= control target key start
LH: loop header
LB: loop body
LE: loop exit
PB: predicated region body
PF: predicated region fallthrough
CT: control target
= control target key end

     0   :  { %v10385_v0 = vmov 0   ;;  %v10414_v6 = vmov 1065369472   ;;  %s7072_s17 = smov 33   ;;  %s7073_s18 = smov 32   ;;  %vm10395_vm0 = vcmask 261120   ;;  %v13_v46 = vlaneseq  ;;  %s10381_s0 = inlined_call_operand.vmem [shape: f32[32,1024], index: 0, kind: input, shape index: {}]   ;;  %s10382_s1 = inlined_call_operand.vmem [shape: bf16[4,8,160], index: 1, kind: input, shape index: {}]   ;;  %s10383_s2 = inlined_call_operand.vmem [shape: f32[8,1024], index: 2, kind: output, shape index: {}]  }
   0x1   :  { %v7097_v1 = vunpack.c.l.bf16 %v10385_v0  ;;  %v7100_v2 = vunpack.c.h.bf16 %v10385_v0  ;;  %v144_v3 = vld [vmem:[%s10381_s0] sm:$0xff]  ;;  %v145_v4 = vld [vmem:[%s10381_s0 + $0x8] sm:$0xff]  ;;  %1321 = vmatprep.subr.bf16.mxu0 %v10414_v6  ;;  %1362 = vmatprep.subr.bf16.mxu1 %v10414_v6  ;;  %v146_v13 = vld [vmem:[%s10381_s0 + $0x10] sm:$0xff]  ;;  %s7074_s27 = smov 31   ;;  %s7075_s28 = smov 1   ;;  %vm10391_vm1 = vcmask 269312  }
   0x2   :  { %v152_v5 = vld [vmem:[%s10381_s0 + $0x40] sm:$0xff]  ;;  %v153_v7 = vld [vmem:[%s10381_s0 + $0x48] sm:$0xff]  ;;  %1322 = vmatpush1.bf16.msra.mxu0 %v10414_v6  ;;  %1363 = vmatpush1.bf16.msra.mxu1 %v10414_v6  ;;  %v5987_v11 = vpack.i.bf16 %v145_v4, %v144_v3  ;;  %v154_v14 = vld [vmem:[%s10381_s0 + $0x50] sm:$0xff]  ;;  %s7076_s29 = smov 127   ;;  %v6037_v22 = vpack.i.bf16 %v146_v13, %v145_v4  ;;  %s7077_s30 = smov 97   ;;  %v7262_v47 = vand.u32 127, %v13_v46 }
   0x3   :  { %10540 = vst [vmem:[#allocation4_spill] sm:$0xff] %v7097_v1  ;;  %10541 = vst [vmem:[#allocation5_spill] sm:$0xff] %v7100_v2  ;;  %v7116_v8 = vpack.c.bf16 %v152_v5, %v144_v3  ;;  %v7122_v9 = vpack.i.bf16 %v7100_v2, %v7097_v1  ;;  %v7124_v10 = vpack.c.bf16 %v153_v7, %v145_v4  ;;  %v147_v15 = vld [vmem:[%s10381_s0 + $0x18] sm:$0xff]  ;;  %s7078_s3 = smov 96   ;;  %v148_v24 = vld [vmem:[%s10381_s0 + $0x20] sm:$0xff]  ;;  %s7079_s12 = smov 95  }
   0x4   :  { %5988 = vrot.lane.b32.xlu0 %v5987_v11, %s7072_s17  ;;  %v5992_v12 = vpack.i.bf16 %v153_v7, %v152_v5  ;;  %v155_v16 = vld [vmem:[%s10381_s0 + $0x58] sm:$0xff]  ;;  %v7146_v17 = vpack.c.bf16 %v154_v14, %v146_v13  ;;  %v6027_v20 = vpack.i.bf16 %v147_v15, %v146_v13  ;;  %v6042_v21 = vpack.i.bf16 %v154_v14, %v153_v7  ;;  %v156_v25 = vld [vmem:[%s10381_s0 + $0x60] sm:$0xff]  ;;  %v149_v27 = vld [vmem:[%s10381_s0 + $0x28] sm:$0xff] }
   0x5   :  { %10542 = vst [vmem:[#allocation6_spill] sm:$0xff] %v7122_v9  ;;  %5983 = vrot.lane.b32.xlu1 %v7122_v9, %s7072_s17  ;;  %v7151_v18 = vpack.c.bf16 %v155_v16, %v147_v15  ;;  %v6032_v19 = vpack.i.bf16 %v155_v16, %v154_v14  ;;  %v6047_v23 = vpack.i.bf16 %v152_v5, %v144_v3  ;;  %v157_v28 = vld [vmem:[%s10381_s0 + $0x68] sm:$0xff]  ;;  %v7200_v30 = vld [vmem:[%s10382_s1] sm:$0xff]  ;;  %v150_v36 = vld [vmem:[%s10381_s0 + $0x30] sm:$0xff]  ;;  %v15_v49 = vadd.s32 128, %v7262_v47 }
   0x6   :  { %v7185_v26 = vpack.c.bf16 %v156_v25, %v148_v24  ;;  %v7195_v29 = vpack.c.bf16 %v157_v28, %v149_v27  ;;  %v7204_v31 = vcombine.high %v7200_v30, %v7200_v30  ;;  %v6107_v32 = vpack.i.bf16 %v156_v25, %v155_v16  ;;  %v7231_v37 = vld [vmem:[%s10381_s0 + $0x38] sm:$0xff]  ;;  %v158_v38 = vld [vmem:[%s10381_s0 + $0x70] sm:$0xff] }
   0x7   :  { %v6102_v33 = vpack.i.bf16 %v148_v24, %v147_v15  ;;  %v6117_v34 = vpack.i.bf16 %v157_v28, %v156_v25  ;;  %v6112_v35 = vpack.i.bf16 %v149_v27, %v148_v24  ;;  %v159_v39 = vld [vmem:[%s10381_s0 + $0x78] sm:$0xff]  ;;  %v7242_v40 = vpack.c.bf16 %v158_v38, %v150_v36 }
   0x8   :  { %5993 = vrot.lane.b32.xlu0 %v5992_v12, %s7072_s17  ;;  %5370 = vmatprep.mubr.msk.bf16.mxu0 %vm10395_vm0, %v7204_v31  ;;  %v7245_v41 = vpack.c.bf16 %v159_v39, %v7231_v37  ;;  %v6167_v42 = vpack.i.bf16 %v159_v39, %v158_v38  ;;  %v6162_v43 = vpack.i.bf16 %v7231_v37, %v150_v36  ;;  %v33_v52 = vand.u32 31, %v15_v49 }
   0x9   :  { %383 = vrot.lane.b32.xlu1 %v7116_v8, %s7073_s18  ;;  %5371 = vmatprep.mubr.msk.bf16.mxu1 %vm10395_vm0, %v7204_v31  ;;  %v6177_v44 = vpack.i.bf16 %v158_v38, %v157_v28  ;;  %v6172_v45 = vpack.i.bf16 %v150_v36, %v149_v27  ;;  %v26_v53 = vand.u32 31, %v7262_v47  ;;  %v7286_v62 = vpack.i.bf16 %v7100_v2, %v159_v39 }
   0xa   :  { %vm119_vm2 = vcmp.ge.s32.totalorder %v33_v52, 1  ;;  %v10543_v7 = vmov 0  ;;  %v10545_v14 = vmov 0  ;;  %vm10396_vm6 = vcmask 252928  }
   0xb   :  { %vm118_vm3 = vcmp.ge.s32.totalorder %v26_v53, 1  ;;  %vm7296_vm4 = vmpackc.low %vm119_vm2, %vm119_vm2  ;;  %vm127_vm7 = vcmp.le.s32.totalorder %v33_v52, 30  ;;  %vm126_vm9 = vcmp.le.s32.totalorder %v26_v53, 30  ;;  %v10549_v53 = vmov 0 }
   0xc   :  { %385 = vrot.lane.b32.xlu0 %v7124_v10, %s7073_s18  ;;  %v10544_v7 = vsel %vm7296_vm4, 4294967295, %v10543_v7  ;;  %vm7304_vm5 = vmpackc.low %vm118_vm3, %vm118_vm3  ;;  %vm10390_vm11 = vcmask 7168   ;;  %vm10389_vm14 = vcmask 1039360   ;;  %vm10384_vm3 = vcmask 793600  }
   0xd   :  { %381 = vrot.lane.b32.xlu1 %v10385_v0, %s7073_s18  ;;  %v10546_v14 = vsel %vm7304_vm5, 4294967295, %v10545_v14  ;;  %vm7346_vm8 = vmpackc.low %vm127_vm7, %vm127_vm7 }
   0xe   :  { %vm7362_vm10 = vmpackc.low %vm126_vm9, %vm126_vm9 }
   0xf   :  { %v10550_v53 = vsel %vm7362_vm10, 4294967295, %v10549_v53 }
  0x10   :  { %5998 = vrot.lane.b32.xlu0 %v5987_v11, %s7074_s27 }
  0x11   :  { %6003 = vrot.lane.b32.xlu1 %v5992_v12, %s7074_s27 }
  0x14   :  { %6008 = vrot.lane.b32.xlu0 %v7122_v9, %s7074_s27 }
  0x15   :  { %6013 = vrot.lane.b32.xlu1 %v5987_v11, %s7075_s28 }
  0x18   :  { %6018 = vrot.lane.b32.xlu0 %v5992_v12, %s7075_s28 }
  0x19   :  { %6023 = vrot.lane.b32.xlu1 %v7122_v9, %s7075_s28 }
  0x1c   :  { %6028 = vrot.lane.b32.xlu0 %v6027_v20, %s7072_s17 }
  0x1d   :  { %6033 = vrot.lane.b32.xlu1 %v6032_v19, %s7072_s17 }
  0x20   :  { %6038 = vrot.lane.b32.xlu0 %v6037_v22, %s7076_s29 }
  0x21   :  { %6043 = vrot.lane.b32.xlu1 %v6042_v21, %s7076_s29 }
  0x24   :  { %6048 = vrot.lane.b32.xlu0 %v6047_v23, %s7076_s29 }
  0x25   :  { %6053 = vrot.lane.b32.xlu1 %v6037_v22, %s7077_s30 }
  0x28   :  { %6058 = vrot.lane.b32.xlu0 %v6042_v21, %s7077_s30 }
  0x29   :  { %387 = vrot.lane.b32.xlu1 %v7146_v17, %s7073_s18 }
  0x2c   :  { %389 = vrot.lane.b32.xlu0 %v7151_v18, %s7073_s18 }
  0x2d   :  { %6063 = vrot.lane.b32.xlu1 %v6047_v23, %s7077_s30 }
  0x30   :  { %6068 = vrot.lane.b32.xlu0 %v6027_v20, %s7074_s27 }
  0x31   :  { %6073 = vrot.lane.b32.xlu1 %v6032_v19, %s7074_s27 }
  0x34   :  { %1044 = vrot.lane.b32.xlu0 %v7124_v10, %s7078_s3 }
  0x35   :  { %1046 = vrot.lane.b32.xlu1 %v7146_v17, %s7078_s3 }
  0x38   :  { %6078 = vrot.lane.b32.xlu0 %v6027_v20, %s7075_s28  ;;  %v7315_v20 = vpack.i.bf16 %v7097_v1, %v7231_v37 }
  0x39   :  { %6083 = vrot.lane.b32.xlu1 %v6032_v19, %s7075_s28 }
  0x3c   :  { %1042 = vrot.lane.b32.xlu0 %v7116_v8, %s7078_s3 }
  0x3d   :  { %6088 = vrot.lane.b32.xlu1 %v6037_v22, %s7079_s12 }
  0x40   :  { %6093 = vrot.lane.b32.xlu0 %v6042_v21, %s7079_s12 }
  0x41   :  { %6098 = vrot.lane.b32.xlu1 %v6047_v23, %s7079_s12 }
  0x44   :  { %6103 = vrot.lane.b32.xlu0 %v6102_v33, %s7076_s29 }
  0x45   :  { %6108 = vrot.lane.b32.xlu1 %v6107_v32, %s7076_s29 }
  0x48   :  { %6113 = vrot.lane.b32.xlu0 %v6112_v35, %s7072_s17 }
  0x49   :  { %6118 = vrot.lane.b32.xlu1 %v6117_v34, %s7072_s17 }
  0x4c   :  { %6123 = vrot.lane.b32.xlu0 %v6102_v33, %s7077_s30 }
  0x4d   :  { %6128 = vrot.lane.b32.xlu1 %v6107_v32, %s7077_s30 }
  0x50   :  { %391 = vrot.lane.b32.xlu0 %v7185_v26, %s7073_s18 }
  0x51   :  { %393 = vrot.lane.b32.xlu1 %v7195_v29, %s7073_s18 }
  0x54   :  { %6133 = vrot.lane.b32.xlu0 %v6112_v35, %s7074_s27 }
  0x55   :  { %6138 = vrot.lane.b32.xlu1 %v6117_v34, %s7074_s27 }
  0x58   :  { %1048 = vrot.lane.b32.xlu0 %v7151_v18, %s7078_s3 }
  0x59   :  { %1050 = vrot.lane.b32.xlu1 %v7185_v26, %s7078_s3 }
  0x5c   :  { %6143 = vrot.lane.b32.xlu0 %v6102_v33, %s7079_s12  ;;  %v7339_v33 = vadd.s32 256, %v7262_v47 }
  0x5d   :  { %6148 = vrot.lane.b32.xlu1 %v6107_v32, %s7079_s12  ;;  %v7336_v32 = vadd.s32 384, %v7262_v47 }
  0x5e   :  { %v40_v46 = vand.u32 31, %v7339_v33 }
  0x60   :  { %6153 = vrot.lane.b32.xlu0 %v6112_v35, %s7075_s28  ;;  %vm7386_vm13 = vcmp.ge.s32.totalorder %v40_v46, 1  ;;  %vm128_vm9 = vcmp.le.s32.totalorder %v40_v46, 30 }
  0x61   :  { %6158 = vrot.lane.b32.xlu1 %v6117_v34, %s7075_s28  ;;  %vm7442_vm2 = vmpackc.low %vm7386_vm13, %vm7386_vm13 }
  0x64   :  { %6163 = vrot.lane.b32.xlu0 %v6162_v43, %s7072_s17 }
  0x65   :  { %6168 = vrot.lane.b32.xlu1 %v6167_v42, %s7072_s17 }
  0x68   :  { %6173 = vrot.lane.b32.xlu0 %v6172_v45, %s7076_s29 }
  0x69   :  { %6178 = vrot.lane.b32.xlu1 %v6177_v44, %s7076_s29 }
  0x6c   :  { %6183 = vrot.lane.b32.xlu0 %v6172_v45, %s7077_s30 }
  0x6d   :  { %6188 = vrot.lane.b32.xlu1 %v6177_v44, %s7077_s30 }
  0x70   :  { %395 = vrot.lane.b32.xlu0 %v7242_v40, %s7073_s18 }
  0x71   :  { %397 = vrot.lane.b32.xlu1 %v7245_v41, %s7073_s18 }
  0x74   :  { %6193 = vrot.lane.b32.xlu0 %v6162_v43, %s7074_s27 }
  0x75   :  { %6198 = vrot.lane.b32.xlu1 %v6167_v42, %s7074_s27 }
  0x76   :  { %v7271_v50 = vpop.permute.xlu0 %5988 }
  0x77   :  { %v5984_v48 = vpop.permute.xlu1 %5983  ;;  %v5991_v55 = vunpack.i.h.bf16 %v7271_v50  ;;  %v5990_v56 = vunpack.i.l.bf16 %v7271_v50 }
  0x78   :  { %1052 = vrot.lane.b32.xlu0 %v7195_v29, %s7078_s3  ;;  %v5985_v54 = vunpack.i.l.bf16 %v5984_v48  ;;  %v5986_v59 = vunpack.i.h.bf16 %v5984_v48 }
  0x79   :  { %1054 = vrot.lane.b32.xlu1 %v7242_v40, %s7078_s3  ;;  %v300_v3 = vsel %vm10391_vm1, %v5990_v56, %v5991_v55 }
  0x7a   :  { %v7279_v57 = vpop.permute.xlu0 %5993  ;;  %v299_v63 = vsel %vm10391_vm1, %v5985_v54, %v5990_v56 }
  0x7b   :  { %v384_v51 = vpop.permute.xlu1 %383  ;;  %v5996_v60 = vunpack.i.h.bf16 %v7279_v57  ;;  %v5995_v61 = vunpack.i.l.bf16 %v7279_v57  ;;  %v10387_v57 = vmov 0.0  }
  0x7c   :  { %6203 = vrot.lane.b32.xlu0 %v6162_v43, %s7075_s28 }
  0x7d   :  { %6208 = vrot.lane.b32.xlu1 %v6167_v42, %s7075_s28  ;;  %v307_v4 = vsel %vm10391_vm1, %v5986_v59, %v5995_v61  ;;  %v308_v5 = vsel %vm10391_vm1, %v5995_v61, %v5996_v60 }
  0x7e   :  { %v7300_v11 = vpop.permute.xlu0 %385  ;;  %v5396_v13 = vpack.c.bf16 %v308_v5, %v300_v3  ;;  %v5399_v15 = vpack.c.bf16 %v307_v4, %v299_v63 }
  0x7f   :  { %v382_v58 = vpop.permute.xlu1 %381  ;;  %v401_v21 = vsel %vm10395_vm0, %v384_v51, %v7300_v11 }
  0x80   :  { %6213 = vrot.lane.b32.xlu0 %v6172_v45, %s7079_s12  ;;  %5397 = vmatprep.subr.msk.bf16.mxu0 %vm7296_vm4, %v5396_v13  ;;  %v400_v28 = vsel %vm10395_vm0, %v382_v58, %v384_v51  ;;  %v47_v45 = vand.u32 31, %v7336_v32 }
  0x81   :  { %6218 = vrot.lane.b32.xlu1 %v6177_v44, %s7079_s12  ;;  %5400 = vmatpush1.bf16.msk.msra.mxu0 %vm7304_vm5, %v5399_v15 }
  0x82   :  { %v7323_v22 = vpop.permute.xlu0 %5998  ;;  %1325 = vmatprep.subr.bf16.mxu0 %v401_v21  ;;  %vm7380_vm12 = vcmp.ge.s32.totalorder %v47_v45, 1  ;;  %vm129_vm7 = vcmp.le.s32.totalorder %v47_v45, 30 }
  0x83   :  { %v7302_v12 = vpop.permute.xlu1 %6003  ;;  %v6001_v25 = vunpack.i.h.bf16 %v7323_v22  ;;  %v6000_v27 = vunpack.i.l.bf16 %v7323_v22  ;;  %vm7429_vm15 = vmpackc.low %vm7380_vm12, %vm7380_vm12  ;;  %vm10393_vm12 = vcmask 785408  }
  0x84   :  { %v6006_v16 = vunpack.i.h.bf16 %v7302_v12  ;;  %v6005_v19 = vunpack.i.l.bf16 %v7302_v12  ;;  %6223 = vrot.lane.b32.xlu0 %v7315_v20, %s7076_s29  ;;  %vm7524_vm13 = vmpackc.low %vm129_vm7, %vm129_vm7  ;;  %v10561_v12 = vmov 0  ;;  %vm10392_vm7 = vcmask 777216  }
  0x85   :  { %6228 = vrot.lane.b32.xlu1 %v7286_v62, %s7076_s29  ;;  %v523_v34 = vsel %vm10396_vm6, %v6000_v27, %v6001_v25  ;;  %1326 = vmatpush1.bf16.msra.mxu0 %v400_v28 }
  0x86   :  { %v531_v24 = vsel %vm10396_vm6, %v6005_v19, %v6006_v16  ;;  %v6009_v36 = vpop.permute.xlu0 %6008 }
  0x87   :  { %v7325_v23 = vpop.permute.xlu1 %6013  ;;  %v5402_v38 = vpack.c.bf16 %v531_v24, %v523_v34  ;;  %v6011_v39 = vunpack.i.h.bf16 %v6009_v36  ;;  %v6010_v42 = vunpack.i.l.bf16 %v6009_v36 }
  0x88   :  { %v6016_v43 = vunpack.i.h.bf16 %v7325_v23  ;;  %v6015_v44 = vunpack.i.l.bf16 %v7325_v23  ;;  %6233 = vrot.lane.b32.xlu0 %v7315_v20, %s7077_s30 }
  0x89   :  { %6238 = vrot.lane.b32.xlu1 %v7286_v62, %s7077_s30  ;;  %5403 = vmatprep.subr.msk.bf16.mxu0 %vm7346_vm8, %v5402_v38  ;;  %v530_v48 = vsel %vm10396_vm6, %v6011_v39, %v6005_v19  ;;  %v522_v49 = vsel %vm10396_vm6, %v6010_v42, %v6000_v27 }
  0x8a   :  { %v7366_v54 = vpop.permute.xlu0 %6018  ;;  %v5405_v58 = vpack.c.bf16 %v530_v48, %v522_v49  ;;  %v669_v13 = vsel %vm10390_vm11, %v6015_v44, %v6016_v43  ;;  %v10557_v49 = vmov 0 }
  0x8b   :  { %v6024_v37 = vpop.permute.xlu1 %6023  ;;  %v6021_v59 = vunpack.i.h.bf16 %v7366_v54  ;;  %v6020_v61 = vunpack.i.l.bf16 %v7366_v54  ;;  %v10558_v49 = vsel %vm7442_vm2, 4294967295, %v10557_v49 }
  0x8c   :  { %v6026_v51 = vunpack.i.h.bf16 %v6024_v37  ;;  %v6025_v52 = vunpack.i.l.bf16 %v6024_v37  ;;  %1056 = vrot.lane.b32.xlu0 %v7245_v41, %s7078_s3  ;;  %5406 = vmatpush1.bf16.msk.msra.mxu0 %vm7362_vm10, %v5405_v58 }
  0x8d   :  { %1058 = vrot.lane.b32.xlu1 %v10385_v0, %s7078_s3  ;;  %v677_v21 = vsel %vm10390_vm11, %v6020_v61, %v6021_v59 }
  0x8e   :  { %v668_v15 = vsel %vm10390_vm11, %v6025_v52, %v6015_v44  ;;  %v676_v19 = vsel %vm10390_vm11, %v6026_v51, %v6020_v61  ;;  %v7403_v27 = vpop.permute.xlu0 %6028  ;;  %v5408_v34 = vpack.c.bf16 %v677_v21, %v669_v13 }
  0x8f   :  { %v7368_v56 = vpop.permute.xlu1 %6033  ;;  %v5411_v36 = vpack.c.bf16 %v676_v19, %v668_v15  ;;  %v6031_v37 = vunpack.i.h.bf16 %v7403_v27  ;;  %v6030_v38 = vunpack.i.l.bf16 %v7403_v27 }
  0x90   :  { %v6036_v63 = vunpack.i.h.bf16 %v7368_v56  ;;  %v6035_v3 = vunpack.i.l.bf16 %v7368_v56  ;;  %6243 = vrot.lane.b32.xlu0 %v7315_v20, %s7079_s12  ;;  %5409 = vmatprep.subr.msk.bf16.mxu0 %vm7296_vm4, %v5408_v34  ;;  %v10555_v20 = vmov 0 }
  0x91   :  { %6248 = vrot.lane.b32.xlu1 %v7286_v62, %s7079_s12  ;;  %v301_v44 = vsel %vm10391_vm1, %v5991_v55, %v6030_v38  ;;  %v302_v48 = vsel %vm10391_vm1, %v6030_v38, %v6031_v37  ;;  %5412 = vmatpush1.bf16.msk.msra.mxu0 %vm7304_vm5, %v5411_v36  ;;  %v10556_v20 = vsel %vm7429_vm15, 4294967295, %v10555_v20 }
  0x92   :  { %v310_v24 = vsel %vm10391_vm1, %v6035_v3, %v6036_v63  ;;  %v309_v62 = vsel %vm10391_vm1, %v5996_v60, %v6035_v3  ;;  %v7435_v50 = vpop.permute.xlu0 %6038  ;;  %1331 = vmatprep.subr.bf16.mxu0 %v7124_v10 }
  0x93   :  { %v7405_v28 = vpop.permute.xlu1 %6043  ;;  %v5432_v60 = vpack.c.bf16 %v310_v24, %v302_v48  ;;  %v5435_v51 = vpack.c.bf16 %v309_v62, %v301_v44  ;;  %v6041_v58 = vunpack.i.h.bf16 %v7435_v50  ;;  %v6040_v61 = vunpack.i.l.bf16 %v7435_v50 }
  0x94   :  { %v6046_v39 = vunpack.i.h.bf16 %v7405_v28  ;;  %v6045_v42 = vunpack.i.l.bf16 %v7405_v28  ;;  %6258 = vrot.lane.b32.xlu0 %v7122_v9, %s7072_s17 }
  0x95   :  { %6253 = vrot.lane.b32.xlu1 %v10387_v57, %s7072_s17  ;;  %5433 = vmatprep.subr.msk.bf16.mxu1 %vm7429_vm15, %v5432_v60  ;;  %v815_v3 = vsel %vm10389_vm14, %v6040_v61, %v6041_v58 }
  0x96   :  { %v823_v52 = vsel %vm10389_vm14, %v6045_v42, %v6046_v39  ;;  %5436 = vmatpush1.bf16.msk.msra.mxu1 %vm7442_vm2, %v5435_v51  ;;  %1332 = vmatpush1.bf16.msra.mxu0 %v7116_v8  ;;  %v6049_v10 = vpop.permute.xlu0 %6048 }
  0x97   :  { %v7437_v55 = vpop.permute.xlu1 %6053  ;;  %v5414_v5 = vpack.c.bf16 %v823_v52, %v815_v3  ;;  %v6051_v13 = vunpack.i.h.bf16 %v6049_v10  ;;  %v6050_v15 = vunpack.i.l.bf16 %v6049_v10 }
  0x98   :  { %v6056_v19 = vunpack.i.h.bf16 %v7437_v55  ;;  %v6055_v21 = vunpack.i.l.bf16 %v7437_v55  ;;  %6268 = vrot.lane.b32.xlu0 %v7122_v9, %s7074_s27 }
  0x99   :  { %1698 = vrot.lane.b32.xlu1 %v10385_v0, %s7073_s18  ;;  %5415 = vmatprep.subr.msk.bf16.mxu0 %vm7346_vm8, %v5414_v5  ;;  %v822_v24 = vsel %vm10389_vm14, %v6051_v13, %v6045_v42  ;;  %v814_v34 = vsel %vm10389_vm14, %v6050_v15, %v6040_v61 }
  0x9a   :  { %v7468_v8 = vpop.permute.xlu0 %6058  ;;  %v5417_v38 = vpack.c.bf16 %v822_v24, %v814_v34  ;;  %v961_v42 = vsel %vm10384_vm3, %v6055_v21, %v6056_v19 }
  0x9b   :  { %v388_v4 = vpop.permute.xlu1 %387  ;;  %v6061_v62 = vunpack.i.h.bf16 %v7468_v8  ;;  %v6060_v44 = vunpack.i.l.bf16 %v7468_v8 }
  0x9c   :  { %5418 = vmatpush1.bf16.msk.msra.mxu0 %vm7362_vm10, %v5417_v38 }
  0x9d   :  { %6263 = vrot.lane.b32.xlu1 %v10387_v57, %s7074_s27  ;;  %v969_v51 = vsel %vm10384_vm3, %v6060_v44, %v6061_v62 }
  0x9e   :  { %v7484_v3 = vpop.permute.xlu0 %389  ;;  %v5420_v5 = vpack.c.bf16 %v969_v51, %v961_v42 }
  0x9f   :  { %v6064_v36 = vpop.permute.xlu1 %6063  ;;  %v403_v24 = vsel %vm10395_vm0, %v388_v4, %v7484_v3 }
  0xa0   :  { %v6066_v48 = vunpack.i.h.bf16 %v6064_v36  ;;  %v6065_v60 = vunpack.i.l.bf16 %v6064_v36  ;;  %5421 = vmatprep.subr.msk.bf16.mxu0 %vm7296_vm4, %v5420_v5  ;;  %1366 = vmatprep.subr.bf16.mxu1 %v403_v24 }
  0xa1   :  { %6278 = vrot.lane.b32.xlu1 %v7122_v9, %s7075_s28 }
  0xa2   :  { %v960_v52 = vsel %vm10384_vm3, %v6065_v60, %v6055_v21  ;;  %v968_v61 = vsel %vm10384_vm3, %v6066_v48, %v6060_v44  ;;  %v402_v21 = vsel %vm10395_vm0, %v7300_v11, %v388_v4  ;;  %v7500_v36 = vpop.permute.xlu0 %6068  ;;  %v10559_v60 = vmov 0  ;;  %vm7530_vm3 = vmpackc.low %vm128_vm9, %vm128_vm9 }
  0xa3   :  { %v7486_v10 = vpop.permute.xlu1 %6073  ;;  %v5423_v13 = vpack.c.bf16 %v968_v61, %v960_v52  ;;  %1367 = vmatpush1.bf16.msra.mxu1 %v402_v21  ;;  %v6071_v4 = vunpack.i.h.bf16 %v7500_v36  ;;  %v6070_v44 = vunpack.i.l.bf16 %v7500_v36  ;;  %v10560_v60 = vsel %vm7524_vm13, 4294967295, %v10559_v60 }
  0xa4   :  { %v6076_v15 = vunpack.i.h.bf16 %v7486_v10  ;;  %v6075_v34 = vunpack.i.l.bf16 %v7486_v10  ;;  %v10562_v12 = vsel %vm7530_vm3, 4294967295, %v10561_v12  ;;  %v10577_v10 = vmov 0 }
  0xa5   :  { %5424 = vmatpush1.bf16.msk.msra.mxu0 %vm7304_vm5, %v5423_v13  ;;  %6283 = vrot.lane.b32.xlu1 %v10387_v57, %s7072_s17  ;;  %v524_v45 = vsel %vm10396_vm6, %v6001_v25, %v6070_v44  ;;  %v525_v48 = vsel %vm10396_vm6, %v6070_v44, %v6071_v4 }
  0xa6   :  { %v533_v11 = vsel %vm10396_vm6, %v6075_v34, %v6076_v15  ;;  %v532_v32 = vsel %vm10396_vm6, %v6006_v16, %v6075_v34  ;;  %v1045_v42 = vpop.permute.xlu0 %1044 }
  0xa7   :  { %v7502_v38 = vpop.permute.xlu1 %1046  ;;  %v5438_v46 = vpack.c.bf16 %v533_v11, %v525_v48  ;;  %v5441_v16 = vpack.c.bf16 %v532_v32, %v524_v45 }
  0xa8   :  { %v1062_v25 = vsel %vm10393_vm12, %v1045_v42, %v7502_v38 }
  0xa9   :  { %6288 = vrot.lane.b32.xlu1 %v10387_v57, %s7076_s29  ;;  %1337 = vmatprep.subr.bf16.mxu0 %v1062_v25 }
  0xaa   :  { %5439 = vmatprep.subr.msk.bf16.mxu1 %vm7524_vm13, %v5438_v46  ;;  %v7544_v52 = vpop.permute.xlu0 %6078 }
  0xab   :  { %v7528_v33 = vpop.permute.xlu1 %6083  ;;  %5442 = vmatpush1.bf16.msk.msra.mxu1 %vm7530_vm3, %v5441_v16  ;;  %v6081_v13 = vunpack.i.h.bf16 %v7544_v52  ;;  %v6080_v24 = vunpack.i.l.bf16 %v7544_v52 }
  0xac   :  { %v6086_v22 = vunpack.i.h.bf16 %v7528_v33  ;;  %v6085_v51 = vunpack.i.l.bf16 %v7528_v33 }
  0xad   :  { %6298 = vrot.lane.b32.xlu1 %v10387_v57, %s7074_s27  ;;  %v670_v34 = vsel %vm10390_vm11, %v6016_v43, %v6080_v24  ;;  %v671_v11 = vsel %vm10390_vm11, %v6080_v24, %v6081_v13 }
  0xae   :  { %v679_v5 = vsel %vm10390_vm11, %v6085_v51, %v6086_v22  ;;  %v678_v21 = vsel %vm10390_vm11, %v6021_v59, %v6085_v51  ;;  %v1043_v44 = vpop.permute.xlu0 %1042 }
  0xaf   :  { %v7546_v61 = vpop.permute.xlu1 %6088  ;;  %v5444_v45 = vpack.c.bf16 %v679_v5, %v671_v11  ;;  %v5447_v48 = vpack.c.bf16 %v678_v21, %v670_v34  ;;  %v1061_v46 = vsel %vm10393_vm12, %v1043_v44, %v1045_v42  ;;  %v7579_v42 = vadd.s32 640, %v7262_v47 }
  0xb0   :  { %v6091_v54 = vunpack.i.h.bf16 %v7546_v61  ;;  %v6090_v59 = vunpack.i.l.bf16 %v7546_v61  ;;  %1338 = vmatpush1.bf16.msra.mxu0 %v1061_v46  ;;  %v7590_v34 = vadd.s32 512, %v7262_v47 }
  0xb1   :  { %6303 = vrot.lane.b32.xlu1 %v10387_v57, %s7075_s28  ;;  %5445 = vmatprep.subr.msk.bf16.mxu1 %vm7429_vm15, %v5444_v45 }
  0xb2   :  { %5448 = vmatpush1.bf16.msk.msra.mxu1 %vm7442_vm2, %v5447_v48  ;;  %v7573_v16 = vpop.permute.xlu0 %6093  ;;  %v1168_v21 = vsel %vm10392_vm7, %v6090_v59, %v6091_v54 }
  0xb3   :  { %v6099_v32 = vpop.permute.xlu1 %6098  ;;  %1372 = vmatprep.subr.bf16.mxu1 %v7151_v18  ;;  %v6096_v51 = vunpack.i.h.bf16 %v7573_v16  ;;  %v6095_v5 = vunpack.i.l.bf16 %v7573_v16 }
  0xb4   :  { %v6101_v23 = vunpack.i.h.bf16 %v6099_v32  ;;  %v6100_v43 = vunpack.i.l.bf16 %v6099_v32 }
  0xb5   :  { %6313 = vrot.lane.b32.xlu1 %v10387_v57, %s7076_s29  ;;  %v1176_v44 = vsel %vm10392_vm7, %v6095_v5, %v6096_v51  ;;  %v61_v57 = vand.u32 31, %v7579_v42 }
  0xb6   :  { %v1167_v18 = vsel %vm10392_vm7, %v6100_v43, %v6090_v59  ;;  %v1175_v11 = vsel %vm10392_vm7, %v6101_v23, %v6095_v5  ;;  %1373 = vmatpush1.bf16.msra.mxu1 %v7146_v17  ;;  %v7599_v45 = vpop.permute.xlu0 %6103  ;;  %v5426_v46 = vpack.c.bf16 %v1176_v44, %v1168_v21  ;;  %v7614_v17 = vcombine.low %v7200_v30, %v7200_v30 }
  0xb7   :  { %v7575_v25 = vpop.permute.xlu1 %6108  ;;  %v5429_v0 = vpack.c.bf16 %v1175_v11, %v1167_v18  ;;  %v6106_v23 = vunpack.i.h.bf16 %v7599_v45  ;;  %v6105_v43 = vunpack.i.l.bf16 %v7599_v45  ;;  %v54_v21 = vand.u32 31, %v7590_v34 }
  0xb8   :  { %v6111_v24 = vunpack.i.h.bf16 %v7575_v25  ;;  %v6110_v32 = vunpack.i.l.bf16 %v7575_v25  ;;  %5427 = vmatprep.subr.msk.bf16.mxu0 %vm7346_vm8, %v5426_v46  ;;  %vm123_vm9 = vcmp.ge.s32.totalorder %v61_v57, 1 }
  0xb9   :  { %v816_v18 = vsel %vm10389_vm14, %v6041_v58, %v6105_v43  ;;  %v817_v11 = vsel %vm10389_vm14, %v6105_v43, %v6106_v23  ;;  %5430 = vmatpush1.bf16.msk.msra.mxu0 %vm7362_vm10, %v5429_v0  ;;  %vm7659_vm11 = vmpackc.low %vm123_vm9, %vm123_vm9 }
  0xba   :  { %v825_v59 = vsel %vm10389_vm14, %v6110_v32, %v6111_v24  ;;  %v824_v42 = vsel %vm10389_vm14, %v6046_v39, %v6110_v32  ;;  %v7629_v30 = vpop.permute.xlu0 %6113  ;;  %1403 = vmatprep.subr.bf16.mxu0 %v10414_v6  ;;  %vm7643_vm14 = vcmp.ge.s32.totalorder %v54_v21, 1 }
  0xbb   :  { %v7601_v48 = vpop.permute.xlu1 %6118  ;;  %v5450_v28 = vpack.c.bf16 %v825_v59, %v817_v11  ;;  %v5453_v39 = vpack.c.bf16 %v824_v42, %v816_v18  ;;  %v6116_v58 = vunpack.i.h.bf16 %v7629_v30  ;;  %v6115_v32 = vunpack.i.l.bf16 %v7629_v30  ;;  %vm7678_vm9 = vmpackc.low %vm7643_vm14, %vm7643_vm14 }
  0xbc   :  { %v6121_v5 = vunpack.i.h.bf16 %v7601_v48  ;;  %v6120_v44 = vunpack.i.l.bf16 %v7601_v48  ;;  %1354 = vmatmul.mubr.bf16.vlgmr.msra.gmra.mrb[0].mxu0 %v7614_v17  ;;  %v10565_v11 = vmov 0  ;;  %vm131_vm14 = vcmp.le.s32.totalorder %v61_v57, 30 }
  0xbd   :  { %5451 = vmatprep.subr.msk.bf16.mxu1 %vm7524_vm13, %v5450_v28  ;;  %v303_v43 = vsel %vm10391_vm1, %v6031_v37, %v6115_v32  ;;  %v304_v42 = vsel %vm10391_vm1, %v6115_v32, %v6116_v58  ;;  %v10566_v11 = vsel %vm7659_vm11, 4294967295, %v10565_v11  ;;  %1404 = vmatpush1.bf16.msra.mxu0 %v10414_v6  ;;  %v10569_v32 = vmov 0 }
  0xbe   :  { %v312_v50 = vsel %vm10391_vm1, %v6120_v44, %v6121_v5  ;;  %v311_v59 = vsel %vm10391_vm1, %v6036_v63, %v6120_v44  ;;  %5454 = vmatpush1.bf16.msk.msra.mxu1 %vm7530_vm3, %v5453_v39  ;;  %10567 = vst [vmem:[#allocation7_spill] sm:$0xff] %v10566_v11  ;;  %v7664_v63 = vpop.permute.xlu0 %6123  ;;  %5372 = vmatprep.mubr.msk.bf16.mxu0 %vm10395_vm0, %v7204_v31  ;;  %vm10568_vm1 = vcmask 793600   ;;  %v10570_v32 = vsel %vm7678_vm9, 4294967295, %v10569_v32 }
  0xbf   :  { %v7631_v34 = vpop.permute.xlu1 %6128  ;;  %v5471_v56 = vpack.c.bf16 %v311_v59, %v303_v43  ;;  %v5468_v37 = vpack.c.bf16 %v312_v50, %v304_v42  ;;  %v6126_v28 = vunpack.i.h.bf16 %v7664_v63  ;;  %v6125_v39 = vunpack.i.l.bf16 %v7664_v63  ;;  %10571 = vst [vmem:[#allocation8_spill] sm:$0xff] %v10570_v32  ;;  %vm10572_vm7 = vmmov %vm10568_vm1 }
  0xc0   :  { %v10394_v46 = vunpack.i.h.bf16 %v7631_v34  ;;  %v6130_v18 = vunpack.i.l.bf16 %v7631_v34  ;;  %vm10573_vm12 = vmmov %vm10568_vm1 }
  0xc1   :  { %5469 = vmatprep.subr.msk.bf16.mxu0 %vm7659_vm11, %v5468_v37  ;;  %v962_v59 = vsel %vm10568_vm1, %v6056_v19, %v6125_v39  ;;  %v963_v0 = vsel %vm10573_vm12, %v6125_v39, %v6126_v28  ;;  %vm130_vm12 = vcmp.le.s32.totalorder %v54_v21, 30 }
  0xc2   :  { %v971_v44 = vsel %vm10568_vm1, %v6130_v18, %v10394_v46  ;;  %v970_v50 = vsel %vm10572_vm7, %v6061_v62, %v6130_v18  ;;  %5472 = vmatpush1.bf16.msk.msra.mxu0 %vm7678_vm9, %v5471_v56  ;;  %v392_v43 = vpop.permute.xlu0 %391  ;;  %vm7725_vm7 = vmpackc.low %vm131_vm14, %vm131_vm14 }
  0xc3   :  { %v7666_v27 = vpop.permute.xlu1 %393  ;;  %v5456_v46 = vpack.c.bf16 %v971_v44, %v963_v0  ;;  %v5459_v37 = vpack.c.bf16 %v970_v50, %v962_v59  ;;  %v404_v55 = vsel %vm10395_vm0, %v7484_v3, %v392_v43  ;;  %v10574_v59 = vmov 0  ;;  %vm7731_vm1 = vmpackc.low %vm130_vm12, %vm130_vm12 }
  0xc4   :  { %v405_v62 = vsel %vm10395_vm0, %v392_v43, %v7666_v27  ;;  %v10575_v59 = vsel %vm7725_vm7, 4294967295, %v10574_v59  ;;  %v10578_v10 = vsel %vm7731_vm1, 4294967295, %v10577_v10  ;;  %vm10580_vm0 = vcmask 785408  }
  0xc5   :  { %5457 = vmatprep.subr.msk.bf16.mxu1 %vm7429_vm15, %v5456_v46  ;;  %1407 = vmatprep.subr.bf16.mxu0 %v405_v62  ;;  %10576 = vst [vmem:[#allocation9_spill] sm:$0xff] %v10575_v59  ;;  %10579 = vst [vmem:[#allocation10_spill] sm:$0xff] %v10578_v10 }
  0xc6   :  { %5460 = vmatpush1.bf16.msk.msra.mxu1 %vm7442_vm2, %v5459_v37  ;;  %1408 = vmatpush1.bf16.msra.mxu0 %v404_v55  ;;  %v7707_v18 = vpop.permute.xlu0 %6133 }
  0xc7   :  { %v7695_v42 = vpop.permute.xlu1 %6138  ;;  %v10398_v3 = vunpack.i.h.bf16 %v7707_v18  ;;  %v6135_v46 = vunpack.i.l.bf16 %v7707_v18 }
  0xc8   :  { %v10399_v8 = vunpack.i.h.bf16 %v7695_v42  ;;  %v6140_v19 = vunpack.i.l.bf16 %v7695_v42 }
  0xc9   :  { %v526_v50 = vsel %vm10396_vm6, %v6071_v4, %v6135_v46  ;;  %v527_v57 = vsel %vm10396_vm6, %v6135_v46, %v10398_v3 }
  0xca   :  { %v535_v44 = vsel %vm10396_vm6, %v6140_v19, %v10399_v8  ;;  %v534_v39 = vsel %vm10396_vm6, %v6076_v15, %v6140_v19  ;;  %v1049_v43 = vpop.permute.xlu0 %1048  ;;  %vm10581_vm6 = vmmov %vm10580_vm0 }
  0xcb   :  { %v7709_v56 = vpop.permute.xlu1 %1050  ;;  %v5477_v0 = vpack.c.bf16 %v534_v39, %v526_v50  ;;  %v5474_v21 = vpack.c.bf16 %v535_v44, %v527_v57  ;;  %v1063_v4 = vsel %vm10581_vm6, %v7502_v38, %v1049_v43  ;;  %v7750_v44 = vadd.s32 896, %v7262_v47 }
  0xcc   :  { %v1064_v36 = vsel %vm10580_vm0, %v1049_v43, %v7709_v56  ;;  %vm10582_vm0 = vcmask 777216   ;;  %v7759_v57 = vadd.s32 768, %v7262_v47 }
  0xcd   :  { %1378 = vmatprep.subr.bf16.mxu1 %v1064_v36  ;;  %5475 = vmatprep.subr.msk.bf16.mxu0 %vm7725_vm7, %v5474_v21  ;;  %vm10583_vm6 = vmmov %vm10582_vm0  ;;  %v75_v8 = vand.u32 31, %v7750_v44  ;;  %v10618_v44 = vmov 0 }
  0xce   :  { %1379 = vmatpush1.bf16.msra.mxu1 %v1063_v4  ;;  %5478 = vmatpush1.bf16.msk.msra.mxu0 %vm7731_vm1, %v5477_v0  ;;  %v7745_v55 = vpop.permute.xlu0 %6143  ;;  %vm10584_vm14 = vmmov %vm10582_vm0 }
  0xcf   :  { %v7729_v37 = vpop.permute.xlu1 %6148  ;;  %v10400_v46 = vunpack.i.h.bf16 %v7745_v55  ;;  %v6145_v39 = vunpack.i.l.bf16 %v7745_v55  ;;  %vm10585_vm12 = vmmov %vm10582_vm0 }
  0xd0   :  { %v10397_v15 = vunpack.i.h.bf16 %v7729_v37  ;;  %v6150_v62 = vunpack.i.l.bf16 %v7729_v37 }
  0xd1   :  { %v1169_v43 = vsel %vm10584_vm14, %v6091_v54, %v6145_v39  ;;  %v1170_v21 = vsel %vm10585_vm12, %v6145_v39, %v10400_v46 }
  0xd2   :  { %v1178_v38 = vsel %vm10582_vm0, %v6150_v62, %v10397_v15  ;;  %v1177_v0 = vsel %vm10583_vm6, %v6096_v51, %v6150_v62  ;;  %v7771_v4 = vpop.permute.xlu0 %6153  ;;  %vm10586_vm0 = vcmask 7168   ;;  %v68_v62 = vand.u32 31, %v7759_v57 }
  0xd3   :  { %v7747_v19 = vpop.permute.xlu1 %6158  ;;  %v5462_v3 = vpack.c.bf16 %v1178_v38, %v1170_v21  ;;  %v5465_v47 = vpack.c.bf16 %v1177_v0, %v1169_v43  ;;  %v6156_v61 = vunpack.i.h.bf16 %v7771_v4  ;;  %v6155_v54 = vunpack.i.l.bf16 %v7771_v4  ;;  %vm10587_vm6 = vmmov %vm10586_vm0 }
  0xd4   :  { %v10401_v50 = vunpack.i.h.bf16 %v7747_v19  ;;  %v6160_v36 = vunpack.i.l.bf16 %v7747_v19  ;;  %vm10588_vm14 = vmmov %vm10586_vm0  ;;  %v10621_v57 = vmov 0  ;;  %v10632_v4 = vunpack.i.h.bf16 %v7729_v37 }
  0xd5   :  { %5463 = vmatprep.subr.msk.bf16.mxu1 %vm7524_vm13, %v5462_v3  ;;  %v672_v39 = vsel %vm10588_vm14, %v6081_v13, %v6155_v54  ;;  %vm10589_vm12 = vmmov %vm10586_vm0  ;;  %vm7805_vm14 = vcmp.ge.s32.totalorder %v68_v62, 1 }
  0xd6   :  { %v681_v16 = vsel %vm10586_vm0, %v6160_v36, %v10401_v50  ;;  %v680_v38 = vsel %vm10587_vm6, %v6086_v22, %v6160_v36  ;;  %v673_v0 = vsel %vm10589_vm12, %v6155_v54, %v6156_v61  ;;  %5466 = vmatpush1.bf16.msk.msra.mxu1 %vm7530_vm3, %v5465_v47  ;;  %v6164_v3 = vpop.permute.xlu0 %6163  ;;  %vm125_vm0 = vcmp.ge.s32.totalorder %v75_v8, 1 }
  0xd7   :  { %v6169_v15 = vpop.permute.xlu1 %6168  ;;  %v5483_v21 = vpack.c.bf16 %v680_v38, %v672_v39  ;;  %v5480_v50 = vpack.c.bf16 %v681_v16, %v673_v0  ;;  %1444 = vmatprep.subr.bf16.mxu1 %v10414_v6  ;;  %vm10590_vm6 = vcmask 269312   ;;  %v6166_v22 = vunpack.i.h.bf16 %v6164_v3  ;;  %vm7819_vm13 = vmpackc.low %vm125_vm0, %vm125_vm0 }
  0xd8   :  { %v6171_v51 = vunpack.i.h.bf16 %v6169_v15  ;;  %v6170_v43 = vunpack.i.l.bf16 %v6169_v15  ;;  %v6165_v52 = vunpack.i.l.bf16 %v6164_v3  ;;  %vm10593_vm12 = vmmov %vm10590_vm6 }
  0xd9   :  { %1395 = vmatmul.mubr.bf16.vlgmr.msra.gmra.mrb[0].mxu1 %v7614_v17  ;;  %5481 = vmatprep.subr.msk.bf16.mxu0 %vm7659_vm11, %v5480_v50  ;;  %vm10594_vm3 = vmmov %vm10590_vm6  ;;  %v10595_v50 = vmov 0 }
  0xda   :  { %v314_v33 = vsel %vm10590_vm6, %v6170_v43, %v6171_v51  ;;  %v313_v36 = vsel %vm10593_vm12, %v6121_v5, %v6170_v43  ;;  %v305_v47 = vsel %vm10590_vm6, %v6116_v58, %v6165_v52  ;;  %v306_v16 = vsel %vm10594_vm3, %v6165_v52, %v6166_v22  ;;  %5484 = vmatpush1.bf16.msk.msra.mxu0 %vm7678_vm9, %v5483_v21  ;;  %v7824_v48 = vpop.permute.xlu0 %6173  ;;  %vm7838_vm0 = vmpackc.low %vm7805_vm14, %vm7805_vm14 }
  0xdb   :  { %v7793_v46 = vpop.permute.xlu1 %6178  ;;  %v10596_v50 = vsel %vm7819_vm13, 4294967295, %v10595_v50  ;;  %v5507_v51 = vpack.c.bf16 %v313_v36, %v305_v47  ;;  %1445 = vmatpush1.bf16.msra.mxu1 %v10414_v6  ;;  %1413 = vmatprep.subr.bf16.mxu0 %v7195_v29  ;;  %v5504_v30 = vpack.c.bf16 %v314_v33, %v306_v16  ;;  %vm10598_vm3 = vcmask 1039360  }
  0xdc   :  { %v6181_v13 = vunpack.i.h.bf16 %v7793_v46  ;;  %v6180_v54 = vunpack.i.l.bf16 %v7793_v46  ;;  %10597 = vst [vmem:[#allocation11_spill] sm:$0xff] %v10596_v50  ;;  %v6176_v38 = vunpack.i.h.bf16 %v7824_v48  ;;  %v6175_v39 = vunpack.i.l.bf16 %v7824_v48  ;;  %vm10603_vm6 = vmmov %vm10598_vm3 }
  0xdd   :  { %v10599_v43 = vmov 0  ;;  %vm10602_vm12 = vcmask 261120   ;;  %5505 = vmatprep.subr.msk.bf16.mxu1 %vm7819_vm13, %v5504_v30  ;;  %vm10604_vm14 = vmmov %vm10598_vm3 }
  0xde   :  { %v827_v58 = vsel %vm10598_vm3, %v6180_v54, %v6181_v13  ;;  %v10600_v43 = vsel %vm7838_vm0, 4294967295, %v10599_v43  ;;  %5373 = vmatprep.mubr.msk.bf16.mxu1 %vm10602_vm12, %v7204_v31  ;;  %v826_v29 = vsel %vm10603_vm6, %v6111_v24, %v6180_v54  ;;  %v818_v21 = vsel %vm10598_vm3, %v6106_v23, %v6175_v39  ;;  %1414 = vmatpush1.bf16.msra.mxu0 %v7185_v26  ;;  %v7859_v22 = vpop.permute.xlu0 %6183 }
  0xdf   :  { %v7826_v5 = vpop.permute.xlu1 %6188  ;;  %10601 = vst [vmem:[#allocation12_spill] sm:$0xff] %v10600_v43  ;;  %v819_v3 = vsel %vm10604_vm14, %v6175_v39, %v6176_v38  ;;  %v5489_v31 = vpack.c.bf16 %v826_v29, %v818_v21  ;;  %5508 = vmatpush1.bf16.msk.msra.mxu1 %vm7838_vm0, %v5507_v51  ;;  %vm10605_vm12 = vcmask 793600   ;;  %v6186_v23 = vunpack.i.h.bf16 %v7859_v22 }
  0xe0   :  { %v6191_v0 = vunpack.i.h.bf16 %v7826_v5  ;;  %v6190_v33 = vunpack.i.l.bf16 %v7826_v5  ;;  %v5486_v24 = vpack.c.bf16 %v827_v58, %v819_v3  ;;  %v6185_v52 = vunpack.i.l.bf16 %v7859_v22  ;;  %vm10607_vm6 = vmmov %vm10605_vm12 }
  0xe1   :  { %v10606_v26 = vunpack.i.h.bf16 %v7631_v34  ;;  %vm10608_vm3 = vmmov %vm10607_vm6 }
  0xe2   :  { %v973_v45 = vsel %vm10605_vm12, %v6190_v33, %v6191_v0  ;;  %5487 = vmatprep.subr.msk.bf16.mxu0 %vm7725_vm7, %v5486_v24  ;;  %v964_v36 = vsel %vm10608_vm3, %v6126_v28, %v6185_v52  ;;  %vm10609_vm14 = vmmov %vm10608_vm3  ;;  %v396_v54 = vpop.permute.xlu0 %395  ;;  %vm10610_vm12 = vcmask 261120   ;;  %vm133_vm3 = vcmp.le.s32.totalorder %v75_v8, 30 }
  0xe3   :  { %v398_v25 = vpop.permute.xlu1 %397  ;;  %v972_v15 = vsel %vm10607_vm6, %v10606_v26, %v6190_v33  ;;  %v965_v47 = vsel %vm10609_vm14, %v6185_v52, %v6186_v23  ;;  %5490 = vmatpush1.bf16.msk.msra.mxu0 %vm7731_vm1, %v5489_v31  ;;  %vm10611_vm6 = vmmov %vm10610_vm12  ;;  %vm10612_vm14 = vcmask 252928  }
  0xe4   :  { %v5495_v16 = vpack.c.bf16 %v972_v15, %v964_v36  ;;  %v5492_v30 = vpack.c.bf16 %v973_v45, %v965_v47  ;;  %v407_v34 = vsel %vm10610_vm12, %v396_v54, %v398_v25  ;;  %v406_v39 = vsel %vm10611_vm6, %v7666_v27, %v396_v54  ;;  %vm10614_vm6 = vmmov %vm10612_vm14 }
  0xe5   :  { %1448 = vmatprep.subr.bf16.mxu1 %v407_v34  ;;  %vm132_vm12 = vcmp.le.s32.totalorder %v68_v62, 30  ;;  %v10613_v27 = vunpack.i.h.bf16 %v7695_v42  ;;  %v10615_v25 = vunpack.i.h.bf16 %v7707_v18  ;;  %vm7900_vm2 = vmpackc.low %vm133_vm3, %vm133_vm3 }
  0xe6   :  { %5493 = vmatprep.subr.msk.bf16.mxu0 %vm7659_vm11, %v5492_v30  ;;  %1449 = vmatpush1.bf16.msra.mxu1 %v406_v39  ;;  %v6194_v28 = vpop.permute.xlu0 %6193  ;;  %vm10617_vm11 = vmmov %vm10614_vm6  ;;  %v10619_v44 = vsel %vm7900_vm2, 4294967295, %v10618_v44 }
  0xe7   :  { %v6199_v51 = vpop.permute.xlu1 %6198  ;;  %5496 = vmatpush1.bf16.msk.msra.mxu0 %vm7678_vm9, %v5495_v16  ;;  %v6196_v3 = vunpack.i.h.bf16 %v6194_v28  ;;  %v6195_v33 = vunpack.i.l.bf16 %v6194_v28  ;;  %vm10616_vm9 = vmmov %vm10614_vm6  ;;  %10620 = vst [vmem:[#allocation13_spill] sm:$0xff] %v10619_v44 }
  0xe8   :  { %v6201_v58 = vunpack.i.h.bf16 %v6199_v51  ;;  %v6200_v63 = vunpack.i.l.bf16 %v6199_v51 }
  0xe9   :  { %v528_v24 = vsel %vm10616_vm9, %v10615_v25, %v6195_v33  ;;  %v529_v45 = vsel %vm10617_vm11, %v6195_v33, %v6196_v3  ;;  %vm10626_vm11 = vcmask 7168  }
  0xea   :  { %v537_v21 = vsel %vm10612_vm14, %v6200_v63, %v6201_v58  ;;  %v536_v31 = vsel %vm10614_vm6, %v10613_v27, %v6200_v63  ;;  %v1053_v52 = vpop.permute.xlu0 %1052  ;;  %vm7904_vm14 = vmpackc.low %vm132_vm12, %vm132_vm12  ;;  %vm10624_vm6 = vcmask 785408  }
  0xeb   :  { %v7886_v29 = vpop.permute.xlu1 %1054  ;;  %v5513_v8 = vpack.c.bf16 %v536_v31, %v528_v24  ;;  %v5510_v15 = vpack.c.bf16 %v537_v21, %v529_v45  ;;  %v10622_v57 = vsel %vm7904_vm14, 4294967295, %v10621_v57  ;;  %vm10625_vm9 = vmmov %vm10624_vm6  ;;  %v10634_v45 = vunpack.i.h.bf16 %v7745_v55 }
  0xec   :  { %10623 = vst [vmem:[#allocation14_spill] sm:$0xff] %v10622_v57  ;;  %v1066_v18 = vsel %vm10624_vm6, %v1053_v52, %v7886_v29  ;;  %v1065_v62 = vsel %vm10625_vm9, %v7709_v56, %v1053_v52  ;;  %v10627_v56 = vunpack.i.h.bf16 %v7747_v19  ;;  %vm10628_vm3 = vmmov %vm10626_vm11  ;;  %vm10631_vm9 = vcmask 777216  }
  0xed   :  { %1419 = vmatprep.subr.bf16.mxu0 %v1066_v18  ;;  %5511 = vmatprep.subr.msk.bf16.mxu1 %vm7900_vm2, %v5510_v15  ;;  %vm10629_vm12 = vmmov %vm10628_vm3 }
  0xee   :  { %1420 = vmatpush1.bf16.msra.mxu0 %v1065_v62  ;;  %5514 = vmatpush1.bf16.msk.msra.mxu1 %vm7904_vm14, %v5513_v8  ;;  %v6204_v47 = vpop.permute.xlu0 %6203  ;;  %vm10630_vm6 = vmmov %vm10628_vm3 }
  0xef   :  { %v6209_v26 = vpop.permute.xlu1 %6208  ;;  %v6206_v51 = vunpack.i.h.bf16 %v6204_v47  ;;  %v6205_v30 = vunpack.i.l.bf16 %v6204_v47 }
  0xf0   :  { %v6211_v42 = vunpack.i.h.bf16 %v6209_v26  ;;  %v6210_v36 = vunpack.i.l.bf16 %v6209_v26 }
  0xf1   :  { %v674_v39 = vsel %vm10629_vm12, %v6156_v61, %v6205_v30  ;;  %v675_v63 = vsel %vm10630_vm6, %v6205_v30, %v6206_v51  ;;  %vm10637_vm6 = vcmask 1039360  }
  0xf2   :  { %v683_v54 = vsel %vm10626_vm11, %v6210_v36, %v6211_v42  ;;  %v682_v34 = vsel %vm10628_vm3, %v10627_v56, %v6210_v36  ;;  %v6214_v3 = vpop.permute.xlu0 %6213  ;;  %vm10633_vm11 = vmmov %vm10631_vm9 }
  0xf3   :  { %v7916_v16 = vpop.permute.xlu1 %6218  ;;  %v5519_v21 = vpack.c.bf16 %v682_v34, %v674_v39  ;;  %v5516_v33 = vpack.c.bf16 %v683_v54, %v675_v63  ;;  %v6216_v31 = vunpack.i.h.bf16 %v6214_v3  ;;  %v6215_v25 = vunpack.i.l.bf16 %v6214_v3  ;;  %vm10635_vm3 = vmmov %vm10631_vm9 }
  0xf4   :  { %v6221_v58 = vunpack.i.h.bf16 %v7916_v16  ;;  %v6220_v28 = vunpack.i.l.bf16 %v7916_v16  ;;  %vm10636_vm12 = vmmov %vm10635_vm3 }
  0xf5   :  { %5517 = vmatprep.subr.msk.bf16.mxu1 %vm7819_vm13, %v5516_v33  ;;  %v1171_v8 = vsel %vm10635_vm3, %v10634_v45, %v6215_v25  ;;  %v1172_v52 = vsel %vm10636_vm12, %v6215_v25, %v6216_v31  ;;  %vm10640_vm3 = vmmov %vm10637_vm6  ;;  %vm10641_vm12 = vcmask 793600  }
  0xf6   :  { %v1180_v27 = vsel %vm10631_vm9, %v6220_v28, %v6221_v58  ;;  %v1179_v61 = vsel %vm10633_vm11, %v10632_v4, %v6220_v28  ;;  %5520 = vmatpush1.bf16.msk.msra.mxu1 %vm7838_vm0, %v5519_v21  ;;  %v6224_v42 = vpop.permute.xlu0 %6223  ;;  %vm10638_vm9 = vmmov %vm10637_vm6 }
  0xf7   :  { %v6229_v19 = vpop.permute.xlu1 %6228  ;;  %v5501_v15 = vpack.c.bf16 %v1179_v61, %v1171_v8  ;;  %v5498_v18 = vpack.c.bf16 %v1180_v27, %v1172_v52  ;;  %1454 = vmatprep.subr.bf16.mxu1 %v7245_v41  ;;  %v6226_v37 = vunpack.i.h.bf16 %v6224_v42  ;;  %v6225_v36 = vunpack.i.l.bf16 %v6224_v42  ;;  %vm10639_vm11 = vmmov %vm10637_vm6  ;;  %v168_v42 = vld [vmem:[%s10381_s0 + $0xc0] sm:$0xff] }
  0xf8   :  { %v6231_v24 = vunpack.i.h.bf16 %v6229_v19  ;;  %v6230_v26 = vunpack.i.l.bf16 %v6229_v19 }
  0xf9   :  { %5499 = vmatprep.subr.msk.bf16.mxu0 %vm7725_vm7, %v5498_v18  ;;  %v820_v51 = vsel %vm10639_vm11, %v6176_v38, %v6225_v36  ;;  %v821_v30 = vsel %vm10640_vm3, %v6225_v36, %v6226_v37  ;;  %vm10645_vm3 = vcmask 785408   ;;  %v169_v36 = vld [vmem:[%s10381_s0 + $0xc8] sm:$0xff] }
  0xfa   :  { %v829_v62 = vsel %vm10637_vm6, %v6230_v26, %v6231_v24  ;;  %v828_v55 = vsel %vm10638_vm9, %v6181_v13, %v6230_v26  ;;  %5502 = vmatpush1.bf16.msk.msra.mxu0 %vm7731_vm1, %v5501_v15  ;;  %1455 = vmatpush1.bf16.msra.mxu1 %v7242_v40  ;;  %v6234_v34 = vpop.permute.xlu0 %6233  ;;  %vm10642_vm6 = vmmov %vm10641_vm12 }
  0xfb   :  { %v6239_v47 = vpop.permute.xlu1 %6238  ;;  %v5525_v56 = vpack.c.bf16 %v828_v55, %v820_v51  ;;  %v5522_v39 = vpack.c.bf16 %v829_v62, %v821_v30  ;;  %2614 = vmatprep.subr.bf16.mxu0 %v10414_v6  ;;  %v6236_v13 = vunpack.i.h.bf16 %v6234_v34  ;;  %v6235_v63 = vunpack.i.l.bf16 %v6234_v34  ;;  %vm10643_vm9 = vmmov %vm10642_vm6 }
  0xfc   :  { %v6241_v54 = vunpack.i.h.bf16 %v6239_v47  ;;  %v6240_v41 = vunpack.i.l.bf16 %v6239_v47  ;;  %vm10644_vm11 = vmmov %vm10642_vm6 }
  0xfd   :  { %1436 = vmatmul.mubr.bf16.vlgmr.msra.gmra.mrb[4].mxu0 %v7614_v17  ;;  %5523 = vmatprep.subr.msk.bf16.mxu1 %vm7900_vm2, %v5522_v39  ;;  %v966_v40 = vsel %vm10643_vm9, %v6186_v23, %v6235_v63  ;;  %v967_v28 = vsel %vm10644_vm11, %v6235_v63, %v6236_v13  ;;  %v170_v63 = vld [vmem:[%s10381_s0 + $0xd0] sm:$0xff] }
  0xfe   :  { %v975_v46 = vsel %vm10641_vm12, %v6240_v41, %v6241_v54  ;;  %v974_v38 = vsel %vm10642_vm6, %v6191_v0, %v6240_v41  ;;  %5526 = vmatpush1.bf16.msk.msra.mxu1 %vm7904_vm14, %v5525_v56  ;;  %2615 = vmatpush1.bf16.msra.mxu0 %v10414_v6  ;;  %v1057_v3 = vpop.permute.xlu0 %1056  ;;  %vm10646_vm12 = vcmask 777216   ;;  %vm10647_vm6 = vmmov %vm10645_vm3  ;;  %v162_v56 = vld [vmem:[%s10381_s0 + $0x90] sm:$0xff] }
  0xff   :  { %v1059_v48 = vpop.permute.xlu1 %1058  ;;  %v5531_v21 = vpack.c.bf16 %v974_v38, %v966_v40  ;;  %v5528_v33 = vpack.c.bf16 %v975_v46, %v967_v28  ;;  %v1067_v4 = vsel %vm10647_vm6, %v7886_v29, %v1057_v3  ;;  %vm10648_vm9 = vmmov %vm10646_vm12  ;;  %v10651_v29 = vmov 0.0   ;;  %v163_v46 = vld [vmem:[%s10381_s0 + $0x98] sm:$0xff] }
 0x100   :  { %v1068_v0 = vsel %vm10645_vm3, %v1057_v3, %v1059_v48  ;;  %vm10649_vm11 = vmmov %vm10648_vm9  ;;  %6318 = vrot.lane.b32.xlu1 %v10651_v29, %s7072_s17  ;;  %6273 = vrot.lane.b32.xlu0 %v10651_v29, %s7075_s28  ;;  %v171_v28 = vld [vmem:[%s10381_s0 + $0xd8] sm:$0xff] }
 0x101   :  { %5529 = vmatprep.subr.msk.bf16.mxu1 %vm7819_vm13, %v5528_v33  ;;  %vm10650_vm13 = vmmov %vm10648_vm9 }
 0x102   :  { %5532 = vmatpush1.bf16.msk.msra.mxu1 %vm7838_vm0, %v5531_v21  ;;  %v6244_v22 = vpop.permute.xlu0 %6243 }
 0x103   :  { %v6249_v27 = vpop.permute.xlu1 %6248  ;;  %1460 = vmatprep.subr.bf16.mxu1 %v1068_v0  ;;  %v6246_v19 = vunpack.i.h.bf16 %v6244_v22  ;;  %v6245_v24 = vunpack.i.l.bf16 %v6244_v22 }
 0x104   :  { %v6251_v25 = vunpack.i.h.bf16 %v6249_v27  ;;  %v6250_v5 = vunpack.i.l.bf16 %v6249_v27  ;;  %6323 = vrot.lane.b32.xlu1 %v10651_v29, %s7077_s30  ;;  %6293 = vrot.lane.b32.xlu0 %v10651_v29, %s7077_s30 }
 0x105   :  { %v1173_v45 = vsel %vm10649_vm11, %v6216_v31, %v6245_v24  ;;  %v1174_v8 = vsel %vm10650_vm13, %v6245_v24, %v6246_v19  ;;  %v161_v31 = vld [vmem:[%s10381_s0 + $0x88] sm:$0xff]  ;;  %vm10653_vm13 = vcmask 261120  }
 0x106   :  { %v1182_v23 = vsel %vm10646_vm12, %v6250_v5, %v6251_v25  ;;  %v1181_v61 = vsel %vm10648_vm9, %v6221_v58, %v6250_v5  ;;  %1461 = vmatpush1.bf16.msra.mxu1 %v1067_v4  ;;  %v164_v4 = vld [vmem:[%s10381_s0 + $0xa0] sm:$0xff]  ;;  %vm10654_vm3 = vmmov %vm10653_vm13  ;;  %vm10660_vm12 = vcmask 269312  }
 0x107   :  { %v5537_v52 = vpack.c.bf16 %v1181_v61, %v1173_v45  ;;  %v5534_v26 = vpack.c.bf16 %v1182_v23, %v1174_v8  ;;  %vm10661_vm6 = vmmov %vm10660_vm12 }
 0x108   :  { %6308 = vrot.lane.b32.xlu0 %v10651_v29, %s7079_s12  ;;  %vm10662_vm9 = vmmov %vm10661_vm6 }
 0x109   :  { %5535 = vmatprep.subr.msk.bf16.mxu1 %vm7900_vm2, %v5534_v26  ;;  %vm10663_vm11 = vmmov %vm10661_vm6 }
 0x10a   :  { %5538 = vmatpush1.bf16.msk.msra.mxu1 %vm7904_vm14, %v5537_v52 }
 0x10b   :  { %2655 = vmatprep.subr.bf16.mxu1 %v10414_v6 }
 0x10d   :  { %1477 = vmatmul.mubr.bf16.vlgmr.msra.gmra.mrb[4].mxu1 %v7614_v17  ;;  %v160_v17 = vld [vmem:[%s10381_s0 + $0x80] sm:$0xff] }
 0x10e   :  { %2656 = vmatpush1.bf16.msra.mxu1 %v10414_v6 }
 0x18f   :  { %v1355_v16 = vpop.f32.mrb[0].mxu0 }
 0x190   :  { %v1485_v58 = vmax.f32 %v1355_v16, 0.0  ;;  %v1357_v15 = vpop.f32.mrb[1].mxu0 }
 0x191   :  { %v1486_v18 = vmax.f32 %v1357_v15, 0.0  ;;  %v1359_v62 = vpop.f32.mrb[2].mxu0 }
 0x192   :  { %v1493_v37 = vadd.f32 %v1485_v58, %v160_v17  ;;  %v1360_v47 = vpop.f32.mrb[3].mxu0  ;;  %v172_v17 = vld [vmem:[%s10381_s0 + $0xe0] sm:$0xff]  ;;  %v165_v58 = vld [vmem:[%s10381_s0 + $0xa8] sm:$0xff] }
 0x193   :  { %v1494_v54 = vadd.f32 %v1486_v18, %v161_v31  ;;  %v8098_v62 = vld [vmem:[%s10382_s1 + $0x8] sm:$0xff]  ;;  %v166_v47 = vld [vmem:[%s10381_s0 + $0xb0] sm:$0xff] }
 0x194   :  { %v1501_v55 = vadd.f32 %v1493_v37, %v168_v42  ;;  %v173_v42 = vld [vmem:[%s10381_s0 + $0xe8] sm:$0xff] }
 0x195   :  { %v1502_v51 = vadd.f32 %v1494_v54, %v169_v36  ;;  %v8104_v36 = vcombine.high %v8098_v62, %v8098_v62 }
 0x196   :  { %v8018_v30 = vpack.c.bf16 %v10651_v29, %v1501_v55  ;;  %v6332_v0 = vpack.i.bf16 %v10651_v29, %v1501_v55 }
 0x197   :  { %v8023_v41 = vpack.c.bf16 %v10651_v29, %v1502_v51  ;;  %v6342_v22 = vpack.i.bf16 %v1502_v51, %v1501_v55  ;;  %5377 = vmatprep.mubr.msk.bf16.mxu0 %vm10653_vm13, %v8104_v36  ;;  %5378 = vmatprep.mubr.msk.bf16.mxu1 %vm10654_vm3, %v8104_v36  ;;  %vm10664_vm13 = vcmask 252928  }
 0x198   :  { %1700 = vrot.lane.b32.xlu1 %v8018_v30, %s7073_s18  ;;  %2338 = vrot.lane.b32.xlu0 %v8018_v30, %s7078_s3 }
 0x19c   :  { %1702 = vrot.lane.b32.xlu0 %v8023_v41, %s7073_s18 }
 0x1ac   :  { %v1396_v34 = vpop.f32.mrb[0].mxu1 }
 0x1ad   :  { %v1487_v39 = vmax.f32 %v1396_v34, 0.0  ;;  %v1398_v13 = vpop.f32.mrb[1].mxu1  ;;  %v8120_v34 = vpop.permute.xlu1 %6253 }
 0x1ae   :  { %v1488_v48 = vmax.f32 %v1398_v13, 0.0  ;;  %v1400_v38 = vpop.f32.mrb[2].mxu1 }
 0x1af   :  { %v1495_v40 = vadd.f32 %v1487_v39, %v162_v56  ;;  %v1401_v21 = vpop.f32.mrb[3].mxu1  ;;  %v174_v39 = vld [vmem:[%s10381_s0 + $0xf0] sm:$0xff] }
 0x1b0   :  { %v1496_v3 = vadd.f32 %v1488_v48, %v163_v46  ;;  %v167_v21 = vld [vmem:[%s10381_s0 + $0xb8] sm:$0xff] }
 0x1b1   :  { %v1503_v33 = vadd.f32 %v1495_v40, %v170_v63  ;;  %v8130_v40 = vpop.permute.xlu1 %1698 }
 0x1b2   :  { %v8041_v27 = vadd.f32 %v1496_v3, %v171_v28 }
 0x1b3   :  { %v8044_v25 = vpack.c.bf16 %v10651_v29, %v1503_v33  ;;  %v6377_v19 = vpack.i.bf16 %v1503_v33, %v1502_v51 }
 0x1b4   :  { %v8048_v5 = vpack.c.bf16 %v10651_v29, %v8041_v27  ;;  %v6367_v23 = vpack.i.bf16 %v8041_v27, %v1503_v33 }
 0x1b5   :  { %1704 = vrot.lane.b32.xlu1 %v8044_v25, %s7073_s18  ;;  %v8139_v3 = vpop.permute.xlu1 %6263 }
 0x1b6   :  { %1706 = vrot.lane.b32.xlu0 %v8048_v5, %s7073_s18 }
 0x1b9   :  { %2342 = vrot.lane.b32.xlu1 %v8044_v25, %s7078_s3 }
 0x1ba   :  { %2340 = vrot.lane.b32.xlu0 %v8023_v41, %s7078_s3 }
 0x1bd   :  { %6333 = vrot.lane.b32.xlu1 %v6332_v0, %s7077_s30 }
 0x1be   :  { %6328 = vrot.lane.b32.xlu0 %v6332_v0, %s7076_s29 }
 0x1c1   :  { %6338 = vrot.lane.b32.xlu1 %v6332_v0, %s7079_s12 }
 0x1c2   :  { %6343 = vrot.lane.b32.xlu0 %v6342_v22, %s7072_s17 }
 0x1c5   :  { %6353 = vrot.lane.b32.xlu1 %v6342_v22, %s7075_s28 }
 0x1c6   :  { %6348 = vrot.lane.b32.xlu0 %v6342_v22, %s7074_s27  ;;  %v175_v22 = vld [vmem:[%s10381_s0 + $0xf8] sm:$0xff] }
 0x1c9   :  { %6358 = vrot.lane.b32.xlu1 %v10651_v29, %s7074_s27 }
 0x1ca   :  { %2344 = vrot.lane.b32.xlu0 %v8048_v5, %s7078_s3 }
 0x1cd   :  { %6363 = vrot.lane.b32.xlu1 %v10651_v29, %s7079_s12 }
 0x1ce   :  { %6368 = vrot.lane.b32.xlu0 %v6367_v23, %s7072_s17 }
 0x1d0   :  { %v1437_v24 = vpop.f32.mrb[4].mxu0 }
 0x1d1   :  { %v1489_v61 = vmax.f32 %v1437_v24, 0.0  ;;  %6378 = vrot.lane.b32.xlu1 %v6377_v19, %s7077_s30  ;;  %v1439_v45 = vpop.f32.mrb[5].mxu0 }
 0x1d2   :  { %6373 = vrot.lane.b32.xlu0 %v6377_v19, %s7076_s29  ;;  %v1441_v8 = vpop.f32.mrb[6].mxu0  ;;  %v1490_v16 = vmax.f32 %v1439_v45, 0.0 }
 0x1d3   :  { %v1442_v52 = vpop.f32.mrb[7].mxu0  ;;  %v1497_v26 = vadd.f32 %v1489_v61, %v164_v4  ;;  %v6259_v61 = vpop.permute.xlu0 %6258 }
 0x1d4   :  { %v1498_v15 = vadd.f32 %v1490_v16, %v165_v58 }
 0x1d5   :  { %6383 = vrot.lane.b32.xlu1 %v10651_v29, %s7075_s28  ;;  %v1505_v31 = vadd.f32 %v1497_v26, %v172_v17 }
 0x1d6   :  { %6388 = vrot.lane.b32.xlu0 %v6367_v23, %s7074_s27  ;;  %v1506_v37 = vadd.f32 %v1498_v15, %v173_v42 }
 0x1d7   :  { %v8093_v18 = vpack.c.bf16 %v10651_v29, %v1505_v31  ;;  %v6427_v0 = vpack.i.bf16 %v1505_v31, %v8041_v27  ;;  %v8173_v8 = vpop.permute.xlu0 %6268 }
 0x1d8   :  { %v8116_v55 = vpack.c.bf16 %v10651_v29, %v1506_v37  ;;  %v6442_v4 = vpack.i.bf16 %v1506_v37, %v1505_v31  ;;  %v10659_v31 = vmov 0  }
 0x1d9   :  { %6398 = vrot.lane.b32.xlu1 %v6377_v19, %s7079_s12  ;;  %10652 = vst [vmem:[#allocation15_spill] sm:$0xff] %v8093_v18  ;;  %v8152_v19 = vpop.permute.xlu1 %6278 }
 0x1da   :  { %6393 = vrot.lane.b32.xlu0 %v6367_v23, %s7075_s28  ;;  %10655 = vst [vmem:[#allocation16_spill] sm:$0xff] %v8116_v55  ;;  %v6280_v59 = vunpack.i.l.bf16 %v8152_v19 }
 0x1db   :  { %v8183_v17 = vpop.permute.xlu0 %6273 }
 0x1dc   :  { %v6275_v50 = vunpack.i.l.bf16 %v8183_v17 }
 0x1dd   :  { %6403 = vrot.lane.b32.xlu1 %v10651_v29, %s7072_s17  ;;  %v8160_v27 = vpop.permute.xlu1 %6283 }
 0x1de   :  { %1708 = vrot.lane.b32.xlu0 %v8093_v18, %s7073_s18  ;;  %v6285_v43 = vunpack.i.l.bf16 %v8160_v27  ;;  %v10676_v32 = vunpack.i.h.bf16 %v8160_v27 }
 0x1df   :  { %v8190_v15 = vpop.permute.xlu0 %6293 }
 0x1e0   :  { %v1478_v54 = vpop.f32.mrb[4].mxu1 }
 0x1e1   :  { %v1491_v51 = vmax.f32 %v1478_v54, 0.0  ;;  %v1480_v56 = vpop.f32.mrb[5].mxu1  ;;  %2346 = vrot.lane.b32.xlu1 %v8093_v18, %s7078_s3  ;;  %v8168_v45 = vpop.permute.xlu1 %6288  ;;  %v6265_v18 = vunpack.i.l.bf16 %v8139_v3 }
 0x1e2   :  { %v1482_v46 = vpop.f32.mrb[6].mxu1  ;;  %v1492_v28 = vmax.f32 %v1480_v56, 0.0 }
 0x1e3   :  { %v1499_v13 = vadd.f32 %v1491_v51, %v166_v47  ;;  %v1483_v63 = vpop.f32.mrb[7].mxu1  ;;  %v8198_v47 = vpop.permute.xlu0 %6308 }
 0x1e4   :  { %v1500_v33 = vadd.f32 %v1492_v28, %v167_v21 }
 0x1e5   :  { %v1507_v48 = vadd.f32 %v1499_v13, %v174_v39  ;;  %1710 = vrot.lane.b32.xlu1 %v8116_v55, %s7073_s18  ;;  %v8175_v52 = vpop.permute.xlu1 %6298 }
 0x1e6   :  { %v1508_v23 = vadd.f32 %v1500_v33, %v175_v22  ;;  %10658 = vst [vmem:[#allocation19_spill] sm:$0xff] %v8175_v52  ;;  %v6255_v22 = vunpack.i.l.bf16 %v8120_v34 }
 0x1e7   :  { %v8128_v38 = vpack.c.bf16 %v10651_v29, %v1507_v48  ;;  %v6462_v58 = vpack.i.bf16 %v1507_v48, %v1506_v37 }
 0x1e8   :  { %v8158_v24 = vpack.c.bf16 %v10651_v29, %v1508_v23  ;;  %v6457_v26 = vpack.i.bf16 %v1508_v23, %v1507_v48  ;;  %v6502_v56 = vpack.i.bf16 %v7097_v1, %v1508_v23  ;;  %v6261_v23 = vunpack.i.h.bf16 %v6259_v61 }
 0x1e9   :  { %10656 = vst [vmem:[#allocation17_spill] sm:$0xff] %v8128_v38  ;;  %1712 = vrot.lane.b32.xlu0 %v8128_v38, %s7073_s18  ;;  %6408 = vrot.lane.b32.xlu1 %v10651_v29, %s7076_s29  ;;  %v8185_v16 = vpop.permute.xlu1 %6303 }
 0x1ea   :  { %10657 = vst [vmem:[#allocation18_spill] sm:$0xff] %v8158_v24 }
 0x1ed   :  { %2348 = vrot.lane.b32.xlu0 %v8116_v55, %s7078_s3  ;;  %6413 = vrot.lane.b32.xlu1 %v10651_v29, %s7077_s30  ;;  %v8192_v42 = vpop.permute.xlu1 %6313 }
 0x1f1   :  { %6428 = vrot.lane.b32.xlu0 %v6427_v0, %s7076_s29  ;;  %6418 = vrot.lane.b32.xlu1 %v10651_v29, %s7074_s27  ;;  %v8200_v54 = vpop.permute.xlu1 %6318 }
 0x1f5   :  { %6433 = vrot.lane.b32.xlu0 %v6427_v0, %s7077_s30  ;;  %2350 = vrot.lane.b32.xlu1 %v8128_v38, %s7078_s3  ;;  %v8205_v51 = vpop.permute.xlu1 %6323 }
 0x1f9   :  { %6438 = vrot.lane.b32.xlu0 %v6427_v0, %s7079_s12  ;;  %1714 = vrot.lane.b32.xlu1 %v8158_v24, %s7073_s18  ;;  %v10428_v0 = vunpack.i.h.bf16 %v8120_v34 }
 0x1fb   :  { %v1625_v1 = vsel %vm10660_vm12, %v6255_v22, %v10428_v0  ;;  %vm10665_vm12 = vmmov %vm10664_vm13 }
 0x1fd   :  { %6423 = vrot.lane.b32.xlu1 %v10651_v29, %s7075_s28  ;;  %6443 = vrot.lane.b32.xlu0 %v6442_v4, %s7072_s17 }
 0x201   :  { %6488 = vrot.lane.b32.xlu1 %v10651_v29, %s7079_s12  ;;  %6448 = vrot.lane.b32.xlu0 %v6442_v4, %s7074_s27 }
 0x205   :  { %6493 = vrot.lane.b32.xlu1 %v7100_v2, %s7076_s29  ;;  %6453 = vrot.lane.b32.xlu0 %v6442_v4, %s7075_s28 }
 0x209   :  { %6498 = vrot.lane.b32.xlu1 %v7100_v2, %s7077_s30  ;;  %6458 = vrot.lane.b32.xlu0 %v6457_v26, %s7072_s17 }
 0x20a   :  { %v8203_v37 = vpop.permute.xlu0 %2338  ;;  %v1701_v46 = vpop.permute.xlu1 %1700 }
 0x20d   :  { %6463 = vrot.lane.b32.xlu0 %v6462_v58, %s7076_s29  ;;  %2354 = vrot.lane.b32.xlu1 %v10659_v31, %s7078_s3 }
 0x20e   :  { %v8210_v39 = vpop.permute.xlu0 %1702 }
 0x211   :  { %6468 = vrot.lane.b32.xlu0 %v6462_v58, %s7077_s30  ;;  %6518 = vrot.lane.b32.xlu1 %v7100_v2, %s7079_s12 }
 0x215   :  { %6473 = vrot.lane.b32.xlu0 %v6457_v26, %s7074_s27  ;;  %6523 = vrot.lane.b32.xlu1 %v10651_v29, %s7072_s17 }
 0x219   :  { %6478 = vrot.lane.b32.xlu0 %v6457_v26, %s7075_s28  ;;  %2975 = vrot.lane.b32.xlu1 %v10659_v31, %s7073_s18  ;;  %v1624_v31 = vsel %vm10661_vm6, %v6261_v23, %v6255_v22  ;;  %vm10666_vm6 = vmmov %vm10665_vm12 }
 0x21d   :  { %6483 = vrot.lane.b32.xlu0 %v6462_v58, %s7079_s12  ;;  %6533 = vrot.lane.b32.xlu1 %v10651_v29, %s7074_s27  ;;  %v6260_v58 = vunpack.i.l.bf16 %v6259_v61  ;;  %v10437_v61 = vunpack.i.h.bf16 %v8139_v3 }
 0x221   :  { %6503 = vrot.lane.b32.xlu0 %v6502_v56, %s7076_s29  ;;  %6548 = vrot.lane.b32.xlu1 %v7122_v9, %s7075_s28 }
 0x225   :  { %6508 = vrot.lane.b32.xlu0 %v6502_v56, %s7077_s30  ;;  %6553 = vrot.lane.b32.xlu1 %v10651_v29, %s7072_s17 }
 0x227   :  { %v8213_v13 = vpop.permute.xlu1 %1704 }
 0x228   :  { %v8215_v63 = vpop.permute.xlu0 %1706 }
 0x229   :  { %2352 = vrot.lane.b32.xlu0 %v8158_v24, %s7078_s3  ;;  %6558 = vrot.lane.b32.xlu1 %v10651_v29, %s7076_s29 }
 0x22b   :  { %v8219_v48 = vpop.permute.xlu1 %2342 }
 0x22c   :  { %v8223_v28 = vpop.permute.xlu0 %2340 }
 0x22d   :  { %6513 = vrot.lane.b32.xlu0 %v6502_v56, %s7079_s12  ;;  %6568 = vrot.lane.b32.xlu1 %v10651_v29, %s7074_s27 }
 0x22f   :  { %v8226_v21 = vpop.permute.xlu1 %6333 }
 0x230   :  { %v8230_v33 = vpop.permute.xlu0 %6328 }
 0x231   :  { %6528 = vrot.lane.b32.xlu0 %v7122_v9, %s7072_s17  ;;  %6573 = vrot.lane.b32.xlu1 %v10651_v29, %s7075_s28 }
 0x233   :  { %v8236_v4 = vpop.permute.xlu1 %6338 }
 0x234   :  { %v6344_v26 = vpop.permute.xlu0 %6343 }
 0x235   :  { %v6346_v56 = vunpack.i.h.bf16 %v6344_v26  ;;  %v6345_v6 = vunpack.i.l.bf16 %v6344_v26  ;;  %6538 = vrot.lane.b32.xlu0 %v7122_v9, %s7074_s27  ;;  %6583 = vrot.lane.b32.xlu1 %v10651_v29, %s7076_s29 }
 0x237   :  { %v1616_v2 = vsel %vm10662_vm9, %v6260_v58, %v6345_v6  ;;  %v1617_v38 = vsel %vm10663_vm11, %v6345_v6, %v6346_v56  ;;  %v8248_v24 = vpop.permute.xlu1 %6353  ;;  %vm10667_vm9 = vmmov %vm10654_vm3  ;;  %vm10669_vm11 = vcmask 7168  }
 0x238   :  { %v5543_v26 = vpack.c.bf16 %v1624_v31, %v1616_v2  ;;  %v8253_v57 = vpop.permute.xlu0 %6348  ;;  %v5540_v44 = vpack.c.bf16 %v1625_v1, %v1617_v38  ;;  %v6355_v23 = vunpack.i.l.bf16 %v8248_v24  ;;  %v1717_v38 = vsel %vm10654_vm3, %v1701_v46, %v8210_v39  ;;  %vm10672_vm3 = vmmov %vm10669_vm11 }
 0x239   :  { %v10429_v0 = vunpack.i.h.bf16 %v8253_v57  ;;  %v6350_v22 = vunpack.i.l.bf16 %v8253_v57  ;;  %6543 = vrot.lane.b32.xlu0 %v10651_v29, %s7075_s28  ;;  %v6271_v31 = vunpack.i.h.bf16 %v8173_v8  ;;  %6588 = vrot.lane.b32.xlu1 %v10651_v29, %s7072_s17 }
 0x23a   :  { %5541 = vmatprep.subr.msk.bf16.mxu0 %vm7296_vm4, %v5540_v44  ;;  %v6270_v44 = vunpack.i.l.bf16 %v8173_v8  ;;  %v1716_v8 = vsel %vm10667_vm9, %v8130_v40, %v1701_v46 }
 0x23b   :  { %v1822_v1 = vsel %vm10664_vm13, %v6350_v22, %v10429_v0  ;;  %v8267_v2 = vpop.permute.xlu1 %6358  ;;  %5544 = vmatpush1.bf16.msk.msra.mxu0 %vm7304_vm5, %v5543_v26  ;;  %v1830_v0 = vsel %vm10665_vm12, %v6265_v18, %v10437_v61  ;;  %v6281_v26 = vunpack.i.h.bf16 %v8152_v19  ;;  %v10668_v61 = vunpack.i.h.bf16 %v8248_v24  ;;  %vm10670_vm13 = vmmov %vm10666_vm6 }
 0x23c   :  { %v8275_v58 = vpop.permute.xlu0 %2344  ;;  %2618 = vmatprep.subr.bf16.mxu0 %v1717_v38  ;;  %v1821_v9 = vsel %vm10666_vm6, %v6270_v44, %v6350_v22  ;;  %v5546_v38 = vpack.c.bf16 %v1830_v0, %v1822_v1  ;;  %v1829_v40 = vsel %vm10670_vm13, %v6271_v31, %v6265_v18  ;;  %v10671_v0 = vunpack.i.h.bf16 %v8183_v17  ;;  %vm10673_vm12 = vmmov %vm10672_vm3 }
 0x23d   :  { %6563 = vrot.lane.b32.xlu0 %v10651_v29, %s7077_s30  ;;  %v1967_v6 = vsel %vm10669_vm11, %v6355_v23, %v10668_v61  ;;  %v5549_v1 = vpack.c.bf16 %v1829_v40, %v1821_v9  ;;  %v6300_v18 = vunpack.i.l.bf16 %v8175_v52  ;;  %v1966_v31 = vsel %vm10673_vm12, %v6280_v59, %v6355_v23  ;;  %6593 = vrot.lane.b32.xlu1 %v10651_v29, %s7077_s30 }
 0x23e   :  { %v1975_v61 = vsel %vm10672_vm3, %v6275_v50, %v10671_v0  ;;  %vm10675_vm6 = vcmask 269312   ;;  %v10447_v59 = vunpack.i.h.bf16 %v8175_v52  ;;  %vm10681_vm12 = vcmask 1039360  }
 0x23f   :  { %v8295_v10 = vpop.permute.xlu1 %6363  ;;  %2619 = vmatpush1.bf16.msra.mxu0 %v1716_v8  ;;  %v6290_v8 = vunpack.i.l.bf16 %v8168_v45  ;;  %v5552_v22 = vpack.c.bf16 %v1975_v61, %v1967_v6  ;;  %vm10677_vm9 = vmmov %vm10675_vm6 }
 0x240   :  { %v8300_v46 = vpop.permute.xlu0 %6368  ;;  %5547 = vmatprep.subr.msk.bf16.mxu0 %vm7346_vm8, %v5546_v38  ;;  %v10674_v38 = vunpack.i.h.bf16 %v8120_v34  ;;  %v1627_v0 = vsel %vm10677_vm9, %v6285_v43, %v10676_v32  ;;  %vm10678_vm11 = vmmov %vm10675_vm6  ;;  %v1974_v34 = vsel %vm10672_vm3, %v6281_v26, %v6275_v50  ;;  %v10682_v50 = vunpack.i.h.bf16 %v8139_v3 }
 0x241   :  { %v10446_v44 = vunpack.i.h.bf16 %v8300_v46  ;;  %v6370_v19 = vunpack.i.l.bf16 %v8300_v46  ;;  %vm10679_vm13 = vmmov %vm10675_vm6  ;;  %v10450_v26 = vunpack.i.h.bf16 %v8190_v15  ;;  %6598 = vrot.lane.b32.xlu1 %v10651_v29, %s7074_s27  ;;  %6578 = vrot.lane.b32.xlu0 %v10651_v29, %s7079_s12 }
 0x242   :  { %v1626_v55 = vsel %vm10675_vm6, %v10674_v38, %v6285_v43  ;;  %v5555_v43 = vpack.c.bf16 %v1974_v34, %v1966_v31  ;;  %vm10683_vm6 = vcmask 252928   ;;  %vm10684_vm9 = vmmov %vm10681_vm12  ;;  %v10692_v34 = vunpack.i.h.bf16 %v8253_v57 }
 0x243   :  { %v1618_v9 = vsel %vm10678_vm11, %v6346_v56, %v6370_v19  ;;  %v1619_v40 = vsel %vm10679_vm13, %v6370_v19, %v10446_v44  ;;  %v8324_v11 = vpop.permute.xlu1 %6378  ;;  %5550 = vmatpush1.bf16.msk.msra.mxu0 %vm7362_vm10, %v5549_v1  ;;  %v10680_v1 = vunpack.i.h.bf16 %v8168_v45  ;;  %vm10685_vm11 = vnez %v10558_v49  ;;  %vm10687_vm3 = vmmov %vm10683_vm6 }
 0x244   :  { %v5579_v6 = vpack.c.bf16 %v1626_v55, %v1618_v9  ;;  %v8330_v23 = vpop.permute.xlu0 %6373  ;;  %5553 = vmatprep.subr.msk.bf16.mxu0 %vm7296_vm4, %v5552_v22  ;;  %v5576_v32 = vpack.c.bf16 %v1627_v0, %v1619_v40  ;;  %v1831_v55 = vsel %vm10683_vm6, %v10682_v50, %v6300_v18  ;;  %v6295_v22 = vunpack.i.l.bf16 %v8190_v15  ;;  %vm10689_vm6 = vmmov %vm10684_vm9 }
 0x245   :  { %v10448_v56 = vunpack.i.h.bf16 %v8330_v23  ;;  %v6375_v61 = vunpack.i.l.bf16 %v8330_v23  ;;  %v2120_v19 = vsel %vm10681_vm12, %v6290_v8, %v10680_v1  ;;  %v6381_v31 = vunpack.i.h.bf16 %v8324_v11  ;;  %6603 = vrot.lane.b32.xlu1 %v10651_v29, %s7079_s12 }
 0x246   :  { %5577 = vmatprep.subr.msk.bf16.mxu1 %vm7429_vm15, %v5576_v32  ;;  %v6380_v38 = vunpack.i.l.bf16 %v8324_v11  ;;  %vm10686_vm13 = vcmask 261120   ;;  %v1832_v40 = vsel %vm10687_vm3, %v6300_v18, %v10447_v59  ;;  %v6331_v32 = vunpack.i.h.bf16 %v8230_v33 }
 0x247   :  { %v2112_v0 = vsel %vm10684_vm9, %v6375_v61, %v10448_v56  ;;  %v8353_v9 = vpop.permute.xlu1 %6383  ;;  %5556 = vmatpush1.bf16.msk.msra.mxu0 %vm7304_vm5, %v5555_v43  ;;  %5580 = vmatpush1.bf16.msk.msra.mxu1 %vm10685_vm11, %v5579_v6  ;;  %v1719_v3 = vsel %vm10686_vm13, %v8213_v13, %v8215_v63  ;;  %v6330_v1 = vunpack.i.l.bf16 %v8230_v33  ;;  %v6305_v6 = vunpack.i.l.bf16 %v8185_v16  ;;  %vm10690_vm9 = vmmov %vm10686_vm13 }
 0x248   :  { %v8368_v50 = vpop.permute.xlu0 %6388  ;;  %2624 = vmatprep.subr.bf16.mxu0 %v8023_v41  ;;  %2659 = vmatprep.subr.bf16.mxu1 %v1719_v3  ;;  %vm10688_vm12 = vcmask 793600   ;;  %v1718_v41 = vsel %vm10690_vm9, %v8210_v39, %v8213_v13  ;;  %v5558_v3 = vpack.c.bf16 %v2120_v19, %v2112_v0  ;;  %v6336_v59 = vunpack.i.h.bf16 %v8226_v21 }
 0x249   :  { %v6390_v44 = vunpack.i.l.bf16 %v8368_v50  ;;  %v2265_v18 = vsel %vm10688_vm12, %v6295_v22, %v10450_v26  ;;  %v2111_v33 = vsel %vm10689_vm6, %v6330_v1, %v6375_v61  ;;  %vm10691_vm13 = vmmov %vm10688_vm12  ;;  %v10693_v52 = vunpack.i.h.bf16 %v8368_v50 }
 0x24a   :  { %v2257_v56 = vsel %vm10691_vm13, %v6380_v38, %v6381_v31  ;;  %vm10694_vm12 = vmmov %vm10687_vm3  ;;  %v6335_v39 = vunpack.i.l.bf16 %v8226_v21  ;;  %v2119_v13 = vsel %vm10689_vm6, %v6331_v32, %v6290_v8  ;;  %vm10696_vm9 = vcmask 7168  }
 0x24b   :  { %v1823_v43 = vsel %vm10687_vm3, %v10692_v34, %v6390_v44  ;;  %v1824_v26 = vsel %vm10694_vm12, %v6390_v44, %v10693_v52  ;;  %v8393_v61 = vpop.permute.xlu1 %6398  ;;  %2625 = vmatpush1.bf16.msra.mxu0 %v8018_v30  ;;  %2660 = vmatpush1.bf16.msra.mxu1 %v1718_v41  ;;  %v5561_v34 = vpack.c.bf16 %v2119_v13, %v2111_v33  ;;  %v10695_v30 = vunpack.i.h.bf16 %v8185_v16  ;;  %vm10698_vm13 = vmmov %vm10696_vm9 }
 0x24c   :  { %v5585_v19 = vpack.c.bf16 %v1831_v55, %v1823_v43  ;;  %v8398_v0 = vpop.permute.xlu0 %6393  ;;  %5559 = vmatprep.subr.msk.bf16.mxu0 %vm7346_vm8, %v5558_v3  ;;  %v5582_v57 = vpack.c.bf16 %v1832_v40, %v1824_v26  ;;  %v10697_v44 = vunpack.i.h.bf16 %v8183_v17  ;;  %vm10699_vm3 = vcmask 793600   ;;  %vm10702_vm6 = vmmov %vm10696_vm9 }
 0x24d   :  { %v6396_v1 = vunpack.i.h.bf16 %v8398_v0  ;;  %v6395_v52 = vunpack.i.l.bf16 %v8398_v0  ;;  %v1977_v21 = vsel %vm10696_vm9, %v6305_v6, %v10695_v30  ;;  %v2256_v55 = vsel %vm10699_vm3, %v6335_v39, %v6380_v38  ;;  %vm10703_vm9 = vmmov %vm10702_vm6 }
 0x24e   :  { %v1976_v8 = vsel %vm10698_vm13, %v10697_v44, %v6305_v6  ;;  %vm10700_vm12 = vnez %v10560_v60  ;;  %v5564_v26 = vpack.c.bf16 %v2265_v18, %v2257_v56  ;;  %v6401_v40 = vunpack.i.h.bf16 %v8393_v61 }
 0x24f   :  { %5583 = vmatprep.subr.msk.bf16.mxu1 %vm10700_vm12, %v5582_v57  ;;  %v6400_v32 = vunpack.i.l.bf16 %v8393_v61  ;;  %v10701_v43 = vunpack.i.h.bf16 %v8248_v24  ;;  %v1969_v17 = vsel %vm10703_vm9, %v6395_v52, %v6396_v1  ;;  %v8423_v41 = vpop.permute.xlu1 %6403  ;;  %5562 = vmatpush1.bf16.msk.msra.mxu0 %vm7362_vm10, %v5561_v34  ;;  %vm10704_vm13 = vnez %v10562_v12 }
 0x250   :  { %5586 = vmatpush1.bf16.msk.msra.mxu1 %vm10704_vm13, %v5585_v19  ;;  %v2264_v56 = vsel %vm10699_vm3, %v6336_v59, %v6295_v22  ;;  %5565 = vmatprep.subr.msk.bf16.mxu0 %vm7296_vm4, %v5564_v26  ;;  %v5588_v24 = vpack.c.bf16 %v1977_v21, %v1969_v17  ;;  %v6311_v6 = vunpack.i.h.bf16 %v8198_v47  ;;  %v6310_v18 = vunpack.i.l.bf16 %v8198_v47 }
 0x251   :  { %v1968_v33 = vsel %vm10702_vm6, %v10701_v43, %v6395_v52  ;;  %v5567_v3 = vpack.c.bf16 %v2264_v56, %v2256_v55  ;;  %vm10705_vm6 = vcmask 777216   ;;  %vm10706_vm9 = vcmask 785408  }
 0x252   :  { %v5591_v38 = vpack.c.bf16 %v1976_v8, %v1968_v33  ;;  %5589 = vmatprep.subr.msk.bf16.mxu1 %vm7429_vm15, %v5588_v24  ;;  %v2462_v59 = vsel %vm10705_vm6, %v6400_v32, %v6401_v40  ;;  %v2357_v22 = vsel %vm10706_vm9, %v8223_v28, %v8219_v48  ;;  %v6341_v39 = vunpack.i.h.bf16 %v8236_v4  ;;  %vm10707_vm3 = vmmov %vm10705_vm6 }
 0x253   :  { %5568 = vmatpush1.bf16.msk.msra.mxu0 %vm7304_vm5, %v5567_v3  ;;  %v6340_v13 = vunpack.i.l.bf16 %v8236_v4  ;;  %v2470_v19 = vsel %vm10707_vm3, %v6310_v18, %v6311_v6  ;;  %v8454_v57 = vpop.permute.xlu1 %2346  ;;  %vm10708_vm6 = vmmov %vm10707_vm3  ;;  %v2356_v52 = vsel %vm10706_vm9, %v8203_v37, %v8223_v28  ;;  %v8462_v4 = vpop.permute.xlu0 %1708  ;;  %v8472_v44 = vcombine.low %v8098_v62, %v8098_v62 }
 0x254   :  { %5592 = vmatpush1.bf16.msk.msra.mxu1 %vm10685_vm11, %v5591_v38  ;;  %2630 = vmatprep.subr.bf16.mxu0 %v2357_v22  ;;  %v5570_v30 = vpack.c.bf16 %v2470_v19, %v2462_v59  ;;  %vm10709_vm5 = vmmov %vm10707_vm3  ;;  %v6316_v62 = vunpack.i.h.bf16 %v8192_v42  ;;  %v6315_v55 = vunpack.i.l.bf16 %v8192_v42  ;;  %v10712_v17 = vunpack.i.h.bf16 %v8168_v45 }
 0x255   :  { %2665 = vmatprep.subr.bf16.mxu1 %v8048_v5  ;;  %v2461_v34 = vsel %vm10708_vm6, %v6340_v13, %v6400_v32  ;;  %v2469_v5 = vsel %vm10709_vm5, %v6341_v39, %v6310_v18  ;;  %vm10711_vm5 = vcmask 261120   ;;  %vm10713_vm3 = vcmask 1039360  }
 0x256   :  { %v5573_v21 = vpack.c.bf16 %v2469_v5, %v2461_v34  ;;  %v2121_v56 = vsel %vm10713_vm3, %v10712_v17, %v6315_v55  ;;  %vm10714_vm6 = vmmov %vm10713_vm3  ;;  %v10458_v24 = vunpack.i.h.bf16 %v8205_v51  ;;  %v6325_v18 = vunpack.i.l.bf16 %v8205_v51 }
 0x257   :  { %2631 = vmatpush1.bf16.msra.mxu0 %v2356_v52  ;;  %v8474_v37 = vpop.permute.xlu1 %1710  ;;  %v2122_v38 = vsel %vm10714_vm6, %v6315_v55, %v6316_v62  ;;  %v10715_v3 = vunpack.i.h.bf16 %v8330_v23  ;;  %vm10716_vm9 = vmmov %vm10713_vm3  ;;  %v6321_v11 = vunpack.i.h.bf16 %v8200_v54  ;;  %v6360_v47 = vunpack.i.l.bf16 %v8267_v2 }
 0x258   :  { %2666 = vmatpush1.bf16.msra.mxu1 %v8044_v25  ;;  %5571 = vmatprep.subr.msk.bf16.mxu0 %vm7346_vm8, %v5570_v30  ;;  %v10710_v25 = vmov 1065369472   ;;  %v10719_v30 = vunpack.i.h.bf16 %v8190_v15 }
 0x25b   :  { %5574 = vmatpush1.bf16.msk.msra.mxu0 %vm7362_vm10, %v5573_v21  ;;  %v8478_v28 = vpop.permute.xlu0 %1712  ;;  %v8489_v26 = vpop.permute.xlu1 %6408 }
 0x25c   :  { %2696 = vmatprep.subr.bf16.mxu0 %v10710_v25 }
 0x25e   :  { %2647 = vmatmul.mubr.bf16.vlgmr.msra.gmra.mrb[8].mxu0 %v8472_v44 }
 0x25f   :  { %v8482_v8 = vpop.permute.xlu0 %2348  ;;  %2697 = vmatpush1.bf16.msra.mxu0 %v10710_v25  ;;  %5379 = vmatprep.mubr.msk.bf16.mxu0 %vm10711_vm5, %v8104_v36  ;;  %vm10717_vm5 = vmmov %vm10713_vm3  ;;  %v8509_v39 = vpop.permute.xlu1 %6413  ;;  %vm10718_vm3 = vcmask 793600  }
 0x260   :  { %v2267_v23 = vsel %vm10718_vm3, %v6325_v18, %v10458_v24  ;;  %vm10720_vm6 = vmmov %vm10718_vm3 }
 0x261   :  { %v2266_v5 = vsel %vm10720_vm6, %v10719_v30, %v6325_v18  ;;  %vm10724_vm6 = vcmask 785408  }
 0x263   :  { %v8491_v32 = vpop.permute.xlu0 %6428 }
 0x264   :  { %v6431_v43 = vunpack.i.h.bf16 %v8491_v32  ;;  %v6430_v33 = vunpack.i.l.bf16 %v8491_v32 }
 0x266   :  { %v2113_v59 = vsel %vm10716_vm9, %v10715_v3, %v6430_v33  ;;  %v2114_v22 = vsel %vm10717_vm5, %v6430_v33, %v6431_v43  ;;  %vm10721_vm9 = vmmov %vm10718_vm3  ;;  %v6320_v3 = vunpack.i.l.bf16 %v8200_v54 }
 0x267   :  { %v5597_v45 = vpack.c.bf16 %v2121_v56, %v2113_v59  ;;  %v8511_v13 = vpop.permute.xlu0 %6433  ;;  %v5594_v19 = vpack.c.bf16 %v2122_v38, %v2114_v22  ;;  %vm10722_vm5 = vmmov %vm10718_vm3  ;;  %v10457_v38 = vunpack.i.h.bf16 %v8295_v10  ;;  %v6365_v59 = vunpack.i.l.bf16 %v8295_v10 }
 0x268   :  { %v6436_v34 = vunpack.i.h.bf16 %v8511_v13  ;;  %v6435_v52 = vunpack.i.l.bf16 %v8511_v13  ;;  %vm10723_vm3 = vcmask 777216  }
 0x269   :  { %5595 = vmatprep.subr.msk.bf16.mxu1 %vm10700_vm12, %v5594_v19 }
 0x26a   :  { %v2258_v21 = vsel %vm10721_vm9, %v6381_v31, %v6435_v52  ;;  %v2259_v55 = vsel %vm10722_vm5, %v6435_v52, %v6436_v34  ;;  %5598 = vmatpush1.bf16.msk.msra.mxu1 %vm10704_vm13, %v5597_v45  ;;  %v8537_v31 = vpop.permute.xlu1 %6418  ;;  %v2359_v45 = vsel %vm10724_vm6, %v8275_v58, %v8454_v57  ;;  %vm10725_vm9 = vmmov %vm10723_vm3 }
 0x26b   :  { %v5603_v33 = vpack.c.bf16 %v2266_v5, %v2258_v21  ;;  %v8531_v17 = vpop.permute.xlu0 %6438  ;;  %v5600_v56 = vpack.c.bf16 %v2267_v23, %v2259_v55  ;;  %v2472_v52 = vsel %vm10725_vm9, %v6365_v59, %v10457_v38  ;;  %vm10726_vm5 = vmmov %vm10723_vm3 }
 0x26c   :  { %v10454_v15 = vunpack.i.h.bf16 %v8531_v17  ;;  %v6440_v18 = vunpack.i.l.bf16 %v8531_v17 }
 0x26d   :  { %5601 = vmatprep.subr.msk.bf16.mxu1 %vm7429_vm15, %v5600_v56 }
 0x26e   :  { %v2464_v22 = vsel %vm10723_vm3, %v6440_v18, %v10454_v15  ;;  %5604 = vmatpush1.bf16.msk.msra.mxu1 %vm10685_vm11, %v5603_v33  ;;  %v2463_v5 = vsel %vm10726_vm5, %v6401_v40, %v6440_v18  ;;  %vm10727_vm3 = vmmov %vm10724_vm6  ;;  %v10728_v33 = vunpack.i.h.bf16 %v8160_v27  ;;  %vm10729_vm6 = vcmask 269312  }
 0x26f   :  { %2671 = vmatprep.subr.bf16.mxu1 %v2359_v45  ;;  %v6444_v19 = vpop.permute.xlu0 %6443  ;;  %v2358_v21 = vsel %vm10727_vm3, %v8219_v48, %v8275_v58  ;;  %v5606_v55 = vpack.c.bf16 %v2472_v52, %v2464_v22  ;;  %vm10730_vm11 = vmmov %vm10729_vm6  ;;  %v10731_v15 = vunpack.i.h.bf16 %v8300_v46  ;;  %v2471_v48 = vsel %vm10726_vm5, %v6311_v6, %v6365_v59  ;;  %v8573_v58 = vpop.permute.xlu1 %2350  ;;  %v10734_v52 = vld [vmem:[#allocation7_spill] sm:$0xff]  ;;  %v10737_v59 = vld [vmem:[#allocation8_spill] sm:$0xff] }
 0x270   :  { %v6446_v23 = vunpack.i.h.bf16 %v6444_v19  ;;  %v6445_v30 = vunpack.i.l.bf16 %v6444_v19  ;;  %v1628_v56 = vsel %vm10729_vm6, %v10728_v33, %v6320_v3  ;;  %v1629_v45 = vsel %vm10730_vm11, %v6320_v3, %v6321_v11  ;;  %vm10732_vm9 = vmmov %vm10729_vm6 }
 0x271   :  { %vm10733_vm15 = vmmov %vm10729_vm6  ;;  %v5609_v3 = vpack.c.bf16 %v2471_v48, %v2463_v5  ;;  %v6361_v22 = vunpack.i.h.bf16 %v8267_v2  ;;  %vm10736_vm11 = vcmask 252928   ;;  %vm10738_vm3 = vnez %v10737_v59 }
 0x272   :  { %v1620_v19 = vsel %vm10732_vm9, %v10731_v15, %v6445_v30  ;;  %v1621_v61 = vsel %vm10733_vm15, %v6445_v30, %v6446_v23  ;;  %2672 = vmatpush1.bf16.msra.mxu1 %v2358_v21  ;;  %vm10735_vm15 = vnez %v10734_v52  ;;  %vm10739_vm6 = vcmask 261120   ;;  %vm10740_vm9 = vmmov %vm10736_vm11 }
 0x273   :  { %v5615_v27 = vpack.c.bf16 %v1628_v56, %v1620_v19  ;;  %5607 = vmatprep.subr.msk.bf16.mxu1 %vm10700_vm12, %v5606_v55  ;;  %v8577_v40 = vpop.permute.xlu0 %6448  ;;  %v5612_v18 = vpack.c.bf16 %v1629_v45, %v1621_v61  ;;  %v1721_v5 = vsel %vm10739_vm6, %v8462_v4, %v8474_v37  ;;  %v1834_v33 = vsel %vm10740_vm9, %v6360_v47, %v6361_v22  ;;  %v1715_v61 = vpop.permute.xlu1 %1714  ;;  %vm10742_vm5 = vmmov %vm10740_vm9 }
 0x274   :  { %v6451_v46 = vunpack.i.h.bf16 %v8577_v40  ;;  %v6450_v15 = vunpack.i.l.bf16 %v8577_v40  ;;  %v10462_v56 = vunpack.i.h.bf16 %v8353_v9  ;;  %v6406_v45 = vunpack.i.h.bf16 %v8423_v41 }
 0x275   :  { %5613 = vmatprep.subr.msk.bf16.mxu0 %vm10735_vm15, %v5612_v18  ;;  %v6405_v19 = vunpack.i.l.bf16 %v8423_v41  ;;  %v10741_v48 = vunpack.i.h.bf16 %v8368_v50  ;;  %v10746_v50 = vld [vmem:[#allocation19_spill] sm:$0xff]  ;;  %v10776_v2 = vunpack.i.h.bf16 %v8205_v51 }
 0x276   :  { %5610 = vmatpush1.bf16.msk.msra.mxu1 %vm10704_vm13, %v5609_v3  ;;  %v1826_v6 = vsel %vm10736_vm11, %v6450_v15, %v6451_v46  ;;  %5616 = vmatpush1.bf16.msk.msra.mxu0 %vm10738_vm3, %v5615_v27  ;;  %vm10743_vm11 = vmmov %vm10739_vm6  ;;  %vm10744_vm6 = vcmask 7168  }
 0x277   :  { %v8592_v30 = vpop.permute.xlu0 %6453  ;;  %2737 = vmatprep.subr.bf16.mxu1 %v10710_v25  ;;  %2700 = vmatprep.subr.bf16.mxu0 %v1721_v5  ;;  %v1825_v27 = vsel %vm10742_vm5, %v10741_v48, %v6450_v15  ;;  %v1720_v18 = vsel %vm10743_vm11, %v8215_v63, %v8462_v4  ;;  %v5618_v3 = vpack.c.bf16 %v1834_v33, %v1826_v6  ;;  %v6385_v5 = vunpack.i.l.bf16 %v8353_v9  ;;  %vm10745_vm9 = vmmov %vm10743_vm11 }
 0x278   :  { %v10461_v21 = vunpack.i.h.bf16 %v8592_v30  ;;  %v6455_v55 = vunpack.i.l.bf16 %v8592_v30  ;;  %v10747_v15 = vunpack.i.h.bf16 %v10746_v50  ;;  %vm10749_vm11 = vmmov %vm10744_vm6 }
 0x279   :  { %2688 = vmatmul.mubr.bf16.vlgmr.msra.gmra.mrb[8].mxu1 %v8472_v44  ;;  %v1979_v6 = vsel %vm10749_vm11, %v6385_v5, %v10462_v56 }
 0x27a   :  { %2738 = vmatpush1.bf16.msra.mxu1 %v10710_v25  ;;  %v1971_v41 = vsel %vm10744_vm6, %v6455_v55, %v10461_v21  ;;  %2701 = vmatpush1.bf16.msra.mxu0 %v1720_v18  ;;  %v1833_v48 = vsel %vm10742_vm5, %v10747_v15, %v6360_v47  ;;  %vm10750_vm6 = vcmask 269312   ;;  %v8637_v15 = vpop.permute.xlu1 %6423 }
 0x27b   :  { %v6459_v38 = vpop.permute.xlu0 %6458  ;;  %5380 = vmatprep.mubr.msk.bf16.mxu1 %vm10745_vm9, %v8104_v36  ;;  %5619 = vmatprep.subr.msk.bf16.mxu0 %vm7725_vm7, %v5618_v3  ;;  %v1630_v33 = vsel %vm10750_vm6, %v6321_v11, %v6405_v19  ;;  %vm10751_vm13 = vmmov %vm10750_vm6  ;;  %v5621_v36 = vpack.c.bf16 %v1833_v48, %v1825_v27  ;;  %v5624_v3 = vpack.c.bf16 %v1979_v6, %v1971_v41 }
 0x27c   :  { %v6461_v24 = vunpack.i.h.bf16 %v6459_v38  ;;  %v6460_v63 = vunpack.i.l.bf16 %v6459_v38  ;;  %v1631_v18 = vsel %vm10751_vm13, %v6405_v19, %v6406_v45  ;;  %vm10752_vm9 = vmmov %vm10749_vm11  ;;  %v10756_v45 = vunpack.i.h.bf16 %v8185_v16  ;;  %v10758_v19 = vld [vmem:[#allocation11_spill] sm:$0xff] }
 0x27d   :  { %v1970_v47 = vsel %vm10752_vm9, %v6396_v1, %v6455_v55  ;;  %vm10753_vm5 = vmmov %vm10750_vm6  ;;  %vm10761_vm11 = vcmask 261120   ;;  %vm10762_vm6 = vcmask 1039360  }
 0x27e   :  { %v1622_v38 = vsel %vm10753_vm5, %v6446_v23, %v6460_v63  ;;  %vm10754_vm12 = vmmov %vm10753_vm5  ;;  %5622 = vmatpush1.bf16.msk.msra.mxu0 %vm7731_vm1, %v5621_v36  ;;  %v1723_v16 = vsel %vm10761_vm11, %v8478_v28, %v1715_v61  ;;  %v6420_v36 = vunpack.i.l.bf16 %v8537_v31 }
 0x27f   :  { %v1623_v50 = vsel %vm10754_vm12, %v6460_v63, %v6461_v24  ;;  %v5651_v21 = vpack.c.bf16 %v1630_v33, %v1622_v38  ;;  %v8641_v54 = vpop.permute.xlu0 %6463  ;;  %vm10757_vm13 = vmmov %vm10752_vm9  ;;  %5625 = vmatprep.subr.msk.bf16.mxu0 %vm10735_vm15, %v5624_v3  ;;  %v6411_v24 = vunpack.i.h.bf16 %v8489_v26  ;;  %vm10759_vm12 = vnez %v10758_v19  ;;  %v10763_v33 = vld [vmem:[#allocation16_spill] sm:$0xff] }
 0x280   :  { %v5648_v11 = vpack.c.bf16 %v1631_v18, %v1623_v50  ;;  %v1978_v0 = vsel %vm10757_vm13, %v10756_v45, %v6385_v5  ;;  %v6466_v1 = vunpack.i.h.bf16 %v8641_v54  ;;  %v6465_v23 = vunpack.i.l.bf16 %v8641_v54  ;;  %vm10764_vm9 = vmmov %vm10762_vm6 }
 0x281   :  { %v5627_v55 = vpack.c.bf16 %v1978_v0, %v1970_v47  ;;  %v6410_v5 = vunpack.i.l.bf16 %v8489_v26  ;;  %v6416_v63 = vunpack.i.h.bf16 %v8509_v39  ;;  %v6421_v18 = vunpack.i.h.bf16 %v8537_v31  ;;  %v8674_v47 = vpop.permute.xlu1 %6488  ;;  %vm10765_vm5 = vmmov %vm10761_vm11  ;;  %v10769_v0 = vld [vmem:[#allocation15_spill] sm:$0xff] }
 0x282   :  { %5649 = vmatprep.subr.msk.bf16.mxu1 %vm10759_vm12, %v5648_v11  ;;  %v2116_v41 = vsel %vm10762_vm6, %v6465_v23, %v6466_v1  ;;  %v1722_v38 = vsel %vm10765_vm5, %v8474_v37, %v8478_v28  ;;  %v6415_v50 = vunpack.i.l.bf16 %v8509_v39  ;;  %vm10766_vm13 = vmmov %vm10762_vm6  ;;  %v6426_v28 = vunpack.i.h.bf16 %v8637_v15 }
 0x283   :  { %5652 = vmatpush1.bf16.msk.msra.mxu1 %vm7838_vm0, %v5651_v21  ;;  %5628 = vmatpush1.bf16.msk.msra.mxu0 %vm10738_vm3, %v5627_v55  ;;  %v8663_v48 = vpop.permute.xlu0 %6468  ;;  %v2124_v61 = vsel %vm10764_vm9, %v6410_v5, %v6411_v24  ;;  %v2115_v3 = vsel %vm10766_vm13, %v6431_v43, %v6465_v23  ;;  %vm10767_vm11 = vmmov %vm10762_vm6  ;;  %vm10768_vm6 = vcmask 793600   ;;  %vm10771_vm5 = vcmask 252928  }
 0x284   :  { %2741 = vmatprep.subr.bf16.mxu1 %v1723_v16  ;;  %v6471_v6 = vunpack.i.h.bf16 %v8663_v48  ;;  %v6470_v21 = vunpack.i.l.bf16 %v8663_v48  ;;  %2706 = vmatprep.subr.bf16.mxu0 %v10763_v33  ;;  %v5630_v11 = vpack.c.bf16 %v2124_v61, %v2116_v41  ;;  %v2123_v45 = vsel %vm10767_vm11, %v6316_v62, %v6410_v5  ;;  %vm10770_vm9 = vmmov %vm10768_vm6 }
 0x285   :  { %v2269_v37 = vsel %vm10770_vm9, %v6415_v50, %v6416_v63  ;;  %v1835_v42 = vsel %vm10771_vm5, %v6361_v22, %v6420_v36  ;;  %vm10772_vm13 = vmmov %vm10771_vm5  ;;  %v6425_v23 = vunpack.i.l.bf16 %v8637_v15  ;;  %v5633_v16 = vpack.c.bf16 %v2123_v45, %v2115_v3 }
 0x286   :  { %v2261_v31 = vsel %vm10768_vm6, %v6470_v21, %v6471_v6  ;;  %v1836_v62 = vsel %vm10772_vm13, %v6420_v36, %v6421_v18  ;;  %vm10773_vm11 = vmmov %vm10768_vm6  ;;  %v6491_v40 = vunpack.i.h.bf16 %v8674_v47  ;;  %v10782_v45 = vunpack.i.h.bf16 %v8592_v30 }
 0x287   :  { %2742 = vmatpush1.bf16.msra.mxu1 %v1722_v38  ;;  %2707 = vmatpush1.bf16.msra.mxu0 %v10769_v0  ;;  %v6474_v55 = vpop.permute.xlu0 %6473  ;;  %v2260_v5 = vsel %vm10773_vm11, %v6436_v34, %v6470_v21  ;;  %vm10774_vm6 = vmmov %vm10771_vm5  ;;  %v5636_v61 = vpack.c.bf16 %v2269_v37, %v2261_v31  ;;  %v6494_v38 = vpop.permute.xlu1 %6493 }
 0x288   :  { %v6476_v32 = vunpack.i.h.bf16 %v6474_v55  ;;  %v6475_v43 = vunpack.i.l.bf16 %v6474_v55  ;;  %5631 = vmatprep.subr.msk.bf16.mxu0 %vm7725_vm7, %v5630_v11  ;;  %vm10775_vm9 = vmmov %vm10771_vm5  ;;  %vm10778_vm5 = vcmask 7168   ;;  %v6490_v11 = vunpack.i.l.bf16 %v8674_v47 }
 0x289   :  { %vm10777_vm10 = vmmov %vm10773_vm11  ;;  %v1981_v34 = vsel %vm10778_vm5, %v6425_v23, %v6426_v28 }
 0x28a   :  { %v1827_v41 = vsel %vm10774_vm6, %v6451_v46, %v6475_v43  ;;  %v1828_v33 = vsel %vm10775_vm9, %v6475_v43, %v6476_v32  ;;  %v2268_v22 = vsel %vm10777_vm10, %v10776_v2, %v6415_v50  ;;  %v10780_v50 = vunpack.i.h.bf16 %v8353_v9  ;;  %vm10781_vm10 = vmmov %vm10778_vm5 }
 0x28b   :  { %v5657_v18 = vpack.c.bf16 %v1835_v42, %v1827_v41  ;;  %5634 = vmatpush1.bf16.msk.msra.mxu0 %vm7731_vm1, %v5633_v16  ;;  %v6479_v15 = vpop.permute.xlu0 %6478  ;;  %v5654_v13 = vpack.c.bf16 %v1836_v62, %v1828_v33  ;;  %v5639_v36 = vpack.c.bf16 %v2268_v22, %v2260_v5  ;;  %vm10783_vm13 = vmmov %vm10778_vm5  ;;  %vm10786_vm6 = vcmask 785408  }
 0x28c   :  { %v6481_v21 = vunpack.i.h.bf16 %v6479_v15  ;;  %v6480_v46 = vunpack.i.l.bf16 %v6479_v15  ;;  %5637 = vmatprep.subr.msk.bf16.mxu0 %vm10735_vm15, %v5636_v61  ;;  %v1980_v3 = vsel %vm10781_vm10, %v10780_v50, %v6425_v23  ;;  %vm10784_vm11 = vmmov %vm10778_vm5  ;;  %v2361_v9 = vsel %vm10786_vm6, %v8482_v8, %v8573_v58  ;;  %v6499_v23 = vpop.permute.xlu1 %6498 }
 0x28d   :  { %5655 = vmatprep.subr.msk.bf16.mxu1 %vm7900_vm2, %v5654_v13  ;;  %vm10787_vm9 = vcmask 777216   ;;  %v6496_v43 = vunpack.i.h.bf16 %v6494_v38  ;;  %vm10788_vm5 = vmmov %vm10786_vm6  ;;  %v10789_v5 = vunpack.i.h.bf16 %v8295_v10  ;;  %v6495_v33 = vunpack.i.l.bf16 %v6494_v38  ;;  %v10794_v13 = vld [vmem:[#allocation18_spill] sm:$0xff] }
 0x28e   :  { %v1972_v31 = vsel %vm10783_vm13, %v10782_v45, %v6480_v46  ;;  %v1973_v0 = vsel %vm10784_vm11, %v6480_v46, %v6481_v21  ;;  %5658 = vmatpush1.bf16.msk.msra.mxu1 %vm7904_vm14, %v5657_v18  ;;  %v2474_v30 = vsel %vm10787_vm9, %v6490_v11, %v6491_v40  ;;  %v2360_v16 = vsel %vm10788_vm5, %v8454_v57, %v8482_v8  ;;  %vm10790_vm10 = vmmov %vm10787_vm9 }
 0x28f   :  { %v5663_v37 = vpack.c.bf16 %v1980_v3, %v1972_v31  ;;  %5640 = vmatpush1.bf16.msk.msra.mxu0 %vm10738_vm3, %v5639_v36  ;;  %v8731_v28 = vpop.permute.xlu0 %6483  ;;  %v5660_v32 = vpack.c.bf16 %v1981_v34, %v1973_v0  ;;  %v2473_v41 = vsel %vm10790_vm10, %v10789_v5, %v6490_v11  ;;  %v10791_v61 = vunpack.i.h.bf16 %v8531_v17  ;;  %vm10792_vm13 = vmmov %vm10787_vm9  ;;  %v10799_v3 = vld [vmem:[#allocation17_spill] sm:$0xff] }
 0x290   :  { %v6486_v42 = vunpack.i.h.bf16 %v8731_v28  ;;  %v6485_v62 = vunpack.i.l.bf16 %v8731_v28  ;;  %2712 = vmatprep.subr.bf16.mxu0 %v2361_v9  ;;  %vm10793_vm11 = vmmov %vm10787_vm9  ;;  %vm10795_vm6 = vcmask 1039360   ;;  %v6501_v8 = vunpack.i.h.bf16 %v6499_v23  ;;  %v2355_v21 = vpop.permute.xlu1 %2354 }
 0x291   :  { %5661 = vmatprep.subr.msk.bf16.mxu1 %vm10759_vm12, %v5660_v32  ;;  %v2126_v10 = vsel %vm10795_vm6, %v6495_v33, %v6496_v43  ;;  %vm10796_vm9 = vmmov %vm10795_vm6  ;;  %v6500_v46 = vunpack.i.l.bf16 %v6499_v23 }
 0x292   :  { %v2465_v2 = vsel %vm10792_vm13, %v10791_v61, %v6485_v62  ;;  %v2466_v22 = vsel %vm10793_vm11, %v6485_v62, %v6486_v42  ;;  %5664 = vmatpush1.bf16.msk.msra.mxu1 %vm7838_vm0, %v5663_v37  ;;  %v2125_v17 = vsel %vm10796_vm9, %v6411_v24, %v6495_v33  ;;  %vm10797_vm5 = vmmov %vm10795_vm6  ;;  %vm10800_vm13 = vcmask 793600  }
 0x293   :  { %v5645_v18 = vpack.c.bf16 %v2473_v41, %v2465_v2  ;;  %2713 = vmatpush1.bf16.msra.mxu0 %v2360_v16  ;;  %v6504_v15 = vpop.permute.xlu0 %6503  ;;  %2747 = vmatprep.subr.bf16.mxu1 %v10794_v13  ;;  %v5642_v57 = vpack.c.bf16 %v2474_v30, %v2466_v22  ;;  %vm10798_vm10 = vmmov %vm10797_vm5  ;;  %v2271_v0 = vsel %vm10800_vm13, %v6500_v46, %v6501_v8 }
 0x294   :  { %v6506_v34 = vunpack.i.h.bf16 %v6504_v15  ;;  %v6505_v38 = vunpack.i.l.bf16 %v6504_v15  ;;  %vm10801_vm11 = vmmov %vm10800_vm13  ;;  %v6519_v28 = vpop.permute.xlu1 %6518 }
 0x295   :  { %5643 = vmatprep.subr.msk.bf16.mxu0 %vm7725_vm7, %v5642_v57  ;;  %v2270_v54 = vsel %vm10801_vm11, %v6416_v63, %v6500_v46  ;;  %vm10802_vm6 = vmmov %vm10801_vm11  ;;  %v6521_v39 = vunpack.i.h.bf16 %v6519_v28  ;;  %v6520_v48 = vunpack.i.l.bf16 %v6519_v28 }
 0x296   :  { %v2117_v36 = vsel %vm10797_vm5, %v6466_v1, %v6505_v38  ;;  %v2118_v50 = vsel %vm10798_vm10, %v6505_v38, %v6506_v34  ;;  %2748 = vmatpush1.bf16.msra.mxu1 %v10799_v3  ;;  %vm10803_vm9 = vmmov %vm10802_vm6  ;;  %vm10804_vm5 = vcmask 785408   ;;  %vm10805_vm10 = vcmask 777216  }
 0x297   :  { %v5669_v11 = vpack.c.bf16 %v2125_v17, %v2117_v36  ;;  %5646 = vmatpush1.bf16.msk.msra.mxu0 %vm7731_vm1, %v5645_v18  ;;  %v6509_v45 = vpop.permute.xlu0 %6508  ;;  %v5666_v31 = vpack.c.bf16 %v2126_v10, %v2118_v50  ;;  %v2476_v43 = vsel %vm10805_vm10, %v6520_v48, %v6521_v39  ;;  %vm10806_vm13 = vmmov %vm10804_vm5 }
 0x298   :  { %v6511_v26 = vunpack.i.h.bf16 %v6509_v45  ;;  %v6510_v37 = vunpack.i.l.bf16 %v6509_v45  ;;  %3891 = vmatprep.subr.bf16.mxu0 %v10710_v25  ;;  %vm10807_vm11 = vmmov %vm10805_vm10  ;;  %v8872_v45 = vld [vmem:[%s10382_s1 + $0x10] sm:$0xff] }
 0x299   :  { %5667 = vmatprep.subr.msk.bf16.mxu1 %vm7900_vm2, %v5666_v31  ;;  %v2475_v5 = vsel %vm10807_vm11, %v6491_v40, %v6520_v48  ;;  %v8877_v31 = vcombine.high %v8872_v45, %v8872_v45 }
 0x29a   :  { %v2262_v1 = vsel %vm10802_vm6, %v6471_v6, %v6510_v37  ;;  %v2263_v24 = vsel %vm10803_vm9, %v6510_v37, %v6511_v26  ;;  %2729 = vmatmul.mubr.bf16.vlgmr.msra.gmra.mrb[12].mxu0 %v8472_v44  ;;  %5670 = vmatpush1.bf16.msk.msra.mxu1 %vm7904_vm14, %v5669_v11  ;;  %vm10808_vm6 = vmmov %vm10805_vm10  ;;  %v8864_v11 = vpop.permute.xlu1 %6523 }
 0x29b   :  { %v5675_v9 = vpack.c.bf16 %v2270_v54, %v2262_v1  ;;  %v2353_v32 = vpop.permute.xlu0 %2352  ;;  %v5672_v30 = vpack.c.bf16 %v2271_v0, %v2263_v24  ;;  %3892 = vmatpush1.bf16.msra.mxu0 %v10710_v25  ;;  %vm10809_vm9 = vmmov %vm10808_vm6 }
 0x29c   :  { %v2363_v63 = vsel %vm10804_vm5, %v2353_v32, %v2355_v21  ;;  %v2362_v16 = vsel %vm10806_vm13, %v8573_v58, %v2353_v32  ;;  %vm10814_vm5 = vcmask 261120   ;;  %vm10827_vm13 = vcmask 269312  }
 0x29d   :  { %5673 = vmatprep.subr.msk.bf16.mxu1 %vm10759_vm12, %v5672_v30  ;;  %5384 = vmatprep.mubr.msk.bf16.mxu0 %vm10814_vm5, %v8877_v31  ;;  %vm10815_vm10 = vmmov %vm10814_vm5  ;;  %vm10831_vm5 = vcmask 252928  }
 0x29e   :  { %5676 = vmatpush1.bf16.msk.msra.mxu1 %vm7838_vm0, %v5675_v9  ;;  %v8880_v0 = vpop.permute.xlu1 %2975  ;;  %vm10828_vm11 = vmmov %vm10827_vm13 }
 0x29f   :  { %v6514_v6 = vpop.permute.xlu0 %6513  ;;  %2753 = vmatprep.subr.bf16.mxu1 %v2363_v63 }
 0x2a0   :  { %v6516_v62 = vunpack.i.h.bf16 %v6514_v6  ;;  %v6515_v23 = vunpack.i.l.bf16 %v6514_v6 }
 0x2a2   :  { %v2467_v41 = vsel %vm10808_vm6, %v6486_v42, %v6515_v23  ;;  %v2468_v33 = vsel %vm10809_vm9, %v6515_v23, %v6516_v62  ;;  %2754 = vmatpush1.bf16.msra.mxu1 %v2362_v16  ;;  %v8889_v26 = vpop.permute.xlu1 %6533  ;;  %vm10829_vm6 = vmmov %vm10828_vm11 }
 0x2a3   :  { %v5681_v61 = vpack.c.bf16 %v2475_v5, %v2467_v41  ;;  %v5678_v2 = vpack.c.bf16 %v2476_v43, %v2468_v33  ;;  %vm10830_vm9 = vmmov %vm10829_vm6 }
 0x2a5   :  { %5679 = vmatprep.subr.msk.bf16.mxu1 %vm7900_vm2, %v5678_v2 }
 0x2a6   :  { %5682 = vmatpush1.bf16.msk.msra.mxu1 %vm7904_vm14, %v5681_v61  ;;  %v8893_v24 = vpop.permute.xlu1 %6548 }
 0x2a7   :  { %3932 = vmatprep.subr.bf16.mxu1 %v10710_v25 }
 0x2a9   :  { %2770 = vmatmul.mubr.bf16.vlgmr.msra.gmra.mrb[12].mxu1 %v8472_v44 }
 0x2aa   :  { %3933 = vmatpush1.bf16.msra.mxu1 %v10710_v25  ;;  %5385 = vmatprep.mubr.msk.bf16.mxu1 %vm10815_vm10, %v8877_v31  ;;  %v8911_v63 = vpop.permute.xlu1 %6553  ;;  %vm10832_vm10 = vnez %v10546_v14 }
 0x2ae   :  { %v8919_v6 = vpop.permute.xlu1 %6558 }
 0x2b2   :  { %v8928_v33 = vpop.permute.xlu1 %6568 }
 0x331   :  { %v2648_v58 = vpop.f32.mrb[8].mxu0 }
 0x332   :  { %v8808_v47 = vmax.f32 %v2648_v58, 0.0  ;;  %v2650_v40 = vpop.f32.mrb[9].mxu0  ;;  %v8942_v58 = vpop.permute.xlu1 %6573 }
 0x333   :  { %v8810_v42 = vmax.f32 %v2650_v40, 0.0  ;;  %v2652_v22 = vpop.f32.mrb[10].mxu0 }
 0x334   :  { %10810 = vst [vmem:[#allocation7_spill] sm:$0xff] %v8808_v47  ;;  %v8814_v18 = vpack.c.bf16 %v10651_v29, %v8808_v47  ;;  %v2653_v44 = vpop.f32.mrb[11].mxu0  ;;  %v6612_v13 = vpack.i.bf16 %v10651_v29, %v8808_v47  ;;  %v6529_v22 = vpop.permute.xlu0 %6528 }
 0x335   :  { %10811 = vst [vmem:[#allocation8_spill] sm:$0xff] %v8810_v42  ;;  %v8818_v15 = vpack.c.bf16 %v10651_v29, %v8810_v42  ;;  %v6632_v57 = vpack.i.bf16 %v8810_v42, %v8808_v47 }
 0x336   :  { %3615 = vrot.lane.b32.xlu0 %v8814_v18, %s7078_s3  ;;  %2977 = vrot.lane.b32.xlu1 %v8814_v18, %s7073_s18  ;;  %v8951_v44 = vpop.permute.xlu1 %6583 }
 0x33a   :  { %6613 = vrot.lane.b32.xlu1 %v6612_v13, %s7077_s30  ;;  %2979 = vrot.lane.b32.xlu0 %v8818_v15, %s7073_s18 }
 0x33e   :  { %6618 = vrot.lane.b32.xlu1 %v6612_v13, %s7079_s12  ;;  %3617 = vrot.lane.b32.xlu0 %v8818_v15, %s7078_s3 }
 0x342   :  { %6608 = vrot.lane.b32.xlu0 %v6612_v13, %s7076_s29  ;;  %6633 = vrot.lane.b32.xlu1 %v6632_v57, %s7075_s28 }
 0x346   :  { %6623 = vrot.lane.b32.xlu0 %v6632_v57, %s7072_s17 }
 0x34a   :  { %6628 = vrot.lane.b32.xlu0 %v6632_v57, %s7074_s27  ;;  %v8959_v57 = vpop.permute.xlu0 %6538 }
 0x34c   :  { %v2689_v10 = vpop.f32.mrb[8].mxu1 }
 0x34d   :  { %v8838_v8 = vmax.f32 %v2689_v10, 0.0  ;;  %v2691_v34 = vpop.f32.mrb[9].mxu1  ;;  %v8964_v10 = vpop.permute.xlu1 %6588 }
 0x34e   :  { %v8840_v38 = vmax.f32 %v2691_v34, 0.0  ;;  %v2693_v21 = vpop.f32.mrb[10].mxu1  ;;  %v10824_v34 = vld [vmem:[#allocation5_spill] sm:$0xff] }
 0x34f   :  { %10812 = vst [vmem:[#allocation19_spill] sm:$0xff] %v8838_v8  ;;  %v8844_v17 = vpack.c.bf16 %v10651_v29, %v8838_v8  ;;  %v2694_v46 = vpop.f32.mrb[11].mxu1  ;;  %v6642_v50 = vpack.i.bf16 %v8838_v8, %v8810_v42  ;;  %v8969_v21 = vpop.permute.xlu0 %6543 }
 0x350   :  { %10813 = vst [vmem:[#allocation16_spill] sm:$0xff] %v8840_v38  ;;  %v8848_v36 = vpack.c.bf16 %v10651_v29, %v8840_v38  ;;  %v6662_v3 = vpack.i.bf16 %v8840_v38, %v8838_v8 }
 0x351   :  { %2981 = vrot.lane.b32.xlu1 %v8844_v17, %s7073_s18 }
 0x352   :  { %2983 = vrot.lane.b32.xlu0 %v8848_v36, %s7073_s18 }
 0x355   :  { %3619 = vrot.lane.b32.xlu1 %v8844_v17, %s7078_s3 }
 0x356   :  { %3621 = vrot.lane.b32.xlu0 %v8848_v36, %s7078_s3 }
 0x359   :  { %6643 = vrot.lane.b32.xlu1 %v6642_v50, %s7077_s30 }
 0x35a   :  { %6638 = vrot.lane.b32.xlu0 %v6642_v50, %s7076_s29 }
 0x35d   :  { %6648 = vrot.lane.b32.xlu1 %v10651_v29, %s7075_s28 }
 0x35e   :  { %6663 = vrot.lane.b32.xlu0 %v6662_v3, %s7072_s17 }
 0x361   :  { %6653 = vrot.lane.b32.xlu1 %v6642_v50, %s7079_s12  ;;  %v8973_v50 = vpop.permute.xlu1 %6593 }
 0x362   :  { %6668 = vrot.lane.b32.xlu0 %v6662_v3, %s7074_s27 }
 0x365   :  { %6658 = vrot.lane.b32.xlu1 %v10651_v29, %s7072_s17 }
 0x366   :  { %6673 = vrot.lane.b32.xlu0 %v6662_v3, %s7075_s28  ;;  %v8978_v3 = vpop.permute.xlu0 %6563 }
 0x36d   :  { %v2730_v37 = vpop.f32.mrb[12].mxu0 }
 0x36e   :  { %v8891_v54 = vmax.f32 %v2730_v37, 0.0  ;;  %v2732_v1 = vpop.f32.mrb[13].mxu0  ;;  %v8982_v37 = vpop.permute.xlu1 %6598 }
 0x36f   :  { %v2734_v28 = vpop.f32.mrb[14].mxu0  ;;  %v8899_v32 = vmax.f32 %v2732_v1, 0.0  ;;  %v10825_v1 = vmov 0  }
 0x370   :  { %10816 = vst [vmem:[#allocation15_spill] sm:$0xff] %v8891_v54  ;;  %v8897_v9 = vpack.c.bf16 %v10651_v29, %v8891_v54  ;;  %v2735_v30 = vpop.f32.mrb[15].mxu0  ;;  %v6692_v48 = vpack.i.bf16 %v8891_v54, %v8840_v38  ;;  %v8987_v28 = vpop.permute.xlu0 %6578 }
 0x371   :  { %10818 = vst [vmem:[#allocation17_spill] sm:$0xff] %v8899_v32  ;;  %v8907_v39 = vpack.c.bf16 %v10651_v29, %v8899_v32  ;;  %v6707_v41 = vpack.i.bf16 %v8899_v32, %v8891_v54  ;;  %v6530_v54 = vunpack.i.l.bf16 %v6529_v22 }
 0x372   :  { %10817 = vst [vmem:[#allocation18_spill] sm:$0xff] %v8897_v9  ;;  %3623 = vrot.lane.b32.xlu1 %v8897_v9, %s7078_s3  ;;  %2985 = vrot.lane.b32.xlu0 %v8897_v9, %s7073_s18  ;;  %v8991_v30 = vpop.permute.xlu1 %6603 }
 0x373   :  { %10819 = vst [vmem:[#allocation20_spill] sm:$0xff] %v8907_v39 }
 0x376   :  { %6693 = vrot.lane.b32.xlu0 %v6692_v48, %s7076_s29  ;;  %2987 = vrot.lane.b32.xlu1 %v8907_v39, %s7073_s18 }
 0x37a   :  { %6698 = vrot.lane.b32.xlu0 %v6692_v48, %s7077_s30  ;;  %6678 = vrot.lane.b32.xlu1 %v10651_v29, %s7076_s29 }
 0x37c   :  { %v2771_v43 = vpop.f32.mrb[12].mxu1 }
 0x37d   :  { %v2773_v62 = vpop.f32.mrb[13].mxu1  ;;  %v8937_v2 = vmax.f32 %v2771_v43, 0.0 }
 0x37e   :  { %6703 = vrot.lane.b32.xlu0 %v6692_v48, %s7079_s12  ;;  %6683 = vrot.lane.b32.xlu1 %v10651_v29, %s7077_s30  ;;  %v8924_v23 = vmax.f32 %v2773_v62, 0.0  ;;  %v2775_v16 = vpop.f32.mrb[14].mxu1 }
 0x37f   :  { %v2776_v5 = vpop.f32.mrb[15].mxu1  ;;  %10822 = vst [vmem:[#allocation23_spill] sm:$0xff] %v8937_v2  ;;  %v8946_v40 = vpack.c.bf16 %v10651_v29, %v8937_v2  ;;  %v6722_v13 = vpack.i.bf16 %v8937_v2, %v8899_v32  ;;  %v10826_v16 = vld [vmem:[#allocation4_spill] sm:$0xff]  ;;  %v6525_v32 = vunpack.i.l.bf16 %v8864_v11 }
 0x380   :  { %10820 = vst [vmem:[#allocation21_spill] sm:$0xff] %v8924_v23  ;;  %v8932_v61 = vpack.c.bf16 %v10651_v29, %v8924_v23  ;;  %v6732_v46 = vpack.i.bf16 %v8924_v23, %v8937_v2  ;;  %v6772_v5 = vpack.i.bf16 %v10826_v16, %v8924_v23  ;;  %v6531_v16 = vunpack.i.h.bf16 %v6529_v22 }
 0x381   :  { %10823 = vst [vmem:[#allocation24_spill] sm:$0xff] %v8946_v40 }
 0x382   :  { %10821 = vst [vmem:[#allocation22_spill] sm:$0xff] %v8932_v61  ;;  %6688 = vrot.lane.b32.xlu1 %v10651_v29, %s7074_s27  ;;  %6708 = vrot.lane.b32.xlu0 %v6707_v41, %s7072_s17  ;;  %v2901_v47 = vsel %vm10828_vm11, %v6531_v16, %v6525_v32  ;;  %vm10834_vm11 = vmmov %vm10831_vm5 }
 0x386   :  { %2991 = vrot.lane.b32.xlu1 %v8932_v61, %s7073_s18  ;;  %6713 = vrot.lane.b32.xlu0 %v6707_v41, %s7074_s27 }
 0x38a   :  { %3627 = vrot.lane.b32.xlu1 %v8946_v40, %s7078_s3  ;;  %6718 = vrot.lane.b32.xlu0 %v6707_v41, %s7075_s28 }
 0x38e   :  { %6738 = vrot.lane.b32.xlu1 %v10651_v29, %s7075_s28  ;;  %2989 = vrot.lane.b32.xlu0 %v8946_v40, %s7073_s18 }
 0x392   :  { %6758 = vrot.lane.b32.xlu1 %v10651_v29, %s7079_s12  ;;  %6723 = vrot.lane.b32.xlu0 %v6722_v13, %s7076_s29 }
 0x396   :  { %6763 = vrot.lane.b32.xlu1 %v10824_v34, %s7076_s29  ;;  %6728 = vrot.lane.b32.xlu0 %v6722_v13, %s7077_s30 }
 0x39a   :  { %6768 = vrot.lane.b32.xlu1 %v10824_v34, %s7077_s30  ;;  %6733 = vrot.lane.b32.xlu0 %v6732_v46, %s7072_s17 }
 0x39e   :  { %3625 = vrot.lane.b32.xlu0 %v8907_v39, %s7078_s3  ;;  %3631 = vrot.lane.b32.xlu1 %v10825_v1, %s7078_s3 }
 0x3a2   :  { %6743 = vrot.lane.b32.xlu0 %v6732_v46, %s7074_s27  ;;  %6788 = vrot.lane.b32.xlu1 %v10824_v34, %s7079_s12 }
 0x3a6   :  { %6748 = vrot.lane.b32.xlu0 %v6732_v46, %s7075_s28  ;;  %6798 = vrot.lane.b32.xlu1 %v10651_v29, %s7072_s17 }
 0x3a8   :  { %v8994_v48 = vpop.permute.xlu0 %3615  ;;  %v2978_v43 = vpop.permute.xlu1 %2977 }
 0x3aa   :  { %6753 = vrot.lane.b32.xlu0 %v6722_v13, %s7079_s12  ;;  %v10479_v13 = vunpack.i.h.bf16 %v8864_v11  ;;  %4260 = vrot.lane.b32.xlu1 %v10825_v1, %s7073_s18 }
 0x3ac   :  { %v8997_v62 = vpop.permute.xlu0 %2979  ;;  %v9002_v41 = vpop.permute.xlu1 %6613  ;;  %v2902_v42 = vsel %vm10827_vm13, %v6525_v32, %v10479_v13  ;;  %v6535_v13 = vunpack.i.l.bf16 %v8889_v26  ;;  %vm10833_vm13 = vcmask 261120  }
 0x3ae   :  { %6773 = vrot.lane.b32.xlu0 %v6772_v5, %s7076_s29  ;;  %6813 = vrot.lane.b32.xlu1 %v10651_v29, %s7074_s27 }
 0x3b0   :  { %v9004_v2 = vpop.permute.xlu0 %3617  ;;  %v9009_v46 = vpop.permute.xlu1 %6618 }
 0x3b2   :  { %6778 = vrot.lane.b32.xlu0 %v6772_v5, %s7077_s30  ;;  %6823 = vrot.lane.b32.xlu1 %v10651_v29, %s7075_s28 }
 0x3b4   :  { %v9007_v34 = vpop.permute.xlu0 %6608  ;;  %v9030_v55 = vpop.permute.xlu1 %6633 }
 0x3b6   :  { %3629 = vrot.lane.b32.xlu0 %v8932_v61, %s7078_s3 }
 0x3b8   :  { %v9015_v23 = vpop.permute.xlu0 %6623 }
 0x3b9   :  { %v10481_v38 = vunpack.i.h.bf16 %v9015_v23  ;;  %v6625_v8 = vunpack.i.l.bf16 %v9015_v23 }
 0x3ba   :  { %6783 = vrot.lane.b32.xlu0 %v6772_v5, %s7079_s12  ;;  %v10485_v5 = vunpack.i.h.bf16 %v8889_v26 }
 0x3bb   :  { %v2893_v40 = vsel %vm10829_vm6, %v6530_v54, %v6625_v8  ;;  %v2894_v61 = vsel %vm10830_vm9, %v6625_v8, %v10481_v38  ;;  %v6545_v38 = vunpack.i.l.bf16 %v8969_v21  ;;  %vm10835_vm6 = vmmov %vm10831_vm5 }
 0x3bc   :  { %v5687_v22 = vpack.c.bf16 %v2901_v47, %v2893_v40  ;;  %v9032_v51 = vpop.permute.xlu0 %6628  ;;  %v5684_v27 = vpack.c.bf16 %v2902_v42, %v2894_v61  ;;  %v6635_v42 = vunpack.i.l.bf16 %v9030_v55  ;;  %v2994_v61 = vsel %vm10833_vm13, %v2978_v43, %v8997_v62  ;;  %vm10836_vm9 = vmmov %vm10833_vm13 }
 0x3bd   :  { %v10480_v32 = vunpack.i.h.bf16 %v9032_v51  ;;  %v6630_v54 = vunpack.i.l.bf16 %v9032_v51  ;;  %v6541_v40 = vunpack.i.h.bf16 %v8959_v57  ;;  %v3107_v16 = vsel %vm10834_vm11, %v6535_v13, %v10485_v5  ;;  %vm10840_vm13 = vmmov %vm10835_vm6 }
 0x3be   :  { %5685 = vmatprep.subr.msk.bf16.mxu0 %vm7296_vm4, %v5684_v27  ;;  %6793 = vrot.lane.b32.xlu0 %v10651_v29, %s7072_s17  ;;  %v6540_v27 = vunpack.i.l.bf16 %v8959_v57  ;;  %v2993_v47 = vsel %vm10836_vm9, %v8880_v0, %v2978_v43  ;;  %v10837_v57 = vld [vmem:[#allocation6_spill] sm:$0xff]  ;;  %v6551_v5 = vunpack.i.h.bf16 %v8893_v24  ;;  %v10841_v0 = vunpack.i.h.bf16 %v8969_v21 }
 0x3bf   :  { %v3099_v8 = vsel %vm10831_vm5, %v6630_v54, %v10480_v32  ;;  %5688 = vmatpush1.bf16.msk.msra.mxu0 %vm10832_vm10, %v5687_v22  ;;  %vm10839_vm5 = vcmask 7168   ;;  %v6550_v32 = vunpack.i.l.bf16 %v8893_v24  ;;  %v10486_v24 = vunpack.i.h.bf16 %v8911_v63  ;;  %6833 = vrot.lane.b32.xlu1 %v10837_v57, %s7075_s28 }
 0x3c0   :  { %3895 = vmatprep.subr.bf16.mxu0 %v2994_v61  ;;  %v3098_v22 = vsel %vm10835_vm6, %v6540_v27, %v6630_v54  ;;  %v5690_v1 = vpack.c.bf16 %v3107_v16, %v3099_v8  ;;  %v10838_v61 = vunpack.i.h.bf16 %v9030_v55  ;;  %v3106_v54 = vsel %vm10840_vm13, %v6541_v40, %v6535_v13  ;;  %vm10842_vm11 = vmmov %vm10839_vm5 }
 0x3c1   :  { %v3252_v43 = vsel %vm10842_vm11, %v6545_v38, %v10841_v0  ;;  %v5693_v8 = vpack.c.bf16 %v3106_v54, %v3098_v22  ;;  %vm10843_vm6 = vmmov %vm10839_vm5  ;;  %v6555_v13 = vunpack.i.l.bf16 %v8911_v63  ;;  %vm10844_vm9 = vnez %v10550_v53 }
 0x3c2   :  { %6803 = vrot.lane.b32.xlu0 %v10837_v57, %s7072_s17  ;;  %v3244_v19 = vsel %vm10839_vm5, %v6635_v42, %v10838_v61  ;;  %v10845_v22 = vunpack.i.h.bf16 %v8864_v11  ;;  %vm10846_vm13 = vcmask 269312   ;;  %v6611_v54 = vunpack.i.h.bf16 %v9007_v34 }
 0x3c3   :  { %v9070_v9 = vpop.permute.xlu1 %2981  ;;  %3896 = vmatpush1.bf16.msra.mxu0 %v2993_v47  ;;  %v3243_v47 = vsel %vm10843_vm6, %v6550_v32, %v6635_v42  ;;  %v5696_v16 = vpack.c.bf16 %v3252_v43, %v3244_v19  ;;  %v10490_v32 = vunpack.i.h.bf16 %v8919_v6  ;;  %v6560_v42 = vunpack.i.l.bf16 %v8919_v6  ;;  %vm10847_vm11 = vmmov %vm10846_vm13  ;;  %6843 = vrot.lane.b32.xlu1 %v10651_v29, %s7076_s29 }
 0x3c4   :  { %v9075_v27 = vpop.permute.xlu0 %2983  ;;  %5691 = vmatprep.subr.msk.bf16.mxu0 %vm7346_vm8, %v5690_v1  ;;  %v3251_v1 = vsel %vm10839_vm5, %v6551_v5, %v6545_v38  ;;  %v9107_v38 = vsel %vm10846_vm13, %v10845_v22, %v6555_v13  ;;  %v2904_v5 = vsel %vm10847_vm11, %v6555_v13, %v10486_v24  ;;  %vm10848_vm6 = vcmask 1039360  }
 0x3c5   :  { %v5699_v19 = vpack.c.bf16 %v3251_v1, %v3243_v47  ;;  %v6565_v47 = vunpack.i.l.bf16 %v8978_v3  ;;  %v6616_v24 = vunpack.i.h.bf16 %v9002_v41  ;;  %vm10849_vm5 = vmmov %vm10848_vm6  ;;  %vm10850_vm13 = vcmask 793600  }
 0x3c6   :  { %6808 = vrot.lane.b32.xlu0 %v10651_v29, %s7074_s27  ;;  %vm10851_vm11 = vmmov %vm10849_vm5  ;;  %v6615_v22 = vunpack.i.l.bf16 %v9002_v41 }
 0x3c7   :  { %v9089_v40 = vpop.permute.xlu1 %3619  ;;  %5694 = vmatpush1.bf16.msk.msra.mxu0 %vm10844_vm9, %v5693_v8  ;;  %vm10852_vm14 = vmmov %vm10849_vm5  ;;  %6848 = vrot.lane.b32.xlu1 %v10651_v29, %s7077_s30 }
 0x3c8   :  { %v9094_v61 = vpop.permute.xlu0 %3621  ;;  %5697 = vmatprep.subr.msk.bf16.mxu0 %vm7296_vm4, %v5696_v16  ;;  %v6610_v16 = vunpack.i.l.bf16 %v9007_v34 }
 0x3ca   :  { %6818 = vrot.lane.b32.xlu0 %v10837_v57, %s7074_s27 }
 0x3cb   :  { %v9113_v0 = vpop.permute.xlu1 %6643  ;;  %5700 = vmatpush1.bf16.msk.msra.mxu0 %vm10832_vm10, %v5699_v19  ;;  %v3397_v19 = vsel %vm10848_vm6, %v6560_v42, %v10490_v32  ;;  %vm10854_vm6 = vmmov %vm10850_vm13  ;;  %6858 = vrot.lane.b32.xlu1 %v10651_v29, %s7079_s12 }
 0x3cc   :  { %v10493_v57 = vunpack.i.h.bf16 %v9113_v0  ;;  %v6645_v11 = vunpack.i.l.bf16 %v9113_v0  ;;  %v9120_v8 = vpop.permute.xlu0 %6638  ;;  %3901 = vmatprep.subr.bf16.mxu0 %v8818_v15  ;;  %v3396_v15 = vsel %vm10849_vm5, %v6611_v54, %v6560_v42  ;;  %v6570_v54 = vunpack.i.l.bf16 %v8928_v33  ;;  %vm10856_vm5 = vmmov %vm10854_vm6 }
 0x3cd   :  { %v10494_v13 = vunpack.i.h.bf16 %v9120_v8  ;;  %v6640_v1 = vunpack.i.l.bf16 %v9120_v8 }
 0x3ce   :  { %6828 = vrot.lane.b32.xlu0 %v10651_v29, %s7075_s28  ;;  %v3534_v34 = vsel %vm10850_vm13, %v6645_v11, %v10493_v57  ;;  %vm10858_vm13 = vcmask 269312  }
 0x3cf   :  { %v3388_v43 = vsel %vm10851_vm11, %v6610_v16, %v6640_v1  ;;  %v3389_v39 = vsel %vm10852_vm14, %v6640_v1, %v10494_v13  ;;  %v9144_v32 = vpop.permute.xlu1 %6648  ;;  %3902 = vmatpush1.bf16.msra.mxu0 %v8814_v18  ;;  %v10853_v16 = vunpack.i.h.bf16 %v8978_v3  ;;  %vm10855_vm14 = vmmov %vm10854_vm6  ;;  %6873 = vrot.lane.b32.xlu1 %v10651_v29, %s7072_s17 }
 0x3d0   :  { %v5705_v56 = vpack.c.bf16 %v3396_v15, %v3388_v43  ;;  %v9148_v4 = vpop.permute.xlu0 %6663  ;;  %v5702_v42 = vpack.c.bf16 %v3397_v19, %v3389_v39  ;;  %v3533_v41 = vsel %vm10855_vm14, %v6615_v22, %v6645_v11  ;;  %v6580_v43 = vunpack.i.l.bf16 %v8987_v28  ;;  %vm10859_vm11 = vmmov %vm10858_vm13 }
 0x3d1   :  { %v3542_v57 = vsel %vm10854_vm6, %v6565_v47, %v10853_v16  ;;  %v10497_v1 = vunpack.i.h.bf16 %v9148_v4  ;;  %v6665_v13 = vunpack.i.l.bf16 %v9148_v4  ;;  %v3541_v19 = vsel %vm10856_vm5, %v6616_v24, %v6565_v47 }
 0x3d2   :  { %5703 = vmatprep.subr.msk.bf16.mxu0 %vm7346_vm8, %v5702_v42  ;;  %v5708_v39 = vpack.c.bf16 %v3542_v57, %v3534_v34  ;;  %6838 = vrot.lane.b32.xlu0 %v10651_v29, %s7076_s29  ;;  %v10857_v15 = vunpack.i.h.bf16 %v9015_v23  ;;  %v5711_v47 = vpack.c.bf16 %v3541_v19, %v3533_v41  ;;  %vm10861_vm6 = vcmask 252928  }
 0x3d3   :  { %v2896_v18 = vsel %vm10859_vm11, %v6665_v13, %v10497_v1  ;;  %v9172_v11 = vpop.permute.xlu1 %6653  ;;  %5706 = vmatpush1.bf16.msk.msra.mxu0 %vm10844_vm9, %v5705_v56  ;;  %vm10862_vm14 = vnez %v10556_v20  ;;  %vm10863_vm5 = vcmask 261120   ;;  %vm10865_vm11 = vmmov %vm10861_vm6 }
 0x3d4   :  { %v2895_v16 = vsel %vm10858_vm13, %v10857_v15, %v6665_v13  ;;  %v10499_v22 = vunpack.i.h.bf16 %v9172_v11  ;;  %v6655_v34 = vunpack.i.l.bf16 %v9172_v11  ;;  %v9179_v24 = vpop.permute.xlu0 %6668  ;;  %5709 = vmatprep.subr.msk.bf16.mxu0 %vm7296_vm4, %v5708_v39  ;;  %v5720_v23 = vpack.c.bf16 %v2904_v5, %v2896_v18 }
 0x3d5   :  { %v5723_v57 = vpack.c.bf16 %v9107_v38, %v2895_v16  ;;  %v10498_v13 = vunpack.i.h.bf16 %v9179_v24  ;;  %v6670_v56 = vunpack.i.l.bf16 %v9179_v24  ;;  %v10860_v38 = vunpack.i.h.bf16 %v8928_v33 }
 0x3d6   :  { %5721 = vmatprep.subr.msk.bf16.mxu1 %vm10862_vm14, %v5720_v23  ;;  %v2996_v39 = vsel %vm10863_vm5, %v9070_v9, %v9075_v27  ;;  %6853 = vrot.lane.b32.xlu0 %v10651_v29, %s7077_s30  ;;  %vm10864_vm13 = vcmask 777216   ;;  %vm10867_vm5 = vcmask 785408   ;;  %v10868_v15 = vunpack.i.h.bf16 %v8987_v28 }
 0x3d7   :  { %v3109_v42 = vsel %vm10861_vm6, %v6570_v54, %v10860_v38  ;;  %v3739_v18 = vsel %vm10864_vm13, %v6655_v34, %v10499_v22  ;;  %v3101_v41 = vsel %vm10865_vm11, %v6670_v56, %v10498_v13  ;;  %5712 = vmatpush1.bf16.msk.msra.mxu0 %vm10832_vm10, %v5711_v47  ;;  %vm10866_vm6 = vnez %v10558_v49  ;;  %vm10869_vm4 = vmmov %vm10864_vm13 }
 0x3d8   :  { %5724 = vmatpush1.bf16.msk.msra.mxu1 %vm10866_vm6, %v5723_v57  ;;  %v3634_v19 = vsel %vm10867_vm5, %v9004_v2, %v9089_v40  ;;  %v3747_v16 = vsel %vm10869_vm4, %v6580_v43, %v10868_v15  ;;  %v6621_v23 = vunpack.i.h.bf16 %v9009_v46  ;;  %v6620_v38 = vunpack.i.l.bf16 %v9009_v46  ;;  %v9216_v1 = vpop.permute.xlu0 %6673  ;;  %vm10870_vm13 = vmmov %vm10867_vm5 }
 0x3d9   :  { %3907 = vmatprep.subr.bf16.mxu0 %v3634_v19  ;;  %3936 = vmatprep.subr.bf16.mxu1 %v2996_v39  ;;  %v3633_v57 = vsel %vm10870_vm13, %v8994_v48, %v9004_v2  ;;  %v6676_v47 = vunpack.i.h.bf16 %v9216_v1  ;;  %v6675_v13 = vunpack.i.l.bf16 %v9216_v1  ;;  %vm10871_vm11 = vcmask 261120  }
 0x3da   :  { %v2995_v15 = vsel %vm10871_vm11, %v8997_v62, %v9070_v9  ;;  %v3738_v22 = vsel %vm10869_vm4, %v6620_v38, %v6655_v34  ;;  %v10872_v46 = vunpack.i.h.bf16 %v9032_v51  ;;  %vm10873_vm5 = vcmask 252928   ;;  %6863 = vrot.lane.b32.xlu0 %v10651_v29, %s7079_s12 }
 0x3db   :  { %v5714_v19 = vpack.c.bf16 %v3747_v16, %v3739_v18  ;;  %v5726_v39 = vpack.c.bf16 %v3109_v42, %v3101_v41  ;;  %v6575_v2 = vunpack.i.l.bf16 %v8942_v58  ;;  %vm10874_vm13 = vcmask 7168   ;;  %3908 = vmatpush1.bf16.msra.mxu0 %v3633_v57  ;;  %vm10876_vm11 = vmmov %vm10873_vm5 }
 0x3dc   :  { %v3100_v5 = vsel %vm10873_vm5, %v10872_v46, %v6670_v56  ;;  %v3246_v48 = vsel %vm10874_vm13, %v6675_v13, %v6676_v47  ;;  %3937 = vmatpush1.bf16.msra.mxu1 %v2995_v15  ;;  %v10875_v9 = vunpack.i.h.bf16 %v8889_v26  ;;  %v3746_v51 = vsel %vm10869_vm4, %v6621_v23, %v6580_v43  ;;  %vm10879_vm10 = vmmov %vm10874_vm13 }
 0x3dd   :  { %5715 = vmatprep.subr.msk.bf16.mxu0 %vm7346_vm8, %v5714_v19  ;;  %vm10877_vm5 = vnez %v10560_v60  ;;  %v10878_v34 = vunpack.i.h.bf16 %v8942_v58  ;;  %v5717_v42 = vpack.c.bf16 %v3746_v51, %v3738_v22  ;;  %v10880_v41 = vunpack.i.h.bf16 %v9030_v55  ;;  %vm10881_vm13 = vmmov %vm10879_vm10  ;;  %v9263_v22 = vpop.permute.xlu1 %6658 }
 0x3de   :  { %v3108_v62 = vsel %vm10876_vm11, %v10875_v9, %v6570_v54  ;;  %5727 = vmatprep.subr.msk.bf16.mxu1 %vm10877_vm5, %v5726_v39  ;;  %v9252_v54 = vcombine.low %v8872_v45, %v8872_v45  ;;  %6868 = vrot.lane.b32.xlu0 %v10651_v29, %s7072_s17  ;;  %vm10882_vm11 = vnez %v10562_v12  ;;  %v10883_v43 = vunpack.i.h.bf16 %v8969_v21 }
 0x3df   :  { %v3254_v56 = vsel %vm10879_vm10, %v6575_v2, %v10878_v34  ;;  %v5729_v18 = vpack.c.bf16 %v3108_v62, %v3100_v5  ;;  %v3245_v26 = vsel %vm10881_vm13, %v10880_v41, %v6675_v13  ;;  %5718 = vmatpush1.bf16.msk.msra.mxu0 %vm10844_vm9, %v5717_v42  ;;  %vm10884_vm4 = vcmask 261120  }
 0x3e0   :  { %v5732_v16 = vpack.c.bf16 %v3254_v56, %v3246_v48  ;;  %v3253_v55 = vsel %vm10879_vm10, %v10883_v43, %v6575_v2  ;;  %3973 = vmatprep.subr.bf16.mxu0 %v10710_v25  ;;  %v6586_v5 = vunpack.i.h.bf16 %v8951_v44  ;;  %v6585_v23 = vunpack.i.l.bf16 %v8951_v44 }
 0x3e1   :  { %5730 = vmatpush1.bf16.msk.msra.mxu1 %vm10882_vm11, %v5729_v18  ;;  %v5735_v45 = vpack.c.bf16 %v3253_v55, %v3245_v26  ;;  %v10885_v19 = vunpack.i.h.bf16 %v8919_v6  ;;  %vm10886_vm13 = vcmask 1039360   ;;  %v6596_v2 = vunpack.i.h.bf16 %v8973_v50 }
 0x3e2   :  { %5733 = vmatprep.subr.msk.bf16.mxu1 %vm10862_vm14, %v5732_v16  ;;  %3924 = vmatmul.mubr.bf16.vlgmr.msra.gmra.mrb[16].mxu0 %v9252_v54  ;;  %vm10887_vm10 = vmmov %vm10886_vm13  ;;  %v10888_v48 = vunpack.i.h.bf16 %v9120_v8  ;;  %v10892_v41 = vunpack.i.h.bf16 %v8978_v3  ;;  %v10894_v16 = vunpack.i.h.bf16 %v9113_v0  ;;  %v6591_v0 = vunpack.i.h.bf16 %v8964_v10 }
 0x3e3   :  { %3974 = vmatpush1.bf16.msra.mxu0 %v10710_v25  ;;  %5386 = vmatprep.mubr.msk.bf16.mxu0 %vm10884_vm4, %v8877_v31  ;;  %v3399_v39 = vsel %vm10887_vm10, %v6585_v23, %v6586_v5  ;;  %vm10889_vm4 = vmmov %vm10887_vm10 }
 0x3e4   :  { %v9272_v13 = vpop.permute.xlu1 %3623  ;;  %v9274_v21 = vpop.permute.xlu0 %2985  ;;  %vm10890_vm9 = vmmov %vm10889_vm4  ;;  %6878 = vrot.lane.b32.xlu0 %v10651_v29, %s7074_s27 }
 0x3e5   :  { %5736 = vmatpush1.bf16.msk.msra.mxu1 %vm10866_vm6, %v5735_v45 }
 0x3e6   :  { %3942 = vmatprep.subr.bf16.mxu1 %v8848_v36  ;;  %v3398_v36 = vsel %vm10886_vm13, %v10885_v19, %v6585_v23  ;;  %vm10891_vm13 = vcmask 793600   ;;  %v10507_v19 = vunpack.i.h.bf16 %v8991_v30 }
 0x3e8   :  { %v9282_v38 = vpop.permute.xlu0 %6693  ;;  %v9284_v57 = vpop.permute.xlu1 %2987 }
 0x3e9   :  { %3943 = vmatpush1.bf16.msra.mxu1 %v8844_v17  ;;  %v6696_v15 = vunpack.i.h.bf16 %v9282_v38  ;;  %v6695_v46 = vunpack.i.l.bf16 %v9282_v38  ;;  %v6595_v17 = vunpack.i.l.bf16 %v8973_v50 }
 0x3eb   :  { %v3390_v9 = vsel %vm10889_vm4, %v10888_v48, %v6695_v46  ;;  %v3391_v62 = vsel %vm10890_vm9, %v6695_v46, %v6696_v15  ;;  %v3544_v8 = vsel %vm10891_vm13, %v6595_v17, %v6596_v2  ;;  %vm10893_vm9 = vmmov %vm10891_vm13  ;;  %vm10897_vm13 = vcmask 777216  }
 0x3ec   :  { %v5741_v51 = vpack.c.bf16 %v3398_v36, %v3390_v9  ;;  %v9302_v6 = vpop.permute.xlu0 %6698  ;;  %v5738_v34 = vpack.c.bf16 %v3399_v39, %v3391_v62  ;;  %v9306_v18 = vpop.permute.xlu1 %6678  ;;  %v3543_v26 = vsel %vm10893_vm9, %v10892_v41, %v6595_v17  ;;  %vm10895_vm10 = vmmov %vm10893_vm9  ;;  %v6590_v39 = vunpack.i.l.bf16 %v8964_v10 }
 0x3ed   :  { %v6701_v56 = vunpack.i.h.bf16 %v9302_v6  ;;  %v6700_v42 = vunpack.i.l.bf16 %v9302_v6  ;;  %vm10896_vm4 = vmmov %vm10893_vm9  ;;  %v6605_v17 = vunpack.i.l.bf16 %v8991_v30  ;;  %vm10898_vm9 = vcmask 785408  }
 0x3ee   :  { %5739 = vmatprep.subr.msk.bf16.mxu1 %vm10877_vm5, %v5738_v34  ;;  %v3636_v9 = vsel %vm10898_vm9, %v9094_v61, %v9272_v13  ;;  %v10900_v41 = vunpack.i.h.bf16 %v9172_v11 }
 0x3ef   :  { %v3535_v43 = vsel %vm10895_vm10, %v10894_v16, %v6700_v42  ;;  %v3536_v55 = vsel %vm10896_vm4, %v6700_v42, %v6701_v56  ;;  %5742 = vmatpush1.bf16.msk.msra.mxu1 %vm10882_vm11, %v5741_v51  ;;  %vm10899_vm10 = vmmov %vm10897_vm13 }
 0x3f0   :  { %v5747_v45 = vpack.c.bf16 %v3543_v26, %v3535_v43  ;;  %v9324_v23 = vpop.permute.xlu0 %6703  ;;  %v5744_v46 = vpack.c.bf16 %v3544_v8, %v3536_v55  ;;  %v9342_v62 = vpop.permute.xlu1 %6683  ;;  %v3749_v34 = vsel %vm10899_vm10, %v6605_v17, %v10507_v19  ;;  %vm10901_vm4 = vmmov %vm10899_vm10  ;;  %v10903_v55 = vunpack.i.h.bf16 %v8911_v63 }
 0x3f1   :  { %v10503_v3 = vunpack.i.h.bf16 %v9324_v23  ;;  %v6705_v36 = vunpack.i.l.bf16 %v9324_v23 }
 0x3f2   :  { %5745 = vmatprep.subr.msk.bf16.mxu1 %vm10862_vm14, %v5744_v46 }
 0x3f3   :  { %v3741_v48 = vsel %vm10897_vm13, %v6705_v36, %v10503_v3  ;;  %5748 = vmatpush1.bf16.msk.msra.mxu1 %vm10866_vm6, %v5747_v45  ;;  %v3740_v26 = vsel %vm10901_vm4, %v10900_v41, %v6705_v36  ;;  %vm10902_vm13 = vmmov %vm10898_vm9  ;;  %vm10904_vm9 = vcmask 269312  }
 0x3f4   :  { %3948 = vmatprep.subr.bf16.mxu1 %v3636_v9  ;;  %v9344_v51 = vpop.permute.xlu0 %6708  ;;  %v3635_v16 = vsel %vm10902_vm13, %v9089_v40, %v9094_v61  ;;  %v5750_v43 = vpack.c.bf16 %v3749_v34, %v3741_v48  ;;  %v2905_v45 = vsel %vm10904_vm9, %v10903_v55, %v6590_v39  ;;  %vm10905_vm10 = vmmov %vm10904_vm9  ;;  %v10906_v9 = vunpack.i.h.bf16 %v9148_v4 }
 0x3f5   :  { %v6711_v42 = vunpack.i.h.bf16 %v9344_v51  ;;  %v6710_v8 = vunpack.i.l.bf16 %v9344_v51  ;;  %v2906_v46 = vsel %vm10905_vm10, %v6590_v39, %v6591_v0  ;;  %vm10907_vm6 = vmmov %vm10904_vm9  ;;  %v10909_v40 = vunpack.i.h.bf16 %v8987_v28 }
 0x3f6   :  { %vm10908_vm4 = vmmov %vm10907_vm6  ;;  %vm10910_vm13 = vcmask 777216   ;;  %v6601_v4 = vunpack.i.h.bf16 %v8982_v37  ;;  %v6600_v28 = vunpack.i.l.bf16 %v8982_v37  ;;  %vm10912_vm9 = vcmask 261120  }
 0x3f7   :  { %v2897_v3 = vsel %vm10907_vm6, %v10906_v9, %v6710_v8  ;;  %v2898_v11 = vsel %vm10908_vm4, %v6710_v8, %v6711_v42  ;;  %3949 = vmatpush1.bf16.msra.mxu1 %v3635_v16  ;;  %v3748_v61 = vsel %vm10910_vm13, %v10909_v40, %v6605_v17  ;;  %v9379_v8 = vpop.permute.xlu1 %6688  ;;  %vm10911_vm6 = vcmask 252928   ;;  %vm10916_vm13 = vmmov %vm10912_vm9 }
 0x3f8   :  { %v5759_v63 = vpack.c.bf16 %v2905_v45, %v2897_v3  ;;  %5751 = vmatprep.subr.msk.bf16.mxu1 %vm10877_vm5, %v5750_v43  ;;  %v9374_v36 = vpop.permute.xlu0 %6713  ;;  %v5756_v39 = vpack.c.bf16 %v2906_v46, %v2898_v11  ;;  %v5753_v48 = vpack.c.bf16 %v3748_v61, %v3740_v26  ;;  %v2998_v17 = vsel %vm10912_vm9, %v9274_v21, %v9284_v57  ;;  %vm10913_vm10 = vmmov %vm10911_vm6 }
 0x3f9   :  { %v6716_v34 = vunpack.i.h.bf16 %v9374_v36  ;;  %v6715_v41 = vunpack.i.l.bf16 %v9374_v36  ;;  %v3111_v16 = vsel %vm10913_vm10, %v6600_v28, %v6601_v4  ;;  %v6651_v43 = vunpack.i.h.bf16 %v9144_v32  ;;  %vm10915_vm4 = vmmov %vm10911_vm6 }
 0x3fa   :  { %5757 = vmatprep.subr.msk.bf16.mxu0 %vm10735_vm15, %v5756_v39  ;;  %v10914_v46 = vunpack.i.h.bf16 %v9179_v24  ;;  %v2997_v11 = vsel %vm10916_vm13, %v9075_v27, %v9274_v21  ;;  %v6650_v61 = vunpack.i.l.bf16 %v9144_v32  ;;  %v10918_v24 = vunpack.i.h.bf16 %v8928_v33  ;;  %vm10919_vm9 = vmmov %vm10915_vm4 }
 0x3fb   :  { %v3103_v3 = vsel %vm10911_vm6, %v6715_v41, %v6716_v34  ;;  %5754 = vmatpush1.bf16.msk.msra.mxu1 %vm10882_vm11, %v5753_v48  ;;  %5760 = vmatpush1.bf16.msk.msra.mxu0 %vm10738_vm3, %v5759_v63  ;;  %vm10917_vm6 = vcmask 7168   ;;  %v2992_v48 = vpop.permute.xlu1 %2991  ;;  %vm10921_vm10 = vmmov %vm10916_vm13  ;;  %v6690_v51 = vunpack.i.l.bf16 %v9379_v8 }
 0x3fc   :  { %v9394_v26 = vpop.permute.xlu0 %6718  ;;  %3977 = vmatprep.subr.bf16.mxu0 %v2998_v17  ;;  %4014 = vmatprep.subr.bf16.mxu1 %v10710_v25  ;;  %v3102_v9 = vsel %vm10915_vm4, %v10914_v46, %v6715_v41  ;;  %v5762_v40 = vpack.c.bf16 %v3111_v16, %v3103_v3  ;;  %v3110_v39 = vsel %vm10919_vm9, %v10918_v24, %v6600_v28  ;;  %vm10922_vm4 = vmmov %vm10917_vm6  ;;  %v10505_v28 = vunpack.i.h.bf16 %v9306_v18 }
 0x3fd   :  { %v6721_v55 = vunpack.i.h.bf16 %v9394_v26  ;;  %v6720_v45 = vunpack.i.l.bf16 %v9394_v26  ;;  %v3256_v27 = vsel %vm10922_vm4, %v6650_v61, %v6651_v43  ;;  %v5765_v21 = vpack.c.bf16 %v3110_v39, %v3102_v9  ;;  %vm10923_vm13 = vmmov %vm10922_vm4  ;;  %v10929_v39 = vld [vmem:[#allocation20_spill] sm:$0xff] }
 0x3fe   :  { %3965 = vmatmul.mubr.bf16.vlgmr.msra.gmra.mrb[16].mxu1 %v9252_v54  ;;  %v10925_v46 = vunpack.i.h.bf16 %v8942_v58  ;;  %v6680_v9 = vunpack.i.l.bf16 %v9306_v18  ;;  %vm10927_vm9 = vcmask 1039360   ;;  %v10959_v26 = vunpack.i.h.bf16 %v8991_v30 }
 0x3ff   :  { %v3248_v63 = vsel %vm10917_vm6, %v6720_v45, %v6721_v55  ;;  %3978 = vmatpush1.bf16.msra.mxu0 %v2997_v11  ;;  %4015 = vmatpush1.bf16.msra.mxu1 %v10710_v25  ;;  %v3247_v33 = vsel %vm10923_vm13, %v6676_v47, %v6720_v45  ;;  %vm10926_vm6 = vmmov %vm10922_vm4  ;;  %vm10931_vm13 = vcmask 793600  }
 0x400   :  { %v9418_v41 = vpop.permute.xlu0 %2989  ;;  %5763 = vmatprep.subr.msk.bf16.mxu0 %vm7725_vm7, %v5762_v40  ;;  %5387 = vmatprep.mubr.msk.bf16.mxu1 %vm10921_vm10, %v8877_v31  ;;  %v5768_v3 = vpack.c.bf16 %v3256_v27, %v3248_v63  ;;  %v3255_v11 = vsel %vm10926_vm6, %v10925_v46, %v6650_v61  ;;  %v9443_v40 = vpop.permute.xlu1 %3627  ;;  %v3401_v58 = vsel %vm10927_vm9, %v6680_v9, %v10505_v28  ;;  %v10506_v61 = vunpack.i.h.bf16 %v9342_v62  ;;  %vm10928_vm10 = vmmov %vm10927_vm9  ;;  %v10933_v28 = vld [vmem:[#allocation18_spill] sm:$0xff] }
 0x401   :  { %v5771_v1 = vpack.c.bf16 %v3255_v11, %v3247_v33  ;;  %v6685_v27 = vunpack.i.l.bf16 %v9342_v62  ;;  %vm10930_vm4 = vmmov %vm10927_vm9  ;;  %v6661_v11 = vunpack.i.h.bf16 %v9263_v22 }
 0x402   :  { %vm10932_vm6 = vmmov %vm10931_vm13 }
 0x403   :  { %5766 = vmatpush1.bf16.msk.msra.mxu0 %vm7731_vm1, %v5765_v21  ;;  %vm10934_vm9 = vmmov %vm10930_vm4 }
 0x404   :  { %v9436_v31 = vpop.permute.xlu0 %6723  ;;  %5769 = vmatprep.subr.msk.bf16.mxu0 %vm10735_vm15, %v5768_v3  ;;  %v3400_v38 = vsel %vm10934_vm9, %v6586_v5, %v6680_v9 }
 0x405   :  { %v10504_v47 = vunpack.i.h.bf16 %v9436_v31  ;;  %v6725_v45 = vunpack.i.l.bf16 %v9436_v31 }
 0x407   :  { %v3393_v63 = vsel %vm10928_vm10, %v6725_v45, %v10504_v47  ;;  %5772 = vmatpush1.bf16.msk.msra.mxu0 %vm10738_vm3, %v5771_v1  ;;  %v3392_v3 = vsel %vm10930_vm4, %v6696_v15, %v6725_v45  ;;  %v6660_v47 = vunpack.i.l.bf16 %v9263_v22  ;;  %v3546_v1 = vsel %vm10931_vm13, %v6685_v27, %v10506_v61  ;;  %v6739_v15 = vpop.permute.xlu1 %6738  ;;  %vm10935_vm10 = vmmov %vm10932_vm6 }
 0x408   :  { %v9454_v24 = vpop.permute.xlu0 %6728  ;;  %3983 = vmatprep.subr.bf16.mxu0 %v10929_v39  ;;  %v5774_v46 = vpack.c.bf16 %v3401_v58, %v3393_v63  ;;  %v5777_v22 = vpack.c.bf16 %v3400_v38, %v3392_v3  ;;  %vm10936_vm4 = vcmask 269312   ;;  %vm10940_vm11 = vmmov %vm10935_vm10  ;;  %v6691_v3 = vunpack.i.h.bf16 %v9379_v8 }
 0x409   :  { %v6731_v21 = vunpack.i.h.bf16 %v9454_v24  ;;  %v6730_v33 = vunpack.i.l.bf16 %v9454_v24  ;;  %vm10937_vm13 = vmmov %vm10936_vm4  ;;  %v3545_v6 = vsel %vm10940_vm11, %v6596_v2, %v6685_v27  ;;  %vm10943_vm11 = vcmask 785408  }
 0x40a   :  { %v2908_v44 = vsel %vm10937_vm13, %v6660_v47, %v6661_v11  ;;  %vm10939_vm9 = vmmov %vm10936_vm4  ;;  %v6741_v27 = vunpack.i.h.bf16 %v6739_v15 }
 0x40b   :  { %v3538_v39 = vsel %vm10932_vm6, %v6730_v33, %v6731_v21  ;;  %3984 = vmatpush1.bf16.msra.mxu0 %v10933_v28  ;;  %v3537_v61 = vsel %vm10935_vm10, %v6701_v56, %v6730_v33  ;;  %v2907_v28 = vsel %vm10936_vm4, %v6591_v0, %v6660_v47  ;;  %vm10938_vm6 = vmmov %vm10936_vm4  ;;  %v9496_v47 = vpop.permute.xlu1 %6758  ;;  %vm10944_vm10 = vcmask 261120  }
 0x40c   :  { %v6734_v45 = vpop.permute.xlu0 %6733  ;;  %5775 = vmatprep.subr.msk.bf16.mxu0 %vm7725_vm7, %v5774_v46  ;;  %v5780_v19 = vpack.c.bf16 %v3546_v1, %v3538_v39  ;;  %v5783_v0 = vpack.c.bf16 %v3545_v6, %v3537_v61  ;;  %vm10945_vm4 = vcmask 252928   ;;  %vm10946_vm13 = vmmov %vm10944_vm10 }
 0x40d   :  { %v6736_v58 = vunpack.i.h.bf16 %v6734_v45  ;;  %v6735_v63 = vunpack.i.l.bf16 %v6734_v45  ;;  %v3112_v8 = vsel %vm10945_vm4, %v6601_v4, %v6690_v51  ;;  %v2999_v1 = vsel %vm10946_vm13, %v9284_v57, %v9418_v41 }
 0x40f   :  { %v2899_v5 = vsel %vm10938_vm6, %v6711_v42, %v6735_v63  ;;  %v2900_v9 = vsel %vm10939_vm9, %v6735_v63, %v6736_v58  ;;  %5778 = vmatpush1.bf16.msk.msra.mxu0 %vm7731_vm1, %v5777_v22  ;;  %vm10947_vm6 = vmmov %vm10943_vm11  ;;  %v6764_v37 = vpop.permute.xlu1 %6763 }
 0x410   :  { %v5792_v56 = vpack.c.bf16 %v2908_v44, %v2900_v9  ;;  %v5795_v33 = vpack.c.bf16 %v2907_v28, %v2899_v5  ;;  %v3626_v10 = vpop.permute.xlu0 %3625  ;;  %5781 = vmatprep.subr.msk.bf16.mxu0 %vm10735_vm15, %v5780_v19  ;;  %v3000_v19 = vsel %vm10944_vm10, %v9418_v41, %v2992_v48  ;;  %vm10948_vm9 = vmmov %vm10945_vm4  ;;  %v6740_v48 = vunpack.i.l.bf16 %v6739_v15  ;;  %v10956_v9 = vld [vmem:[#allocation14_spill] sm:$0xff] }
 0x411   :  { %v3638_v2 = vsel %vm10943_vm11, %v3626_v10, %v9443_v40  ;;  %v3637_v39 = vsel %vm10947_vm6, %v9272_v13, %v3626_v10  ;;  %v3113_v38 = vsel %vm10948_vm9, %v6690_v51, %v6691_v3  ;;  %vm10949_vm11 = vmmov %vm10945_vm4  ;;  %v6761_v41 = vunpack.i.h.bf16 %v9496_v47 }
 0x412   :  { %5793 = vmatprep.subr.msk.bf16.mxu1 %vm10759_vm12, %v5792_v56  ;;  %vm10950_vm10 = vmmov %vm10945_vm4  ;;  %vm10951_vm4 = vcmask 7168   ;;  %v6766_v10 = vunpack.i.h.bf16 %v6764_v37  ;;  %v6765_v3 = vunpack.i.l.bf16 %v6764_v37  ;;  %v10968_v37 = vunpack.i.h.bf16 %v9436_v31 }
 0x413   :  { %5784 = vmatpush1.bf16.msk.msra.mxu0 %vm10738_vm3, %v5783_v0  ;;  %5796 = vmatpush1.bf16.msk.msra.mxu1 %vm7838_vm0, %v5795_v33  ;;  %v3258_v57 = vsel %vm10951_vm4, %v6740_v48, %v6741_v27  ;;  %vm10953_vm13 = vmmov %vm10951_vm4  ;;  %v6769_v51 = vpop.permute.xlu1 %6768  ;;  %v10973_v31 = vunpack.i.h.bf16 %v9342_v62 }
 0x414   :  { %v6744_v61 = vpop.permute.xlu0 %6743  ;;  %3989 = vmatprep.subr.bf16.mxu0 %v3638_v2  ;;  %4018 = vmatprep.subr.bf16.mxu1 %v3000_v19  ;;  %v3257_v36 = vsel %vm10953_vm13, %v6651_v43, %v6740_v48  ;;  %vm10954_vm6 = vmmov %vm10951_vm4  ;;  %v10961_v2 = vunpack.i.h.bf16 %v9324_v23  ;;  %v6771_v30 = vunpack.i.h.bf16 %v6769_v51  ;;  %v10966_v23 = vunpack.i.h.bf16 %v9306_v18 }
 0x415   :  { %v6746_v46 = vunpack.i.h.bf16 %v6744_v61  ;;  %v6745_v11 = vunpack.i.l.bf16 %v6744_v61  ;;  %vm10955_vm9 = vmmov %vm10951_vm4 }
 0x417   :  { %v3104_v45 = vsel %vm10949_vm11, %v6716_v34, %v6745_v11  ;;  %v3105_v22 = vsel %vm10950_vm10, %v6745_v11, %v6746_v46  ;;  %3990 = vmatpush1.bf16.msra.mxu0 %v3637_v39  ;;  %4019 = vmatpush1.bf16.msra.mxu1 %v2999_v1  ;;  %v6760_v34 = vunpack.i.l.bf16 %v9496_v47  ;;  %vm10957_vm11 = vnez %v10956_v9  ;;  %v3632_v48 = vpop.permute.xlu1 %3631 }
 0x418   :  { %v5798_v4 = vpack.c.bf16 %v3113_v38, %v3105_v22  ;;  %v5801_v58 = vpack.c.bf16 %v3112_v8, %v3104_v45  ;;  %v6749_v63 = vpop.permute.xlu0 %6748  ;;  %vm10958_vm10 = vcmask 777216   ;;  %v10964_v8 = vld [vmem:[#allocation22_spill] sm:$0xff]  ;;  %v6770_v22 = vunpack.i.l.bf16 %v6769_v51 }
 0x419   :  { %v6751_v13 = vunpack.i.h.bf16 %v6749_v63  ;;  %v6750_v28 = vunpack.i.l.bf16 %v6749_v63  ;;  %v3751_v32 = vsel %vm10958_vm10, %v6760_v34, %v6761_v41  ;;  %vm10960_vm4 = vmmov %vm10958_vm10  ;;  %v10971_v63 = vld [vmem:[#allocation24_spill] sm:$0xff] }
 0x41a   :  { %5799 = vmatprep.subr.msk.bf16.mxu1 %vm7900_vm2, %v5798_v4  ;;  %vm10962_vm13 = vmmov %vm10960_vm4 }
 0x41b   :  { %v3249_v15 = vsel %vm10954_vm6, %v6721_v55, %v6750_v28  ;;  %v3250_v5 = vsel %vm10955_vm9, %v6750_v28, %v6751_v13  ;;  %5802 = vmatpush1.bf16.msk.msra.mxu1 %vm10957_vm11, %v5801_v58  ;;  %v3750_v55 = vsel %vm10960_vm4, %v10959_v26, %v6760_v34  ;;  %vm10963_vm6 = vmmov %vm10960_vm4  ;;  %vm10965_vm9 = vcmask 1039360  }
 0x41c   :  { %v5804_v6 = vpack.c.bf16 %v3258_v57, %v3250_v5  ;;  %v5807_v56 = vpack.c.bf16 %v3257_v36, %v3249_v15  ;;  %v6754_v33 = vpop.permute.xlu0 %6753  ;;  %v3403_v1 = vsel %vm10965_vm9, %v6765_v3, %v6766_v10  ;;  %vm10967_vm10 = vmmov %vm10965_vm9 }
 0x41d   :  { %v6756_v43 = vunpack.i.h.bf16 %v6754_v33  ;;  %v6755_v0 = vunpack.i.l.bf16 %v6754_v33  ;;  %v3402_v45 = vsel %vm10967_vm10, %v10966_v23, %v6765_v3  ;;  %vm10969_vm4 = vmmov %vm10965_vm9 }
 0x41e   :  { %5805 = vmatprep.subr.msk.bf16.mxu1 %vm10759_vm12, %v5804_v6 }
 0x41f   :  { %v3742_v19 = vsel %vm10962_vm13, %v10961_v2, %v6755_v0  ;;  %v3743_v61 = vsel %vm10963_vm6, %v6755_v0, %v6756_v43  ;;  %5808 = vmatpush1.bf16.msk.msra.mxu1 %vm7838_vm0, %v5807_v56  ;;  %vm10970_vm13 = vmmov %vm10969_vm4  ;;  %vm10972_vm6 = vcmask 793600   ;;  %v6789_v56 = vpop.permute.xlu1 %6788 }
 0x420   :  { %v5786_v27 = vpack.c.bf16 %v3751_v32, %v3743_v61  ;;  %v5789_v46 = vpack.c.bf16 %v3750_v55, %v3742_v19  ;;  %v6774_v11 = vpop.permute.xlu0 %6773  ;;  %4024 = vmatprep.subr.bf16.mxu1 %v10964_v8  ;;  %v3548_v18 = vsel %vm10972_vm6, %v6770_v22, %v6771_v30  ;;  %vm10974_vm9 = vmmov %vm10972_vm6  ;;  %v6791_v0 = vunpack.i.h.bf16 %v6789_v56 }
 0x421   :  { %v6776_v39 = vunpack.i.h.bf16 %v6774_v11  ;;  %v6775_v38 = vunpack.i.l.bf16 %v6774_v11  ;;  %v3547_v15 = vsel %vm10974_vm9, %v10973_v31, %v6770_v22  ;;  %vm10975_vm10 = vmmov %vm10972_vm6  ;;  %v6790_v62 = vunpack.i.l.bf16 %v6789_v56 }
 0x422   :  { %5787 = vmatprep.subr.msk.bf16.mxu0 %vm7725_vm7, %v5786_v27 }
 0x423   :  { %v3394_v4 = vsel %vm10969_vm4, %v10968_v37, %v6775_v38  ;;  %v3395_v58 = vsel %vm10970_vm13, %v6775_v38, %v6776_v39  ;;  %5790 = vmatpush1.bf16.msk.msra.mxu0 %vm7731_vm1, %v5789_v46  ;;  %4025 = vmatpush1.bf16.msra.mxu1 %v10971_v63  ;;  %vm10976_vm4 = vmmov %vm10972_vm6  ;;  %vm10977_vm13 = vcmask 785408   ;;  %vm10978_vm6 = vcmask 777216   ;;  %v9619_v30 = vpop.permute.xlu1 %6798  ;;  %v10984_v63 = vld [vmem:[#allocation7_spill] sm:$0xff] }
 0x424   :  { %v5810_v57 = vpack.c.bf16 %v3403_v1, %v3395_v58  ;;  %v5813_v13 = vpack.c.bf16 %v3402_v45, %v3394_v4  ;;  %v6779_v28 = vpop.permute.xlu0 %6778  ;;  %5176 = vmatprep.subr.bf16.mxu0 %v10710_v25  ;;  %v3753_v51 = vsel %vm10978_vm6, %v6790_v62, %v6791_v0  ;;  %vm10979_vm9 = vmmov %vm10977_vm13  ;;  %v10511_v39 = vunpack.i.h.bf16 %v9619_v30 }
 0x425   :  { %v6781_v36 = vunpack.i.h.bf16 %v6779_v28  ;;  %v6780_v34 = vunpack.i.l.bf16 %v6779_v28 }
 0x426   :  { %4006 = vmatmul.mubr.bf16.vlgmr.msra.gmra.mrb[20].mxu0 %v9252_v54  ;;  %5811 = vmatprep.subr.msk.bf16.mxu1 %vm7900_vm2, %v5810_v57 }
 0x427   :  { %v3539_v5 = vsel %vm10975_vm10, %v6731_v21, %v6780_v34  ;;  %v3540_v6 = vsel %vm10976_vm4, %v6780_v34, %v6781_v36  ;;  %5814 = vmatpush1.bf16.msk.msra.mxu1 %vm10957_vm11, %v5813_v13  ;;  %5177 = vmatpush1.bf16.msra.mxu0 %v10710_v25  ;;  %vm10980_vm10 = vmmov %vm10978_vm6 }
 0x428   :  { %v5816_v33 = vpack.c.bf16 %v3548_v18, %v3540_v6  ;;  %v5819_v32 = vpack.c.bf16 %v3547_v15, %v3539_v5  ;;  %v3630_v10 = vpop.permute.xlu0 %3629  ;;  %v3752_v2 = vsel %vm10980_vm10, %v6761_v41, %v6790_v62  ;;  %vm10981_vm4 = vmmov %vm10978_vm6  ;;  %v10986_v18 = vld [vmem:[#allocation8_spill] sm:$0xff] }
 0x429   :  { %v3640_v24 = vsel %vm10977_vm13, %v3630_v10, %v3632_v48  ;;  %v3639_v3 = vsel %vm10979_vm9, %v9443_v40, %v3630_v10  ;;  %v10988_v10 = vld [vmem:[#allocation19_spill] sm:$0xff]  ;;  %vm10992_vm13 = vcmask 261120  }
 0x42a   :  { %5817 = vmatprep.subr.msk.bf16.mxu1 %vm10759_vm12, %v5816_v33  ;;  %vm10982_vm12 = vmmov %vm10981_vm4 }
 0x42b   :  { %5820 = vmatpush1.bf16.msk.msra.mxu1 %vm7838_vm0, %v5819_v32  ;;  %vm10993_vm6 = vmmov %vm10992_vm13 }
 0x42c   :  { %v6784_v21 = vpop.permute.xlu0 %6783  ;;  %4030 = vmatprep.subr.bf16.mxu1 %v3640_v24  ;;  %v10990_v24 = vld [vmem:[#allocation16_spill] sm:$0xff] }
 0x42d   :  { %v6786_v26 = vunpack.i.h.bf16 %v6784_v21  ;;  %v6785_v55 = vunpack.i.l.bf16 %v6784_v21 }
 0x42f   :  { %v3744_v19 = vsel %vm10981_vm4, %v6756_v43, %v6785_v55  ;;  %v3745_v61 = vsel %vm10982_vm12, %v6785_v55, %v6786_v26  ;;  %4031 = vmatpush1.bf16.msra.mxu1 %v3639_v3  ;;  %vm10983_vm12 = vcmask 269312  }
 0x430   :  { %v5822_v27 = vpack.c.bf16 %v3753_v51, %v3745_v61  ;;  %v5825_v46 = vpack.c.bf16 %v3752_v2, %v3744_v19  ;;  %v9603_v40 = vpop.permute.xlu0 %6793  ;;  %v9698_v2 = vld [vmem:[%s10382_s1 + $0x18] sm:$0xff]  ;;  %vm11010_vm9 = vmmov %vm10983_vm12 }
 0x431   :  { %v9702_v19 = vcombine.high %v9698_v2, %v9698_v2  ;;  %vm11011_vm10 = vmmov %vm11010_vm9 }
 0x432   :  { %5823 = vmatprep.subr.msk.bf16.mxu1 %vm7900_vm2, %v5822_v27  ;;  %vm11012_vm4 = vmmov %vm11010_vm9 }
 0x433   :  { %5826 = vmatpush1.bf16.msk.msra.mxu1 %vm10957_vm11, %v5825_v46  ;;  %5391 = vmatprep.mubr.msk.bf16.mxu0 %vm10992_vm13, %v9702_v19  ;;  %vm11014_vm13 = vnez %v10544_v7 }
 0x434   :  { %5217 = vmatprep.subr.bf16.mxu1 %v10710_v25  ;;  %v9605_v47 = vpop.permute.xlu0 %6803 }
 0x436   :  { %4047 = vmatmul.mubr.bf16.vlgmr.msra.gmra.mrb[20].mxu1 %v9252_v54 }
 0x437   :  { %5218 = vmatpush1.bf16.msra.mxu1 %v10710_v25  ;;  %5392 = vmatprep.mubr.msk.bf16.mxu1 %vm10993_vm6, %v9702_v19  ;;  %vm11015_vm6 = vcmask 252928  }
 0x438   :  { %v9607_v41 = vpop.permute.xlu0 %6808 }
 0x43c   :  { %v9609_v43 = vpop.permute.xlu0 %6818 }
 0x440   :  { %v9611_v11 = vpop.permute.xlu0 %6828 }
 0x444   :  { %v9613_v8 = vpop.permute.xlu0 %6838 }
 0x448   :  { %v9615_v54 = vpop.permute.xlu0 %6853 }
 0x44c   :  { %v9617_v1 = vpop.permute.xlu0 %6863 }
 0x450   :  { %v9622_v38 = vpop.permute.xlu0 %6868 }
 0x451   :  { %v10510_v48 = vunpack.i.l.bf16 %v9622_v38 }
 0x453   :  { %v9630_v23 = vsel %vm10983_vm12, %v10511_v39, %v10510_v48  ;;  %vm11013_vm12 = vmmov %vm11012_vm4 }
 0x4b5   :  { %v3925_v45 = vpop.f32.mrb[16].mxu0 }
 0x4b6   :  { %v4055_v22 = vmax.f32 %v3925_v45, 0.0  ;;  %v3927_v37 = vpop.f32.mrb[17].mxu0 }
 0x4b7   :  { %v4056_v4 = vmax.f32 %v3927_v37, 0.0  ;;  %v3929_v58 = vpop.f32.mrb[18].mxu0  ;;  %v10994_v37 = vld [vmem:[#allocation15_spill] sm:$0xff] }
 0x4b8   :  { %v9633_v57 = vadd.f32 %v4055_v22, %v10984_v63  ;;  %v3930_v13 = vpop.f32.mrb[19].mxu0 }
 0x4b9   :  { %v9640_v36 = vadd.f32 %v4056_v4, %v10986_v18  ;;  %v10997_v13 = vld [vmem:[#allocation17_spill] sm:$0xff] }
 0x4ba   :  { %10985 = vst [vmem:[#allocation6_spill] sm:$0xff] %v9633_v57  ;;  %v9637_v28 = vpack.c.bf16 %v10651_v29, %v9633_v57  ;;  %v6887_v31 = vpack.i.bf16 %v10651_v29, %v9633_v57 }
 0x4bb   :  { %10987 = vst [vmem:[#allocation20_spill] sm:$0xff] %v9640_v36  ;;  %v9648_v34 = vpack.c.bf16 %v10651_v29, %v9640_v36  ;;  %v6907_v15 = vpack.i.bf16 %v9640_v36, %v9633_v57 }
 0x4bc   :  { %4900 = vrot.lane.b32.xlu0 %v9637_v28, %s7078_s3  ;;  %4262 = vrot.lane.b32.xlu1 %v9637_v28, %s7073_s18 }
 0x4c0   :  { %6888 = vrot.lane.b32.xlu1 %v6887_v31, %s7077_s30  ;;  %4264 = vrot.lane.b32.xlu0 %v9648_v34, %s7073_s18 }
 0x4c4   :  { %6893 = vrot.lane.b32.xlu1 %v6887_v31, %s7079_s12  ;;  %4902 = vrot.lane.b32.xlu0 %v9648_v34, %s7078_s3 }
 0x4c8   :  { %6883 = vrot.lane.b32.xlu0 %v6887_v31, %s7076_s29  ;;  %6908 = vrot.lane.b32.xlu1 %v6907_v15, %s7075_s28  ;;  %v9727_v31 = vpop.permute.xlu1 %4260 }
 0x4cc   :  { %6898 = vrot.lane.b32.xlu0 %v6907_v15, %s7072_s17 }
 0x4d0   :  { %6903 = vrot.lane.b32.xlu0 %v6907_v15, %s7074_s27 }
 0x4d1   :  { %v3966_v5 = vpop.f32.mrb[16].mxu1 }
 0x4d2   :  { %v4057_v6 = vmax.f32 %v3966_v5, 0.0  ;;  %v3968_v56 = vpop.f32.mrb[17].mxu1 }
 0x4d3   :  { %v4058_v33 = vmax.f32 %v3968_v56, 0.0  ;;  %v3970_v32 = vpop.f32.mrb[18].mxu1 }
 0x4d4   :  { %v9665_v0 = vadd.f32 %v4057_v6, %v10988_v10  ;;  %v3971_v62 = vpop.f32.mrb[19].mxu1  ;;  %v9739_v6 = vpop.permute.xlu1 %6813 }
 0x4d5   :  { %v9668_v21 = vadd.f32 %v4058_v33, %v10990_v24 }
 0x4d6   :  { %10989 = vst [vmem:[#allocation18_spill] sm:$0xff] %v9665_v0  ;;  %v9672_v51 = vpack.c.bf16 %v10651_v29, %v9665_v0  ;;  %v6917_v55 = vpack.i.bf16 %v9665_v0, %v9640_v36 }
 0x4d7   :  { %10991 = vst [vmem:[#allocation22_spill] sm:$0xff] %v9668_v21  ;;  %v9676_v26 = vpack.c.bf16 %v10651_v29, %v9668_v21  ;;  %v6927_v3 = vpack.i.bf16 %v9668_v21, %v9665_v0 }
 0x4d8   :  { %4266 = vrot.lane.b32.xlu1 %v9672_v51, %s7073_s18 }
 0x4d9   :  { %4268 = vrot.lane.b32.xlu0 %v9676_v26, %s7073_s18 }
 0x4dc   :  { %4904 = vrot.lane.b32.xlu1 %v9672_v51, %s7078_s3 }
 0x4dd   :  { %4906 = vrot.lane.b32.xlu0 %v9676_v26, %s7078_s3 }
 0x4e0   :  { %6918 = vrot.lane.b32.xlu1 %v6917_v55, %s7077_s30 }
 0x4e1   :  { %6913 = vrot.lane.b32.xlu0 %v6917_v55, %s7076_s29 }
 0x4e4   :  { %6923 = vrot.lane.b32.xlu1 %v6917_v55, %s7079_s12  ;;  %v9746_v55 = vpop.permute.xlu1 %6823 }
 0x4e5   :  { %6938 = vrot.lane.b32.xlu0 %v10651_v29, %s7075_s28 }
 0x4e8   :  { %6928 = vrot.lane.b32.xlu1 %v6927_v3, %s7072_s17 }
 0x4e9   :  { %6948 = vrot.lane.b32.xlu0 %v6927_v3, %s7075_s28 }
 0x4ec   :  { %6933 = vrot.lane.b32.xlu1 %v10651_v29, %s7074_s27 }
 0x4f0   :  { %6943 = vrot.lane.b32.xlu1 %v6927_v3, %s7074_s27  ;;  %v11000_v3 = vld [vmem:[#allocation23_spill] sm:$0xff] }
 0x4f9   :  { %v4007_v61 = vpop.f32.mrb[20].mxu0 }
 0x4fa   :  { %v4059_v27 = vmax.f32 %v4007_v61, 0.0  ;;  %v4009_v46 = vpop.f32.mrb[21].mxu0 }
 0x4fb   :  { %v4060_v45 = vmax.f32 %v4009_v46, 0.0  ;;  %v4011_v22 = vpop.f32.mrb[22].mxu0 }
 0x4fc   :  { %v9714_v4 = vadd.f32 %v4059_v27, %v10994_v37  ;;  %v4012_v58 = vpop.f32.mrb[23].mxu0  ;;  %v11002_v27 = vld [vmem:[#allocation21_spill] sm:$0xff] }
 0x4fd   :  { %v9721_v18 = vadd.f32 %v4060_v45, %v10997_v13  ;;  %v11004_v22 = vld [vmem:[#allocation5_spill] sm:$0xff]  ;;  %v9767_v13 = vpop.permute.xlu1 %6833 }
 0x4fe   :  { %10995 = vst [vmem:[#allocation24_spill] sm:$0xff] %v9714_v4  ;;  %v9718_v63 = vpack.c.bf16 %v10651_v29, %v9714_v4  ;;  %v6972_v5 = vpack.i.bf16 %v9714_v4, %v9668_v21 }
 0x4ff   :  { %10998 = vst [vmem:[#allocation8_spill] sm:$0xff] %v9721_v18  ;;  %v9731_v15 = vpack.c.bf16 %v10651_v29, %v9721_v18  ;;  %v6982_v45 = vpack.i.bf16 %v9721_v18, %v9714_v4  ;;  %v6806_v4 = vunpack.i.h.bf16 %v9605_v47 }
 0x500   :  { %10996 = vst [vmem:[#allocation7_spill] sm:$0xff] %v9718_v63  ;;  %4270 = vrot.lane.b32.xlu0 %v9718_v63, %s7073_s18  ;;  %4908 = vrot.lane.b32.xlu1 %v9718_v63, %s7078_s3  ;;  %v10532_v63 = vunpack.i.h.bf16 %v9607_v41 }
 0x501   :  { %10999 = vst [vmem:[#allocation19_spill] sm:$0xff] %v9731_v15 }
 0x504   :  { %6963 = vrot.lane.b32.xlu0 %v10651_v29, %s7076_s29  ;;  %4272 = vrot.lane.b32.xlu1 %v9731_v15, %s7073_s18 }
 0x508   :  { %6973 = vrot.lane.b32.xlu0 %v6972_v5, %s7077_s30  ;;  %6953 = vrot.lane.b32.xlu1 %v6972_v5, %s7076_s29 }
 0x509   :  { %v4048_v56 = vpop.f32.mrb[20].mxu1 }
 0x50a   :  { %v4061_v33 = vmax.f32 %v4048_v56, 0.0  ;;  %v4050_v32 = vpop.f32.mrb[21].mxu1 }
 0x50b   :  { %v4062_v10 = vmax.f32 %v4050_v32, 0.0  ;;  %v4052_v62 = vpop.f32.mrb[22].mxu1 }
 0x50c   :  { %6978 = vrot.lane.b32.xlu0 %v6972_v5, %s7079_s12  ;;  %6958 = vrot.lane.b32.xlu1 %v10651_v29, %s7075_s28  ;;  %v4053_v24 = vpop.f32.mrb[23].mxu1  ;;  %v9749_v61 = vadd.f32 %v4061_v33, %v11000_v3  ;;  %v9775_v5 = vpop.permute.xlu1 %6843  ;;  %v11008_v3 = vmov 0  }
 0x50d   :  { %v9752_v46 = vadd.f32 %v4062_v10, %v11002_v27  ;;  %v9797_v62 = vpop.permute.xlu0 %6878 }
 0x50e   :  { %11001 = vst [vmem:[#allocation16_spill] sm:$0xff] %v9749_v61  ;;  %v9761_v37 = vpack.c.bf16 %v10651_v29, %v9749_v61  ;;  %v7007_v10 = vpack.i.bf16 %v9749_v61, %v9721_v18  ;;  %v10526_v18 = vunpack.i.h.bf16 %v9603_v40 }
 0x50f   :  { %11003 = vst [vmem:[#allocation15_spill] sm:$0xff] %v9752_v46  ;;  %v9765_v58 = vpack.c.bf16 %v10651_v29, %v9752_v46  ;;  %v7017_v56 = vpack.i.bf16 %v9752_v46, %v9749_v61 }
 0x510   :  { %6968 = vrot.lane.b32.xlu1 %v11004_v22, %s7076_s29  ;;  %6983 = vrot.lane.b32.xlu0 %v6982_v45, %s7072_s17  ;;  %11005 = vst [vmem:[#allocation17_spill] sm:$0xff] %v9761_v37  ;;  %v9782_v33 = vpop.permute.xlu1 %6848 }
 0x511   :  { %11006 = vst [vmem:[#allocation23_spill] sm:$0xff] %v9765_v58 }
 0x514   :  { %7003 = vrot.lane.b32.xlu1 %v11004_v22, %s7077_s30  ;;  %6988 = vrot.lane.b32.xlu0 %v6982_v45, %s7074_s27  ;;  %v9791_v32 = vpop.permute.xlu1 %6858 }
 0x518   :  { %4276 = vrot.lane.b32.xlu1 %v9765_v58, %s7073_s18  ;;  %6993 = vrot.lane.b32.xlu0 %v6982_v45, %s7075_s28  ;;  %v9799_v24 = vpop.permute.xlu1 %6873  ;;  %v11009_v45 = vld [vmem:[#allocation4_spill] sm:$0xff] }
 0x519   :  { %11007 = vst [vmem:[#allocation21_spill] sm:$0xff] %v9799_v24  ;;  %v7037_v48 = vpack.i.bf16 %v11009_v45, %v9752_v46 }
 0x51c   :  { %7018 = vrot.lane.b32.xlu1 %v7017_v56, %s7072_s17  ;;  %4274 = vrot.lane.b32.xlu0 %v9761_v37, %s7073_s18 }
 0x520   :  { %4912 = vrot.lane.b32.xlu1 %v9761_v37, %s7078_s3  ;;  %6998 = vrot.lane.b32.xlu0 %v10651_v29, %s7077_s30 }
 0x524   :  { %7023 = vrot.lane.b32.xlu1 %v7017_v56, %s7074_s27  ;;  %4910 = vrot.lane.b32.xlu0 %v9731_v15, %s7078_s3  ;;  %v6810_v15 = vunpack.i.l.bf16 %v9607_v41 }
 0x528   :  { %7028 = vrot.lane.b32.xlu1 %v7017_v56, %s7075_s28  ;;  %7008 = vrot.lane.b32.xlu0 %v7007_v10, %s7076_s29 }
 0x52c   :  { %4916 = vrot.lane.b32.xlu1 %v11008_v3, %s7078_s3  ;;  %7013 = vrot.lane.b32.xlu0 %v7007_v10, %s7077_s30 }
 0x52e   :  { %v9804_v27 = vpop.permute.xlu0 %4900  ;;  %v4263_v39 = vpop.permute.xlu1 %4262 }
 0x530   :  { %7038 = vrot.lane.b32.xlu1 %v7037_v48, %s7076_s29  ;;  %4914 = vrot.lane.b32.xlu0 %v9765_v58, %s7078_s3 }
 0x532   :  { %v9811_v56 = vpop.permute.xlu0 %4264  ;;  %v9815_v3 = vpop.permute.xlu1 %6888 }
 0x534   :  { %7043 = vrot.lane.b32.xlu1 %v7037_v48, %s7077_s30  ;;  %7033 = vrot.lane.b32.xlu0 %v7007_v10, %s7079_s12  ;;  %v6795_v10 = vunpack.i.l.bf16 %v9603_v40 }
 0x536   :  { %v9817_v61 = vpop.permute.xlu0 %4902  ;;  %v9824_v46 = vpop.permute.xlu1 %6893  ;;  %v4187_v36 = vsel %vm11010_vm9, %v6795_v10, %v10526_v18  ;;  %vm11016_vm9 = vnez %v10546_v14 }
 0x538   :  { %7048 = vrot.lane.b32.xlu1 %v7037_v48, %s7079_s12  ;;  %7053 = vrot.lane.b32.xlu0 %v10651_v29, %s7079_s12  ;;  %v6805_v48 = vunpack.i.l.bf16 %v9605_v47 }
 0x53a   :  { %v9822_v45 = vpop.permute.xlu0 %6883  ;;  %v9844_v58 = vpop.permute.xlu1 %6908 }
 0x53b   :  { %v11021_v50 = vunpack.i.h.bf16 %v9844_v58 }
 0x53c   :  { %7058 = vrot.lane.b32.xlu1 %v11004_v22, %s7079_s12  ;;  %v4186_v22 = vsel %vm11011_vm10, %v6806_v4, %v6795_v10  ;;  %vm11017_vm10 = vcmask 261120  }
 0x53e   :  { %v9831_v21 = vpop.permute.xlu0 %6898 }
 0x53f   :  { %v10527_v0 = vunpack.i.h.bf16 %v9831_v21  ;;  %v6900_v29 = vunpack.i.l.bf16 %v9831_v21 }
 0x541   :  { %v4178_v57 = vsel %vm11012_vm4, %v6805_v48, %v6900_v29  ;;  %v4179_v37 = vsel %vm11013_vm12, %v6900_v29, %v10527_v0  ;;  %v6910_v48 = vunpack.i.l.bf16 %v9844_v58  ;;  %v6820_v29 = vunpack.i.l.bf16 %v9609_v43  ;;  %vm11018_vm4 = vmmov %vm11015_vm6 }
 0x542   :  { %v5828_v9 = vpack.c.bf16 %v4187_v36, %v4179_v37  ;;  %v5831_v47 = vpack.c.bf16 %v4186_v22, %v4178_v57  ;;  %v9846_v44 = vpop.permute.xlu0 %6903  ;;  %v4279_v36 = vsel %vm11017_vm10, %v4263_v39, %v9811_v56  ;;  %v6821_v37 = vunpack.i.h.bf16 %v9609_v43  ;;  %vm11019_vm12 = vmmov %vm11017_vm10 }
 0x543   :  { %v10528_v18 = vunpack.i.h.bf16 %v9846_v44  ;;  %v6905_v4 = vunpack.i.l.bf16 %v9846_v44  ;;  %v6825_v0 = vunpack.i.l.bf16 %v9746_v55  ;;  %vm11022_vm10 = vcmask 7168   ;;  %vm11023_vm11 = vmmov %vm11018_vm4 }
 0x544   :  { %5829 = vmatprep.subr.msk.bf16.mxu0 %vm11014_vm13, %v5828_v9  ;;  %v4392_v9 = vsel %vm11018_vm4, %v6810_v15, %v10532_v63  ;;  %v4529_v42 = vsel %vm11022_vm10, %v6910_v48, %v11021_v50  ;;  %v4391_v43 = vsel %vm11023_vm11, %v6821_v37, %v6810_v15  ;;  %v6835_v63 = vunpack.i.l.bf16 %v9767_v13 }
 0x545   :  { %v4384_v57 = vsel %vm11015_vm6, %v6905_v4, %v10528_v18  ;;  %5832 = vmatpush1.bf16.msk.msra.mxu0 %vm11016_vm9, %v5831_v47  ;;  %v4278_v18 = vsel %vm11019_vm12, %v9727_v31, %v4263_v39  ;;  %vm11020_vm6 = vmmov %vm11018_vm4  ;;  %v11024_v39 = vunpack.i.h.bf16 %v9746_v55  ;;  %vm11027_vm11 = vnez %v10550_v53 }
 0x546   :  { %5180 = vmatprep.subr.bf16.mxu0 %v4279_v36  ;;  %v4383_v47 = vsel %vm11020_vm6, %v6820_v29, %v6905_v4  ;;  %v5834_v10 = vpack.c.bf16 %v4392_v9, %v4384_v57  ;;  %v6836_v36 = vunpack.i.h.bf16 %v9767_v13  ;;  %vm11025_vm4 = vmmov %vm11022_vm10  ;;  %v10535_v29 = vunpack.i.h.bf16 %v9613_v8 }
 0x547   :  { %v4537_v31 = vsel %vm11025_vm4, %v6825_v0, %v11024_v39  ;;  %v5837_v4 = vpack.c.bf16 %v4391_v43, %v4383_v47  ;;  %vm11026_vm12 = vmmov %vm11025_vm4  ;;  %v6840_v9 = vunpack.i.l.bf16 %v9613_v8  ;;  %vm11029_vm10 = vcmask 1039360  }
 0x548   :  { %v4528_v50 = vsel %vm11026_vm12, %v6835_v63, %v6910_v48  ;;  %vm11028_vm6 = vmmov %vm11025_vm4  ;;  %vm11031_vm12 = vcmask 793600   ;;  %v6890_v43 = vunpack.i.l.bf16 %v9815_v3  ;;  %v11057_v35 = vunpack.i.h.bf16 %v9846_v44 }
 0x549   :  { %5181 = vmatpush1.bf16.msra.mxu0 %v4278_v18  ;;  %v5840_v18 = vpack.c.bf16 %v4537_v31, %v4529_v42  ;;  %v4536_v15 = vsel %vm11028_vm6, %v6836_v36, %v6825_v0  ;;  %v6886_v42 = vunpack.i.h.bf16 %v9822_v45  ;;  %v6885_v36 = vunpack.i.l.bf16 %v9822_v45  ;;  %vm11030_vm4 = vmmov %vm11029_vm10 }
 0x54a   :  { %v9879_v22 = vpop.permute.xlu1 %4266  ;;  %5835 = vmatprep.subr.msk.bf16.mxu0 %vm7346_vm8, %v5834_v10  ;;  %v5843_v10 = vpack.c.bf16 %v4536_v15, %v4528_v50  ;;  %vm11032_vm6 = vmmov %vm11030_vm4  ;;  %v11064_v53 = vunpack.i.h.bf16 %v9746_v55 }
 0x54b   :  { %v9886_v57 = vpop.permute.xlu0 %4268  ;;  %v4681_v50 = vsel %vm11030_vm4, %v6886_v42, %v6840_v9  ;;  %vm11033_vm2 = vmmov %vm11030_vm4  ;;  %v11034_v42 = vunpack.i.h.bf16 %v9782_v33 }
 0x54d   :  { %5838 = vmatpush1.bf16.msk.msra.mxu0 %vm11027_vm11, %v5837_v4  ;;  %v4682_v4 = vsel %vm11029_vm10, %v6840_v9, %v10535_v29  ;;  %v6891_v29 = vunpack.i.h.bf16 %v9815_v3  ;;  %v6800_v9 = vunpack.i.l.bf16 %v9619_v30  ;;  %vm11035_vm10 = vmmov %vm11031_vm12 }
 0x54e   :  { %v9892_v13 = vpop.permute.xlu1 %4904  ;;  %5841 = vmatprep.subr.msk.bf16.mxu0 %vm11014_vm13, %v5840_v18  ;;  %vm11036_vm4 = vmmov %vm11035_vm10 }
 0x54f   :  { %v9896_v37 = vpop.permute.xlu0 %4906 }
 0x551   :  { %5844 = vmatpush1.bf16.msk.msra.mxu0 %vm11016_vm9, %v5843_v10 }
 0x552   :  { %v9903_v63 = vpop.permute.xlu1 %6918  ;;  %5186 = vmatprep.subr.bf16.mxu0 %v9648_v34  ;;  %v6850_v34 = vunpack.i.l.bf16 %v9782_v33 }
 0x553   :  { %v10537_v0 = vunpack.i.h.bf16 %v9903_v63  ;;  %v6920_v48 = vunpack.i.l.bf16 %v9903_v63  ;;  %v9908_v47 = vpop.permute.xlu0 %6913 }
 0x554   :  { %v6916_v39 = vunpack.i.h.bf16 %v9908_v47  ;;  %v6915_v31 = vunpack.i.l.bf16 %v9908_v47  ;;  %v11073_v47 = vunpack.i.h.bf16 %v9903_v63 }
 0x555   :  { %5187 = vmatpush1.bf16.msra.mxu0 %v9637_v28  ;;  %v4819_v18 = vsel %vm11031_vm12, %v6920_v48, %v10537_v0  ;;  %v4827_v0 = vsel %vm11035_vm10, %v6850_v34, %v11034_v42  ;;  %vm11039_vm12 = vcmask 269312  }
 0x556   :  { %v4673_v45 = vsel %vm11032_vm6, %v6885_v36, %v6915_v31  ;;  %v4674_v15 = vsel %vm11033_vm2, %v6915_v31, %v6916_v39  ;;  %v9927_v10 = vpop.permute.xlu1 %6923  ;;  %v4818_v36 = vsel %vm11036_vm4, %v6890_v43, %v6920_v48  ;;  %v5852_v24 = vpack.c.bf16 %v4827_v0, %v4819_v18  ;;  %vm11037_vm2 = vmmov %vm11036_vm4 }
 0x557   :  { %v5846_v16 = vpack.c.bf16 %v4682_v4, %v4674_v15  ;;  %v5849_v28 = vpack.c.bf16 %v4681_v50, %v4673_v45  ;;  %v9935_v17 = vpop.permute.xlu0 %6938  ;;  %v6926_v31 = vunpack.i.h.bf16 %v9927_v10  ;;  %v6925_v3 = vunpack.i.l.bf16 %v9927_v10  ;;  %vm11041_vm6 = vmmov %vm11039_vm12 }
 0x558   :  { %v4826_v50 = vsel %vm11037_vm2, %v6891_v29, %v6850_v34  ;;  %v6861_v48 = vunpack.i.h.bf16 %v9791_v32  ;;  %v11040_v18 = vunpack.i.h.bf16 %v9619_v30  ;;  %v6860_v29 = vunpack.i.l.bf16 %v9791_v32  ;;  %vm11043_vm10 = vmmov %vm11041_vm6 }
 0x559   :  { %5847 = vmatprep.subr.msk.bf16.mxu0 %vm7346_vm8, %v5846_v16  ;;  %v11038_v16 = vunpack.i.h.bf16 %v9603_v40  ;;  %v5855_v43 = vpack.c.bf16 %v4826_v50, %v4818_v36  ;;  %v11042_v34 = vunpack.i.h.bf16 %v9831_v21  ;;  %vm11045_vm4 = vcmask 777216  }
 0x55a   :  { %v9942_v4 = vpop.permute.xlu1 %6928  ;;  %5850 = vmatpush1.bf16.msk.msra.mxu0 %vm11027_vm11, %v5849_v28  ;;  %v4189_v28 = vsel %vm11041_vm6, %v6800_v9, %v11040_v18  ;;  %v5024_v40 = vsel %vm11045_vm4, %v6925_v3, %v6926_v31  ;;  %vm11046_vm2 = vcmask 785408  }
 0x55b   :  { %v6931_v45 = vunpack.i.h.bf16 %v9942_v4  ;;  %v6930_v15 = vunpack.i.l.bf16 %v9942_v4  ;;  %5853 = vmatprep.subr.msk.bf16.mxu0 %vm11014_vm13, %v5852_v24  ;;  %v4188_v0 = vsel %vm11039_vm12, %v11038_v16, %v6800_v9  ;;  %vm11044_vm13 = vmmov %vm11041_vm6  ;;  %v9968_v50 = vpop.permute.xlu0 %6948  ;;  %v4919_v21 = vsel %vm11046_vm2, %v9817_v61, %v9892_v13 }
 0x55c   :  { %v6816_v9 = vunpack.i.h.bf16 %v9739_v6  ;;  %v6895_v16 = vunpack.i.l.bf16 %v9824_v46  ;;  %vm11047_vm12 = vmmov %vm11045_vm4  ;;  %vm11049_vm6 = vcmask 261120  }
 0x55d   :  { %v4180_v42 = vsel %vm11043_vm10, %v11042_v34, %v6930_v15  ;;  %v4181_v7 = vsel %vm11044_vm13, %v6930_v15, %v6931_v45  ;;  %v6896_v15 = vunpack.i.h.bf16 %v9824_v46  ;;  %v5032_v18 = vsel %vm11047_vm12, %v6860_v29, %v6861_v48  ;;  %vm11050_vm10 = vmmov %vm11045_vm4 }
 0x55e   :  { %v5864_v24 = vpack.c.bf16 %v4189_v28, %v4181_v7  ;;  %v5867_v36 = vpack.c.bf16 %v4188_v0, %v4180_v42  ;;  %v9970_v30 = vpop.permute.xlu1 %6933  ;;  %5856 = vmatpush1.bf16.msk.msra.mxu0 %vm11016_vm9, %v5855_v43  ;;  %v6815_v0 = vunpack.i.l.bf16 %v9739_v6  ;;  %vm11048_vm9 = vmmov %vm11046_vm2  ;;  %v4281_v43 = vsel %vm11049_vm6, %v9879_v22, %v9886_v57 }
 0x55f   :  { %5192 = vmatprep.subr.bf16.mxu0 %v4919_v21  ;;  %v4918_v14 = vsel %vm11048_vm9, %v9804_v27, %v9817_v61  ;;  %v5023_v46 = vsel %vm11050_vm10, %v6895_v16, %v6925_v3  ;;  %v5858_v28 = vpack.c.bf16 %v5032_v18, %v5024_v40  ;;  %v6951_v34 = vunpack.i.h.bf16 %v9968_v50  ;;  %vm11055_vm9 = vmmov %vm11049_vm6 }
 0x560   :  { %5865 = vmatprep.subr.msk.bf16.mxu1 %vm10862_vm14, %v5864_v24  ;;  %v6950_v42 = vunpack.i.l.bf16 %v9968_v50  ;;  %vm11051_vm13 = vnez %v10558_v49  ;;  %v6831_v7 = vunpack.i.h.bf16 %v9611_v11  ;;  %v6830_v27 = vunpack.i.l.bf16 %v9611_v11 }
 0x561   :  { %5868 = vmatpush1.bf16.msk.msra.mxu1 %vm11051_vm13, %v5867_v36  ;;  %v5031_v24 = vsel %vm11045_vm4, %v6896_v15, %v6860_v29  ;;  %v11052_v21 = vunpack.i.h.bf16 %v9607_v41  ;;  %vm11053_vm2 = vcmask 252928   ;;  %v4280_v18 = vsel %vm11055_vm9, %v9811_v56, %v9879_v22 }
 0x562   :  { %v9998_v61 = vpop.permute.xlu1 %6943  ;;  %5193 = vmatpush1.bf16.msra.mxu0 %v4918_v14  ;;  %5221 = vmatprep.subr.bf16.mxu1 %v4281_v43  ;;  %vm11054_vm12 = vmmov %vm11053_vm2  ;;  %v5861_v29 = vpack.c.bf16 %v5031_v24, %v5023_v46  ;;  %vm11056_vm6 = vcmask 7168   ;;  %v11061_v22 = vunpack.i.h.bf16 %v9844_v58  ;;  %v6936_v11 = vunpack.i.h.bf16 %v9970_v30 }
 0x563   :  { %v6946_v3 = vunpack.i.h.bf16 %v9998_v61  ;;  %v6945_v40 = vunpack.i.l.bf16 %v9998_v61  ;;  %5859 = vmatprep.subr.msk.bf16.mxu0 %vm7346_vm8, %v5858_v28  ;;  %v4393_v36 = vsel %vm11053_vm2, %v11052_v21, %v6815_v0  ;;  %v4394_v16 = vsel %vm11054_vm12, %v6815_v0, %v6816_v9  ;;  %vm11058_vm8 = vmmov %vm11053_vm2 }
 0x564   :  { %v4531_v15 = vsel %vm11056_vm6, %v6950_v42, %v6951_v34  ;;  %vm11059_vm10 = vmmov %vm11053_vm2  ;;  %v10026_v0 = vcombine.low %v9698_v2, %v9698_v2  ;;  %vm11063_vm12 = vnez %v10562_v12  ;;  %v6846_v21 = vunpack.i.h.bf16 %v9775_v5 }
 0x565   :  { %v4385_v14 = vsel %vm11058_vm8, %v11057_v35, %v6945_v40  ;;  %v4386_v41 = vsel %vm11059_vm10, %v6945_v40, %v6946_v3  ;;  %5222 = vmatpush1.bf16.msra.mxu1 %v4280_v18  ;;  %vm11060_vm4 = vmmov %vm11056_vm6  ;;  %v6845_v40 = vunpack.i.l.bf16 %v9775_v5  ;;  %vm11067_vm6 = vcmask 1039360  }
 0x566   :  { %v5870_v43 = vpack.c.bf16 %v4394_v16, %v4386_v41  ;;  %v5873_v56 = vpack.c.bf16 %v4393_v36, %v4385_v14  ;;  %5862 = vmatpush1.bf16.msk.msra.mxu0 %vm11027_vm11, %v5861_v29  ;;  %v4539_v44 = vsel %vm11060_vm4, %v6830_v27, %v6831_v7  ;;  %vm11062_vm2 = vmmov %vm11060_vm4  ;;  %v6856_v36 = vunpack.i.h.bf16 %v9615_v54 }
 0x567   :  { %5258 = vmatprep.subr.bf16.mxu0 %v10710_v25  ;;  %v4530_v46 = vsel %vm11062_vm2, %v11061_v22, %v6950_v42  ;;  %v5876_v28 = vpack.c.bf16 %v4539_v44, %v4531_v15  ;;  %vm11065_vm11 = vmmov %vm11062_vm2  ;;  %v6855_v16 = vunpack.i.l.bf16 %v9615_v54  ;;  %v11066_v14 = vunpack.i.h.bf16 %v9613_v8 }
 0x568   :  { %5871 = vmatprep.subr.msk.bf16.mxu1 %vm10877_vm5, %v5870_v43  ;;  %v4538_v2 = vsel %vm11065_vm11, %v11064_v53, %v6830_v27  ;;  %vm11068_vm8 = vmmov %vm11067_vm6  ;;  %vm11069_vm10 = vcmask 793600  }
 0x569   :  { %5209 = vmatmul.mubr.bf16.vlgmr.msra.gmra.mrb[24].mxu0 %v10026_v0  ;;  %5874 = vmatpush1.bf16.msk.msra.mxu1 %vm11063_vm12, %v5873_v56  ;;  %v5879_v58 = vpack.c.bf16 %v4538_v2, %v4530_v46  ;;  %v4683_v41 = vsel %vm11067_vm6, %v11066_v14, %v6845_v40  ;;  %v4684_v43 = vsel %vm11068_vm8, %v6845_v40, %v6846_v21  ;;  %vm11070_vm4 = vmmov %vm11067_vm6  ;;  %vm11078_vm8 = vcmask 269312  }
 0x56a   :  { %5877 = vmatprep.subr.msk.bf16.mxu1 %vm10862_vm14, %v5876_v28  ;;  %5259 = vmatpush1.bf16.msra.mxu0 %v10710_v25  ;;  %vm11071_vm2 = vmmov %vm11070_vm4 }
 0x56b   :  { %5393 = vmatprep.mubr.msk.bf16.mxu0 %vm11055_vm9, %v9702_v19  ;;  %vm11072_vm11 = vmmov %vm11069_vm10 }
 0x56c   :  { %v4829_v2 = vsel %vm11072_vm11, %v6855_v16, %v6856_v36  ;;  %vm11074_vm9 = vmmov %vm11069_vm10 }
 0x56d   :  { %5880 = vmatpush1.bf16.msk.msra.mxu1 %vm11051_vm13, %v5879_v58  ;;  %v6871_v58 = vunpack.i.h.bf16 %v9622_v38  ;;  %vm11076_vm6 = vmmov %vm11074_vm9 }
 0x56e   :  { %5227 = vmatprep.subr.bf16.mxu1 %v9676_v26 }
 0x571   :  { %5228 = vmatpush1.bf16.msra.mxu1 %v9672_v51 }
 0x572   :  { %v10054_v42 = vpop.permute.xlu0 %4270  ;;  %v10056_v55 = vpop.permute.xlu1 %4908 }
 0x576   :  { %v10058_v27 = vpop.permute.xlu0 %6963  ;;  %v10060_v24 = vpop.permute.xlu1 %4272 }
 0x57a   :  { %v10066_v18 = vpop.permute.xlu0 %6973  ;;  %v10068_v26 = vpop.permute.xlu1 %6953 }
 0x57b   :  { %v6976_v51 = vunpack.i.h.bf16 %v10066_v18  ;;  %v6975_v29 = vunpack.i.l.bf16 %v10066_v18  ;;  %v6956_v15 = vunpack.i.h.bf16 %v10068_v26  ;;  %v6955_v35 = vunpack.i.l.bf16 %v10068_v26 }
 0x57d   :  { %v4821_v56 = vsel %vm11069_vm10, %v6975_v29, %v6976_v51  ;;  %v4675_v44 = vsel %vm11070_vm4, %v6916_v39, %v6955_v35  ;;  %v4676_v22 = vsel %vm11071_vm2, %v6955_v35, %v6956_v15  ;;  %v4820_v39 = vsel %vm11074_vm9, %v11073_v47, %v6975_v29  ;;  %vm11081_vm4 = vmmov %vm11078_vm8 }
 0x57e   :  { %v5882_v46 = vpack.c.bf16 %v4684_v43, %v4676_v22  ;;  %v5885_v8 = vpack.c.bf16 %v4683_v41, %v4675_v44  ;;  %v10089_v28 = vpop.permute.xlu0 %6978  ;;  %v10091_v53 = vpop.permute.xlu1 %6958  ;;  %v5888_v40 = vpack.c.bf16 %v4829_v2, %v4821_v56  ;;  %v6866_v41 = vunpack.i.h.bf16 %v9617_v1 }
 0x57f   :  { %v6981_v35 = vunpack.i.h.bf16 %v10089_v28  ;;  %v6980_v14 = vunpack.i.l.bf16 %v10089_v28  ;;  %v11075_v43 = vunpack.i.h.bf16 %v9782_v33  ;;  %v6865_v56 = vunpack.i.l.bf16 %v9617_v1 }
 0x580   :  { %5883 = vmatprep.subr.msk.bf16.mxu1 %vm10877_vm5, %v5882_v46  ;;  %v11077_v33 = vunpack.i.l.bf16 %v9622_v38  ;;  %vm11079_vm10 = vcmask 777216   ;;  %vm11082_vm2 = vcmask 785408  }
 0x581   :  { %5886 = vmatpush1.bf16.msk.msra.mxu1 %vm11063_vm12, %v5885_v8  ;;  %v4828_v44 = vsel %vm11076_vm6, %v11075_v43, %v6855_v16  ;;  %v5026_v20 = vsel %vm11079_vm10, %v6980_v14, %v6981_v35  ;;  %vm11083_vm11 = vmmov %vm11079_vm10  ;;  %vm11086_vm6 = vcmask 252928  }
 0x582   :  { %v10110_v63 = vpop.permute.xlu1 %6968  ;;  %5889 = vmatprep.subr.msk.bf16.mxu1 %vm10862_vm14, %v5888_v40  ;;  %v10114_v29 = vpop.permute.xlu0 %6983  ;;  %v5891_v22 = vpack.c.bf16 %v4828_v44, %v4820_v39  ;;  %v4191_v16 = vsel %vm11078_vm8, %v11077_v33, %v6871_v58  ;;  %vm11080_vm14 = vmmov %vm11078_vm8  ;;  %v4921_v39 = vsel %vm11082_vm2, %v9896_v37, %v10056_v55  ;;  %v6881_v40 = vunpack.i.h.bf16 %v9797_v62 }
 0x583   :  { %v6986_v46 = vunpack.i.h.bf16 %v10114_v29  ;;  %v6985_v8 = vunpack.i.l.bf16 %v10114_v29  ;;  %vm11085_vm9 = vmmov %vm11079_vm10  ;;  %vm11087_vm8 = vcmask 261120   ;;  %v6971_v26 = vunpack.i.h.bf16 %v10110_v63 }
 0x584   :  { %vm11088_vm10 = vmmov %vm11085_vm9 }
 0x585   :  { %v4182_v2 = vsel %vm11080_vm14, %v6931_v45, %v6985_v8  ;;  %v4183_v47 = vsel %vm11081_vm4, %v6985_v8, %v6986_v46  ;;  %5892 = vmatpush1.bf16.msk.msra.mxu1 %vm11051_vm13, %v5891_v22  ;;  %v5034_v45 = vsel %vm11083_vm11, %v6865_v56, %v6866_v41  ;;  %v6880_v8 = vunpack.i.l.bf16 %v9797_v62  ;;  %vm11084_vm13 = vmmov %vm11082_vm2 }
 0x586   :  { %v5900_v43 = vpack.c.bf16 %v4191_v16, %v4183_v47  ;;  %v5903_v44 = vpack.c.bf16 %v9630_v23, %v4182_v2  ;;  %v10138_v29 = vpop.permute.xlu1 %7003  ;;  %5233 = vmatprep.subr.bf16.mxu1 %v4921_v39  ;;  %v10140_v4 = vpop.permute.xlu0 %6988  ;;  %v4920_v33 = vsel %vm11084_vm13, %v9892_v13, %v9896_v37  ;;  %v5025_v23 = vsel %vm11085_vm9, %v6926_v31, %v6980_v14  ;;  %vm11089_vm14 = vmmov %vm11086_vm6 }
 0x587   :  { %v6991_v49 = vunpack.i.h.bf16 %v10140_v4  ;;  %v6990_v22 = vunpack.i.l.bf16 %v10140_v4  ;;  %v5894_v16 = vpack.c.bf16 %v5034_v45, %v5026_v20  ;;  %v4283_v13 = vsel %vm11087_vm8, %v10054_v42, %v10060_v24  ;;  %vm11091_vm4 = vmmov %vm11087_vm8 }
 0x588   :  { %5901 = vmatprep.subr.msk.bf16.mxu0 %vm10735_vm15, %v5900_v43  ;;  %v5033_v37 = vsel %vm11088_vm10, %v6861_v48, %v6865_v56  ;;  %v4396_v10 = vsel %vm11089_vm14, %v6880_v8, %v6881_v40  ;;  %v6941_v20 = vunpack.i.h.bf16 %v9935_v17  ;;  %v11090_v43 = vld [vmem:[#allocation21_spill] sm:$0xff]  ;;  %v4282_v56 = vsel %vm11091_vm4, %v9886_v57, %v10054_v42  ;;  %vm11092_vm2 = vmmov %vm11086_vm6 }
 0x589   :  { %v4388_v2 = vsel %vm11086_vm6, %v6990_v22, %v6991_v49  ;;  %5234 = vmatpush1.bf16.msra.mxu1 %v4920_v33  ;;  %5904 = vmatpush1.bf16.msk.msra.mxu0 %vm10738_vm3, %v5903_v44  ;;  %v5897_v47 = vpack.c.bf16 %v5033_v37, %v5025_v23  ;;  %v6875_v48 = vunpack.i.l.bf16 %v11090_v43  ;;  %v4387_v60 = vsel %vm11092_vm2, %v6946_v3, %v6990_v22  ;;  %vm11094_vm11 = vmmov %vm11092_vm2 }
 0x58a   :  { %v4277_v31 = vpop.permute.xlu1 %4276  ;;  %5895 = vmatprep.subr.msk.bf16.mxu1 %vm10877_vm5, %v5894_v16  ;;  %v10172_v14 = vpop.permute.xlu0 %6993  ;;  %5262 = vmatprep.subr.bf16.mxu0 %v4283_v13  ;;  %v5906_v44 = vpack.c.bf16 %v4396_v10, %v4388_v2  ;;  %v6876_v45 = vunpack.i.h.bf16 %v11090_v43  ;;  %v6940_v33 = vunpack.i.l.bf16 %v9935_v17  ;;  %vm11093_vm5 = vcmask 7168  }
 0x58b   :  { %v6996_v39 = vunpack.i.h.bf16 %v10172_v14  ;;  %v6995_v32 = vunpack.i.l.bf16 %v10172_v14  ;;  %v4395_v57 = vsel %vm11094_vm11, %v6816_v9, %v6880_v8  ;;  %vm11096_vm13 = vmmov %vm11093_vm5 }
 0x58c   :  { %v4541_v22 = vsel %vm11096_vm13, %v6940_v33, %v6941_v20  ;;  %v5909_v16 = vpack.c.bf16 %v4395_v57, %v4387_v60  ;;  %vm11098_vm9 = vmmov %vm11093_vm5  ;;  %v6961_v57 = vunpack.i.h.bf16 %v10091_v53 }
 0x58d   :  { %v4533_v23 = vsel %vm11093_vm5, %v6995_v32, %v6996_v39  ;;  %5898 = vmatpush1.bf16.msk.msra.mxu1 %vm11063_vm12, %v5897_v47  ;;  %5263 = vmatpush1.bf16.msra.mxu0 %v4282_v56  ;;  %vm11097_vm12 = vcmask 269312   ;;  %v4532_v9 = vsel %vm11098_vm9, %v6951_v34, %v6995_v32  ;;  %vm11103_vm14 = vmmov %vm11093_vm5  ;;  %v6965_v56 = vunpack.i.l.bf16 %v10058_v27  ;;  %v11149_v47 = vld [vmem:[#allocation6_spill] sm:$0xff] }
 0x58e   :  { %v7019_v61 = vpop.permute.xlu1 %7018  ;;  %v4275_v42 = vpop.permute.xlu0 %4274  ;;  %5907 = vmatprep.subr.msk.bf16.mxu0 %vm7725_vm7, %v5906_v44  ;;  %5299 = vmatprep.subr.bf16.mxu1 %v10710_v25  ;;  %v4192_v6 = vsel %vm11097_vm12, %v6871_v58, %v6875_v48  ;;  %v5912_v8 = vpack.c.bf16 %v4541_v22, %v4533_v23  ;;  %vm11099_vm6 = vmmov %vm11097_vm12  ;;  %v4540_v38 = vsel %vm11103_vm14, %v6831_v7, %v6940_v33  ;;  %v11108_v44 = vld [vmem:[#allocation19_spill] sm:$0xff]  ;;  %v6966_v23 = vunpack.i.h.bf16 %v10058_v27 }
 0x58f   :  { %v7021_v2 = vunpack.i.h.bf16 %v7019_v61  ;;  %v7020_v12 = vunpack.i.l.bf16 %v7019_v61  ;;  %v4193_v13 = vsel %vm11099_vm6, %v6875_v48, %v6876_v45  ;;  %vm11100_vm8 = vmmov %vm11099_vm6  ;;  %v5915_v43 = vpack.c.bf16 %v4540_v38, %v4532_v9 }
 0x590   :  { %5250 = vmatmul.mubr.bf16.vlgmr.msra.gmra.mrb[24].mxu1 %v10026_v0  ;;  %vm11101_vm10 = vmmov %vm11099_vm6 }
 0x591   :  { %v4184_v37 = vsel %vm11100_vm8, %v6986_v46, %v7020_v12  ;;  %v4185_v10 = vsel %vm11101_vm10, %v7020_v12, %v7021_v2  ;;  %5910 = vmatpush1.bf16.msk.msra.mxu0 %vm7731_vm1, %v5909_v16  ;;  %5300 = vmatpush1.bf16.msra.mxu1 %v10710_v25  ;;  %v6935_v46 = vunpack.i.l.bf16 %v9970_v30  ;;  %v11104_v25 = vld [vmem:[#allocation11_spill] sm:$0xff]  ;;  %vm11107_vm5 = vmmov %vm11091_vm4  ;;  %vm11114_vm8 = vcmask 1039360  }
 0x592   :  { %v5936_v50 = vpack.c.bf16 %v4193_v13, %v4185_v10  ;;  %v5939_v34 = vpack.c.bf16 %v4192_v6, %v4184_v37  ;;  %v10216_v58 = vpop.permute.xlu1 %4912  ;;  %v10218_v32 = vpop.permute.xlu0 %6998  ;;  %5913 = vmatprep.subr.msk.bf16.mxu0 %vm10735_vm15, %v5912_v8  ;;  %5394 = vmatprep.mubr.msk.bf16.mxu1 %vm11091_vm4, %v9702_v19  ;;  %vm11105_vm2 = vnez %v11104_v25  ;;  %v4285_v48 = vsel %vm11107_vm5, %v4275_v42, %v4277_v31  ;;  %vm11109_vm13 = vmmov %vm11091_vm4  ;;  %v11117_v37 = vld [vmem:[#allocation13_spill] sm:$0xff] }
 0x593   :  { %v4397_v30 = vsel %vm11094_vm11, %v6881_v40, %v6935_v46  ;;  %v6960_v31 = vunpack.i.l.bf16 %v10091_v53  ;;  %v4284_v61 = vsel %vm11109_vm13, %v10060_v24, %v4275_v42  ;;  %vm11110_vm12 = vmmov %vm11094_vm11  ;;  %v11113_v40 = vld [vmem:[#allocation7_spill] sm:$0xff]  ;;  %v4685_v27 = vsel %vm11114_vm8, %v6846_v21, %v6965_v56 }
 0x594   :  { %5937 = vmatprep.subr.msk.bf16.mxu1 %vm11105_vm2, %v5936_v50  ;;  %v4398_v22 = vsel %vm11110_vm12, %v6935_v46, %v6936_v11  ;;  %vm11111_vm9 = vmmov %vm11094_vm11  ;;  %v7000_v5 = vunpack.i.l.bf16 %v10218_v32  ;;  %vm11118_vm5 = vnez %v11117_v37 }
 0x595   :  { %5916 = vmatpush1.bf16.msk.msra.mxu0 %vm10738_vm3, %v5915_v43  ;;  %5940 = vmatpush1.bf16.msk.msra.mxu1 %vm7838_vm0, %v5939_v34  ;;  %vm11112_vm6 = vmmov %vm11111_vm9 }
 0x596   :  { %v7024_v60 = vpop.permute.xlu1 %7023  ;;  %v10234_v19 = vpop.permute.xlu0 %4910  ;;  %5268 = vmatprep.subr.bf16.mxu0 %v11108_v44  ;;  %5303 = vmatprep.subr.bf16.mxu1 %v4285_v48  ;;  %vm11115_vm10 = vmmov %vm11114_vm8 }
 0x597   :  { %v7026_v45 = vunpack.i.h.bf16 %v7024_v60  ;;  %v7025_v33 = vunpack.i.l.bf16 %v7024_v60  ;;  %v4686_v4 = vsel %vm11115_vm10, %v6965_v56, %v6966_v23  ;;  %vm11116_vm4 = vmmov %vm11103_vm14 }
 0x598   :  { %v4543_v13 = vsel %vm11116_vm4, %v6960_v31, %v6961_v57  ;;  %vm11119_vm11 = vmmov %vm11116_vm4 }
 0x599   :  { %v4389_v16 = vsel %vm11111_vm9, %v6991_v49, %v7025_v33  ;;  %v4390_v62 = vsel %vm11112_vm6, %v7025_v33, %v7026_v45  ;;  %5269 = vmatpush1.bf16.msra.mxu0 %v11113_v40  ;;  %5304 = vmatpush1.bf16.msra.mxu1 %v4284_v61  ;;  %v4542_v49 = vsel %vm11103_vm14, %v6941_v20, %v6960_v31  ;;  %vm11120_vm13 = vmmov %vm11116_vm4  ;;  %v11123_v20 = vld [vmem:[#allocation14_spill] sm:$0xff]  ;;  %v11129_v33 = vld [vmem:[#allocation23_spill] sm:$0xff]  ;;  %v7006_v61 = vunpack.i.h.bf16 %v10138_v29 }
 0x59a   :  { %v5942_v2 = vpack.c.bf16 %v4398_v22, %v4390_v62  ;;  %v5945_v53 = vpack.c.bf16 %v4397_v30, %v4389_v16  ;;  %v7029_v12 = vpop.permute.xlu1 %7028  ;;  %v7009_v6 = vpop.permute.xlu0 %7008  ;;  %vm11121_vm12 = vmmov %vm11114_vm8  ;;  %vm11124_vm6 = vnez %v11123_v20  ;;  %v7005_v22 = vunpack.i.l.bf16 %v10138_v29  ;;  %v11133_v40 = vld [vmem:[#allocation17_spill] sm:$0xff] }
 0x59b   :  { %v7031_v24 = vunpack.i.h.bf16 %v7029_v12  ;;  %v7030_v42 = vunpack.i.l.bf16 %v7029_v12  ;;  %v7011_v9 = vunpack.i.h.bf16 %v7009_v6  ;;  %v7010_v8 = vunpack.i.l.bf16 %v7009_v6  ;;  %vm11122_vm9 = vmmov %vm11114_vm8 }
 0x59c   :  { %5943 = vmatprep.subr.msk.bf16.mxu1 %vm11118_vm5, %v5942_v2  ;;  %vm11125_vm8 = vcmask 793600  }
 0x59d   :  { %v4534_v21 = vsel %vm11119_vm11, %v6996_v39, %v7030_v42  ;;  %v4535_v10 = vsel %vm11120_vm13, %v7030_v42, %v7031_v24  ;;  %v4677_v38 = vsel %vm11121_vm12, %v6956_v15, %v7010_v8  ;;  %v4678_v17 = vsel %vm11122_vm9, %v7010_v8, %v7011_v9  ;;  %5946 = vmatpush1.bf16.msk.msra.mxu1 %vm11124_vm6, %v5945_v53  ;;  %vm11126_vm10 = vmmov %vm11125_vm8 }
 0x59e   :  { %v5948_v50 = vpack.c.bf16 %v4543_v13, %v4535_v10  ;;  %v5951_v34 = vpack.c.bf16 %v4542_v49, %v4534_v21  ;;  %v5918_v46 = vpack.c.bf16 %v4686_v4, %v4678_v17  ;;  %v5921_v43 = vpack.c.bf16 %v4685_v27, %v4677_v38  ;;  %v10272_v11 = vpop.permute.xlu1 %4916  ;;  %v7014_v14 = vpop.permute.xlu0 %7013  ;;  %vm11127_vm14 = vmmov %vm11125_vm8 }
 0x59f   :  { %v7001_v39 = vunpack.i.h.bf16 %v10218_v32  ;;  %v7016_v48 = vunpack.i.h.bf16 %v7014_v14  ;;  %v7015_v56 = vunpack.i.l.bf16 %v7014_v14  ;;  %v6970_v15 = vunpack.i.l.bf16 %v10110_v63  ;;  %vm11128_vm4 = vmmov %vm11125_vm8 }
 0x5a0   :  { %v4830_v60 = vsel %vm11125_vm8, %v6856_v36, %v7000_v5  ;;  %5919 = vmatprep.subr.msk.bf16.mxu0 %vm7725_vm7, %v5918_v46  ;;  %5949 = vmatprep.subr.msk.bf16.mxu1 %vm11105_vm2, %v5948_v50  ;;  %vm11130_vm11 = vmmov %vm11122_vm9  ;;  %vm11134_vm8 = vcmask 785408  }
 0x5a1   :  { %v4831_v44 = vsel %vm11126_vm10, %v7000_v5, %v7001_v39  ;;  %v4822_v32 = vsel %vm11127_vm14, %v6976_v51, %v7015_v56  ;;  %v4823_v30 = vsel %vm11128_vm4, %v7015_v56, %v7016_v48  ;;  %5922 = vmatpush1.bf16.msk.msra.mxu0 %vm7731_vm1, %v5921_v43  ;;  %5952 = vmatpush1.bf16.msk.msra.mxu1 %vm7838_vm0, %v5951_v34  ;;  %vm11131_vm13 = vmmov %vm11122_vm9 }
 0x5a2   :  { %v5924_v54 = vpack.c.bf16 %v4831_v44, %v4823_v30  ;;  %v5927_v36 = vpack.c.bf16 %v4830_v60, %v4822_v32  ;;  %v7039_v63 = vpop.permute.xlu1 %7038  ;;  %v4915_v45 = vpop.permute.xlu0 %4914  ;;  %5309 = vmatprep.subr.bf16.mxu1 %v11129_v33  ;;  %v4687_v18 = vsel %vm11130_vm11, %v6966_v23, %v6970_v15  ;;  %v4688_v51 = vsel %vm11131_vm13, %v6970_v15, %v6971_v26  ;;  %vm11132_vm12 = vmmov %vm11122_vm9  ;;  %v11151_v33 = vld [vmem:[#allocation18_spill] sm:$0xff] }
 0x5a3   :  { %v7041_v57 = vunpack.i.h.bf16 %v7039_v63  ;;  %v7040_v31 = vunpack.i.l.bf16 %v7039_v63  ;;  %v4923_v23 = vsel %vm11134_vm8, %v10234_v19, %v10216_v58  ;;  %vm11140_vm11 = vcmask 777216  }
 0x5a4   :  { %5925 = vmatprep.subr.msk.bf16.mxu0 %vm10735_vm15, %v5924_v54  ;;  %vm11135_vm15 = vmmov %vm11134_vm8  ;;  %v11150_v54 = vld [vmem:[#allocation20_spill] sm:$0xff] }
 0x5a5   :  { %v4679_v16 = vsel %vm11132_vm12, %v7011_v9, %v7040_v31  ;;  %v4680_v62 = vsel %vm11122_vm9, %v7040_v31, %v7041_v57  ;;  %5928 = vmatpush1.bf16.msk.msra.mxu0 %vm10738_vm3, %v5927_v36  ;;  %5310 = vmatpush1.bf16.msra.mxu1 %v11133_v40  ;;  %v4922_v6 = vsel %vm11135_vm15, %v10056_v55, %v10234_v19  ;;  %vm11136_vm3 = vmmov %vm11128_vm4 }
 0x5a6   :  { %v5954_v27 = vpack.c.bf16 %v4688_v51, %v4680_v62  ;;  %v5957_v2 = vpack.c.bf16 %v4687_v18, %v4679_v16  ;;  %v7044_v53 = vpop.permute.xlu1 %7043  ;;  %v7034_v52 = vpop.permute.xlu0 %7033  ;;  %5274 = vmatprep.subr.bf16.mxu0 %v4923_v23  ;;  %v4833_v42 = vsel %vm11136_vm3, %v7005_v22, %v7006_v61  ;;  %vm11137_vm10 = vmmov %vm11136_vm3  ;;  %v11152_v18 = vld [vmem:[#allocation22_spill] sm:$0xff]  ;;  %v11153_v23 = vld [vmem:[#allocation24_spill] sm:$0xff] }
 0x5a7   :  { %v7046_v12 = vunpack.i.h.bf16 %v7044_v53  ;;  %v7045_v29 = vunpack.i.l.bf16 %v7044_v53  ;;  %v7036_v24 = vunpack.i.h.bf16 %v7034_v52  ;;  %v7035_v59 = vunpack.i.l.bf16 %v7034_v52  ;;  %vm11138_vm14 = vmmov %vm11136_vm3  ;;  %v11154_v53 = vld [vmem:[#allocation8_spill] sm:$0xff] }
 0x5a8   :  { %5955 = vmatprep.subr.msk.bf16.mxu1 %vm11118_vm5, %v5954_v27  ;;  %v4832_v9 = vsel %vm11137_vm10, %v7001_v39, %v7005_v22  ;;  %vm11139_vm4 = vmmov %vm11136_vm3 }
 0x5a9   :  { %v4824_v8 = vsel %vm11138_vm14, %v7016_v48, %v7045_v29  ;;  %v4825_v4 = vsel %vm11139_vm4, %v7045_v29, %v7046_v12  ;;  %5275 = vmatpush1.bf16.msra.mxu0 %v4922_v6  ;;  %5958 = vmatpush1.bf16.msk.msra.mxu1 %vm11124_vm6, %v5957_v2  ;;  %v5027_v10 = vsel %vm11140_vm11, %v6981_v35, %v7035_v59  ;;  %vm11141_vm13 = vmmov %vm11140_vm11 }
 0x5aa   :  { %v5960_v49 = vpack.c.bf16 %v4833_v42, %v4825_v4  ;;  %v5963_v13 = vpack.c.bf16 %v4832_v9, %v4824_v8  ;;  %v7049_v55 = vpop.permute.xlu1 %7048  ;;  %v7054_v19 = vpop.permute.xlu0 %7053  ;;  %v5028_v38 = vsel %vm11141_vm13, %v7035_v59, %v7036_v24  ;;  %vm11142_vm12 = vmmov %vm11140_vm11  ;;  %v4925_v35 = vsel %vm11134_vm8, %v4915_v45, %v10272_v11  ;;  %v11155_v42 = vld [vmem:[#allocation16_spill] sm:$0xff]  ;;  %v11156_v4 = vld [vmem:[#allocation15_spill] sm:$0xff] }
 0x5ab   :  { %v7056_v5 = vunpack.i.h.bf16 %v7054_v19  ;;  %v7055_v21 = vunpack.i.l.bf16 %v7054_v19  ;;  %v7051_v17 = vunpack.i.h.bf16 %v7049_v55  ;;  %v7050_v50 = vunpack.i.l.bf16 %v7049_v55  ;;  %vm11143_vm9 = vmmov %vm11140_vm11 }
 0x5ac   :  { %5961 = vmatprep.subr.msk.bf16.mxu1 %vm11105_vm2, %v5960_v49  ;;  %vm11144_vm2 = vmmov %vm11134_vm8 }
 0x5ad   :  { %v5035_v34 = vsel %vm11142_vm12, %v6866_v41, %v7055_v21  ;;  %v5036_v46 = vsel %vm11143_vm9, %v7055_v21, %v7056_v5  ;;  %5964 = vmatpush1.bf16.msk.msra.mxu1 %vm7838_vm0, %v5963_v13  ;;  %v4924_v48 = vsel %vm11144_vm2, %v10216_v58, %v4915_v45  ;;  %vm11145_vm15 = vmmov %vm11143_vm9 }
 0x5ae   :  { %v5930_v43 = vpack.c.bf16 %v5036_v46, %v5028_v38  ;;  %v5933_v14 = vpack.c.bf16 %v5035_v34, %v5027_v10  ;;  %v7059_v28 = vpop.permute.xlu1 %7058  ;;  %5315 = vmatprep.subr.bf16.mxu1 %v4925_v35  ;;  %v5029_v1 = vsel %vm11145_vm15, %v7036_v24, %v7050_v50  ;;  %vm11146_vm3 = vmmov %vm11143_vm9 }
 0x5af   :  { %v7061_v39 = vunpack.i.h.bf16 %v7059_v28  ;;  %v7060_v25 = vunpack.i.l.bf16 %v7059_v28  ;;  %v5030_v41 = vsel %vm11146_vm3, %v7050_v50, %v7051_v17  ;;  %vm11147_vm10 = vmmov %vm11146_vm3 }
 0x5b0   :  { %5931 = vmatprep.subr.msk.bf16.mxu0 %vm7725_vm7, %v5930_v43  ;;  %vm11148_vm0 = vmmov %vm11146_vm3 }
 0x5b1   :  { %v5037_v7 = vsel %vm11147_vm10, %v7056_v5, %v7060_v25  ;;  %v5038_v56 = vsel %vm11148_vm0, %v7060_v25, %v7061_v39  ;;  %5934 = vmatpush1.bf16.msk.msra.mxu0 %vm7731_vm1, %v5933_v14  ;;  %5316 = vmatpush1.bf16.msra.mxu1 %v4924_v48 }
 0x5b2   :  { %v5966_v11 = vpack.c.bf16 %v5038_v56, %v5030_v41  ;;  %v5969_v26 = vpack.c.bf16 %v5037_v7, %v5029_v1 }
 0x5b4   :  { %5291 = vmatmul.mubr.bf16.vlgmr.msra.gmra.mrb[28].mxu0 %v10026_v0  ;;  %5967 = vmatprep.subr.msk.bf16.mxu1 %vm11118_vm5, %v5966_v11 }
 0x5b5   :  { %5970 = vmatpush1.bf16.msk.msra.mxu1 %vm11124_vm6, %v5969_v26 }
 0x5b8   :  { %5332 = vmatmul.mubr.bf16.vlgmr.msra.gmra.mrb[28].mxu1 %v10026_v0 }
 0x63c   :  { %v5210_v3 = vpop.f32.mrb[24].mxu0 }
 0x63d   :  { %v5340_v58 = vmax.f32 %v5210_v3, 0.0  ;;  %v5212_v15 = vpop.f32.mrb[25].mxu0 }
 0x63e   :  { %v5341_v60 = vmax.f32 %v5212_v15, 0.0  ;;  %v5214_v44 = vpop.f32.mrb[26].mxu0 }
 0x63f   :  { %v5348_v32 = vadd.f32 %v5340_v58, %v11149_v47  ;;  %v5215_v30 = vpop.f32.mrb[27].mxu0 }
 0x640   :  { %v5349_v36 = vadd.f32 %v5341_v60, %v11150_v54 }
 0x641   :  { %5356 = vst [vmem:[%s10383_s2] sm:$0xff] %v5348_v32 }
 0x642   :  { %5357 = vst [vmem:[%s10383_s2 + $0x8] sm:$0xff] %v5349_v36 }
 0x663   :  { %v5251_v37 = vpop.f32.mrb[24].mxu1 }
 0x664   :  { %v5342_v0 = vmax.f32 %v5251_v37, 0.0  ;;  %v5253_v20 = vpop.f32.mrb[25].mxu1 }
 0x665   :  { %v5343_v63 = vmax.f32 %v5253_v20, 0.0  ;;  %v5255_v45 = vpop.f32.mrb[26].mxu1 }
 0x666   :  { %v5350_v57 = vadd.f32 %v5342_v0, %v11151_v33  ;;  %v5256_v31 = vpop.f32.mrb[27].mxu1 }
 0x667   :  { %v5351_v51 = vadd.f32 %v5343_v63, %v11152_v18 }
 0x668   :  { %5358 = vst [vmem:[%s10383_s2 + $0x10] sm:$0xff] %v5350_v57 }
 0x669   :  { %5359 = vst [vmem:[%s10383_s2 + $0x18] sm:$0xff] %v5351_v51 }
 0x687   :  { %v5292_v61 = vpop.f32.mrb[28].mxu0 }
 0x688   :  { %v5344_v22 = vmax.f32 %v5292_v61, 0.0  ;;  %v5294_v16 = vpop.f32.mrb[29].mxu0 }
 0x689   :  { %v5345_v62 = vmax.f32 %v5294_v16, 0.0  ;;  %v5296_v40 = vpop.f32.mrb[30].mxu0 }
 0x68a   :  { %v5352_v27 = vadd.f32 %v5344_v22, %v11153_v23  ;;  %v5297_v2 = vpop.f32.mrb[31].mxu0 }
 0x68b   :  { %v5353_v52 = vadd.f32 %v5345_v62, %v11154_v53  ;;  %v5333_v12 = vpop.f32.mrb[28].mxu1 }
 0x68c   :  { %5360 = vst [vmem:[%s10383_s2 + $0x20] sm:$0xff] %v5352_v27  ;;  %v5346_v29 = vmax.f32 %v5333_v12, 0.0  ;;  %v5335_v6 = vpop.f32.mrb[29].mxu1 }
 0x68d   :  { %5361 = vst [vmem:[%s10383_s2 + $0x28] sm:$0xff] %v5353_v52  ;;  %v5347_v24 = vmax.f32 %v5335_v6, 0.0  ;;  %v5337_v59 = vpop.f32.mrb[30].mxu1 }
 0x68e   :  { %v5354_v9 = vadd.f32 %v5346_v29, %v11155_v42  ;;  %v5338_v8 = vpop.f32.mrb[31].mxu1 }
 0x68f   :  { %v5355_v49 = vadd.f32 %v5347_v24, %v11156_v4 }
 0x690   :  { %5362 = vst [vmem:[%s10383_s2 + $0x30] sm:$0xff] %v5354_v9 }
 0x691   :  { %5363 = vst [vmem:[%s10383_s2 + $0x38] sm:$0xff] %v5355_v49 }

</bundles_post_ra>
